<compile_context>
chip_gen: v7x
topology: tpu7x:2x2x1
jax: 0.10.0
libtpu: 0.0.40
codegen_flags: <defaults>
</compile_context>

<pallas_src>
import functools
import math

import numpy as np
import jax
import jax.numpy as jnp
from jax.experimental import pallas as pl
from jax.experimental.pallas import tpu as pltpu


# ---------------------------------------------------------------------------
# Fixed geometry (the module's LayerNorm shapes hard-code an 84x84 input):
#   conv1: 8x8 s4 : 84x84xC  -> 20x20x32
#   conv2: 4x4 s2 : 20x20x32 ->  9x 9x64
#   conv3: 3x3 s1 :  9x 9x64 ->  7x 7x32
# Every stage uses a "flat row" layout r = 11*i + j (11 = super-block grid width).
# ---------------------------------------------------------------------------
_HW_IN = 84
_HW_PAD = 88                   # pad to a multiple of the 8x8 super-block
_GRID = 11                     # 88 / 8 super blocks per side
_PITCH = 11                    # flat row index = _PITCH * i + j at every stage

_R_IN = 144                    # input rows (121 real + zero pad), multiple of 16
_S0, _S1, _S2 = 128, 112, 80   # computed rows per layer (>= last valid row + shifts)
_N0, _N1, _N2 = 128, 64, 32    # GEMM output widths per layer

_SHIFTS0 = (0, 1, 11, 12)                      # 2x2 super-block neighborhood
_SHIFTS1 = (0, 1, 11, 12)                      # 2x2 pixel-group neighborhood
_SHIFTS2 = (0, 1, 2, 11, 12, 13, 22, 23, 24)   # 3x3 pixel neighborhood

_VALID0 = (10, 10, 20 * 20 * 32)   # valid (i, j) extents + LayerNorm element count
_VALID1 = (9, 9, 9 * 9 * 64)
_VALID2 = (7, 7, 7 * 7 * 32)


# ---------------------------------------------------------------------------
# Fused kernel: 3 x (conv-as-shifted-GEMMs + bias + LayerNorm + ReLU)
# ---------------------------------------------------------------------------
def _fused_encoder_kernel(x_ref,
                          w0_ref, b0_ref, g0_ref, be0_ref, m0_ref,
                          w1_ref, b1_ref, g1_ref, be1_ref, m1_ref,
                          w2_ref, b2_ref, g2_ref, be2_ref, m2_ref,
                          o_ref, a0_scr, a1_scr):
    bt = x_ref.shape[0]

    def conv(src_ref, w_ref, shifts, n_rows, n_out):
        """Conv block as a sum of contiguous row-shifted batched GEMMs (f32 acc)."""
        k = src_ref.shape[-1]
        acc = None
        for idx, sh in enumerate(shifts):
            lhs = src_ref[:, pl.ds(sh, n_rows), :].reshape(bt * n_rows, k)
            y = jnp.dot(lhs, w_ref[idx], preferred_element_type=jnp.float32)
            acc = y if acc is None else acc + y
        return acc.reshape(bt, n_rows, n_out)

    def ln_relu(y, b_ref, g_ref, be_ref, m_ref, count):
        """Per-sample LayerNorm over the valid (row, channel) elements + ReLU."""
        y = y + b_ref[...]
        mask = m_ref[...]                                   # (rows, 1): 1 on valid rows
        inv_n = 1.0 / float(count)
        mean = jnp.sum(jnp.sum(y * mask, axis=2, keepdims=True),
                       axis=1, keepdims=True) * inv_n       # (Bt, 1, 1)
        d = (y - mean) * mask
        var = jnp.sum(jnp.sum(d * d, axis=2, keepdims=True),
                      axis=1, keepdims=True) * inv_n        # biased var (PyTorch LN)
        inv_std = jax.lax.rsqrt(var + 1e-5)
        yn = (y - mean) * inv_std * g_ref[...] + be_ref[...]  # gamma/beta = 0 on pad rows
        return jnp.maximum(yn, 0.0)

    # conv1 (8x8 stride 4) + LayerNorm([32, 20, 20]) + ReLU
    y0 = ln_relu(conv(x_ref, w0_ref, _SHIFTS0, _S0, _N0),
                 b0_ref, g0_ref, be0_ref, m0_ref, _VALID0[2])
    a0_scr[...] = y0.astype(a0_scr.dtype)

    # conv2 (4x4 stride 2) + LayerNorm([64, 9, 9]) + ReLU  (reads VMEM-resident a0)
    y1 = ln_relu(conv(a0_scr, w1_ref, _SHIFTS1, _S1, _N1),
                 b1_ref, g1_ref, be1_ref, m1_ref, _VALID1[2])
    a1_scr[...] = y1.astype(a1_scr.dtype)

    # conv3 (3x3 stride 1) + LayerNorm([32, 7, 7]) + ReLU  (reads VMEM-resident a1)
    y2 = ln_relu(conv(a1_scr, w2_ref, _SHIFTS2, _S2, _N2),
                 b2_ref, g2_ref, be2_ref, m2_ref, _VALID2[2])
    o_ref[...] = y2.astype(o_ref.dtype)


def _fused_encoder(xb, params, *, block_b):
    bp, r_in, kin = xb.shape
    assert bp % block_b == 0 and r_in == _R_IN
    grid = (bp // block_b,)

    const3 = lambda i: (0, 0, 0)
    const2 = lambda i: (0, 0)

    flops = 2 * bp * (_S0 * kin * _N0 * len(_SHIFTS0)
                      + _S1 * _N0 * _N1 * len(_SHIFTS1)
                      + _S2 * _N1 * _N2 * len(_SHIFTS2))
    bytes_accessed = (xb.size * 2 + bp * _S2 * _N2 * 4
                      + sum(int(np.prod(v.shape)) * v.dtype.itemsize
                            for v in params.values()))

    return pl.pallas_call(
        _fused_encoder_kernel,
        out_shape=jax.ShapeDtypeStruct((bp, _S2, _N2), jnp.float32),
        grid=grid,
        in_specs=[
            # batch-tiled, pre-blocked input stream (double-buffered by Pallas)
            pl.BlockSpec((block_b, _R_IN, kin), lambda i: (i, 0, 0)),
            # layer-0 constants (constant index_map -> VMEM resident across steps)
            pl.BlockSpec((len(_SHIFTS0), kin, _N0), const3),
            pl.BlockSpec((1, _N0), const2),
            pl.BlockSpec((_S0, _N0), const2),
            pl.BlockSpec((_S0, _N0), const2),
            pl.BlockSpec((_S0, 1), const2),
            # layer-1 constants
            pl.BlockSpec((len(_SHIFTS1), _N0, _N1), const3),
            pl.BlockSpec((1, _N1), const2),
            pl.BlockSpec((_S1, _N1), const2),
            pl.BlockSpec((_S1, _N1), const2),
            pl.BlockSpec((_S1, 1), const2),
            # layer-2 constants
            pl.BlockSpec((len(_SHIFTS2), _N1, _N2), const3),
            pl.BlockSpec((1, _N2), const2),
            pl.BlockSpec((_S2, _N2), const2),
            pl.BlockSpec((_S2, _N2), const2),
            pl.BlockSpec((_S2, 1), const2),
        ],
        out_specs=pl.BlockSpec((block_b, _S2, _N2), lambda i: (i, 0, 0)),
        scratch_shapes=[
            pltpu.VMEM((block_b, _S0, _N0), jnp.bfloat16),   # layer-0 activations
            pltpu.VMEM((block_b, _S1, _N1), jnp.bfloat16),   # layer-1 activations
        ],
        compiler_params=pltpu.CompilerParams(
            dimension_semantics=("parallel",),   # batch tiles shard across TCs (v7x)
            vmem_limit_bytes=48 * 1024 * 1024,   # fits v5e/v6e/v7x; headroom for Bt<=64
        ),
        cost_estimate=pl.CostEstimate(
            flops=int(flops),
            transcendentals=int(3 * bp),
            bytes_accessed=int(bytes_accessed)),
    )(xb,
      params["w0"], params["b0"], params["g0"], params["be0"], params["m0"],
      params["w1"], params["b1"], params["g1"], params["be1"], params["m1"],
      params["w2"], params["b2"], params["g2"], params["be2"], params["m2"])


# ---------------------------------------------------------------------------
# Parameter packing (all layout plumbing hoisted to init time, host-side numpy)
# ---------------------------------------------------------------------------
def _orthogonal_conv_weight(key, oc, ic, kh, kw):
    gain = math.sqrt(2.0)                               # nn.init.calculate_gain('relu')
    w = jax.nn.initializers.orthogonal(scale=gain)(key, (oc, ic * kh * kw), jnp.float32)
    return np.asarray(w).reshape(oc, ic, kh, kw)        # PyTorch (OC, IC, KH, KW)


def _pack_w0(w, c):
    # (32, C, 8, 8) -> (4, 64*C, 128).  Row k = (u*8 + v)*C + ic (position inside an
    # 8x8 super block); column n = 32*(2*ph + pw) + oc (2x2 output-pixel parity packed
    # into lanes).  Shift index = 2*di + dj, matching _SHIFTS0 = (0, 1, 11, 12).
    out = np.zeros((2, 2, 8, 8, c, 2, 2, 32), np.float32)
    for ph in range(2):
        for pw in range(2):
            for ki in range(8):
                di, u = divmod(4 * ph + ki, 8)
                for kj in range(8):
                    dj, v = divmod(4 * pw + kj, 8)
                    out[di, dj, u, v, :, ph, pw, :] = w[:, :, ki, kj].T
    return out.reshape(4, 64 * c, 128)


def _pack_w1(w):
    # (64, 32, 4, 4) -> (4, 128, 64).  Row k = 32*(2*ph + pw) + ic (layer-0 column
    # layout); shift index = 2*di + dj, matching _SHIFTS1.
    out = np.zeros((2, 2, 2, 2, 32, 64), np.float32)
    for di in range(2):
        for dj in range(2):
            for ph in range(2):
                for pw in range(2):
                    out[di, dj, ph, pw] = w[:, :, 2 * di + ph, 2 * dj + pw].T
    return out.reshape(4, 128, 64)


def _pack_w2(w):
    # (32, 64, 3, 3) -> (9, 64, 32).  Shift index = 3*di + dj, matching _SHIFTS2.
    out = np.zeros((3, 3, 64, 32), np.float32)
    for di in range(3):
        for dj in range(3):
            out[di, dj] = w[:, :, di, dj].T
    return out.reshape(9, 64, 32)


def _ln_rows_l0(p_chw):
    # LayerNorm([32,20,20]) params -> (S0, 128) padded-row layout of layer 0.
    out = np.zeros((_S0, _N0), np.float32)
    for bh in range(10):
        for bw in range(10):
            r = bh * _PITCH + bw
            for ph in range(2):
                for pw in range(2):
                    col = 32 * (2 * ph + pw)
                    out[r, col:col + 32] = p_chw[:, 2 * bh + ph, 2 * bw + pw]
    return out


def _ln_rows(p_chw, n_rows):
    # LayerNorm([C,H,W]) params -> (n_rows, C) padded flat-row layout.
    c, h, w = p_chw.shape
    out = np.zeros((n_rows, c), np.float32)
    for i in range(h):
        for j in range(w):
            out[i * _PITCH + j] = p_chw[:, i, j]
    return out


def _row_mask(h, w, n_rows):
    m = np.zeros((n_rows, 1), np.float32)
    for i in range(h):
        for j in range(w):
            m[i * _PITCH + j, 0] = 1.0
    return m


def init_feature_encoder_params(num_inputs, key):
    c = num_inputs
    k0, k1, k2 = jax.random.split(key, 3)
    w0 = _orthogonal_conv_weight(k0, 32, c, 8, 8)
    w1 = _orthogonal_conv_weight(k1, 64, 32, 4, 4)
    w2 = _orthogonal_conv_weight(k2, 32, 64, 3, 3)
    f32 = jnp.float32
    return dict(
        w0=jnp.asarray(_pack_w0(w0, c), jnp.bfloat16),
        b0=jnp.zeros((1, _N0), f32),      # conv bias (0 init), replicated over 4 pixels
        g0=jnp.asarray(_ln_rows_l0(np.ones((32, 20, 20), np.float32)), f32),
        be0=jnp.asarray(_ln_rows_l0(np.zeros((32, 20, 20), np.float32)), f32),
        m0=jnp.asarray(_row_mask(_VALID0[0], _VALID0[1], _S0), f32),
        w1=jnp.asarray(_pack_w1(w1), jnp.bfloat16),
        b1=jnp.zeros((1, _N1), f32),
        g1=jnp.asarray(_ln_rows(np.ones((64, 9, 9), np.float32), _S1), f32),
        be1=jnp.asarray(_ln_rows(np.zeros((64, 9, 9), np.float32), _S1), f32),
        m1=jnp.asarray(_row_mask(_VALID1[0], _VALID1[1], _S1), f32),
        w2=jnp.asarray(_pack_w2(w2), jnp.bfloat16),
        b2=jnp.zeros((1, _N2), f32),
        g2=jnp.asarray(_ln_rows(np.ones((32, 7, 7), np.float32), _S2), f32),
        be2=jnp.asarray(_ln_rows(np.zeros((32, 7, 7), np.float32), _S2), f32),
        m2=jnp.asarray(_row_mask(_VALID2[0], _VALID2[1], _S2), f32),
    )


# ---------------------------------------------------------------------------
# Forward (matches FeatureEncoder.forward; input/output are NCHW f32)
# ---------------------------------------------------------------------------
@functools.partial(jax.jit, static_argnames=("block_b",))
def feature_encoder_forward(params, x_nchw, block_b=32):
    b, c = x_nchw.shape[0], x_nchw.shape[1]
    bt = max(1, min(block_b, b))
    bp = ((b + bt - 1) // bt) * bt

    # NCHW -> NHWC, pad 84 -> 88, 8x8 space-to-depth (zero HBM inflation), flatten the
    # 11x11 super-block grid to rows r = 11*bh + bw, zero-pad rows / batch, cast bf16.
    x = jnp.transpose(x_nchw, (0, 2, 3, 1))
    x = jnp.pad(x, ((0, bp - b), (0, _HW_PAD - _HW_IN), (0, _HW_PAD - _HW_IN), (0, 0)))
    x = x.reshape(bp, _GRID, 8, _GRID, 8, c).transpose(0, 1, 3, 2, 4, 5)
    x = x.reshape(bp, _GRID * _GRID, 64 * c)
    x = jnp.pad(x, ((0, 0), (0, _R_IN - _GRID * _GRID), (0, 0))).astype(jnp.bfloat16)

    y = _fused_encoder(x, params, block_b=bt)                    # (bp, 80, 32) f32

    # Extract the valid 7x7 grid from the flat-11 row layout, back to NCHW.
    y = y[:b, :7 * _PITCH, :].reshape(b, 7, _PITCH, 32)[:, :, :7, :]
    return jnp.transpose(y, (0, 3, 1, 2))


if __name__ == "__main__":
    # The module's LayerNorm shapes ([32,20,20], [64,9,9], [32,7,7]) hard-code an
    # 84x84 spatial input, so the input must be (B, num_inputs, 84, 84).
    key = jax.random.PRNGKey(0)
    k_param, k_input = jax.random.split(key)

    num_inputs = 4
    batch = 2
    params = init_feature_encoder_params(num_inputs, k_param)
    x = jax.random.normal(k_input, (batch, num_inputs, 84, 84), jnp.float32)

    out = feature_encoder_forward(params, x)
    out = jax.block_until_ready(out)

    assert out.shape == (batch, 32, 7, 7), out.shape
    assert out.dtype == jnp.float32
    assert bool(jnp.all(jnp.isfinite(out)))
    assert bool(jnp.all(out >= 0.0))   # trailing ReLU
    print("KERNEL_OK")
</pallas_src>

<mosaic_0001>
module attributes {stable_mosaic.version = 11 : i64} {
  func.func @_fused_encoder_kernel(%arg0: i32, %arg1: memref<2x144x256xbf16, #tpu.memory_space<vmem>>, %arg2: memref<4x256x128xbf16, #tpu.memory_space<vmem>>, %arg3: memref<1x128xf32, #tpu.memory_space<vmem>>, %arg4: memref<128x128xf32, #tpu.memory_space<vmem>>, %arg5: memref<128x128xf32, #tpu.memory_space<vmem>>, %arg6: memref<128x1xf32, #tpu.memory_space<vmem>>, %arg7: memref<4x128x64xbf16, #tpu.memory_space<vmem>>, %arg8: memref<1x64xf32, #tpu.memory_space<vmem>>, %arg9: memref<112x64xf32, #tpu.memory_space<vmem>>, %arg10: memref<112x64xf32, #tpu.memory_space<vmem>>, %arg11: memref<112x1xf32, #tpu.memory_space<vmem>>, %arg12: memref<9x64x32xbf16, #tpu.memory_space<vmem>>, %arg13: memref<1x32xf32, #tpu.memory_space<vmem>>, %arg14: memref<80x32xf32, #tpu.memory_space<vmem>>, %arg15: memref<80x32xf32, #tpu.memory_space<vmem>>, %arg16: memref<80x1xf32, #tpu.memory_space<vmem>>, %arg17: memref<2x80x32xf32, #tpu.memory_space<vmem>>, %arg18: memref<2x128x128xbf16, #tpu.memory_space<vmem>>, %arg19: memref<2x112x64xbf16, #tpu.memory_space<vmem>>) attributes {dimension_semantics = [#tpu.dimension_semantics<parallel>], iteration_bounds = array<i64: 1>, scalar_prefetch = 0 : i64, scratch_operands = 2 : i64, tpu.core_type = #tpu.core_type<tc>, window_params = [{transform_indices = @transform_0, window_bounds = array<i64: 2, 144, 256>}, {pipeline_mode = #tpu.pipeline_mode<synchronous>, transform_indices = @transform_1, window_bounds = array<i64: 4, 256, 128>}, {pipeline_mode = #tpu.pipeline_mode<synchronous>, transform_indices = @transform_2, window_bounds = array<i64: 1, 128>}, {pipeline_mode = #tpu.pipeline_mode<synchronous>, transform_indices = @transform_3, window_bounds = array<i64: 128, 128>}, {pipeline_mode = #tpu.pipeline_mode<synchronous>, transform_indices = @transform_4, window_bounds = array<i64: 128, 128>}, {pipeline_mode = #tpu.pipeline_mode<synchronous>, transform_indices = @transform_5, window_bounds = array<i64: 128, 1>}, {pipeline_mode = #tpu.pipeline_mode<synchronous>, transform_indices = @transform_6, window_bounds = array<i64: 4, 128, 64>}, {pipeline_mode = #tpu.pipeline_mode<synchronous>, transform_indices = @transform_7, window_bounds = array<i64: 1, 64>}, {pipeline_mode = #tpu.pipeline_mode<synchronous>, transform_indices = @transform_8, window_bounds = array<i64: 112, 64>}, {pipeline_mode = #tpu.pipeline_mode<synchronous>, transform_indices = @transform_9, window_bounds = array<i64: 112, 64>}, {pipeline_mode = #tpu.pipeline_mode<synchronous>, transform_indices = @transform_10, window_bounds = array<i64: 112, 1>}, {pipeline_mode = #tpu.pipeline_mode<synchronous>, transform_indices = @transform_11, window_bounds = array<i64: 9, 64, 32>}, {pipeline_mode = #tpu.pipeline_mode<synchronous>, transform_indices = @transform_12, window_bounds = array<i64: 1, 32>}, {pipeline_mode = #tpu.pipeline_mode<synchronous>, transform_indices = @transform_13, window_bounds = array<i64: 80, 32>}, {pipeline_mode = #tpu.pipeline_mode<synchronous>, transform_indices = @transform_14, window_bounds = array<i64: 80, 32>}, {pipeline_mode = #tpu.pipeline_mode<synchronous>, transform_indices = @transform_15, window_bounds = array<i64: 80, 1>}, {transform_indices = @transform_16, window_bounds = array<i64: 2, 80, 32>}]} {
    %c0 = arith.constant 0 : index
    %c0_0 = arith.constant 0 : index
    %c0_1 = arith.constant 0 : index
    %0 = vector.load %arg1[%c0, %c0_0, %c0_1] : memref<2x144x256xbf16, #tpu.memory_space<vmem>>, vector<2x128x256xbf16>
    %1 = vector.shape_cast %0 : vector<2x128x256xbf16> to vector<256x256xbf16>
    %c0_2 = arith.constant 0 : index
    %c0_3 = arith.constant 0 : index
    %c0_4 = arith.constant 0 : index
    %2 = vector.load %arg2[%c0_2, %c0_3, %c0_4] : memref<4x256x128xbf16, #tpu.memory_space<vmem>>, vector<1x256x128xbf16>
    %3 = vector.shape_cast %2 : vector<1x256x128xbf16> to vector<256x128xbf16>
    %cst = arith.constant dense<0.000000e+00> : vector<256x128xf32>
    %4 = tpu.matmul %1, %3, %cst {dimension_numbers = #tpu.dot_dimension_numbers<[1], [0], [0], [1], [0, 0, 1, 1], [], []>} : vector<256x256xbf16>, vector<256x128xbf16>, vector<256x128xf32> -> vector<256x128xf32>
    %c0_5 = arith.constant 0 : index
    %c1 = arith.constant 1 : index
    %c0_6 = arith.constant 0 : index
    %5 = vector.load %arg1[%c0_5, %c1, %c0_6] : memref<2x144x256xbf16, #tpu.memory_space<vmem>>, vector<2x128x256xbf16>
    %6 = vector.shape_cast %5 : vector<2x128x256xbf16> to vector<256x256xbf16>
    %c1_7 = arith.constant 1 : index
    %c0_8 = arith.constant 0 : index
    %c0_9 = arith.constant 0 : index
    %7 = vector.load %arg2[%c1_7, %c0_8, %c0_9] : memref<4x256x128xbf16, #tpu.memory_space<vmem>>, vector<1x256x128xbf16>
    %8 = vector.shape_cast %7 : vector<1x256x128xbf16> to vector<256x128xbf16>
    %cst_10 = arith.constant dense<0.000000e+00> : vector<256x128xf32>
    %9 = tpu.matmul %6, %8, %cst_10 {dimension_numbers = #tpu.dot_dimension_numbers<[1], [0], [0], [1], [0, 0, 1, 1], [], []>} : vector<256x256xbf16>, vector<256x128xbf16>, vector<256x128xf32> -> vector<256x128xf32>
    %10 = arith.addf %4, %9 : vector<256x128xf32>
    %c0_11 = arith.constant 0 : index
    %c11 = arith.constant 11 : index
    %c0_12 = arith.constant 0 : index
    %11 = vector.load %arg1[%c0_11, %c11, %c0_12] : memref<2x144x256xbf16, #tpu.memory_space<vmem>>, vector<2x128x256xbf16>
    %12 = vector.shape_cast %11 : vector<2x128x256xbf16> to vector<256x256xbf16>
    %c2 = arith.constant 2 : index
    %c0_13 = arith.constant 0 : index
    %c0_14 = arith.constant 0 : index
    %13 = vector.load %arg2[%c2, %c0_13, %c0_14] : memref<4x256x128xbf16, #tpu.memory_space<vmem>>, vector<1x256x128xbf16>
    %14 = vector.shape_cast %13 : vector<1x256x128xbf16> to vector<256x128xbf16>
    %cst_15 = arith.constant dense<0.000000e+00> : vector<256x128xf32>
    %15 = tpu.matmul %12, %14, %cst_15 {dimension_numbers = #tpu.dot_dimension_numbers<[1], [0], [0], [1], [0, 0, 1, 1], [], []>} : vector<256x256xbf16>, vector<256x128xbf16>, vector<256x128xf32> -> vector<256x128xf32>
    %16 = arith.addf %10, %15 : vector<256x128xf32>
    %c0_16 = arith.constant 0 : index
    %c12 = arith.constant 12 : index
    %c0_17 = arith.constant 0 : index
    %17 = vector.load %arg1[%c0_16, %c12, %c0_17] : memref<2x144x256xbf16, #tpu.memory_space<vmem>>, vector<2x128x256xbf16>
    %18 = vector.shape_cast %17 : vector<2x128x256xbf16> to vector<256x256xbf16>
    %c3 = arith.constant 3 : index
    %c0_18 = arith.constant 0 : index
    %c0_19 = arith.constant 0 : index
    %19 = vector.load %arg2[%c3, %c0_18, %c0_19] : memref<4x256x128xbf16, #tpu.memory_space<vmem>>, vector<1x256x128xbf16>
    %20 = vector.shape_cast %19 : vector<1x256x128xbf16> to vector<256x128xbf16>
    %cst_20 = arith.constant dense<0.000000e+00> : vector<256x128xf32>
    %21 = tpu.matmul %18, %20, %cst_20 {dimension_numbers = #tpu.dot_dimension_numbers<[1], [0], [0], [1], [0, 0, 1, 1], [], []>} : vector<256x256xbf16>, vector<256x128xbf16>, vector<256x128xf32> -> vector<256x128xf32>
    %22 = arith.addf %16, %21 : vector<256x128xf32>
    %23 = vector.shape_cast %22 : vector<256x128xf32> to vector<2x128x128xf32>
    %c0_21 = arith.constant 0 : index
    %c0_22 = arith.constant 0 : index
    %24 = vector.load %arg3[%c0_21, %c0_22] : memref<1x128xf32, #tpu.memory_space<vmem>>, vector<1x128xf32>
    %25 = vector.shape_cast %24 : vector<1x128xf32> to vector<1x1x128xf32>
    %26 = vector.broadcast %25 : vector<1x1x128xf32> to vector<2x128x128xf32>
    %27 = arith.addf %23, %26 : vector<2x128x128xf32>
    %c0_23 = arith.constant 0 : index
    %c0_24 = arith.constant 0 : index
    %28 = vector.load %arg6[%c0_23, %c0_24] : memref<128x1xf32, #tpu.memory_space<vmem>>, vector<128x1xf32>
    %29 = vector.shape_cast %28 : vector<128x1xf32> to vector<1x128x1xf32>
    %30 = vector.broadcast %29 : vector<1x128x1xf32> to vector<2x128x128xf32>
    %31 = arith.mulf %27, %30 : vector<2x128x128xf32>
    %cst_25 = arith.constant dense<0.000000e+00> : vector<2x128xf32>
    %32 = vector.multi_reduction <add>, %31, %cst_25 [2] : vector<2x128x128xf32> to vector<2x128xf32>
    %33 = vector.shape_cast %32 : vector<2x128xf32> to vector<2x128x1xf32>
    %cst_26 = arith.constant dense<0.000000e+00> : vector<2x1xf32>
    %34 = vector.multi_reduction <add>, %33, %cst_26 [1] : vector<2x128x1xf32> to vector<2x1xf32>
    %35 = vector.shape_cast %34 : vector<2x1xf32> to vector<2x1x1xf32>
    %cst_27 = arith.constant 7.812500e-05 : f32
    %36 = vector.broadcast %cst_27 : f32 to vector<2x1x1xf32>
    %37 = arith.mulf %35, %36 : vector<2x1x1xf32>
    %38 = vector.broadcast %37 : vector<2x1x1xf32> to vector<2x128x128xf32>
    %39 = arith.subf %27, %38 : vector<2x128x128xf32>
    %40 = vector.shape_cast %28 : vector<128x1xf32> to vector<1x128x1xf32>
    %41 = vector.broadcast %40 : vector<1x128x1xf32> to vector<2x128x128xf32>
    %42 = arith.mulf %39, %41 : vector<2x128x128xf32>
    %43 = arith.mulf %42, %42 : vector<2x128x128xf32>
    %cst_28 = arith.constant dense<0.000000e+00> : vector<2x128xf32>
    %44 = vector.multi_reduction <add>, %43, %cst_28 [2] : vector<2x128x128xf32> to vector<2x128xf32>
    %45 = vector.shape_cast %44 : vector<2x128xf32> to vector<2x128x1xf32>
    %cst_29 = arith.constant dense<0.000000e+00> : vector<2x1xf32>
    %46 = vector.multi_reduction <add>, %45, %cst_29 [1] : vector<2x128x1xf32> to vector<2x1xf32>
    %47 = vector.shape_cast %46 : vector<2x1xf32> to vector<2x1x1xf32>
    %cst_30 = arith.constant 7.812500e-05 : f32
    %48 = vector.broadcast %cst_30 : f32 to vector<2x1x1xf32>
    %49 = arith.mulf %47, %48 : vector<2x1x1xf32>
    %cst_31 = arith.constant 9.99999974E-6 : f32
    %50 = vector.broadcast %cst_31 : f32 to vector<2x1x1xf32>
    %51 = arith.addf %49, %50 : vector<2x1x1xf32>
    %52 = math.rsqrt %51 : vector<2x1x1xf32>
    %53 = vector.broadcast %37 : vector<2x1x1xf32> to vector<2x128x128xf32>
    %54 = arith.subf %27, %53 : vector<2x128x128xf32>
    %55 = vector.broadcast %52 : vector<2x1x1xf32> to vector<2x128x128xf32>
    %56 = arith.mulf %54, %55 : vector<2x128x128xf32>
    %c0_32 = arith.constant 0 : index
    %c0_33 = arith.constant 0 : index
    %57 = vector.load %arg4[%c0_32, %c0_33] : memref<128x128xf32, #tpu.memory_space<vmem>>, vector<128x128xf32>
    %58 = vector.shape_cast %57 : vector<128x128xf32> to vector<1x128x128xf32>
    %59 = vector.broadcast %58 : vector<1x128x128xf32> to vector<2x128x128xf32>
    %60 = arith.mulf %56, %59 : vector<2x128x128xf32>
    %c0_34 = arith.constant 0 : index
    %c0_35 = arith.constant 0 : index
    %61 = vector.load %arg5[%c0_34, %c0_35] : memref<128x128xf32, #tpu.memory_space<vmem>>, vector<128x128xf32>
    %62 = vector.shape_cast %61 : vector<128x128xf32> to vector<1x128x128xf32>
    %63 = vector.broadcast %62 : vector<1x128x128xf32> to vector<2x128x128xf32>
    %64 = arith.addf %60, %63 : vector<2x128x128xf32>
    %cst_36 = arith.constant 0.000000e+00 : f32
    %65 = vector.broadcast %cst_36 : f32 to vector<2x128x128xf32>
    %66 = arith.maximumf %64, %65 : vector<2x128x128xf32>
    %67 = arith.truncf %66 : vector<2x128x128xf32> to vector<2x128x128xbf16>
    %c0_37 = arith.constant 0 : index
    %c0_38 = arith.constant 0 : index
    %c0_39 = arith.constant 0 : index
    %68 = vector.load %arg18[%c0_37, %c0_38, %c0_39] : memref<2x128x128xbf16, #tpu.memory_space<vmem>>, vector<2x128x128xbf16>
    tpu.vector_store %arg18[%c0_37, %c0_38, %c0_39], %67 {strides = array<i32>} : memref<2x128x128xbf16, #tpu.memory_space<vmem>>, vector<2x128x128xbf16>,
    %c0_40 = arith.constant 0 : index
    %c0_41 = arith.constant 0 : index
    %c0_42 = arith.constant 0 : index
    %69 = vector.load %arg18[%c0_40, %c0_41, %c0_42] : memref<2x128x128xbf16, #tpu.memory_space<vmem>>, vector<2x112x128xbf16>
    %70 = vector.shape_cast %69 : vector<2x112x128xbf16> to vector<224x128xbf16>
    %c0_43 = arith.constant 0 : index
    %c0_44 = arith.constant 0 : index
    %c0_45 = arith.constant 0 : index
    %71 = vector.load %arg7[%c0_43, %c0_44, %c0_45] : memref<4x128x64xbf16, #tpu.memory_space<vmem>>, vector<1x128x64xbf16>
    %72 = vector.shape_cast %71 : vector<1x128x64xbf16> to vector<128x64xbf16>
    %cst_46 = arith.constant dense<0.000000e+00> : vector<224x64xf32>
    %73 = tpu.matmul %70, %72, %cst_46 {dimension_numbers = #tpu.dot_dimension_numbers<[1], [0], [0], [1], [0, 0, 1, 1], [], []>} : vector<224x128xbf16>, vector<128x64xbf16>, vector<224x64xf32> -> vector<224x64xf32>
    %c0_47 = arith.constant 0 : index
    %c1_48 = arith.constant 1 : index
    %c0_49 = arith.constant 0 : index
    %74 = vector.load %arg18[%c0_47, %c1_48, %c0_49] : memref<2x128x128xbf16, #tpu.memory_space<vmem>>, vector<2x112x128xbf16>
    %75 = vector.shape_cast %74 : vector<2x112x128xbf16> to vector<224x128xbf16>
    %c1_50 = arith.constant 1 : index
    %c0_51 = arith.constant 0 : index
    %c0_52 = arith.constant 0 : index
    %76 = vector.load %arg7[%c1_50, %c0_51, %c0_52] : memref<4x128x64xbf16, #tpu.memory_space<vmem>>, vector<1x128x64xbf16>
    %77 = vector.shape_cast %76 : vector<1x128x64xbf16> to vector<128x64xbf16>
    %cst_53 = arith.constant dense<0.000000e+00> : vector<224x64xf32>
    %78 = tpu.matmul %75, %77, %cst_53 {dimension_numbers = #tpu.dot_dimension_numbers<[1], [0], [0], [1], [0, 0, 1, 1], [], []>} : vector<224x128xbf16>, vector<128x64xbf16>, vector<224x64xf32> -> vector<224x64xf32>
    %79 = arith.addf %73, %78 : vector<224x64xf32>
    %c0_54 = arith.constant 0 : index
    %c11_55 = arith.constant 11 : index
    %c0_56 = arith.constant 0 : index
    %80 = vector.load %arg18[%c0_54, %c11_55, %c0_56] : memref<2x128x128xbf16, #tpu.memory_space<vmem>>, vector<2x112x128xbf16>
    %81 = vector.shape_cast %80 : vector<2x112x128xbf16> to vector<224x128xbf16>
    %c2_57 = arith.constant 2 : index
    %c0_58 = arith.constant 0 : index
    %c0_59 = arith.constant 0 : index
    %82 = vector.load %arg7[%c2_57, %c0_58, %c0_59] : memref<4x128x64xbf16, #tpu.memory_space<vmem>>, vector<1x128x64xbf16>
    %83 = vector.shape_cast %82 : vector<1x128x64xbf16> to vector<128x64xbf16>
    %cst_60 = arith.constant dense<0.000000e+00> : vector<224x64xf32>
    %84 = tpu.matmul %81, %83, %cst_60 {dimension_numbers = #tpu.dot_dimension_numbers<[1], [0], [0], [1], [0, 0, 1, 1], [], []>} : vector<224x128xbf16>, vector<128x64xbf16>, vector<224x64xf32> -> vector<224x64xf32>
    %85 = arith.addf %79, %84 : vector<224x64xf32>
    %c0_61 = arith.constant 0 : index
    %c12_62 = arith.constant 12 : index
    %c0_63 = arith.constant 0 : index
    %86 = vector.load %arg18[%c0_61, %c12_62, %c0_63] : memref<2x128x128xbf16, #tpu.memory_space<vmem>>, vector<2x112x128xbf16>
    %87 = vector.shape_cast %86 : vector<2x112x128xbf16> to vector<224x128xbf16>
    %c3_64 = arith.constant 3 : index
    %c0_65 = arith.constant 0 : index
    %c0_66 = arith.constant 0 : index
    %88 = vector.load %arg7[%c3_64, %c0_65, %c0_66] : memref<4x128x64xbf16, #tpu.memory_space<vmem>>, vector<1x128x64xbf16>
    %89 = vector.shape_cast %88 : vector<1x128x64xbf16> to vector<128x64xbf16>
    %cst_67 = arith.constant dense<0.000000e+00> : vector<224x64xf32>
    %90 = tpu.matmul %87, %89, %cst_67 {dimension_numbers = #tpu.dot_dimension_numbers<[1], [0], [0], [1], [0, 0, 1, 1], [], []>} : vector<224x128xbf16>, vector<128x64xbf16>, vector<224x64xf32> -> vector<224x64xf32>
    %91 = arith.addf %85, %90 : vector<224x64xf32>
    %92 = vector.shape_cast %91 : vector<224x64xf32> to vector<2x112x64xf32>
    %c0_68 = arith.constant 0 : index
    %c0_69 = arith.constant 0 : index
    %93 = vector.load %arg8[%c0_68, %c0_69] : memref<1x64xf32, #tpu.memory_space<vmem>>, vector<1x64xf32>
    %94 = vector.shape_cast %93 : vector<1x64xf32> to vector<1x1x64xf32>
    %95 = vector.broadcast %94 : vector<1x1x64xf32> to vector<2x112x64xf32>
    %96 = arith.addf %92, %95 : vector<2x112x64xf32>
    %c0_70 = arith.constant 0 : index
    %c0_71 = arith.constant 0 : index
    %97 = vector.load %arg11[%c0_70, %c0_71] : memref<112x1xf32, #tpu.memory_space<vmem>>, vector<112x1xf32>
    %98 = vector.shape_cast %97 : vector<112x1xf32> to vector<1x112x1xf32>
    %99 = vector.broadcast %98 : vector<1x112x1xf32> to vector<2x112x64xf32>
    %100 = arith.mulf %96, %99 : vector<2x112x64xf32>
    %cst_72 = arith.constant dense<0.000000e+00> : vector<2x112xf32>
    %101 = vector.multi_reduction <add>, %100, %cst_72 [2] : vector<2x112x64xf32> to vector<2x112xf32>
    %102 = vector.shape_cast %101 : vector<2x112xf32> to vector<2x112x1xf32>
    %cst_73 = arith.constant dense<0.000000e+00> : vector<2x1xf32>
    %103 = vector.multi_reduction <add>, %102, %cst_73 [1] : vector<2x112x1xf32> to vector<2x1xf32>
    %104 = vector.shape_cast %103 : vector<2x1xf32> to vector<2x1x1xf32>
    %cst_74 = arith.constant 1.92901236E-4 : f32
    %105 = vector.broadcast %cst_74 : f32 to vector<2x1x1xf32>
    %106 = arith.mulf %104, %105 : vector<2x1x1xf32>
    %107 = vector.broadcast %106 : vector<2x1x1xf32> to vector<2x112x64xf32>
    %108 = arith.subf %96, %107 : vector<2x112x64xf32>
    %109 = vector.shape_cast %97 : vector<112x1xf32> to vector<1x112x1xf32>
    %110 = vector.broadcast %109 : vector<1x112x1xf32> to vector<2x112x64xf32>
    %111 = arith.mulf %108, %110 : vector<2x112x64xf32>
    %112 = arith.mulf %111, %111 : vector<2x112x64xf32>
    %cst_75 = arith.constant dense<0.000000e+00> : vector<2x112xf32>
    %113 = vector.multi_reduction <add>, %112, %cst_75 [2] : vector<2x112x64xf32> to vector<2x112xf32>
    %114 = vector.shape_cast %113 : vector<2x112xf32> to vector<2x112x1xf32>
    %cst_76 = arith.constant dense<0.000000e+00> : vector<2x1xf32>
    %115 = vector.multi_reduction <add>, %114, %cst_76 [1] : vector<2x112x1xf32> to vector<2x1xf32>
    %116 = vector.shape_cast %115 : vector<2x1xf32> to vector<2x1x1xf32>
    %cst_77 = arith.constant 1.92901236E-4 : f32
    %117 = vector.broadcast %cst_77 : f32 to vector<2x1x1xf32>
    %118 = arith.mulf %116, %117 : vector<2x1x1xf32>
    %cst_78 = arith.constant 9.99999974E-6 : f32
    %119 = vector.broadcast %cst_78 : f32 to vector<2x1x1xf32>
    %120 = arith.addf %118, %119 : vector<2x1x1xf32>
    %121 = math.rsqrt %120 : vector<2x1x1xf32>
    %122 = vector.broadcast %106 : vector<2x1x1xf32> to vector<2x112x64xf32>
    %123 = arith.subf %96, %122 : vector<2x112x64xf32>
    %124 = vector.broadcast %121 : vector<2x1x1xf32> to vector<2x112x64xf32>
    %125 = arith.mulf %123, %124 : vector<2x112x64xf32>
    %c0_79 = arith.constant 0 : index
    %c0_80 = arith.constant 0 : index
    %126 = vector.load %arg9[%c0_79, %c0_80] : memref<112x64xf32, #tpu.memory_space<vmem>>, vector<112x64xf32>
    %127 = vector.shape_cast %126 : vector<112x64xf32> to vector<1x112x64xf32>
    %128 = vector.broadcast %127 : vector<1x112x64xf32> to vector<2x112x64xf32>
    %129 = arith.mulf %125, %128 : vector<2x112x64xf32>
    %c0_81 = arith.constant 0 : index
    %c0_82 = arith.constant 0 : index
    %130 = vector.load %arg10[%c0_81, %c0_82] : memref<112x64xf32, #tpu.memory_space<vmem>>, vector<112x64xf32>
    %131 = vector.shape_cast %130 : vector<112x64xf32> to vector<1x112x64xf32>
    %132 = vector.broadcast %131 : vector<1x112x64xf32> to vector<2x112x64xf32>
    %133 = arith.addf %129, %132 : vector<2x112x64xf32>
    %cst_83 = arith.constant 0.000000e+00 : f32
    %134 = vector.broadcast %cst_83 : f32 to vector<2x112x64xf32>
    %135 = arith.maximumf %133, %134 : vector<2x112x64xf32>
    %136 = arith.truncf %135 : vector<2x112x64xf32> to vector<2x112x64xbf16>
    %c0_84 = arith.constant 0 : index
    %c0_85 = arith.constant 0 : index
    %c0_86 = arith.constant 0 : index
    %137 = vector.load %arg19[%c0_84, %c0_85, %c0_86] : memref<2x112x64xbf16, #tpu.memory_space<vmem>>, vector<2x112x64xbf16>
    tpu.vector_store %arg19[%c0_84, %c0_85, %c0_86], %136 {strides = array<i32>} : memref<2x112x64xbf16, #tpu.memory_space<vmem>>, vector<2x112x64xbf16>,
    %c0_87 = arith.constant 0 : index
    %c0_88 = arith.constant 0 : index
    %c0_89 = arith.constant 0 : index
    %138 = vector.load %arg19[%c0_87, %c0_88, %c0_89] : memref<2x112x64xbf16, #tpu.memory_space<vmem>>, vector<2x80x64xbf16>
    %139 = vector.shape_cast %138 : vector<2x80x64xbf16> to vector<160x64xbf16>
    %c0_90 = arith.constant 0 : index
    %c0_91 = arith.constant 0 : index
    %c0_92 = arith.constant 0 : index
    %140 = vector.load %arg12[%c0_90, %c0_91, %c0_92] : memref<9x64x32xbf16, #tpu.memory_space<vmem>>, vector<1x64x32xbf16>
    %141 = vector.shape_cast %140 : vector<1x64x32xbf16> to vector<64x32xbf16>
    %cst_93 = arith.constant dense<0.000000e+00> : vector<160x32xf32>
    %142 = tpu.matmul %139, %141, %cst_93 {dimension_numbers = #tpu.dot_dimension_numbers<[1], [0], [0], [1], [0, 0, 1, 1], [], []>} : vector<160x64xbf16>, vector<64x32xbf16>, vector<160x32xf32> -> vector<160x32xf32>
    %c0_94 = arith.constant 0 : index
    %c1_95 = arith.constant 1 : index
    %c0_96 = arith.constant 0 : index
    %143 = vector.load %arg19[%c0_94, %c1_95, %c0_96] : memref<2x112x64xbf16, #tpu.memory_space<vmem>>, vector<2x80x64xbf16>
    %144 = vector.shape_cast %143 : vector<2x80x64xbf16> to vector<160x64xbf16>
    %c1_97 = arith.constant 1 : index
    %c0_98 = arith.constant 0 : index
    %c0_99 = arith.constant 0 : index
    %145 = vector.load %arg12[%c1_97, %c0_98, %c0_99] : memref<9x64x32xbf16, #tpu.memory_space<vmem>>, vector<1x64x32xbf16>
    %146 = vector.shape_cast %145 : vector<1x64x32xbf16> to vector<64x32xbf16>
    %cst_100 = arith.constant dense<0.000000e+00> : vector<160x32xf32>
    %147 = tpu.matmul %144, %146, %cst_100 {dimension_numbers = #tpu.dot_dimension_numbers<[1], [0], [0], [1], [0, 0, 1, 1], [], []>} : vector<160x64xbf16>, vector<64x32xbf16>, vector<160x32xf32> -> vector<160x32xf32>
    %148 = arith.addf %142, %147 : vector<160x32xf32>
    %c0_101 = arith.constant 0 : index
    %c2_102 = arith.constant 2 : index
    %c0_103 = arith.constant 0 : index
    %149 = vector.load %arg19[%c0_101, %c2_102, %c0_103] : memref<2x112x64xbf16, #tpu.memory_space<vmem>>, vector<2x80x64xbf16>
    %150 = vector.shape_cast %149 : vector<2x80x64xbf16> to vector<160x64xbf16>
    %c2_104 = arith.constant 2 : index
    %c0_105 = arith.constant 0 : index
    %c0_106 = arith.constant 0 : index
    %151 = vector.load %arg12[%c2_104, %c0_105, %c0_106] : memref<9x64x32xbf16, #tpu.memory_space<vmem>>, vector<1x64x32xbf16>
    %152 = vector.shape_cast %151 : vector<1x64x32xbf16> to vector<64x32xbf16>
    %cst_107 = arith.constant dense<0.000000e+00> : vector<160x32xf32>
    %153 = tpu.matmul %150, %152, %cst_107 {dimension_numbers = #tpu.dot_dimension_numbers<[1], [0], [0], [1], [0, 0, 1, 1], [], []>} : vector<160x64xbf16>, vector<64x32xbf16>, vector<160x32xf32> -> vector<160x32xf32>
    %154 = arith.addf %148, %153 : vector<160x32xf32>
    %c0_108 = arith.constant 0 : index
    %c11_109 = arith.constant 11 : index
    %c0_110 = arith.constant 0 : index
    %155 = vector.load %arg19[%c0_108, %c11_109, %c0_110] : memref<2x112x64xbf16, #tpu.memory_space<vmem>>, vector<2x80x64xbf16>
    %156 = vector.shape_cast %155 : vector<2x80x64xbf16> to vector<160x64xbf16>
    %c3_111 = arith.constant 3 : index
    %c0_112 = arith.constant 0 : index
    %c0_113 = arith.constant 0 : index
    %157 = vector.load %arg12[%c3_111, %c0_112, %c0_113] : memref<9x64x32xbf16, #tpu.memory_space<vmem>>, vector<1x64x32xbf16>
    %158 = vector.shape_cast %157 : vector<1x64x32xbf16> to vector<64x32xbf16>
    %cst_114 = arith.constant dense<0.000000e+00> : vector<160x32xf32>
    %159 = tpu.matmul %156, %158, %cst_114 {dimension_numbers = #tpu.dot_dimension_numbers<[1], [0], [0], [1], [0, 0, 1, 1], [], []>} : vector<160x64xbf16>, vector<64x32xbf16>, vector<160x32xf32> -> vector<160x32xf32>
    %160 = arith.addf %154, %159 : vector<160x32xf32>
    %c0_115 = arith.constant 0 : index
    %c12_116 = arith.constant 12 : index
    %c0_117 = arith.constant 0 : index
    %161 = vector.load %arg19[%c0_115, %c12_116, %c0_117] : memref<2x112x64xbf16, #tpu.memory_space<vmem>>, vector<2x80x64xbf16>
    %162 = vector.shape_cast %161 : vector<2x80x64xbf16> to vector<160x64xbf16>
    %c4 = arith.constant 4 : index
    %c0_118 = arith.constant 0 : index
    %c0_119 = arith.constant 0 : index
    %163 = vector.load %arg12[%c4, %c0_118, %c0_119] : memref<9x64x32xbf16, #tpu.memory_space<vmem>>, vector<1x64x32xbf16>
    %164 = vector.shape_cast %163 : vector<1x64x32xbf16> to vector<64x32xbf16>
    %cst_120 = arith.constant dense<0.000000e+00> : vector<160x32xf32>
    %165 = tpu.matmul %162, %164, %cst_120 {dimension_numbers = #tpu.dot_dimension_numbers<[1], [0], [0], [1], [0, 0, 1, 1], [], []>} : vector<160x64xbf16>, vector<64x32xbf16>, vector<160x32xf32> -> vector<160x32xf32>
    %166 = arith.addf %160, %165 : vector<160x32xf32>
    %c0_121 = arith.constant 0 : index
    %c13 = arith.constant 13 : index
    %c0_122 = arith.constant 0 : index
    %167 = vector.load %arg19[%c0_121, %c13, %c0_122] : memref<2x112x64xbf16, #tpu.memory_space<vmem>>, vector<2x80x64xbf16>
    %168 = vector.shape_cast %167 : vector<2x80x64xbf16> to vector<160x64xbf16>
    %c5 = arith.constant 5 : index
    %c0_123 = arith.constant 0 : index
    %c0_124 = arith.constant 0 : index
    %169 = vector.load %arg12[%c5, %c0_123, %c0_124] : memref<9x64x32xbf16, #tpu.memory_space<vmem>>, vector<1x64x32xbf16>
    %170 = vector.shape_cast %169 : vector<1x64x32xbf16> to vector<64x32xbf16>
    %cst_125 = arith.constant dense<0.000000e+00> : vector<160x32xf32>
    %171 = tpu.matmul %168, %170, %cst_125 {dimension_numbers = #tpu.dot_dimension_numbers<[1], [0], [0], [1], [0, 0, 1, 1], [], []>} : vector<160x64xbf16>, vector<64x32xbf16>, vector<160x32xf32> -> vector<160x32xf32>
    %172 = arith.addf %166, %171 : vector<160x32xf32>
    %c0_126 = arith.constant 0 : index
    %c22 = arith.constant 22 : index
    %c0_127 = arith.constant 0 : index
    %173 = vector.load %arg19[%c0_126, %c22, %c0_127] : memref<2x112x64xbf16, #tpu.memory_space<vmem>>, vector<2x80x64xbf16>
    %174 = vector.shape_cast %173 : vector<2x80x64xbf16> to vector<160x64xbf16>
    %c6 = arith.constant 6 : index
    %c0_128 = arith.constant 0 : index
    %c0_129 = arith.constant 0 : index
    %175 = vector.load %arg12[%c6, %c0_128, %c0_129] : memref<9x64x32xbf16, #tpu.memory_space<vmem>>, vector<1x64x32xbf16>
    %176 = vector.shape_cast %175 : vector<1x64x32xbf16> to vector<64x32xbf16>
    %cst_130 = arith.constant dense<0.000000e+00> : vector<160x32xf32>
    %177 = tpu.matmul %174, %176, %cst_130 {dimension_numbers = #tpu.dot_dimension_numbers<[1], [0], [0], [1], [0, 0, 1, 1], [], []>} : vector<160x64xbf16>, vector<64x32xbf16>, vector<160x32xf32> -> vector<160x32xf32>
    %178 = arith.addf %172, %177 : vector<160x32xf32>
    %c0_131 = arith.constant 0 : index
    %c23 = arith.constant 23 : index
    %c0_132 = arith.constant 0 : index
    %179 = vector.load %arg19[%c0_131, %c23, %c0_132] : memref<2x112x64xbf16, #tpu.memory_space<vmem>>, vector<2x80x64xbf16>
    %180 = vector.shape_cast %179 : vector<2x80x64xbf16> to vector<160x64xbf16>
    %c7 = arith.constant 7 : index
    %c0_133 = arith.constant 0 : index
    %c0_134 = arith.constant 0 : index
    %181 = vector.load %arg12[%c7, %c0_133, %c0_134] : memref<9x64x32xbf16, #tpu.memory_space<vmem>>, vector<1x64x32xbf16>
    %182 = vector.shape_cast %181 : vector<1x64x32xbf16> to vector<64x32xbf16>
    %cst_135 = arith.constant dense<0.000000e+00> : vector<160x32xf32>
    %183 = tpu.matmul %180, %182, %cst_135 {dimension_numbers = #tpu.dot_dimension_numbers<[1], [0], [0], [1], [0, 0, 1, 1], [], []>} : vector<160x64xbf16>, vector<64x32xbf16>, vector<160x32xf32> -> vector<160x32xf32>
    %184 = arith.addf %178, %183 : vector<160x32xf32>
    %c0_136 = arith.constant 0 : index
    %c24 = arith.constant 24 : index
    %c0_137 = arith.constant 0 : index
    %185 = vector.load %arg19[%c0_136, %c24, %c0_137] : memref<2x112x64xbf16, #tpu.memory_space<vmem>>, vector<2x80x64xbf16>
    %186 = vector.shape_cast %185 : vector<2x80x64xbf16> to vector<160x64xbf16>
    %c8 = arith.constant 8 : index
    %c0_138 = arith.constant 0 : index
    %c0_139 = arith.constant 0 : index
    %187 = vector.load %arg12[%c8, %c0_138, %c0_139] : memref<9x64x32xbf16, #tpu.memory_space<vmem>>, vector<1x64x32xbf16>
    %188 = vector.shape_cast %187 : vector<1x64x32xbf16> to vector<64x32xbf16>
    %cst_140 = arith.constant dense<0.000000e+00> : vector<160x32xf32>
    %189 = tpu.matmul %186, %188, %cst_140 {dimension_numbers = #tpu.dot_dimension_numbers<[1], [0], [0], [1], [0, 0, 1, 1], [], []>} : vector<160x64xbf16>, vector<64x32xbf16>, vector<160x32xf32> -> vector<160x32xf32>
    %190 = arith.addf %184, %189 : vector<160x32xf32>
    %191 = vector.shape_cast %190 : vector<160x32xf32> to vector<2x80x32xf32>
    %c0_141 = arith.constant 0 : index
    %c0_142 = arith.constant 0 : index
    %192 = vector.load %arg13[%c0_141, %c0_142] : memref<1x32xf32, #tpu.memory_space<vmem>>, vector<1x32xf32>
    %193 = vector.shape_cast %192 : vector<1x32xf32> to vector<1x1x32xf32>
    %194 = vector.broadcast %193 : vector<1x1x32xf32> to vector<2x80x32xf32>
    %195 = arith.addf %191, %194 : vector<2x80x32xf32>
    %c0_143 = arith.constant 0 : index
    %c0_144 = arith.constant 0 : index
    %196 = vector.load %arg16[%c0_143, %c0_144] : memref<80x1xf32, #tpu.memory_space<vmem>>, vector<80x1xf32>
    %197 = vector.shape_cast %196 : vector<80x1xf32> to vector<1x80x1xf32>
    %198 = vector.broadcast %197 : vector<1x80x1xf32> to vector<2x80x32xf32>
    %199 = arith.mulf %195, %198 : vector<2x80x32xf32>
    %cst_145 = arith.constant dense<0.000000e+00> : vector<2x80xf32>
    %200 = vector.multi_reduction <add>, %199, %cst_145 [2] : vector<2x80x32xf32> to vector<2x80xf32>
    %201 = vector.shape_cast %200 : vector<2x80xf32> to vector<2x80x1xf32>
    %cst_146 = arith.constant dense<0.000000e+00> : vector<2x1xf32>
    %202 = vector.multi_reduction <add>, %201, %cst_146 [1] : vector<2x80x1xf32> to vector<2x1xf32>
    %203 = vector.shape_cast %202 : vector<2x1xf32> to vector<2x1x1xf32>
    %cst_147 = arith.constant 6.37755089E-4 : f32
    %204 = vector.broadcast %cst_147 : f32 to vector<2x1x1xf32>
    %205 = arith.mulf %203, %204 : vector<2x1x1xf32>
    %206 = vector.broadcast %205 : vector<2x1x1xf32> to vector<2x80x32xf32>
    %207 = arith.subf %195, %206 : vector<2x80x32xf32>
    %208 = vector.shape_cast %196 : vector<80x1xf32> to vector<1x80x1xf32>
    %209 = vector.broadcast %208 : vector<1x80x1xf32> to vector<2x80x32xf32>
    %210 = arith.mulf %207, %209 : vector<2x80x32xf32>
    %211 = arith.mulf %210, %210 : vector<2x80x32xf32>
    %cst_148 = arith.constant dense<0.000000e+00> : vector<2x80xf32>
    %212 = vector.multi_reduction <add>, %211, %cst_148 [2] : vector<2x80x32xf32> to vector<2x80xf32>
    %213 = vector.shape_cast %212 : vector<2x80xf32> to vector<2x80x1xf32>
    %cst_149 = arith.constant dense<0.000000e+00> : vector<2x1xf32>
    %214 = vector.multi_reduction <add>, %213, %cst_149 [1] : vector<2x80x1xf32> to vector<2x1xf32>
    %215 = vector.shape_cast %214 : vector<2x1xf32> to vector<2x1x1xf32>
    %cst_150 = arith.constant 6.37755089E-4 : f32
    %216 = vector.broadcast %cst_150 : f32 to vector<2x1x1xf32>
    %217 = arith.mulf %215, %216 : vector<2x1x1xf32>
    %cst_151 = arith.constant 9.99999974E-6 : f32
    %218 = vector.broadcast %cst_151 : f32 to vector<2x1x1xf32>
    %219 = arith.addf %217, %218 : vector<2x1x1xf32>
    %220 = math.rsqrt %219 : vector<2x1x1xf32>
    %221 = vector.broadcast %205 : vector<2x1x1xf32> to vector<2x80x32xf32>
    %222 = arith.subf %195, %221 : vector<2x80x32xf32>
    %223 = vector.broadcast %220 : vector<2x1x1xf32> to vector<2x80x32xf32>
    %224 = arith.mulf %222, %223 : vector<2x80x32xf32>
    %c0_152 = arith.constant 0 : index
    %c0_153 = arith.constant 0 : index
    %225 = vector.load %arg14[%c0_152, %c0_153] : memref<80x32xf32, #tpu.memory_space<vmem>>, vector<80x32xf32>
    %226 = vector.shape_cast %225 : vector<80x32xf32> to vector<1x80x32xf32>
    %227 = vector.broadcast %226 : vector<1x80x32xf32> to vector<2x80x32xf32>
    %228 = arith.mulf %224, %227 : vector<2x80x32xf32>
    %c0_154 = arith.constant 0 : index
    %c0_155 = arith.constant 0 : index
    %229 = vector.load %arg15[%c0_154, %c0_155] : memref<80x32xf32, #tpu.memory_space<vmem>>, vector<80x32xf32>
    %230 = vector.shape_cast %229 : vector<80x32xf32> to vector<1x80x32xf32>
    %231 = vector.broadcast %230 : vector<1x80x32xf32> to vector<2x80x32xf32>
    %232 = arith.addf %228, %231 : vector<2x80x32xf32>
    %cst_156 = arith.constant 0.000000e+00 : f32
    %233 = vector.broadcast %cst_156 : f32 to vector<2x80x32xf32>
    %234 = arith.maximumf %232, %233 : vector<2x80x32xf32>
    %c0_157 = arith.constant 0 : index
    %c0_158 = arith.constant 0 : index
    %c0_159 = arith.constant 0 : index
    %235 = vector.load %arg17[%c0_157, %c0_158, %c0_159] : memref<2x80x32xf32, #tpu.memory_space<vmem>>, vector<2x80x32xf32>
    tpu.vector_store %arg17[%c0_157, %c0_158, %c0_159], %234 {strides = array<i32>} : memref<2x80x32xf32, #tpu.memory_space<vmem>>, vector<2x80x32xf32>,
    return
  }
  func.func @transform_0(%arg0: i32) -> (i32, i32, i32) {
    %c0_i32 = arith.constant 0 : i32
    %c0_i32_0 = arith.constant 0 : i32
    %c0_i32_1 = arith.constant 0 : i32
    return %arg0, %c0_i32, %c0_i32_0 : i32, i32, i32
  }
  func.func @transform_1(%arg0: i32) -> (i32, i32, i32) {
    %c0_i32 = arith.constant 0 : i32
    %c0_i32_0 = arith.constant 0 : i32
    %c0_i32_1 = arith.constant 0 : i32
    %c0_i32_2 = arith.constant 0 : i32
    return %c0_i32, %c0_i32_0, %c0_i32_1 : i32, i32, i32
  }
  func.func @transform_2(%arg0: i32) -> (i32, i32) {
    %c0_i32 = arith.constant 0 : i32
    %c0_i32_0 = arith.constant 0 : i32
    %c0_i32_1 = arith.constant 0 : i32
    return %c0_i32, %c0_i32_0 : i32, i32
  }
  func.func @transform_3(%arg0: i32) -> (i32, i32) {
    %c0_i32 = arith.constant 0 : i32
    %c0_i32_0 = arith.constant 0 : i32
    %c0_i32_1 = arith.constant 0 : i32
    return %c0_i32, %c0_i32_0 : i32, i32
  }
  func.func @transform_4(%arg0: i32) -> (i32, i32) {
    %c0_i32 = arith.constant 0 : i32
    %c0_i32_0 = arith.constant 0 : i32
    %c0_i32_1 = arith.constant 0 : i32
    return %c0_i32, %c0_i32_0 : i32, i32
  }
  func.func @transform_5(%arg0: i32) -> (i32, i32) {
    %c0_i32 = arith.constant 0 : i32
    %c0_i32_0 = arith.constant 0 : i32
    %c0_i32_1 = arith.constant 0 : i32
    return %c0_i32, %c0_i32_0 : i32, i32
  }
  func.func @transform_6(%arg0: i32) -> (i32, i32, i32) {
    %c0_i32 = arith.constant 0 : i32
    %c0_i32_0 = arith.constant 0 : i32
    %c0_i32_1 = arith.constant 0 : i32
    %c0_i32_2 = arith.constant 0 : i32
    return %c0_i32, %c0_i32_0, %c0_i32_1 : i32, i32, i32
  }
  func.func @transform_7(%arg0: i32) -> (i32, i32) {
    %c0_i32 = arith.constant 0 : i32
    %c0_i32_0 = arith.constant 0 : i32
    %c0_i32_1 = arith.constant 0 : i32
    return %c0_i32, %c0_i32_0 : i32, i32
  }
  func.func @transform_8(%arg0: i32) -> (i32, i32) {
    %c0_i32 = arith.constant 0 : i32
    %c0_i32_0 = arith.constant 0 : i32
    %c0_i32_1 = arith.constant 0 : i32
    return %c0_i32, %c0_i32_0 : i32, i32
  }
  func.func @transform_9(%arg0: i32) -> (i32, i32) {
    %c0_i32 = arith.constant 0 : i32
    %c0_i32_0 = arith.constant 0 : i32
    %c0_i32_1 = arith.constant 0 : i32
    return %c0_i32, %c0_i32_0 : i32, i32
  }
  func.func @transform_10(%arg0: i32) -> (i32, i32) {
    %c0_i32 = arith.constant 0 : i32
    %c0_i32_0 = arith.constant 0 : i32
    %c0_i32_1 = arith.constant 0 : i32
    return %c0_i32, %c0_i32_0 : i32, i32
  }
  func.func @transform_11(%arg0: i32) -> (i32, i32, i32) {
    %c0_i32 = arith.constant 0 : i32
    %c0_i32_0 = arith.constant 0 : i32
    %c0_i32_1 = arith.constant 0 : i32
    %c0_i32_2 = arith.constant 0 : i32
    return %c0_i32, %c0_i32_0, %c0_i32_1 : i32, i32, i32
  }
  func.func @transform_12(%arg0: i32) -> (i32, i32) {
    %c0_i32 = arith.constant 0 : i32
    %c0_i32_0 = arith.constant 0 : i32
    %c0_i32_1 = arith.constant 0 : i32
    return %c0_i32, %c0_i32_0 : i32, i32
  }
  func.func @transform_13(%arg0: i32) -> (i32, i32) {
    %c0_i32 = arith.constant 0 : i32
    %c0_i32_0 = arith.constant 0 : i32
    %c0_i32_1 = arith.constant 0 : i32
    return %c0_i32, %c0_i32_0 : i32, i32
  }
  func.func @transform_14(%arg0: i32) -> (i32, i32) {
    %c0_i32 = arith.constant 0 : i32
    %c0_i32_0 = arith.constant 0 : i32
    %c0_i32_1 = arith.constant 0 : i32
    return %c0_i32, %c0_i32_0 : i32, i32
  }
  func.func @transform_15(%arg0: i32) -> (i32, i32) {
    %c0_i32 = arith.constant 0 : i32
    %c0_i32_0 = arith.constant 0 : i32
    %c0_i32_1 = arith.constant 0 : i32
    return %c0_i32, %c0_i32_0 : i32, i32
  }
  func.func @transform_16(%arg0: i32) -> (i32, i32, i32) {
    %c0_i32 = arith.constant 0 : i32
    %c0_i32_0 = arith.constant 0 : i32
    %c0_i32_1 = arith.constant 0 : i32
    return %arg0, %c0_i32, %c0_i32_0 : i32, i32, i32
  }
}

</mosaic_0001>

<bundles_post_ra>
// kernel: feature_encoder_forward.1
= control target key start
LH: loop header
LB: loop body
LE: loop exit
PB: predicated region body
PF: predicated region fallthrough
CT: control target
= control target key end

     0   :  { %vm120_vm0 = vsmask.f32 3328  ;;  %vm121_vm1 = vsmask.f32 7440  ;;  %vm1320_vm3 = vsmask.f32 2304  ;;  %s14911_s1 = inlined_call_operand.vmem [shape: bf16[4,256,128], index: 1, kind: input, shape index: {}]   ;;  %s14912_s0 = inlined_call_operand.vmem [shape: bf16[2,144,256], index: 0, kind: input, shape index: {}]   ;;  %s14913_s5 = inlined_call_operand.vmem [shape: f32[128,1], index: 5, kind: input, shape index: {}]   ;;  %s14914_s2 = inlined_call_operand.vmem [shape: f32[1,128], index: 2, kind: input, shape index: {}]   ;;  %s14915_s6 = inlined_call_operand.vmem [shape: bf16[4,128,64], index: 6, kind: input, shape index: {}]   ;;  %s14916_s10 = inlined_call_operand.vmem [shape: f32[112,1], index: 10, kind: input, shape index: {}]   ;;  %s14917_s3 = inlined_call_operand.vmem [shape: f32[128,128], index: 3, kind: input, shape index: {}]   ;;  %s14918_s4 = inlined_call_operand.vmem [shape: f32[128,128], index: 4, kind: input, shape index: {}]   ;;  %s14919_s7 = inlined_call_operand.vmem [shape: f32[1,64], index: 7, kind: input, shape index: {}]   ;;  %s14920_s11 = inlined_call_operand.vmem [shape: bf16[9,64,32], index: 11, kind: input, shape index: {}]   ;;  %s14921_s15 = inlined_call_operand.vmem [shape: f32[80,1], index: 15, kind: input, shape index: {}]   ;;  %s14922_s8 = inlined_call_operand.vmem [shape: f32[112,64], index: 8, kind: input, shape index: {}]   ;;  %s14923_s9 = inlined_call_operand.vmem [shape: f32[112,64], index: 9, kind: input, shape index: {}]   ;;  %s14924_s12 = inlined_call_operand.vmem [shape: f32[1,32], index: 12, kind: input, shape index: {}]   ;;  %s14925_s13 = inlined_call_operand.vmem [shape: f32[80,32], index: 13, kind: input, shape index: {}]   ;;  %s14926_s14 = inlined_call_operand.vmem [shape: f32[80,32], index: 14, kind: input, shape index: {}]   ;;  %s14927_s16 = inlined_call_operand.vmem [shape: f32[2,80,32], index: 16, kind: output, shape index: {}]  }
   0x1   :  { %14960 = sst [smem:[#allocation20_spill]] %s14911_s1  ;;  %v54_v11 = vld [vmem:[%s14912_s0] sm:$0xff]  ;;  %v55_v12 = vld [vmem:[%s14912_s0 + $0x8] sm:$0xff]  ;;  %v56_v13 = vld [vmem:[%s14912_s0 + $0x10] sm:$0xff]  ;;  %vm1321_vm4 = vsmask.f32 6416 }
   0x2   :  { %s14961_s23 = sld [smem:[#allocation20_spill]]  ;;  %v124_v15 = vshrl.u32 %v54_v11, 16  ;;  %v127_v16 = vshll.u32 %v54_v11, 16  ;;  %v133_v17 = vshll.u32 %v55_v12, 16  ;;  %v137_v18 = vshrl.u32 %v55_v12, 16  ;;  %v57_v30 = vld [vmem:[%s14912_s0 + $0x18] sm:$0xff]  ;;  %vm10191_vm2 = vmor %vm120_vm0, %vm121_vm1 }
   0x3   :  { %v143_v20 = vshll.u32 %v56_v13, 16  ;;  %v147_v21 = vshrl.u32 %v56_v13, 16  ;;  %v58_v31 = vld [vmem:[%s14912_s0 + $0x20] sm:$0xff]  ;;  %v153_v35 = vshll.u32 %v57_v30, 16  ;;  %v157_v36 = vshrl.u32 %v57_v30, 16  ;;  %v59_v37 = vld [vmem:[%s14912_s0 + $0x28] sm:$0xff]  ;;  %vm10775_vm7 = vmor %vm1320_vm3, %vm1321_vm4 }
   0x4   :  { %v126_v24 = vrot.slane %v124_v15, 4  ;;  %v129_v25 = vrot.slane %v127_v16, 5  ;;  %v135_v26 = vrot.slane %v133_v17, 5  ;;  %v139_v27 = vrot.slane %v137_v18, 4  ;;  %v10208_v56 = vld [vmem:[%s14912_s0 + $0x30] sm:$0xff]  ;;  %v10216_v59 = vld [vmem:[%s14912_s0 + $0x38] sm:$0xff] }
   0x5   :  { %v145_v28 = vrot.slane %v143_v20, 5  ;;  %v149_v29 = vrot.slane %v147_v21, 4  ;;  %v163_v41 = vshll.u32 %v58_v31, 16  ;;  %v167_v42 = vshrl.u32 %v58_v31, 16  ;;  %v10250_v20 = vld [vmem:[%s14912_s0 + $0x40] sm:$0xff] }
   0x6   :  { %v130_v33 = vor.u32 %v129_v25, %v126_v24  ;;  %v140_v34 = vor.u32 %v139_v27, %v135_v26  ;;  %v173_v43 = vshll.u32 %v59_v37, 16  ;;  %v155_v47 = vrot.slane %v153_v35, 5 }
   0x7   :  { %v150_v40 = vor.u32 %v149_v29, %v145_v28  ;;  %v159_v48 = vrot.slane %v157_v36, 4  ;;  %v165_v50 = vrot.slane %v163_v41, 5  ;;  %v169_v51 = vrot.slane %v167_v42, 4 }
   0x8   :  { %v9843_v0 = vld [vmem:[%s14961_s23 + $0xc0] sm:$0xff]   ;;  %v9845_v2 = vld [vmem:[%s14961_s23 + $0xc8] sm:$0xff]   ;;  %v9847_v4 = vld [vmem:[%s14961_s23 + $0xd0] sm:$0xff]   ;;  %v131_v45 = vrot.slane %v130_v33, 4  ;;  %v141_v46 = vrot.slane %v140_v34, 4  ;;  %v175_v52 = vrot.slane %v173_v43, 5 }
   0x9   :  { %v9844_v1 = vld [vmem:[%s14961_s23 + $0x80] sm:$0xff]   ;;  %8490 = vmatprep.subr.bf16.mxu0 %v9843_v0  ;;  %v9846_v3 = vld [vmem:[%s14961_s23 + $0x88] sm:$0xff]   ;;  %v9848_v5 = vld [vmem:[%s14961_s23 + $0x90] sm:$0xff]   ;;  %v151_v49 = vrot.slane %v150_v40, 4  ;;  %v160_v55 = vor.u32 %v159_v48, %v155_v47  ;;  %v177_v57 = vshrl.u32 %v59_v37, 16  ;;  %v170_v63 = vor.u32 %v169_v51, %v165_v50 }
   0xa   :  { %8491 = vmatpush3.bf16.msra.mxu0 %v9844_v1  ;;  %v9849_v6 = vld [vmem:[%s14961_s23 + $0xd8] sm:$0xff]   ;;  %v9851_v8 = vld [vmem:[%s14961_s23 + $0xe0] sm:$0xff]   ;;  %v9853_v10 = vld [vmem:[%s14961_s23 + $0xe8] sm:$0xff]   ;;  %v136_v53 = vsel %vm10191_vm2, %v131_v45, %v135_v26  ;;  %v146_v54 = vsel %vm10191_vm2, %v141_v46, %v145_v28  ;;  %v187_v1 = vshrl.u32 %v10208_v56, 16  ;;  %v207_v25 = vshrl.u32 %v10250_v20, 16 }
   0xb   :  { %8492 = vmatprep.subr.bf16.mxu0 %v9845_v2  ;;  %v9850_v7 = vld [vmem:[%s14961_s23 + $0x98] sm:$0xff]   ;;  %v9852_v9 = vld [vmem:[%s14961_s23 + $0xa0] sm:$0xff]   ;;  %v9854_v14 = vld [vmem:[%s14961_s23 + $0xa8] sm:$0xff]   ;;  %v7960_v60 = vcombine.high %v136_v53, %v146_v54  ;;  %v161_v62 = vrot.slane %v160_v55, 4  ;;  %v179_v0 = vrot.slane %v177_v57, 4  ;;  %v156_v2 = vsel %vm10191_vm2, %v151_v49, %v155_v47 }
   0xc   :  { %v9855_v19 = vld [vmem:[%s14961_s23 + $0xf0] sm:$0xff]   ;;  %v10165_v22 = vld [vmem:[%s14961_s23 + $0x40] sm:$0xff]   ;;  %v9857_v38 = vld [vmem:[%s14961_s23 + $0xf8] sm:$0xff]   ;;  %v189_v11 = vrot.slane %v187_v1, 4  ;;  %v171_v13 = vrot.slane %v170_v63, 4  ;;  %v203_v31 = vshll.u32 %v10250_v20, 16 }
   0xd   :  { %v10170_v23 = vld [vmem:[%s14961_s23] sm:$0xff]   ;;  %9580 = vmatprep.subr.bf16.mxu1 %v10165_v22  ;;  %v9856_v32 = vld [vmem:[%s14961_s23 + $0xb0] sm:$0xff]   ;;  %v10198_v44 = vld [vmem:[%s14961_s23 + $0x48] sm:$0xff]   ;;  %740 = vmatprep.mubr.bf16.mxu0 %v7960_v60  ;;  %v209_v37 = vrot.slane %v207_v25, 4  ;;  %vm2145_vm5 = vcmask 1041408   ;;  %vm2146_vm6 = vcmask 1045508  }
   0xe   :  { %8493 = vmatpush3.bf16.msra.mxu0 %v9846_v3  ;;  %9588 = vmatpush3.bf16.msra.mxu1 %v10170_v23  ;;  %v9862_v58 = vld [vmem:[%s14961_s23 + $0x8] sm:$0xff]   ;;  %v9858_v61 = vld [vmem:[%s14961_s23 + $0xb8] sm:$0xff]   ;;  %v183_v3 = vshll.u32 %v10208_v56, 16  ;;  %v10268_v28 = vsel %vm10191_vm2, %v171_v13, %v175_v52  ;;  %v10290_v33 = vld [vmem:[%s14961_s23 + $0x20] sm:$0xff]   ;;  %vm3417_vm9 = vsmask.f32 7424 }
   0xf   :  { %8494 = vmatprep.subr.bf16.mxu0 %v9847_v4  ;;  %9581 = vmatprep.subr.bf16.mxu1 %v10198_v44  ;;  %v193_v4 = vshll.u32 %v10216_v59, 16  ;;  %v9865_v15 = vld [vmem:[%s14961_s23 + $0x58] sm:$0xff]   ;;  %v10296_v34 = vld [vmem:[%s14961_s23 + $0x68] sm:$0xff]   ;;  %v10304_v45 = vld [vmem:[%s14912_s0 + $0x60] sm:$0xff]  ;;  %vm4740_vm10 = vcmask 523264   ;;  %vm5700_vm11 = vcmask 1046528  }
  0x10   :  { %v185_v17 = vrot.slane %v183_v3, 5  ;;  %v10255_v21 = vld [vmem:[%s14961_s23 + $0x18] sm:$0xff]   ;;  %v10311_v47 = vld [vmem:[%s14961_s23 + $0x28] sm:$0xff]   ;;  %v243_v57 = vshll.u32 %v10304_v45, 16  ;;  %vm10787_vm8 = vmor %vm2145_vm5, %vm2146_vm6  ;;  %vm6411_vm12 = vsmask.f32 1280 }
  0x11   :  { %v195_v18 = vrot.slane %v193_v4, 5  ;;  %v10317_v49 = vld [vmem:[%s14912_s0 + $0x68] sm:$0xff]  ;;  %vm6698_vm13 = vcmask 1044480   ;;  %vm6919_vm14 = vsmask.f32 4352  ;;  %vm7228_vm15 = vcmask 1043456  }
  0x12   :  { %8495 = vmatpush3.bf16.msra.mxu0 %v9848_v5  ;;  %9589 = vmatpush3.bf16.msra.mxu1 %v9862_v58  ;;  %v197_v5 = vshrl.u32 %v10216_v59, 16  ;;  %v190_v24 = vor.u32 %v189_v11, %v185_v17  ;;  %v257_v63 = vshrl.u32 %v10317_v49, 16  ;;  %v10366_v11 = vld [vmem:[%s14912_s0 + $0x70] sm:$0xff]  ;;  %vm7554_vm0 = vcmask 261120  }
  0x13   :  { %8496 = vmatprep.subr.bf16.mxu0 %v9849_v6  ;;  %v9863_v6 = vld [vmem:[%s14961_s23 + $0x50] sm:$0xff]  }
  0x14   :  { %9582 = vmatprep.subr.bf16.mxu1 %v9863_v6  ;;  %v191_v36 = vrot.slane %v190_v24, 4  ;;  %v259_v13 = vrot.slane %v257_v63, 4 }
  0x16   :  { %8497 = vmatpush3.bf16.msra.mxu0 %v9850_v7  ;;  %v10233_v7 = vld [vmem:[%s14961_s23 + $0x10] sm:$0xff]  }
  0x17   :  { %8498 = vmatprep.subr.bf16.mxu0 %v9851_v8  ;;  %v166_v8 = vsel %vm10191_vm2, %v161_v62, %v165_v50  ;;  %9590 = vmatpush3.bf16.msra.mxu1 %v10233_v7  ;;  %v10322_v50 = vsel %vm10191_vm2, %v191_v36, %v195_v18  ;;  %v253_v62 = vshll.u32 %v10317_v49, 16 }
  0x18   :  { %v7962_v12 = vcombine.high %v156_v2, %v166_v8  ;;  %9583 = vmatprep.subr.bf16.mxu1 %v9865_v15  ;;  %v7961_v35 = vcombine.low %v156_v2, %v166_v8  ;;  %v10351_v2 = vld [vmem:[%s14961_s23 + $0x78] sm:$0xff]  }
  0x1a   :  { %8499 = vmatpush3.bf16.msra.mxu0 %v9852_v9  ;;  %v180_v9 = vor.u32 %v179_v0, %v175_v52  ;;  %v10345_v0 = vld [vmem:[%s14961_s23 + $0x30] sm:$0xff]  }
  0x1b   :  { %8500 = vmatprep.subr.bf16.mxu0 %v9853_v10  ;;  %v7959_v10 = vcombine.low %v136_v53, %v146_v54  ;;  %9591 = vmatpush3.bf16.msra.mxu1 %v10255_v21  ;;  %v10328_v53 = vld [vmem:[%s14961_s23 + $0x70] sm:$0xff]  }
  0x1c   :  { %v181_v16 = vrot.slane %v180_v9, 4  ;;  %v10361_v9 = vld [vmem:[%s14912_s0 + $0x78] sm:$0xff] }
  0x1d   :  { %v277_v24 = vshrl.u32 %v10361_v9, 16 }
  0x1e   :  { %8501 = vmatpush3.bf16.msra.mxu0 %v9854_v14  ;;  %v10240_v14 = vld [vmem:[%s14912_s0 + $0x48] sm:$0xff]  ;;  %v10272_v29 = vsel %vm10191_vm2, %v181_v16, %v185_v17  ;;  %v245_v17 = vrot.slane %v243_v57, 5  ;;  %v9896_v57 = vld [vmem:[%s14961_s23 + $0x180] sm:$0xff]  }
  0x1f   :  { %8502 = vmatprep.subr.bf16.mxu0 %v9855_v19  ;;  %v199_v19 = vrot.slane %v197_v5, 4  ;;  %v213_v26 = vshll.u32 %v10240_v14, 16  ;;  %v217_v27 = vshrl.u32 %v10240_v14, 16  ;;  %v7963_v3 = vcombine.low %v10268_v28, %v10272_v29 }
  0x21   :  { %v200_v30 = vor.u32 %v199_v19, %v195_v18  ;;  %v215_v40 = vrot.slane %v213_v26, 5  ;;  %v219_v41 = vrot.slane %v217_v27, 4  ;;  %v118_v18 = vld [vmem:[%s14912_s0 + $0x80] sm:$0x11]  ;;  %v267_v19 = vshrl.u32 %v10366_v11, 16 }
  0x22   :  { %8503 = vmatpush3.bf16.msra.mxu0 %v9856_v32  ;;  %v10284_v32 = vld [vmem:[%s14912_s0 + $0x58] sm:$0xff]  ;;  %v263_v27 = vshll.u32 %v10366_v11, 16 }
  0x23   :  { %8504 = vmatprep.subr.bf16.mxu0 %v9857_v38  ;;  %v7964_v38 = vcombine.high %v10268_v28, %v10272_v29  ;;  %v201_v43 = vrot.slane %v200_v30, 4  ;;  %v233_v46 = vshll.u32 %v10284_v32, 16  ;;  %v237_v48 = vshrl.u32 %v10284_v32, 16  ;;  %v70_v28 = vld [vmem:[%s14912_s0 + $0x90] sm:$0xff]  ;;  %v10400_v29 = vld [vmem:[%s14912_s0 + $0x98] sm:$0xff] }
  0x24   :  { %v220_v54 = vor.u32 %v219_v41, %v215_v40  ;;  %v8023_v36 = vcombine.low %v70_v28, %v10400_v29  ;;  %v269_v41 = vrot.slane %v267_v19, 4  ;;  %v301_v63 = vshrl.u32 %v10400_v29, 16 }
  0x25   :  { %v239_v1 = vrot.slane %v237_v48, 4  ;;  %v10424_v48 = vld [vmem:[%s14912_s0 + $0xa0] sm:$0xff] }
  0x26   :  { %8505 = vmatpush3.bf16.msra.mxu0 %v9858_v61  ;;  %v10337_v61 = vrot.slane %v233_v46, 5 }
  0x27   :  { %8602 = vmatprep.subr.bf16.mxu0 %v10165_v22  ;;  %v10261_v22 = vld [vmem:[%s14961_s23 + $0x60] sm:$0xff]  }
  0x28   :  { %9584 = vmatprep.subr.bf16.mxu1 %v10261_v22  ;;  %v240_v16 = vor.u32 %v239_v1, %v10337_v61  ;;  %v307_v1 = vshll.u32 %v10424_v48, 16 }
  0x29   :  { %741 = vmatmul.mubr.bf16.vlgmr.msra.gmra.mrb[0].mxu0 %v7959_v10  ;;  %9592 = vmatpush3.bf16.msra.mxu1 %v10290_v33 }
  0x2a   :  { %8603 = vmatpush3.bf16.msra.mxu0 %v10170_v23  ;;  %748 = vmatprep.mubr.bf16.mxu0 %v7962_v12  ;;  %v10279_v23 = vld [vmem:[%s14912_s0 + $0x50] sm:$0xff]  ;;  %v10368_v12 = vrot.slane %v253_v62, 5 }
  0x2b   :  { %8604 = vmatprep.subr.bf16.mxu0 %v10198_v44  ;;  %v227_v42 = vshrl.u32 %v10279_v23, 16  ;;  %v205_v44 = vrot.slane %v203_v31, 5  ;;  %9585 = vmatprep.subr.bf16.mxu1 %v10296_v34  ;;  %v223_v52 = vshll.u32 %v10279_v23, 16 }
  0x2c   :  { %v260_v31 = vor.u32 %v259_v13, %v10368_v12 }
  0x2d   :  { %v210_v51 = vor.u32 %v209_v37, %v205_v44  ;;  %v229_v55 = vrot.slane %v227_v42, 4  ;;  %v10335_v60 = vsel %vm10191_vm2, %v201_v43, %v205_v44  ;;  %9593 = vmatpush3.bf16.msra.mxu1 %v10311_v47  ;;  %v225_v4 = vrot.slane %v223_v52, 5  ;;  %v9895_v43 = vld [vmem:[%s14961_s23 + $0x1c0] sm:$0xff]  }
  0x2e   :  { %8605 = vmatpush3.bf16.msra.mxu0 %v9862_v58  ;;  %v247_v58 = vshrl.u32 %v10304_v45, 16  ;;  %9586 = vmatprep.subr.bf16.mxu1 %v10328_v53  ;;  %v7966_v5 = vcombine.high %v10322_v50, %v10335_v60  ;;  %v241_v37 = vrot.slane %v240_v16, 4  ;;  %v288_v52 = vshrl.u32 %v70_v28, 16 }
  0x2f   :  { %8606 = vmatprep.subr.bf16.mxu0 %v9863_v6  ;;  %v211_v6 = vrot.slane %v210_v51, 4  ;;  %v230_v10 = vor.u32 %v229_v55, %v225_v4  ;;  %v261_v51 = vrot.slane %v260_v31, 4  ;;  %v291_v55 = vshll.u32 %v70_v28, 16 }
  0x30   :  { %v249_v8 = vrot.slane %v247_v58, 4 }
  0x31   :  { %749 = vmatmul.mubr.bf16.gmra.mrb[4].mxu0 %v7961_v35  ;;  %9594 = vmatpush3.bf16.msra.mxu1 %v10345_v0  ;;  %v10387_v25 = vsel %vm10191_vm2, %v211_v6, %v215_v40  ;;  %v231_v30 = vrot.slane %v230_v10, 4  ;;  %v8024_v35 = vcombine.high %v70_v28, %v10400_v29  ;;  %v7965_v40 = vcombine.low %v10322_v50, %v10335_v60  ;;  %v73_v50 = vld [vmem:[%s14912_s0 + $0xa8] sm:$0xff]  ;;  %v9893_v10 = vld [vmem:[%s14961_s23 + $0x140] sm:$0xff]  }
  0x32   :  { %756 = vmatprep.mubr.bf16.mxu0 %v7964_v38  ;;  %8607 = vmatpush3.bf16.msra.mxu0 %v10233_v7  ;;  %v221_v7 = vrot.slane %v220_v54, 4  ;;  %v250_v26 = vor.u32 %v249_v8, %v245_v17  ;;  %v283_v38 = vshll.u32 %v118_v18, 16  ;;  %v8026_v54 = vcombine.high %v10424_v48, %v73_v50  ;;  %v10476_v18 = vld [vmem:[%s14912_s0 + $0xc8] sm:$0xff] }
  0x33   :  { %8608 = vmatprep.subr.bf16.mxu0 %v9865_v15  ;;  %v10374_v15 = vld [vmem:[%s14961_s23 + $0x38] sm:$0xff]   ;;  %9587 = vmatprep.subr.bf16.mxu1 %v10351_v2  ;;  %v290_v6 = vrot.slane %v288_v52, 4  ;;  %v293_v13 = vrot.slane %v291_v55, 5  ;;  %v317_v16 = vshll.u32 %v73_v50, 16 }
  0x34   :  { %1221 = vmatprep.mubr.bf16.mxu1 %v8024_v35  ;;  %v10417_v46 = vrot.slane %v250_v26, 4  ;;  %v10437_v62 = vrot.slane %v283_v38, 5  ;;  %v10488_v26 = vld [vmem:[%s14912_s0 + $0xc0] sm:$0xff] }
  0x35   :  { %9595 = vmatpush3.bf16.msra.mxu1 %v10374_v15  ;;  %v294_v35 = vor.u32 %v293_v13, %v290_v6  ;;  %v9913_v13 = vld [vmem:[%s14961_s23 + $0x1d8] sm:$0xff]  }
  0x36   :  { %8609 = vmatpush3.bf16.msra.mxu0 %v10255_v21  ;;  %v273_v21 = vshll.u32 %v10361_v9, 16  ;;  %8826 = vmatprep.subr.bf16.mxu1 %v9895_v43 }
  0x37   :  { %8610 = vmatprep.subr.bf16.mxu0 %v10261_v22  ;;  %v10391_v22 = vsel %vm10191_vm2, %v221_v7, %v225_v4  ;;  %v8025_v4 = vcombine.low %v10424_v48, %v73_v50  ;;  %v311_v7 = vshrl.u32 %v10424_v48, 16  ;;  %v295_v55 = vrot.slane %v294_v35, 4 }
  0x38   :  { %v10410_v42 = vrot.slane %v273_v21, 5  ;;  %v7968_v44 = vcombine.high %v10387_v25, %v10391_v22  ;;  %1222 = vmatmul.mubr.bf16.vlgmr.msra.gmra.mrb[0].mxu1 %v8023_v36  ;;  %v7967_v19 = vcombine.low %v10387_v25, %v10391_v22  ;;  %v10496_v36 = vrot.slane %v317_v16, 5 }
  0x39   :  { %757 = vmatmul.mubr.bf16.gmra.mrb[8].mxu0 %v7963_v3  ;;  %1229 = vmatprep.mubr.bf16.mxu1 %v8026_v54  ;;  %v10450_v3 = vld [vmem:[%s14912_s0 + $0xb0] sm:$0xff] }
  0x3a   :  { %764 = vmatprep.mubr.bf16.mxu0 %v7966_v5  ;;  %8611 = vmatpush3.bf16.msra.mxu0 %v10290_v33  ;;  %v279_v33 = vrot.slane %v277_v24, 4  ;;  %v10456_v5 = vld [vmem:[%s14912_s0 + $0xb8] sm:$0xff]  ;;  %v331_v25 = vshrl.u32 %v10450_v3, 16  ;;  %v327_v38 = vshll.u32 %v10450_v3, 16  ;;  %v10524_v54 = vld [vmem:[%s14912_s0 + $0xd0] sm:$0xff] }
  0x3b   :  { %8612 = vmatprep.subr.bf16.mxu0 %v10296_v34  ;;  %v10419_v34 = vrot.slane %v263_v27, 5  ;;  %v8028_v8 = vcombine.high %v10450_v3, %v10456_v5  ;;  %8827 = vmatpush3.bf16.msra.mxu1 %v9896_v57  ;;  %v337_v22 = vshll.u32 %v10456_v5, 16  ;;  %v341_v31 = vshrl.u32 %v10456_v5, 16 }
  0x3c   :  { %v280_v60 = vor.u32 %v279_v33, %v10410_v42  ;;  %v357_v33 = vshll.u32 %v10476_v18, 16  ;;  %v8027_v48 = vcombine.low %v10450_v3, %v10456_v5 }
  0x3d   :  { %v270_v58 = vor.u32 %v269_v41, %v10419_v34  ;;  %v351_v41 = vshrl.u32 %v10488_v26, 16  ;;  %v10513_v43 = vsel %vm10191_vm2, %v261_v51, %v10419_v34  ;;  %v343_v52 = vrot.slane %v341_v31, 4  ;;  %v9908_v51 = vld [vmem:[%s14961_s23 + $0x190] sm:$0xff]   ;;  %v10575_v31 = vld [vmem:[%s14912_s0 + $0xe0] sm:$0xff] }
  0x3e   :  { %8613 = vmatpush3.bf16.msra.mxu0 %v10311_v47  ;;  %v297_v47 = vshll.u32 %v10400_v29, 16  ;;  %v10483_v24 = vrot.slane %v280_v60, 4  ;;  %v303_v29 = vrot.slane %v301_v63, 4  ;;  %v8030_v34 = vcombine.high %v10488_v26, %v10476_v18 }
  0x3f   :  { %8614 = vmatprep.subr.bf16.mxu0 %v10328_v53  ;;  %v10443_v53 = vsel %vm10191_vm2, %v231_v30, %v10337_v61  ;;  %v10461_v61 = vsel %vm10191_vm2, %v241_v37, %v245_v17  ;;  %v321_v17 = vshrl.u32 %v73_v50, 16  ;;  %v271_v21 = vrot.slane %v270_v58, 4 }
  0x40   :  { %v7970_v27 = vcombine.high %v10443_v53, %v10461_v61  ;;  %v299_v28 = vrot.slane %v297_v47, 5  ;;  %1230 = vmatmul.mubr.bf16.gmra.mrb[4].mxu1 %v8025_v4  ;;  %v313_v30 = vrot.slane %v311_v7, 4  ;;  %v361_v50 = vshrl.u32 %v10476_v18, 16  ;;  %v10534_v47 = vld [vmem:[%s14912_s0 + $0xd8] sm:$0xff] }
  0x41   :  { %765 = vmatmul.mubr.bf16.gmra.mrb[12].mxu0 %v7965_v40  ;;  %1237 = vmatprep.mubr.bf16.mxu1 %v8028_v8  ;;  %v323_v37 = vrot.slane %v321_v17, 4  ;;  %v10506_v40 = vsel %vm10191_vm2, %v10417_v46, %v10368_v12  ;;  %v333_v12 = vrot.slane %v331_v25, 4  ;;  %v10519_v46 = vrot.slane %v337_v22, 5 }
  0x42   :  { %772 = vmatprep.mubr.bf16.mxu0 %v7968_v44  ;;  %8615 = vmatpush3.bf16.msra.mxu0 %v10345_v0  ;;  %v9901_v0 = vld [vmem:[%s14961_s23 + $0x1c8] sm:$0xff]   ;;  %v347_v44 = vshll.u32 %v10488_v26, 16  ;;  %v304_v57 = vor.u32 %v303_v29, %v299_v28  ;;  %v309_v58 = vrot.slane %v307_v1, 5  ;;  %v329_v60 = vrot.slane %v327_v38, 5 }
  0x43   :  { %8616 = vmatprep.subr.bf16.mxu0 %v10351_v2  ;;  %v9902_v2 = vld [vmem:[%s14961_s23 + $0x188] sm:$0xff]   ;;  %8828 = vmatprep.subr.bf16.mxu1 %v9901_v0  ;;  %v7969_v63 = vcombine.low %v10443_v53, %v10461_v61  ;;  %v7972_v3 = vcombine.high %v10506_v40, %v10513_v43  ;;  %v353_v4 = vrot.slane %v351_v41, 4  ;;  %v10540_v5 = vrot.slane %v357_v33, 5 }
  0x44   :  { %8829 = vmatpush3.bf16.msra.mxu1 %v9902_v2  ;;  %v10545_v1 = vsel %vm10191_vm2, %v271_v21, %v10410_v42  ;;  %v314_v6 = vor.u32 %v313_v30, %v309_v58  ;;  %v363_v7 = vrot.slane %v361_v50, 4  ;;  %v371_v8 = vshrl.u32 %v10524_v54, 16  ;;  %v9914_v42 = vld [vmem:[%s14961_s23 + $0x198] sm:$0xff]   ;;  %v10582_v38 = vld [vmem:[%s14912_s0 + $0xe8] sm:$0xff] }
  0x45   :  { %v334_v53 = vor.u32 %v333_v12, %v329_v60  ;;  %v344_v61 = vor.u32 %v343_v52, %v10519_v46  ;;  %v349_v0 = vrot.slane %v347_v44, 5  ;;  %v305_v16 = vrot.slane %v304_v57, 4  ;;  %v9920_v44 = vld [vmem:[%s14961_s23 + $0x1a0] sm:$0xff]  }
  0x46   :  { %8617 = vmatpush3.bf16.msra.mxu0 %v10374_v15  ;;  %v9907_v15 = vld [vmem:[%s14961_s23 + $0x1d0] sm:$0xff]   ;;  %v367_v17 = vshll.u32 %v10524_v54, 16  ;;  %v377_v2 = vshll.u32 %v10534_v47, 16  ;;  %v10563_v21 = vsel %vm10191_vm2, %v10483_v24, %v10437_v62  ;;  %v315_v30 = vrot.slane %v314_v6, 4 }
  0x47   :  { %8714 = vmatprep.subr.bf16.mxu0 %v9893_v10  ;;  %8830 = vmatprep.subr.bf16.mxu1 %v9907_v15  ;;  %v324_v10 = vor.u32 %v323_v37, %v10496_v36  ;;  %v354_v29 = vor.u32 %v353_v4, %v349_v0  ;;  %v364_v25 = vor.u32 %v363_v7, %v10540_v5  ;;  %v373_v62 = vrot.slane %v371_v8, 4 }
  0x48   :  { %8831 = vmatpush3.bf16.msra.mxu1 %v9908_v51  ;;  %v8029_v22 = vcombine.low %v10488_v26, %v10476_v18  ;;  %v335_v35 = vrot.slane %v334_v53, 4  ;;  %v8032_v37 = vcombine.high %v10524_v54, %v10534_v47  ;;  %v9919_v18 = vld [vmem:[%s14961_s23 + $0x1e0] sm:$0xff]   ;;  %v10589_v26 = vsel %vm10191_vm2, %v305_v16, %v309_v58  ;;  %v10612_v58 = vld [vmem:[%s14912_s0 + $0xf0] sm:$0xff]  ;;  %v9926_v16 = vld [vmem:[%s14961_s23 + $0x1a8] sm:$0xff]  }
  0x49   :  { %773 = vmatmul.mubr.bf16.gmra.mrb[16].mxu0 %v7967_v19  ;;  %1238 = vmatmul.mubr.bf16.gmra.mrb[8].mxu1 %v8027_v48  ;;  %v381_v19 = vshrl.u32 %v10534_v47, 16  ;;  %v325_v24 = vrot.slane %v324_v10, 4  ;;  %v369_v15 = vrot.slane %v367_v17, 5  ;;  %v379_v41 = vrot.slane %v377_v2, 5 }
  0x4a   :  { %780 = vmatprep.mubr.bf16.mxu0 %v7970_v27  ;;  %1245 = vmatprep.mubr.bf16.mxu1 %v8030_v34  ;;  %v10567_v27 = vsel %vm10191_vm2, %v295_v55, %v299_v28  ;;  %v345_v28 = vrot.slane %v344_v61, 4  ;;  %v7971_v48 = vcombine.low %v10506_v40, %v10513_v43  ;;  %v355_v50 = vrot.slane %v354_v29, 4 }
  0x4b   :  { %8832 = vmatprep.subr.bf16.mxu1 %v9913_v13  ;;  %v383_v33 = vrot.slane %v381_v19, 4  ;;  %v391_v12 = vshrl.u32 %v10575_v31, 16  ;;  %v7974_v52 = vcombine.high %v10545_v1, %v10563_v21  ;;  %v365_v34 = vrot.slane %v364_v25, 4  ;;  %v10662_v19 = vld [vmem:[%s14912_s0 + $0xf8] sm:$0xff] }
  0x4c   :  { %8833 = vmatpush3.bf16.msra.mxu1 %v9914_v42  ;;  %v374_v51 = vor.u32 %v373_v62, %v369_v15  ;;  %v7973_v55 = vcombine.low %v10545_v1, %v10563_v21  ;;  %v7976_v57 = vcombine.high %v10567_v27, %v10589_v26  ;;  %v10606_v40 = vsel %vm10191_vm2, %v315_v30, %v10496_v36  ;;  %v9925_v1 = vld [vmem:[%s14961_s23 + $0x1e8] sm:$0xff]  }
  0x4d   :  { %8834 = vmatprep.subr.bf16.mxu1 %v9919_v18  ;;  %v387_v43 = vshll.u32 %v10575_v31, 16  ;;  %v384_v36 = vor.u32 %v383_v33, %v379_v41  ;;  %v397_v4 = vshll.u32 %v10582_v38, 16  ;;  %v10629_v6 = vsel %vm10191_vm2, %v345_v28, %v349_v0  ;;  %v2746_v28 = vld [vmem:[%s14913_s5 + $0x58] sm:$0xff] }
  0x4e   :  { %v393_v7 = vrot.slane %v391_v12, 4  ;;  %v10639_v8 = vsel %vm10191_vm2, %v365_v34, %v369_v15  ;;  %v375_v10 = vrot.slane %v374_v51, 4  ;;  %v8031_v53 = vcombine.low %v10524_v54, %v10534_v47  ;;  %v2109_v12 = vld [vmem:[%s14912_s0 + $0x8] sm:$0xcc] }
  0x4f   :  { %v407_v61 = vshll.u32 %v10612_v58, 16  ;;  %v7975_v0 = vcombine.low %v10567_v27, %v10589_v26  ;;  %v389_v13 = vrot.slane %v387_v43, 5  ;;  %v8034_v42 = vcombine.high %v10575_v31, %v10582_v38 }
  0x50   :  { %8835 = vmatpush3.bf16.msra.mxu1 %v9920_v44  ;;  %v385_v2 = vrot.slane %v384_v36, 4  ;;  %v10666_v30 = vrot.slane %v397_v4, 5  ;;  %v411_v18 = vshrl.u32 %v10612_v58, 16  ;;  %v9932_v44 = vld [vmem:[%s14961_s23 + $0x1b0] sm:$0xff]   ;;  %v417_v51 = vshll.u32 %v10662_v19, 16 }
  0x51   :  { %781 = vmatmul.mubr.bf16.gmra.mrb[20].mxu0 %v7969_v63  ;;  %1246 = vmatmul.mubr.bf16.gmra.mrb[12].mxu1 %v8029_v22  ;;  %v10616_v63 = vsel %vm10191_vm2, %v325_v24, %v329_v60  ;;  %v10634_v60 = vsel %vm10191_vm2, %v355_v50, %v10540_v5  ;;  %v394_v29 = vor.u32 %v393_v7, %v389_v13  ;;  %v10674_v62 = vrot.slane %v407_v61, 5  ;;  %v10679_v24 = vld [vmem:[%s14912_s0 + $0x100] sm:$0xff]  ;;  %v9937_v7 = vld [vmem:[%s14961_s23 + $0x1f8] sm:$0xff]  }
  0x52   :  { %788 = vmatprep.mubr.bf16.mxu0 %v7972_v3  ;;  %1253 = vmatprep.mubr.bf16.mxu1 %v8032_v37  ;;  %v10621_v3 = vsel %vm10191_vm2, %v335_v35, %v10519_v46  ;;  %v401_v46 = vshrl.u32 %v10582_v38, 16  ;;  %v7978_v5 = vcombine.high %v10606_v40, %v10616_v63  ;;  %v7977_v54 = vcombine.low %v10606_v40, %v10616_v63  ;;  %v9931_v37 = vld [vmem:[%s14961_s23 + $0x1f0] sm:$0xff]  }
  0x53   :  { %8836 = vmatprep.subr.bf16.mxu1 %v9925_v1  ;;  %v7980_v47 = vcombine.high %v10621_v3, %v10629_v6  ;;  %v7979_v17 = vcombine.low %v10621_v3, %v10629_v6  ;;  %v7982_v21 = vcombine.high %v10634_v60, %v10639_v8  ;;  %v10672_v22 = vsel %vm10191_vm2, %v375_v10, %v379_v41  ;;  %v10766_v41 = vld [vmem:[%s14912_s0 + $0x28] sm:$0xff]  ;;  %v10799_v35 = vld [vmem:[%s14912_s0 + $0x30] sm:$0xff] }
  0x54   :  { %v10668_v25 = vrot.slane %v401_v46, 4  ;;  %8837 = vmatpush3.bf16.msra.mxu1 %v9926_v16  ;;  %v10708_v34 = vrot.slane %v394_v29, 4  ;;  %v7981_v36 = vcombine.low %v10634_v60, %v10639_v8  ;;  %v8033_v4 = vcombine.low %v10575_v31, %v10582_v38  ;;  %v9938_v38 = vld [vmem:[%s14961_s23 + $0x1b8] sm:$0xff]  }
  0x55   :  { %8838 = vmatprep.subr.bf16.mxu1 %v9931_v37  ;;  %v421_v1 = vshrl.u32 %v10662_v19, 16  ;;  %v427_v10 = vshll.u32 %v10679_v24, 16  ;;  %v8036_v31 = vcombine.high %v10612_v58, %v10662_v19  ;;  %v1363_v27 = vshrl.u32 %v10766_v41, 16 }
  0x56   :  { %v404_v61 = vor.u32 %v10668_v25, %v10666_v30  ;;  %v1366_v26 = vshll.u32 %v10766_v41, 16  ;;  %v10889_v25 = vld [vmem:[%s14912_s0 + $0x48] sm:$0xff] }
  0x58   :  { %8839 = vmatpush3.bf16.msra.mxu1 %v9932_v44 }
  0x59   :  { %789 = vmatmul.mubr.bf16.gmra.mrb[24].mxu0 %v7971_v48  ;;  %1254 = vmatmul.mubr.bf16.gmra.mrb[16].mxu1 %v8031_v53  ;;  %v10700_v48 = vsel %vm10191_vm2, %v385_v2, %v389_v13  ;;  %v1286_v53 = vld [vmem:[%s14912_s0 + $0x8] sm:$0xee]  ;;  %v1287_v13 = vld [vmem:[%s14912_s0 + $0x10] sm:$0xff] }
  0x5a   :  { %796 = vmatprep.mubr.bf16.mxu0 %v7974_v52  ;;  %1261 = vmatprep.mubr.bf16.mxu1 %v8034_v42  ;;  %v7984_v46 = vcombine.high %v10672_v22, %v10700_v48  ;;  %v10744_v42 = vld [vmem:[%s14912_s0 + $0x18] sm:$0xff]  ;;  %v1324_v16 = vshrl.u32 %v1286_v53, 16  ;;  %v1327_v2 = vshll.u32 %v1286_v53, 16  ;;  %v1333_v29 = vshrl.u32 %v1287_v13, 16 }
  0x5b   :  { %8840 = vmatprep.subr.bf16.mxu1 %v9937_v7  ;;  %v1336_v37 = vshll.u32 %v1287_v13, 16  ;;  %v1343_v44 = vshrl.u32 %v10744_v42, 16  ;;  %v8035_v7 = vcombine.low %v10612_v58, %v10662_v19  ;;  %v2150_v50 = vrot.slane %v1287_v13, 6 }
  0x5c   :  { %8841 = vmatpush3.bf16.msra.mxu1 %v9938_v38  ;;  %v1326_v43 = vrot.slane %v1324_v16, 5  ;;  %v1329_v52 = vrot.slane %v1327_v2, 6  ;;  %v10756_v38 = vld [vmem:[%s14912_s0 + $0x20] sm:$0xff]  ;;  %v1335_v53 = vrot.slane %v1333_v29, 5 }
  0x5d   :  { %v1338_v33 = vrot.slane %v1336_v37, 6  ;;  %v1345_v16 = vrot.slane %v1343_v44, 5  ;;  %v1353_v37 = vshrl.u32 %v10756_v38, 16  ;;  %v1356_v44 = vshll.u32 %v10756_v38, 16 }
  0x5e   :  { %v1330_v15 = vor.u32 %v1329_v52, %v1326_v43  ;;  %v8135_v43 = vrot.slane %v2109_v12, 10  ;;  %v1365_v12 = vrot.slane %v1363_v27, 5  ;;  %v2156_v27 = vrot.slane %v10756_v38, 6 }
  0x5f   :  { %v10845_v38 = vsel %vm10191_vm2, %v10708_v34, %v10666_v30 }
  0x60   :  { %v1331_v52 = vrot.slane %v1330_v15, 4  ;;  %v1358_v15 = vrot.slane %v1356_v44, 6  ;;  %v10819_v58 = vsel %vm10787_vm8, %v8135_v43, %v2150_v50  ;;  %v2158_v44 = vrot.slane %v2156_v27, 4 }
  0x61   :  { %797 = vmatmul.mubr.bf16.gmra.mrb[28].mxu0 %v7973_v55  ;;  %v1346_v55 = vshll.u32 %v10744_v42, 16  ;;  %1262 = vmatmul.mubr.bf16.gmra.mrb[20].mxu1 %v8033_v4  ;;  %v10761_v4 = vld [vmem:[%s14912_s0 + $0x108] sm:$0xff] }
  0x62   :  { %804 = vmatprep.mubr.bf16.mxu0 %v7976_v57  ;;  %1269 = vmatprep.mubr.bf16.mxu1 %v8036_v31  ;;  %v8038_v13 = vcombine.high %v10679_v24, %v10761_v4  ;;  %v10803_v57 = vrot.slane %v411_v18, 4 }
  0x63   :  { %v1348_v2 = vrot.slane %v1346_v55, 6  ;;  %v1339_v55 = vor.u32 %v1338_v33, %v1335_v53  ;;  %v2152_v33 = vrot.slane %v2150_v50, 4  ;;  %v2153_v53 = vrot.slane %v10744_v42, 6 }
  0x64   :  { %v10807_v42 = vrot.slane %v417_v51, 5  ;;  %v10824_v51 = vld [vmem:[%s14912_s0 + $0x38] sm:$0xff] }
  0x65   :  { %v1349_v29 = vor.u32 %v1348_v2, %v1345_v16  ;;  %v10794_v2 = vsel %vm10775_vm7, %v1331_v52, %v1339_v55 }
  0x67   :  { %v1351_v16 = vrot.slane %v1349_v29, 4 }
  0x69   :  { %805 = vmatmul.mubr.bf16.gmra.mrb[32].mxu0 %v7975_v0  ;;  %v1341_v0 = vrot.slane %v1339_v55, 4  ;;  %1270 = vmatmul.mubr.bf16.gmra.mrb[24].mxu1 %v8035_v7  ;;  %v10828_v7 = vsel %vm10787_vm8, %v2152_v33, %v2153_v53 }
  0x6a   :  { %812 = vmatprep.mubr.bf16.mxu0 %v7978_v5  ;;  %v1355_v5 = vrot.slane %v1353_v37, 5  ;;  %v1368_v37 = vrot.slane %v1366_v26, 6  ;;  %1277 = vmatprep.mubr.bf16.mxu1 %v8038_v13  ;;  %v1373_v26 = vshrl.u32 %v10799_v35, 16  ;;  %v8037_v13 = vcombine.low %v10679_v24, %v10761_v4 }
  0x6b   :  { %v10811_v55 = vsel %vm10775_vm7, %v1341_v0, %v1349_v29  ;;  %v1376_v0 = vshll.u32 %v10799_v35, 16  ;;  %v8170_v40 = vcombine.high %v10819_v58, %v10828_v7 }
  0x6c   :  { %v1359_v18 = vor.u32 %v1358_v15, %v1355_v5  ;;  %v1369_v29 = vor.u32 %v1368_v37, %v1365_v12  ;;  %v1383_v5 = vshrl.u32 %v10824_v51, 16  ;;  %v1375_v33 = vrot.slane %v1373_v26, 5 }
  0x6d   :  { %v1378_v34 = vrot.slane %v1376_v0, 6  ;;  %v2155_v26 = vrot.slane %v2153_v53, 4  ;;  %v10876_v53 = vrot.slane %v421_v1, 4  ;;  %v1403_v1 = vshrl.u32 %v10889_v25, 16 }
  0x6e   :  { %v10834_v50 = vsel %vm10775_vm7, %v1351_v16, %v1359_v18  ;;  %v1361_v43 = vrot.slane %v1359_v18, 4  ;;  %v1386_v16 = vshll.u32 %v10824_v51, 16  ;;  %v1385_v37 = vrot.slane %v1383_v5, 5 }
  0x6f   :  { %v1379_v52 = vor.u32 %v1378_v34, %v1375_v33  ;;  %v1405_v3 = vrot.slane %v1403_v1, 5 }
  0x70   :  { %v10857_v63 = vsel %vm10775_vm7, %v1361_v43, %v1369_v29  ;;  %v1388_v18 = vrot.slane %v1386_v16, 6  ;;  %v10867_v43 = vld [vmem:[%s14912_s0 + $0x40] sm:$0xff]  ;;  %v1406_v16 = vshll.u32 %v10889_v25, 16 }
  0x71   :  { %813 = vmatmul.mubr.bf16.gmra.mrb[36].mxu0 %v7977_v54  ;;  %v1371_v54 = vrot.slane %v1369_v29, 4  ;;  %v8089_v12 = vcombine.low %v10834_v50, %v10857_v63  ;;  %v405_v29 = vrot.slane %v404_v61, 4  ;;  %v1393_v15 = vshrl.u32 %v10867_v43, 16  ;;  %1278 = vmatmul.mubr.bf16.gmra.mrb[28].mxu1 %v8037_v13 }
  0x72   :  { %820 = vmatprep.mubr.bf16.mxu0 %v7980_v47  ;;  %v2159_v47 = vrot.slane %v10766_v41, 6  ;;  %v1389_v0 = vor.u32 %v1388_v18, %v1385_v37  ;;  %v1396_v5 = vshll.u32 %v10867_v43, 16  ;;  %v10880_v41 = vrot.slane %v427_v10, 5  ;;  %2535 = vmatprep.mubr.bf16.mxu1 %v8170_v40 }
  0x73   :  { %v10884_v33 = vsel %vm10775_vm7, %v1371_v54, %v1379_v52  ;;  %v1381_v30 = vrot.slane %v1379_v52, 4  ;;  %v1395_v61 = vrot.slane %v1393_v15, 5  ;;  %v10895_v10 = vsel %vm10787_vm8, %v2155_v26, %v2156_v27 }
  0x74   :  { %v1398_v19 = vrot.slane %v1396_v5, 6  ;;  %v10899_v13 = vsel %vm10787_vm8, %v2158_v44, %v2159_v47  ;;  %v2162_v40 = vrot.slane %v10799_v35, 6  ;;  %v414_v54 = vor.u32 %v10803_v57, %v10674_v62 }
  0x75   :  { %v10903_v52 = vsel %vm10775_vm7, %v1381_v30, %v1389_v0  ;;  %v8169_v27 = vcombine.low %v10819_v58, %v10828_v7  ;;  %v2161_v35 = vrot.slane %v2159_v47, 4  ;;  %v1408_v6 = vrot.slane %v1406_v16, 6 }
  0x76   :  { %v1399_v15 = vor.u32 %v1398_v19, %v1395_v61  ;;  %v437_v57 = vshll.u32 %v10761_v4, 16  ;;  %v8172_v58 = vcombine.high %v10895_v10, %v10899_v13  ;;  %v1391_v7 = vrot.slane %v1389_v0, 4 }
  0x77   :  { %v2164_v37 = vrot.slane %v2162_v40, 4  ;;  %v2165_v18 = vrot.slane %v10824_v51, 6  ;;  %v1409_v5 = vor.u32 %v1408_v6, %v1405_v3  ;;  %v441_v47 = vshrl.u32 %v10761_v4, 16  ;;  %v10947_v4 = vld [vmem:[%s14912_s0 + $0x110] sm:$0x11] }
  0x78   :  { %v1401_v26 = vrot.slane %v1399_v15, 4  ;;  %v10940_v51 = vsel %vm10191_vm2, %v405_v29, %v10674_v62  ;;  %v424_v61 = vor.u32 %v10876_v53, %v10807_v42  ;;  %v10951_v19 = vsel %vm10787_vm8, %v2161_v35, %v2162_v40  ;;  %v10960_v62 = vld [vmem:[%s14912_s0 + $0x58] sm:$0xff] }
  0x79   :  { %821 = vmatmul.mubr.bf16.gmra.mrb[40].mxu0 %v7979_v17  ;;  %v431_v17 = vshrl.u32 %v10679_v24, 16  ;;  %v10933_v24 = vsel %vm10775_vm7, %v1391_v7, %v1399_v15  ;;  %2536 = vmatmul.mubr.bf16.vlgmr.msra.gmra.mrb[32].mxu1 %v8169_v27  ;;  %v10968_v40 = vsel %vm10787_vm8, %v2164_v37, %v2165_v18  ;;  %v2168_v35 = vrot.slane %v10867_v43, 6 }
  0x7a   :  { %828 = vmatprep.mubr.bf16.mxu0 %v7982_v21  ;;  %v10928_v21 = vld [vmem:[%s14912_s0 + $0x50] sm:$0xff]  ;;  %v10955_v1 = vsel %vm10775_vm7, %v1401_v26, %v1409_v5  ;;  %2543 = vmatprep.mubr.bf16.mxu1 %v8172_v58  ;;  %v1423_v15 = vshrl.u32 %v10960_v62, 16  ;;  %v1426_v3 = vshll.u32 %v10960_v62, 16  ;;  %v415_v6 = vrot.slane %v414_v54, 4 }
  0x7b   :  { %v1413_v30 = vshrl.u32 %v10928_v21, 16  ;;  %v1416_v0 = vshll.u32 %v10928_v21, 16  ;;  %v433_v58 = vrot.slane %v431_v17, 4  ;;  %v447_v7 = vshll.u32 %v10947_v4, 16 }
  0x7c   :  { %v8171_v43 = vcombine.low %v10895_v10, %v10899_v13  ;;  %v2167_v37 = vrot.slane %v2165_v18, 4  ;;  %v425_v53 = vrot.slane %v424_v61, 4  ;;  %v8174_v60 = vcombine.high %v10951_v19, %v10968_v40 }
  0x7d   :  { %v1415_v16 = vrot.slane %v1413_v30, 5  ;;  %v1418_v27 = vrot.slane %v1416_v0, 6  ;;  %v1425_v30 = vrot.slane %v1423_v15, 5  ;;  %v1428_v0 = vrot.slane %v1426_v3, 6 }
  0x7e   :  { %v1411_v8 = vrot.slane %v1409_v5, 4  ;;  %v10984_v54 = vrot.slane %v437_v57, 5  ;;  %v2170_v17 = vrot.slane %v2168_v35, 4  ;;  %v2171_v4 = vrot.slane %v10889_v25, 6 }
  0x7f   :  { %v1419_v26 = vor.u32 %v1418_v27, %v1415_v16  ;;  %v1429_v16 = vor.u32 %v1428_v0, %v1425_v30  ;;  %v443_v10 = vrot.slane %v441_v47, 4  ;;  %v7986_v57 = vcombine.high %v10845_v38, %v10940_v51  ;;  %v11016_v27 = vld [vmem:[%s14912_s0 + $0x68] sm:$0xff] }
  0x80   :  { %v11003_v25 = vsel %vm10191_vm2, %v415_v6, %v10807_v42  ;;  %v11007_v47 = vsel %vm10787_vm8, %v2167_v37, %v2168_v35  ;;  %v11024_v35 = vsel %vm10787_vm8, %v2170_v17, %v2171_v4  ;;  %v1446_v37 = vshll.u32 %v11016_v27, 16 }
  0x81   :  { %829 = vmatmul.mubr.bf16.gmra.mrb[44].mxu0 %v7981_v36  ;;  %v1421_v36 = vrot.slane %v1419_v26, 4  ;;  %v10994_v13 = vsel %vm10775_vm7, %v1411_v8, %v1419_v26  ;;  %2544 = vmatmul.mubr.bf16.gmra.mrb[36].mxu1 %v8171_v43  ;;  %v2174_v26 = vrot.slane %v10928_v21, 6  ;;  %v1443_v43 = vshrl.u32 %v11016_v27, 16 }
  0x82   :  { %836 = vmatprep.mubr.bf16.mxu0 %v7984_v46  ;;  %v10990_v46 = vld [vmem:[%s14912_s0 + $0x60] sm:$0xff]  ;;  %2551 = vmatprep.mubr.bf16.mxu1 %v8174_v60  ;;  %v14968_v30 = vcombine.low %v10672_v22, %v10700_v48  ;;  %v11035_v0 = vsel %vm10191_vm2, %v425_v53, %v10880_v41  ;;  %v434_v60 = vor.u32 %v433_v58, %v10880_v41  ;;  %v2173_v17 = vrot.slane %v2171_v4, 4 }
  0x83   :  { %v1433_v18 = vshrl.u32 %v10990_v46, 16  ;;  %v1436_v5 = vshll.u32 %v10990_v46, 16  ;;  %v11011_v61 = vsel %vm10775_vm7, %v1421_v36, %v1429_v16  ;;  %v444_v8 = vor.u32 %v443_v10, %v10984_v54 }
  0x84   :  { %v8173_v21 = vcombine.low %v10951_v19, %v10968_v40  ;;  %v7985_v22 = vcombine.low %v10845_v38, %v10940_v51  ;;  %v8176_v48 = vcombine.high %v11007_v47, %v11024_v35  ;;  %v1431_v53 = vrot.slane %v1429_v16, 4  ;;  %v11049_v19 = vld [vmem:[%s14912_s0 + $0x70] sm:$0xff] }
  0x85   :  { %v1435_v3 = vrot.slane %v1433_v18, 5  ;;  %v1438_v6 = vrot.slane %v1436_v5, 6  ;;  %v1445_v18 = vrot.slane %v1443_v43, 5  ;;  %v1448_v5 = vrot.slane %v1446_v37, 6 }
  0x86   :  { %v449_v42 = vrot.slane %v447_v7, 5  ;;  %v2176_v41 = vrot.slane %v2174_v26, 4  ;;  %v2177_v58 = vrot.slane %v10960_v62, 6  ;;  %v7988_v40 = vcombine.high %v11003_v25, %v11035_v0 }
  0x87   :  { %v1439_v36 = vor.u32 %v1438_v6, %v1435_v3  ;;  %v1449_v10 = vor.u32 %v1448_v5, %v1445_v18  ;;  %v1453_v51 = vshrl.u32 %v11049_v19, 16  ;;  %v1456_v7 = vshll.u32 %v11049_v19, 16  ;;  %v11070_v3 = vld [vmem:[%s14912_s0 + $0x78] sm:$0xff] }
  0x88   :  { %v435_v4 = vrot.slane %v434_v60, 4  ;;  %v445_v16 = vrot.slane %v444_v8, 4  ;;  %v11061_v62 = vsel %vm10787_vm8, %v2173_v17, %v2174_v26  ;;  %v2178_v26 = vsel %vm10787_vm8, %v2176_v41, %v2177_v58 }
  0x89   :  { %837 = vmatmul.mubr.bf16.gmra.mrb[48].mxu0 %v14968_v30  ;;  %v1441_v30 = vrot.slane %v1439_v36, 4  ;;  %v11055_v38 = vsel %vm10775_vm7, %v1431_v53, %v1439_v36  ;;  %2552 = vmatmul.mubr.bf16.gmra.mrb[40].mxu1 %v8173_v21  ;;  %v1455_v37 = vrot.slane %v1453_v51, 5  ;;  %v1458_v60 = vrot.slane %v1456_v7, 6 }
  0x8a   :  { %844 = vmatprep.mubr.bf16.mxu0 %v7986_v57  ;;  %2559 = vmatprep.mubr.bf16.mxu1 %v8176_v48  ;;  %v2180_v8 = vrot.slane %v10990_v46, 6  ;;  %v1463_v36 = vshrl.u32 %v11070_v3, 16  ;;  %v1466_v21 = vshll.u32 %v11070_v3, 16  ;;  %v11084_v18 = vsel %vm10191_vm2, %v435_v4, %v10984_v54  ;;  %v11097_v54 = vld [vmem:[%s14912_s0 + $0x80] sm:$0xff] }
  0x8b   :  { %v11065_v57 = vsel %vm10775_vm7, %v1441_v30, %v1449_v10  ;;  %v1459_v17 = vor.u32 %v1458_v60, %v1455_v37  ;;  %v8175_v5 = vcombine.low %v11007_v47, %v11024_v35  ;;  %v11090_v46 = vsel %vm10191_vm2, %v445_v16, %v449_v42 }
  0x8c   :  { %v1465_v48 = vrot.slane %v1463_v36, 5  ;;  %v1468_v53 = vrot.slane %v1466_v21, 6  ;;  %v8178_v30 = vcombine.high %v11061_v62, %v2178_v26  ;;  %v1451_v41 = vrot.slane %v1449_v10, 4 }
  0x8d   :  { %v2179_v51 = vrot.slane %v2177_v58, 4  ;;  %v2183_v7 = vrot.slane %v11016_v27, 6  ;;  %v7987_v47 = vcombine.low %v11003_v25, %v11035_v0  ;;  %v1473_v42 = vshrl.u32 %v11097_v54, 16  ;;  %v11117_v25 = vld [vmem:[%s14912_s0 + $0x88] sm:$0x33] }
  0x8e   :  { %v1469_v37 = vor.u32 %v1468_v53, %v1465_v48  ;;  %v11103_v39 = vsel %vm10775_vm7, %v1451_v41, %v1459_v17  ;;  %v1476_v35 = vshll.u32 %v11097_v54, 16  ;;  %v7990_v27 = vcombine.high %v11084_v18, %v11090_v46 }
  0x8f   :  { %v2186_v10 = vrot.slane %v11049_v19, 6  ;;  %v1475_v16 = vrot.slane %v1473_v42, 5  ;;  %v11125_v36 = vsel %vm10787_vm8, %v2179_v51, %v2180_v8  ;;  %v1483_v21 = vshrl.u32 %v11117_v25, 16 }
  0x90   :  { %v1478_v60 = vrot.slane %v1476_v35, 6  ;;  %v2185_v48 = vrot.slane %v2183_v7, 4  ;;  %v2189_v41 = vrot.slane %v11070_v3, 6  ;;  %v7989_v35 = vcombine.low %v11084_v18, %v11090_v46 }
  0x91   :  { %845 = vmatmul.mubr.bf16.gmra.mrb[52].mxu0 %v7985_v22  ;;  %v1461_v22 = vrot.slane %v1459_v17, 4  ;;  %2560 = vmatmul.mubr.bf16.gmra.mrb[44].mxu1 %v8175_v5  ;;  %v1486_v17 = vshll.u32 %v11117_v25, 16  ;;  %v8177_v5 = vcombine.low %v11061_v62, %v2178_v26  ;;  %v10019_v62 = vld [vmem:[%s14912_s0] sm:$0xff]  ;;  %v10020_v26 = vld [vmem:[%s14912_s0 + $0x8] sm:$0xff]  ;;  %v2195_v0 = vrot.slane %v11117_v25, 6  ;;  %v10021_v25 = vld [vmem:[%s14912_s0 + $0x10] sm:$0xff] }
  0x92   :  { %852 = vmatprep.mubr.bf16.mxu0 %v7988_v40  ;;  %v2182_v40 = vrot.slane %v2180_v8, 4  ;;  %2567 = vmatprep.mubr.bf16.mxu1 %v8178_v30  ;;  %v1479_v53 = vor.u32 %v1478_v60, %v1475_v16  ;;  %v2188_v30 = vrot.slane %v2186_v10, 4  ;;  %v11155_v18 = vsel %vm10787_vm8, %v2185_v48, %v2186_v10  ;;  %v11173_v10 = vld [vmem:[%s14912_s0 + $0xa8] sm:$0xff] }
  0x93   :  { %v11111_v58 = vsel %vm10775_vm7, %v1461_v22, %v1469_v37  ;;  %v1485_v22 = vrot.slane %v1483_v21, 5  ;;  %v1488_v8 = vrot.slane %v1486_v17, 6  ;;  %v2192_v17 = vrot.slane %v11097_v54, 6 }
  0x94   :  { %v11129_v19 = vsel %vm10787_vm8, %v2182_v40, %v2183_v7  ;;  %v1471_v40 = vrot.slane %v1469_v37, 4  ;;  %v1481_v42 = vrot.slane %v1479_v53, 4  ;;  %v8008_v7 = vcombine.high %v10019_v62, %v10020_v26  ;;  %v11151_v37 = vld [vmem:[%s14912_s0 + $0xa0] sm:$0xff] }
  0x95   :  { %v8180_v51 = vcombine.high %v11125_v36, %v11129_v19  ;;  %v1489_v3 = vor.u32 %v1488_v8, %v1485_v22  ;;  %v11163_v60 = vsel %vm10787_vm8, %v2188_v30, %v2189_v41  ;;  %v1501_v48 = vshrl.u32 %v11151_v37, 16 }
  0x96   :  { %v11159_v46 = vsel %vm10775_vm7, %v1471_v40, %v1479_v53  ;;  %v1504_v40 = vshll.u32 %v11151_v37, 16  ;;  %v1511_v54 = vshrl.u32 %v11173_v10, 16  ;;  %v2194_v53 = vrot.slane %v2192_v17, 4 }
  0x97   :  { %v11167_v21 = vsel %vm10775_vm7, %v1481_v42, %v1489_v3  ;;  %v1503_v8 = vrot.slane %v1501_v48, 5  ;;  %v1514_v42 = vshll.u32 %v11173_v10, 16 }
  0x99   :  { %853 = vmatmul.mubr.bf16.gmra.mrb[56].mxu0 %v7987_v47  ;;  %v1303_v47 = vld [vmem:[%s14912_s0 + $0x98] sm:$0xee]  ;;  %2568 = vmatmul.mubr.bf16.gmra.mrb[48].mxu1 %v8177_v5  ;;  %v1513_v5 = vrot.slane %v1511_v54, 5  ;;  %v1516_v4 = vrot.slane %v1514_v42, 6 }
  0x9a   :  { %860 = vmatprep.mubr.bf16.mxu0 %v7990_v27  ;;  %v1492_v27 = vshrl.u32 %v1303_v47, 16  ;;  %v1495_v16 = vshll.u32 %v1303_v47, 16  ;;  %2575 = vmatprep.mubr.bf16.mxu1 %v8180_v51  ;;  %v8179_v51 = vcombine.low %v11125_v36, %v11129_v19  ;;  %v1506_v47 = vrot.slane %v1504_v40, 6 }
  0x9b   :  { %v1517_v6 = vor.u32 %v1516_v4, %v1513_v5  ;;  %v10022_v4 = vld [vmem:[%s14912_s0 + $0x18] sm:$0xff] }
  0x9c   :  { %v1494_v30 = vrot.slane %v1492_v27, 5  ;;  %v1497_v22 = vrot.slane %v1495_v16, 6  ;;  %v8182_v27 = vcombine.high %v11155_v18, %v11163_v60  ;;  %v2191_v16 = vrot.slane %v2189_v41, 4  ;;  %v9894_v41 = vld [vmem:[%s14961_s23 + $0x100] sm:$0xff]  }
  0x9d   :  { %v1507_v43 = vor.u32 %v1506_v47, %v1503_v8  ;;  %v8010_v5 = vcombine.high %v10021_v25, %v10022_v4  ;;  %v2110_v8 = vld [vmem:[%s14912_s0 + $0x98] sm:$0xcc] }
  0x9e   :  { %v1498_v3 = vor.u32 %v1497_v22, %v1494_v30  ;;  %v11214_v22 = vld [vmem:[%s14912_s0 + $0xb8] sm:$0xff] }
  0x9f   :  { %v1509_v30 = vrot.slane %v1507_v43, 4  ;;  %v1531_v42 = vshrl.u32 %v11214_v22, 16 }
  0xa0   :  { %v1499_v48 = vrot.slane %v1498_v3, 4  ;;  %v1534_v3 = vshll.u32 %v11214_v22, 16 }
  0xa1   :  { %861 = vmatmul.mubr.bf16.gmra.mrb[60].mxu0 %v7989_v35  ;;  %v11191_v35 = vld [vmem:[%s14912_s0 + $0xb0] sm:$0xff]  ;;  %2576 = vmatmul.mubr.bf16.gmra.mrb[52].mxu1 %v8179_v51  ;;  %v11223_v51 = vsel %vm10787_vm8, %v2191_v16, %v2192_v17  ;;  %v11231_v47 = vsel %vm10775_vm7, %v1509_v30, %v1517_v6  ;;  %v1533_v17 = vrot.slane %v1531_v42, 5  ;;  %v8136_v16 = vrot.slane %v2110_v8, 10 }
  0xa2   :  { %1157 = vmatprep.mubr.bf16.mxu0 %v8008_v7  ;;  %v8007_v7 = vcombine.low %v10019_v62, %v10020_v26  ;;  %v1521_v36 = vshrl.u32 %v11191_v35, 16  ;;  %v1524_v19 = vshll.u32 %v11191_v35, 16  ;;  %v9899_v62 = vld [vmem:[%s14961_s23 + $0x148] sm:$0xff]   ;;  %v11209_v26 = vsel %vm10775_vm7, %v1499_v48, %v1507_v43  ;;  %2583 = vmatprep.mubr.bf16.mxu1 %v8182_v27 }
  0xa3   :  { %v11227_v43 = vsel %vm10787_vm8, %v2194_v53, %v2195_v0  ;;  %v2199_v27 = vrot.slane %v11151_v37, 6  ;;  %v9900_v0 = vld [vmem:[%s14961_s23 + $0x108] sm:$0xff]   ;;  %v8181_v53 = vcombine.low %v11155_v18, %v11163_v60  ;;  %v1536_v37 = vrot.slane %v1534_v3, 6  ;;  %v11252_v18 = vld [vmem:[%s14912_s0 + $0xc0] sm:$0xff] }
  0xa4   :  { %v1523_v40 = vrot.slane %v1521_v36, 5  ;;  %v1526_v54 = vrot.slane %v1524_v19, 6  ;;  %v8184_v30 = vcombine.high %v11223_v51, %v11227_v43  ;;  %v8009_v60 = vcombine.low %v10021_v25, %v10022_v4  ;;  %v9906_v25 = vld [vmem:[%s14961_s23 + $0x110] sm:$0xff]  }
  0xa5   :  { %v1537_v42 = vor.u32 %v1536_v37, %v1533_v17  ;;  %v1541_v8 = vshrl.u32 %v11252_v18, 16  ;;  %v1544_v3 = vshll.u32 %v11252_v18, 16  ;;  %v11271_v4 = vsel %vm10787_vm8, %v8136_v16, %v2199_v27  ;;  %v9911_v37 = vld [vmem:[%s14961_s23 + $0x158] sm:$0xff]  }
  0xa6   :  { %v1527_v19 = vor.u32 %v1526_v54, %v1523_v40  ;;  %v1519_v40 = vrot.slane %v1517_v6, 4  ;;  %v2202_v54 = vrot.slane %v11173_v10, 6  ;;  %v10023_v6 = vld [vmem:[%s14912_s0 + $0x20] sm:$0xff]  ;;  %v10024_v10 = vld [vmem:[%s14912_s0 + $0x28] sm:$0xff]  ;;  %v2205_v36 = vrot.slane %v11191_v35, 6 }
  0xa7   :  { %v8012_v17 = vcombine.high %v10023_v6, %v10024_v10  ;;  %v1543_v16 = vrot.slane %v1541_v8, 5  ;;  %v8183_v8 = vcombine.low %v11223_v51, %v11227_v43  ;;  %v9917_v35 = vld [vmem:[%s14961_s23 + $0x160] sm:$0xff]   ;;  %v11310_v51 = vld [vmem:[%s14912_s0 + $0xd0] sm:$0xff]  ;;  %v8011_v43 = vcombine.low %v10023_v6, %v10024_v10  ;;  %v11332_v10 = vld [vmem:[%s14912_s0 + $0xd8] sm:$0xff] }
  0xa9   :  { %1158 = vmatmul.mubr.bf16.vlgmr.msra.gmra.mrb[64].mxu0 %v8007_v7  ;;  %v9905_v7 = vld [vmem:[%s14961_s23 + $0x150] sm:$0xff]   ;;  %2584 = vmatmul.mubr.bf16.gmra.mrb[56].mxu1 %v8181_v53 }
  0xaa   :  { %8715 = vmatpush3.bf16.msra.mxu0 %v9894_v41  ;;  %1165 = vmatprep.mubr.bf16.mxu0 %v8010_v5  ;;  %v1529_v41 = vrot.slane %v1527_v19, 4  ;;  %v2201_v5 = vrot.slane %v2199_v27, 4  ;;  %v9912_v27 = vld [vmem:[%s14961_s23 + $0x118] sm:$0xff]  }
  0xab   :  { %8716 = vmatprep.subr.bf16.mxu0 %v9899_v62  ;;  %v11256_v62 = vsel %vm10775_vm7, %v1519_v40, %v1527_v19  ;;  %2591 = vmatprep.mubr.bf16.mxu1 %v8184_v30  ;;  %v1546_v40 = vrot.slane %v1544_v3, 6  ;;  %v2204_v3 = vrot.slane %v2202_v54, 4 }
  0xac   :  { %v11275_v19 = vsel %vm10775_vm7, %v1529_v41, %v1537_v42  ;;  %v11291_v41 = vsel %vm10787_vm8, %v2201_v5, %v2202_v54  ;;  %v1561_v54 = vshrl.u32 %v11310_v51, 16 }
  0xad   :  { %v1547_v30 = vor.u32 %v1546_v40, %v1543_v16  ;;  %v2207_v16 = vrot.slane %v2205_v36, 4  ;;  %v2208_v40 = vrot.slane %v11214_v22, 6  ;;  %v9918_v22 = vld [vmem:[%s14961_s23 + $0x120] sm:$0xff]  }
  0xae   :  { %8717 = vmatpush3.bf16.msra.mxu0 %v9900_v0  ;;  %v11280_v0 = vld [vmem:[%s14912_s0 + $0xc8] sm:$0xff] }
  0xaf   :  { %8718 = vmatprep.subr.bf16.mxu0 %v9905_v7  ;;  %v1551_v7 = vshrl.u32 %v11280_v0, 16  ;;  %v1554_v48 = vshll.u32 %v11280_v0, 16 }
  0xb1   :  { %1166 = vmatmul.mubr.bf16.gmra.mrb[68].mxu0 %v8009_v60  ;;  %v1553_v5 = vrot.slane %v1551_v7, 5  ;;  %v1556_v53 = vrot.slane %v1554_v48, 6  ;;  %v8186_v60 = vcombine.high %v11271_v4, %v11291_v41  ;;  %2592 = vmatmul.mubr.bf16.gmra.mrb[60].mxu1 %v8183_v8  ;;  %v1563_v7 = vrot.slane %v1561_v54, 5 }
  0xb2   :  { %1173 = vmatprep.mubr.bf16.mxu0 %v8012_v17  ;;  %8719 = vmatpush3.bf16.msra.mxu0 %v9906_v25  ;;  %v1539_v17 = vrot.slane %v1537_v42, 4  ;;  %v1549_v25 = vrot.slane %v1547_v30, 4  ;;  %v11323_v42 = vsel %vm10787_vm8, %v2204_v3, %v2205_v36  ;;  %v11343_v8 = vsel %vm10787_vm8, %v2207_v16, %v2208_v40 }
  0xb3   :  { %8720 = vmatprep.subr.bf16.mxu0 %v9911_v37  ;;  %v1557_v15 = vor.u32 %v1556_v53, %v1553_v5  ;;  %v1564_v37 = vshll.u32 %v11310_v51, 16  ;;  %v9923_v53 = vld [vmem:[%s14961_s23 + $0x168] sm:$0xff]   ;;  %2599 = vmatprep.mubr.bf16.mxu1 %v8186_v60  ;;  %v2211_v3 = vrot.slane %v11252_v18, 6  ;;  %v1571_v5 = vshrl.u32 %v11332_v10, 16 }
  0xb4   :  { %v11314_v48 = vsel %vm10775_vm7, %v1539_v17, %v1547_v30  ;;  %v14969_v17 = vcombine.high %v10208_v56, %v10216_v59  ;;  %v8185_v16 = vcombine.low %v11271_v4, %v11291_v41  ;;  %v2210_v54 = vrot.slane %v2208_v40, 4  ;;  %v11365_v4 = vld [vmem:[%s14912_s0 + $0xe0] sm:$0xff] }
  0xb5   :  { %v11327_v6 = vsel %vm10775_vm7, %v1549_v25, %v1557_v15  ;;  %v1566_v30 = vrot.slane %v1564_v37, 6  ;;  %v9924_v25 = vld [vmem:[%s14961_s23 + $0x128] sm:$0xff]   ;;  %v1573_v18 = vrot.slane %v1571_v5, 5  ;;  %v2214_v36 = vrot.slane %v11280_v0, 6 }
  0xb6   :  { %8721 = vmatpush3.bf16.msra.mxu0 %v9912_v27  ;;  %v1581_v40 = vshrl.u32 %v11365_v4, 16  ;;  %v11378_v0 = vsel %vm10787_vm8, %v2210_v54, %v2211_v3 }
  0xb7   :  { %8722 = vmatprep.subr.bf16.mxu0 %v9917_v35  ;;  %v1574_v35 = vshll.u32 %v11332_v10, 16  ;;  %v1567_v60 = vor.u32 %v1566_v30, %v1563_v7  ;;  %v8188_v7 = vcombine.high %v11323_v42, %v11343_v8  ;;  %v1559_v30 = vrot.slane %v1557_v15, 4  ;;  %v9930_v15 = vld [vmem:[%s14961_s23 + $0x130] sm:$0xff]  }
  0xb9   :  { %1174 = vmatmul.mubr.bf16.gmra.mrb[72].mxu0 %v8011_v43  ;;  %v1576_v37 = vrot.slane %v1574_v35, 6  ;;  %v9929_v43 = vld [vmem:[%s14961_s23 + $0x170] sm:$0xff]   ;;  %v11369_v41 = vsel %vm10775_vm7, %v1559_v30, %v1567_v60  ;;  %2600 = vmatmul.mubr.bf16.gmra.mrb[64].mxu1 %v8185_v16  ;;  %v11387_v35 = vld [vmem:[%s14912_s0 + $0xe8] sm:$0xff]  ;;  %v1583_v16 = vrot.slane %v1581_v40, 5  ;;  %v14971_v40 = vcombine.high %v10250_v20, %v10240_v14 }
  0xba   :  { %1181 = vmatprep.mubr.bf16.mxu0 %v14969_v17  ;;  %8723 = vmatpush3.bf16.msra.mxu0 %v9918_v22  ;;  %v1569_v22 = vrot.slane %v1567_v60, 4  ;;  %v2213_v17 = vrot.slane %v2211_v3, 4  ;;  %v9935_v60 = vld [vmem:[%s14961_s23 + $0x178] sm:$0xff]   ;;  %v1594_v30 = vshll.u32 %v11387_v35, 16 }
  0xbb   :  { %8724 = vmatprep.subr.bf16.mxu0 %v9923_v53  ;;  %v1577_v27 = vor.u32 %v1576_v37, %v1573_v18  ;;  %v1584_v53 = vshll.u32 %v11365_v4, 16  ;;  %2607 = vmatprep.mubr.bf16.mxu1 %v8188_v7  ;;  %v2217_v37 = vrot.slane %v11310_v51, 6  ;;  %v14970_v7 = vcombine.low %v10208_v56, %v10216_v59  ;;  %v9936_v51 = vld [vmem:[%s14961_s23 + $0x138] sm:$0xff]  }
  0xbc   :  { %v11398_v18 = vsel %vm10787_vm8, %v2213_v17, %v2214_v36  ;;  %v2216_v17 = vrot.slane %v2214_v36, 4  ;;  %v10028_v59 = vmov 0   ;;  %v11423_v36 = vld [vmem:[%s14912_s0 + $0xf0] sm:$0xff] }
  0xbd   :  { %v11382_v5 = vsel %vm10775_vm7, %v1569_v22, %v1577_v27  ;;  %v1586_v54 = vrot.slane %v1584_v53, 6  ;;  %v8187_v22 = vcombine.low %v11323_v42, %v11343_v8  ;;  %v8190_v56 = vcombine.high %v11378_v0, %v11398_v18  ;;  %9841 = vset.pattern.permute.xlu0 %v10028_v59  ;;  %v2735_v42 = vld [vmem:[%s14913_s5] sm:$0xff]  ;;  %9842 = vset.pattern.permute.xlu1 %v10028_v59 }
  0xbe   :  { %8725 = vmatpush3.bf16.msra.mxu0 %v9924_v25  ;;  %v1596_v25 = vrot.slane %v1594_v30, 6  ;;  %v1579_v8 = vrot.slane %v1577_v27, 4  ;;  %2753 = vperm.xlu0 %9841, %v2735_v42   ;;  %v1604_v27 = vshll.u32 %v11423_v36, 16  ;;  %v11442_v30 = vld [vmem:[%s14912_s0 + $0xf8] sm:$0xff]  ;;  %v14972_v42 = vcombine.low %v10250_v20, %v10240_v14 }
  0xbf   :  { %8726 = vmatprep.subr.bf16.mxu0 %v9929_v43  ;;  %v1591_v43 = vshrl.u32 %v11387_v35, 16  ;;  %v1587_v3 = vor.u32 %v1586_v54, %v1583_v16  ;;  %v2220_v54 = vrot.slane %v11332_v10, 6  ;;  %v11433_v10 = vsel %vm10787_vm8, %v2216_v17, %v2217_v37 }
  0xc0   :  { %v1614_v59 = vshll.u32 %v11442_v30, 16  ;;  %v2232_v34 = vrot.slane %v11442_v30, 6 }
  0xc1   :  { %1182 = vmatmul.mubr.bf16.gmra.mrb[76].mxu0 %v14970_v7  ;;  %v1593_v53 = vrot.slane %v1591_v43, 5  ;;  %v1589_v16 = vrot.slane %v1587_v3, 4  ;;  %v1601_v43 = vshrl.u32 %v11423_v36, 16  ;;  %2608 = vmatmul.mubr.bf16.gmra.mrb[68].mxu1 %v8187_v22 }
  0xc2   :  { %1189 = vmatprep.mubr.bf16.mxu0 %v14971_v40  ;;  %8727 = vmatpush3.bf16.msra.mxu0 %v9930_v15  ;;  %v2219_v15 = vrot.slane %v2217_v37, 4 }
  0xc3   :  { %8728 = vmatprep.subr.bf16.mxu0 %v9935_v60  ;;  %v1597_v7 = vor.u32 %v1596_v25, %v1593_v53  ;;  %v11427_v60 = vsel %vm10775_vm7, %v1579_v8, %v1587_v3  ;;  %2615 = vmatprep.mubr.bf16.mxu1 %v8190_v56  ;;  %v2736_v3 = vld [vmem:[%s14913_s5 + $0x8] sm:$0xff]  ;;  %v1603_v40 = vrot.slane %v1601_v43, 5  ;;  %v2223_v53 = vrot.slane %v11365_v4, 6  ;;  %v2737_v4 = vld [vmem:[%s14913_s5 + $0x10] sm:$0xff] }
  0xc4   :  { %v2221_v17 = vsel %vm10787_vm8, %v2219_v15, %v2220_v54  ;;  %2758 = vperm.xlu0 %9841, %v2736_v3   ;;  %v1611_v56 = vshrl.u32 %v11442_v30, 16  ;;  %v8189_v43 = vcombine.low %v11378_v0, %v11398_v18  ;;  %v2222_v15 = vrot.slane %v2220_v54, 4  ;;  %2763 = vperm.xlu1 %9842, %v2737_v4   ;;  %v11472_v0 = vld [vmem:[%s14912_s0 + $0x100] sm:$0xff] }
  0xc5   :  { %v11437_v25 = vsel %vm10775_vm7, %v1589_v16, %v1597_v7  ;;  %v14973_v16 = vcombine.high %v10279_v23, %v10284_v32  ;;  %v1616_v3 = vrot.slane %v1614_v59, 6  ;;  %v8192_v37 = vcombine.high %v11433_v10, %v2221_v17  ;;  %v11491_v59 = vld [vmem:[%s14912_s0 + $0x108] sm:$0xff] }
  0xc6   :  { %8729 = vmatpush3.bf16.msra.mxu0 %v9936_v51  ;;  %v1606_v51 = vrot.slane %v1604_v27, 6  ;;  %v1613_v27 = vrot.slane %v1611_v56, 5  ;;  %v1599_v14 = vrot.slane %v1597_v7, 4  ;;  %v1621_v54 = vshrl.u32 %v11472_v0, 16 }
  0xc7   :  { %v1624_v56 = vshll.u32 %v11472_v0, 16  ;;  %v11482_v7 = vsel %vm10787_vm8, %v2222_v15, %v2223_v53 }
  0xc8   :  { %v1607_v8 = vor.u32 %v1606_v51, %v1603_v40  ;;  %v2225_v40 = vrot.slane %v2223_v53, 4  ;;  %v2226_v51 = vrot.slane %v11387_v35, 6  ;;  %v14975_v53 = vcombine.high %v10304_v45, %v10317_v49 }
  0xc9   :  { %1190 = vmatmul.mubr.bf16.gmra.mrb[80].mxu0 %v14972_v42  ;;  %v1617_v42 = vor.u32 %v1616_v3, %v1613_v27  ;;  %2616 = vmatmul.mubr.bf16.gmra.mrb[72].mxu1 %v8189_v43  ;;  %v1623_v43 = vrot.slane %v1621_v54, 5  ;;  %v1626_v15 = vrot.slane %v1624_v56, 6  ;;  %v2229_v27 = vrot.slane %v11423_v36, 6 }
  0xca   :  { %1197 = vmatprep.mubr.bf16.mxu0 %v14973_v16  ;;  %v1609_v20 = vrot.slane %v1607_v8, 4  ;;  %v11476_v18 = vsel %vm10775_vm7, %v1599_v14, %v1607_v8  ;;  %2623 = vmatprep.mubr.bf16.mxu1 %v8192_v37  ;;  %v2738_v8 = vld [vmem:[%s14913_s5 + $0x18] sm:$0xff]  ;;  %v2227_v4 = vsel %vm10787_vm8, %v2225_v40, %v2226_v51  ;;  %v1631_v37 = vshrl.u32 %v11491_v59, 16 }
  0xcb   :  { %2768 = vperm.xlu1 %9842, %v2738_v8   ;;  %v1634_v3 = vshll.u32 %v11491_v59, 16  ;;  %v14974_v14 = vcombine.low %v10279_v23, %v10284_v32  ;;  %v8191_v54 = vcombine.low %v11433_v10, %v2221_v17  ;;  %v2228_v56 = vrot.slane %v2226_v51, 4  ;;  %v1318_v23 = vld [vmem:[%s14912_s0 + $0x110] sm:$0xff]  ;;  %v2739_v32 = vld [vmem:[%s14913_s5 + $0x20] sm:$0xff] }
  0xcc   :  { %v11486_v35 = vsel %vm10775_vm7, %v1609_v20, %v1617_v42  ;;  %v1627_v20 = vor.u32 %v1626_v15, %v1623_v43  ;;  %v1633_v40 = vrot.slane %v1631_v37, 5  ;;  %v8194_v36 = vcombine.high %v11482_v7, %v2227_v4  ;;  %2773 = vperm.xlu0 %9841, %v2739_v32  }
  0xcd   :  { %v1636_v8 = vrot.slane %v1634_v3, 6  ;;  %v1619_v16 = vrot.slane %v1617_v42, 4  ;;  %v2231_v29 = vrot.slane %v2229_v27, 4  ;;  %v1641_v17 = vshrl.u32 %v1318_v23, 16 }
  0xce   :  { %v1629_v22 = vrot.slane %v1627_v20, 4  ;;  %v1644_v51 = vshll.u32 %v1318_v23, 16  ;;  %v2230_v42 = vsel %vm10787_vm8, %v2228_v56, %v2229_v27  ;;  %v2235_v3 = vrot.slane %v11472_v0, 6 }
  0xcf   :  { %v1637_v44 = vor.u32 %v1636_v8, %v1633_v40  ;;  %v11522_v10 = vsel %vm10775_vm7, %v1619_v16, %v1627_v20  ;;  %v2740_v16 = vld [vmem:[%s14913_s5 + $0x28] sm:$0xff]  ;;  %v1643_v27 = vrot.slane %v1641_v17, 5  ;;  %v14977_v40 = vcombine.high %v10366_v11, %v10361_v9 }
  0xd0   :  { %v1646_v37 = vrot.slane %v1644_v51, 6  ;;  %2778 = vperm.xlu1 %9842, %v2740_v16   ;;  %v8193_v8 = vcombine.low %v11482_v7, %v2227_v4  ;;  %v2234_v16 = vrot.slane %v2232_v34, 4  ;;  %v2237_v0 = vrot.slane %v2235_v3, 4 }
  0xd1   :  { %1198 = vmatmul.mubr.bf16.gmra.mrb[84].mxu0 %v14974_v14  ;;  %2624 = vmatmul.mubr.bf16.gmra.mrb[76].mxu1 %v8191_v54  ;;  %v11528_v30 = vsel %vm10775_vm7, %v1629_v22, %v1637_v44  ;;  %v2233_v22 = vsel %vm10787_vm8, %v2231_v29, %v2232_v34  ;;  %v14976_v54 = vcombine.low %v10304_v45, %v10317_v49  ;;  %v1639_v29 = vrot.slane %v1637_v44, 4  ;;  %v2741_v45 = vld [vmem:[%s14913_s5 + $0x30] sm:$0xff]  ;;  %v2742_v44 = vld [vmem:[%s14913_s5 + $0x38] sm:$0xff] }
  0xd2   :  { %1205 = vmatprep.mubr.bf16.mxu0 %v14975_v53  ;;  %v1319_v53 = vld [vmem:[%s14912_s0 + $0x118] sm:$0x33]  ;;  %2631 = vmatprep.mubr.bf16.mxu1 %v8194_v36  ;;  %v1647_v56 = vor.u32 %v1646_v37, %v1643_v27  ;;  %v8196_v17 = vcombine.high %v2230_v42, %v2233_v22  ;;  %v2238_v15 = vrot.slane %v11491_v59, 6  ;;  %v2236_v4 = vsel %vm10787_vm8, %v2234_v16, %v2235_v3  ;;  %v2743_v3 = vld [vmem:[%s14913_s5 + $0x40] sm:$0xff] }
  0xd3   :  { %v1651_v14 = vshrl.u32 %v1319_v53, 16  ;;  %v1654_v20 = vshll.u32 %v1319_v53, 16  ;;  %2783 = vperm.xlu0 %9841, %v2741_v45   ;;  %v2241_v31 = vrot.slane %v1318_v23, 6  ;;  %v14979_v37 = vcombine.high %v10794_v2, %v10811_v55 }
  0xd4   :  { %v1649_v51 = vrot.slane %v1647_v56, 4  ;;  %v11556_v49 = vsel %vm10775_vm7, %v1639_v29, %v1647_v56  ;;  %v2239_v27 = vsel %vm10787_vm8, %v2237_v0, %v2238_v15  ;;  %2788 = vperm.xlu1 %9842, %v2742_v44   ;;  %v2749_v29 = vld [vmem:[%s14913_s5 + $0x70] sm:$0xff]  ;;  %v14985_v45 = vcombine.low %v10933_v24, %v10955_v1 }
  0xd5   :  { %v1653_v36 = vrot.slane %v1651_v14, 5  ;;  %v1656_v32 = vrot.slane %v1654_v20, 6  ;;  %v8195_v14 = vcombine.low %v2230_v42, %v2233_v22  ;;  %v8198_v20 = vcombine.high %v2236_v4, %v2239_v27 }
  0xd6   :  { %v2243_v56 = vrot.slane %v2241_v31, 4  ;;  %v14980_v42 = vcombine.low %v10794_v2, %v10811_v55  ;;  %v14982_v2 = vcombine.high %v10884_v33, %v10903_v52  ;;  %v14986_v44 = vcombine.high %v10994_v13, %v11011_v61 }
  0xd7   :  { %v1657_v43 = vor.u32 %v1656_v32, %v1653_v36  ;;  %2793 = vperm.xlu0 %9841, %v2743_v3   ;;  %v2747_v36 = vld [vmem:[%s14913_s5 + $0x60] sm:$0xff]  ;;  %v2748_v32 = vld [vmem:[%s14913_s5 + $0x68] sm:$0xff] }
  0xd9   :  { %1206 = vmatmul.mubr.bf16.gmra.mrb[88].mxu0 %v14976_v54  ;;  %2632 = vmatmul.mubr.bf16.gmra.mrb[80].mxu1 %v8193_v8  ;;  %v11560_v7 = vsel %vm10775_vm7, %v1649_v51, %v1657_v43  ;;  %v14978_v43 = vcombine.low %v10366_v11, %v10361_v9  ;;  %v2240_v54 = vrot.slane %v2238_v15, 4  ;;  %v2744_v9 = vld [vmem:[%s14913_s5 + $0x48] sm:$0xff]  ;;  %v8197_v15 = vcombine.low %v2236_v4, %v2239_v27  ;;  %v2745_v8 = vld [vmem:[%s14913_s5 + $0x50] sm:$0xff] }
  0xda   :  { %1213 = vmatprep.mubr.bf16.mxu0 %v14977_v40  ;;  %2639 = vmatprep.mubr.bf16.mxu1 %v8196_v17  ;;  %v8118_v34 = vcombine.high %v11556_v49, %v11560_v7  ;;  %v8117_v59 = vcombine.low %v11556_v49, %v11560_v7  ;;  %v2244_v40 = vrot.slane %v1319_v53, 6  ;;  %v14981_v53 = vcombine.high %v10834_v50, %v10857_v63 }
  0xdb   :  { %v2242_v11 = vsel %vm10787_vm8, %v2240_v54, %v2241_v31  ;;  %2798 = vperm.xlu1 %9842, %v2744_v9   ;;  %2803 = vperm.xlu0 %9841, %v2745_v8   ;;  %v14983_v50 = vcombine.low %v10884_v33, %v10903_v52  ;;  %v14984_v63 = vcombine.high %v10933_v24, %v10955_v1  ;;  %v2750_v33 = vld [vmem:[%s14913_s5 + $0x78] sm:$0xff] }
  0xdc   :  { %v2245_v23 = vsel %vm10787_vm8, %v2243_v56, %v2244_v40  ;;  %v14988_v24 = vcombine.high %v11055_v38, %v11065_v57 }
  0xdd   :  { %v8200_v22 = vcombine.high %v2242_v11, %v2245_v23  ;;  %v8199_v55 = vcombine.low %v2242_v11, %v2245_v23  ;;  %v14989_v11 = vcombine.low %v11055_v38, %v11065_v57  ;;  %v14991_v57 = vcombine.low %v11103_v39, %v11111_v58 }
  0xdf   :  { %2808 = vperm.xlu1 %9842, %v2746_v28   ;;  %2813 = vperm.xlu0 %9841, %v2747_v36  }
  0xe1   :  { %1214 = vmatmul.mubr.bf16.gmra.mrb[92].mxu0 %v14978_v43  ;;  %2640 = vmatmul.mubr.bf16.gmra.mrb[84].mxu1 %v8195_v14 }
  0xe2   :  { %1948 = vmatprep.mubr.bf16.mxu0 %v14979_v37  ;;  %2647 = vmatprep.mubr.bf16.mxu1 %v8198_v20  ;;  %v14987_v20 = vcombine.low %v10994_v13, %v11011_v61  ;;  %v14990_v13 = vcombine.high %v11103_v39, %v11111_v58  ;;  %v14993_v58 = vcombine.low %v11159_v46, %v11167_v21 }
  0xe3   :  { %2818 = vperm.xlu1 %9842, %v2748_v32   ;;  %2823 = vperm.xlu0 %9841, %v2749_v29  }
  0xe7   :  { %2828 = vperm.xlu1 %9842, %v2750_v33  }
  0xe9   :  { %1949 = vmatmul.mubr.bf16.vlgmr.msra.gmra.mrb[96].mxu0 %v14980_v42  ;;  %2648 = vmatmul.mubr.bf16.gmra.mrb[88].mxu1 %v8197_v15 }
  0xea   :  { %1956 = vmatprep.mubr.bf16.mxu0 %v14981_v53  ;;  %2655 = vmatprep.mubr.bf16.mxu1 %v8200_v22 }
  0xf1   :  { %1957 = vmatmul.mubr.bf16.gmra.mrb[100].mxu0 %v8089_v12  ;;  %2656 = vmatmul.mubr.bf16.gmra.mrb[92].mxu1 %v8199_v55 }
  0xf2   :  { %1964 = vmatprep.mubr.bf16.mxu0 %v14982_v2 }
  0xf9   :  { %1965 = vmatmul.mubr.bf16.gmra.mrb[104].mxu0 %v14983_v50  ;;  %v14992_v50 = vcombine.high %v11159_v46, %v11167_v21  ;;  %v14995_v21 = vcombine.low %v11209_v26, %v11231_v47 }
  0xfa   :  { %1972 = vmatprep.mubr.bf16.mxu0 %v14984_v63 }
  0xfc   :  { %v8506_v12 = vpop.f32.mrb[0].mxu0 }
  0xfd   :  { %v8507_v17 = vpop.f32.mrb[1].mxu0 }
  0xfe   :  { %v11622_v51 = vadd.f32 %v8507_v17, %v8506_v12  ;;  %v8509_v16 = vpop.f32.mrb[2].mxu0 }
  0xff   :  { %v8510_v0 = vpop.f32.mrb[3].mxu0 }
 0x100   :  { %v11627_v52 = vadd.f32 %v8510_v0, %v8509_v16 }
 0x101   :  { %1973 = vmatmul.mubr.bf16.gmra.mrb[108].mxu0 %v14985_v45 }
 0x102   :  { %1980 = vmatprep.mubr.bf16.mxu0 %v14986_v44 }
 0x104   :  { %v8512_v4 = vpop.f32.mrb[4].mxu0 }
 0x105   :  { %v8513_v27 = vpop.f32.mrb[5].mxu0 }
 0x106   :  { %v11635_v31 = vadd.f32 %v8513_v27, %v8512_v4  ;;  %v8515_v43 = vpop.f32.mrb[6].mxu0 }
 0x107   :  { %v8516_v37 = vpop.f32.mrb[7].mxu0 }
 0x108   :  { %v11637_v14 = vadd.f32 %v8516_v37, %v8515_v43  ;;  %v14994_v43 = vcombine.high %v11209_v26, %v11231_v47  ;;  %v14997_v47 = vcombine.low %v11256_v62, %v11275_v19 }
 0x109   :  { %1981 = vmatmul.mubr.bf16.gmra.mrb[112].mxu0 %v14987_v20 }
 0x10a   :  { %1988 = vmatprep.mubr.bf16.mxu0 %v14988_v24 }
 0x10b   :  { %v8666_v23 = vpop.f32.mrb[0].mxu1 }
 0x10c   :  { %v8518_v1 = vpop.f32.mrb[8].mxu0  ;;  %v8667_v61 = vpop.f32.mrb[1].mxu1 }
 0x10d   :  { %v8519_v54 = vpop.f32.mrb[9].mxu0  ;;  %v11655_v42 = vadd.f32 %v8667_v61, %v8666_v23  ;;  %v8669_v53 = vpop.f32.mrb[2].mxu1 }
 0x10e   :  { %v11645_v56 = vadd.f32 %v8519_v54, %v8518_v1  ;;  %v8521_v40 = vpop.f32.mrb[10].mxu0  ;;  %v8670_v22 = vpop.f32.mrb[3].mxu1 }
 0x10f   :  { %v8522_v3 = vpop.f32.mrb[11].mxu0  ;;  %v11657_v28 = vadd.f32 %v8670_v22, %v8669_v53  ;;  %v14996_v53 = vcombine.high %v11256_v62, %v11275_v19  ;;  %v14999_v19 = vcombine.low %v11314_v48, %v11327_v6 }
 0x110   :  { %v11647_v9 = vadd.f32 %v8522_v3, %v8521_v40 }
 0x111   :  { %1989 = vmatmul.mubr.bf16.gmra.mrb[116].mxu0 %v14989_v11 }
 0x112   :  { %1996 = vmatprep.mubr.bf16.mxu0 %v14990_v13 }
 0x113   :  { %v8672_v32 = vpop.f32.mrb[4].mxu1 }
 0x114   :  { %v8524_v15 = vpop.f32.mrb[12].mxu0  ;;  %v8673_v63 = vpop.f32.mrb[5].mxu1 }
 0x115   :  { %v8525_v8 = vpop.f32.mrb[13].mxu0  ;;  %v11669_v12 = vadd.f32 %v8673_v63, %v8672_v32  ;;  %v8675_v17 = vpop.f32.mrb[6].mxu1 }
 0x116   :  { %v11659_v2 = vadd.f32 %v8525_v8, %v8524_v15  ;;  %v8527_v55 = vpop.f32.mrb[14].mxu0  ;;  %v8676_v16 = vpop.f32.mrb[7].mxu1 }
 0x117   :  { %v8528_v36 = vpop.f32.mrb[15].mxu0  ;;  %v11671_v33 = vadd.f32 %v8676_v16, %v8675_v17  ;;  %v14998_v16 = vcombine.high %v11314_v48, %v11327_v6 }
 0x118   :  { %v11661_v38 = vadd.f32 %v8528_v36, %v8527_v55 }
 0x119   :  { %1997 = vmatmul.mubr.bf16.gmra.mrb[120].mxu0 %v14991_v57 }
 0x11a   :  { %2004 = vmatprep.mubr.bf16.mxu0 %v14992_v50 }
 0x11c   :  { %v8530_v29 = vpop.f32.mrb[16].mxu0  ;;  %v8678_v27 = vpop.f32.mrb[8].mxu1 }
 0x11d   :  { %v8531_v0 = vpop.f32.mrb[17].mxu0  ;;  %v8679_v37 = vpop.f32.mrb[9].mxu1 }
 0x11e   :  { %v11673_v45 = vadd.f32 %v8531_v0, %v8530_v29  ;;  %v8533_v44 = vpop.f32.mrb[18].mxu0  ;;  %v11683_v20 = vadd.f32 %v8679_v37, %v8678_v27  ;;  %v8681_v24 = vpop.f32.mrb[10].mxu1 }
 0x11f   :  { %v8534_v4 = vpop.f32.mrb[19].mxu0  ;;  %v8682_v54 = vpop.f32.mrb[11].mxu1 }
 0x120   :  { %v11675_v39 = vadd.f32 %v8534_v4, %v8533_v44  ;;  %v11685_v3 = vadd.f32 %v8682_v54, %v8681_v24 }
 0x121   :  { %2005 = vmatmul.mubr.bf16.gmra.mrb[124].mxu0 %v14993_v58 }
 0x122   :  { %2012 = vmatprep.mubr.bf16.mxu0 %v14994_v43 }
 0x124   :  { %v8536_v1 = vpop.f32.mrb[20].mxu0  ;;  %v8684_v61 = vpop.f32.mrb[12].mxu1 }
 0x125   :  { %v8537_v40 = vpop.f32.mrb[21].mxu0  ;;  %v8685_v15 = vpop.f32.mrb[13].mxu1 }
 0x126   :  { %v11687_v11 = vadd.f32 %v8537_v40, %v8536_v1  ;;  %v8539_v23 = vpop.f32.mrb[22].mxu0  ;;  %v11697_v22 = vadd.f32 %v8685_v15, %v8684_v61  ;;  %v8687_v8 = vpop.f32.mrb[14].mxu1 }
 0x127   :  { %v8540_v13 = vpop.f32.mrb[23].mxu0  ;;  %v8688_v36 = vpop.f32.mrb[15].mxu1 }
 0x128   :  { %v11689_v46 = vadd.f32 %v8540_v13, %v8539_v23  ;;  %v11699_v32 = vadd.f32 %v8688_v36, %v8687_v8  ;;  %v15000_v23 = vcombine.high %v11369_v41, %v11382_v5 }
 0x129   :  { %2013 = vmatmul.mubr.bf16.gmra.mrb[128].mxu0 %v14995_v21 }
 0x12a   :  { %2020 = vmatprep.mubr.bf16.mxu0 %v14996_v53 }
 0x12c   :  { %v8542_v55 = vpop.f32.mrb[24].mxu0  ;;  %v8690_v29 = vpop.f32.mrb[16].mxu1 }
 0x12d   :  { %v8543_v57 = vpop.f32.mrb[25].mxu0  ;;  %v8691_v0 = vpop.f32.mrb[17].mxu1 }
 0x12e   :  { %v11701_v50 = vadd.f32 %v8543_v57, %v8542_v55  ;;  %v8545_v63 = vpop.f32.mrb[26].mxu0  ;;  %v11711_v44 = vadd.f32 %v8691_v0, %v8690_v29  ;;  %v8693_v4 = vpop.f32.mrb[18].mxu1 }
 0x12f   :  { %v8546_v17 = vpop.f32.mrb[27].mxu0  ;;  %v8694_v27 = vpop.f32.mrb[19].mxu1 }
 0x130   :  { %v11703_v26 = vadd.f32 %v8546_v17, %v8545_v63  ;;  %v11713_v37 = vadd.f32 %v8694_v27, %v8693_v4  ;;  %v15001_v17 = vcombine.low %v11369_v41, %v11382_v5 }
 0x131   :  { %2021 = vmatmul.mubr.bf16.gmra.mrb[132].mxu0 %v14997_v47 }
 0x132   :  { %2028 = vmatprep.mubr.bf16.mxu0 %v14998_v16  ;;  %v15002_v16 = vcombine.high %v11427_v60, %v11437_v25 }
 0x134   :  { %v8548_v58 = vpop.f32.mrb[28].mxu0  ;;  %v8696_v40 = vpop.f32.mrb[20].mxu1 }
 0x135   :  { %v8549_v43 = vpop.f32.mrb[29].mxu0  ;;  %v8697_v13 = vpop.f32.mrb[21].mxu1 }
 0x136   :  { %v11715_v24 = vadd.f32 %v8549_v43, %v8548_v58  ;;  %v8551_v1 = vpop.f32.mrb[30].mxu0  ;;  %v11725_v21 = vadd.f32 %v8697_v13, %v8696_v40  ;;  %v8699_v61 = vpop.f32.mrb[22].mxu1  ;;  %v15003_v40 = vcombine.low %v11427_v60, %v11437_v25 }
 0x137   :  { %v8552_v54 = vpop.f32.mrb[31].mxu0  ;;  %v8700_v15 = vpop.f32.mrb[23].mxu1 }
 0x138   :  { %v11717_v62 = vadd.f32 %v8552_v54, %v8551_v1  ;;  %v11727_v55 = vadd.f32 %v8700_v15, %v8699_v61  ;;  %v15004_v61 = vcombine.high %v11476_v18, %v11486_v35 }
 0x139   :  { %2029 = vmatmul.mubr.bf16.gmra.mrb[136].mxu0 %v14999_v19 }
 0x13a   :  { %2036 = vmatprep.mubr.bf16.mxu0 %v15000_v23 }
 0x13c   :  { %v8554_v53 = vpop.f32.mrb[32].mxu0  ;;  %v8702_v47 = vpop.f32.mrb[24].mxu1 }
 0x13d   :  { %v8555_v8 = vpop.f32.mrb[33].mxu0  ;;  %v8703_v0 = vpop.f32.mrb[25].mxu1 }
 0x13e   :  { %v8556_v36 = vadd.f32 %v8555_v8, %v8554_v53  ;;  %v8557_v57 = vpop.f32.mrb[34].mxu0  ;;  %v11741_v4 = vadd.f32 %v8703_v0, %v8702_v47  ;;  %v8705_v58 = vpop.f32.mrb[26].mxu1  ;;  %v15005_v47 = vcombine.low %v11476_v18, %v11486_v35 }
 0x13f   :  { %v8558_v63 = vpop.f32.mrb[35].mxu0 }
 0x140   :  { %v11730_v48 = vadd.f32 %v11655_v42, %v8556_v36  ;;  %v8559_v6 = vadd.f32 %v8558_v63, %v8557_v57  ;;  %v8706_v42 = vpop.f32.mrb[27].mxu1 }
 0x141   :  { %2037 = vmatmul.mubr.bf16.gmra.mrb[140].mxu0 %v15001_v17  ;;  %v11743_v1 = vadd.f32 %v8706_v42, %v8705_v58  ;;  %v15006_v58 = vcombine.high %v11522_v10, %v11528_v30 }
 0x142   :  { %v11736_v29 = vadd.f32 %v11657_v28, %v8559_v6  ;;  %2044 = vmatprep.mubr.bf16.mxu0 %v15002_v16 }
 0x144   :  { %v8560_v27 = vpop.f32.mrb[36].mxu0  ;;  %v8708_v23 = vpop.f32.mrb[28].mxu1 }
 0x145   :  { %v8561_v43 = vpop.f32.mrb[37].mxu0  ;;  %v8709_v53 = vpop.f32.mrb[29].mxu1 }
 0x146   :  { %v8562_v54 = vadd.f32 %v8561_v43, %v8560_v27  ;;  %v8563_v41 = vpop.f32.mrb[38].mxu0  ;;  %v11757_v15 = vadd.f32 %v8709_v53, %v8708_v23  ;;  %v8711_v8 = vpop.f32.mrb[30].mxu1  ;;  %v15007_v23 = vcombine.low %v11522_v10, %v11528_v30 }
 0x147   :  { %v8564_v5 = vpop.f32.mrb[39].mxu0 }
 0x148   :  { %v11746_v19 = vadd.f32 %v11669_v12, %v8562_v54  ;;  %v8565_v28 = vadd.f32 %v8564_v5, %v8563_v41  ;;  %v8712_v12 = vpop.f32.mrb[31].mxu1 }
 0x149   :  { %2045 = vmatmul.mubr.bf16.gmra.mrb[144].mxu0 %v15003_v40  ;;  %v11759_v63 = vadd.f32 %v8712_v12, %v8711_v8 }
 0x14a   :  { %v11752_v13 = vadd.f32 %v11671_v33, %v8565_v28  ;;  %2052 = vmatprep.mubr.bf16.mxu0 %v15004_v61 }
 0x14c   :  { %v8566_v36 = vpop.f32.mrb[40].mxu0  ;;  %v8842_v16 = vpop.f32.mrb[32].mxu1 }
 0x14d   :  { %v8567_v57 = vpop.f32.mrb[41].mxu0  ;;  %v8843_v27 = vpop.f32.mrb[33].mxu1 }
 0x14e   :  { %v8568_v6 = vadd.f32 %v8567_v57, %v8566_v36  ;;  %v8569_v60 = vpop.f32.mrb[42].mxu0  ;;  %v11773_v42 = vadd.f32 %v8843_v27, %v8842_v16  ;;  %v8845_v43 = vpop.f32.mrb[34].mxu1 }
 0x14f   :  { %v8570_v25 = vpop.f32.mrb[43].mxu0 }
 0x150   :  { %v11762_v17 = vadd.f32 %v11683_v20, %v8568_v6  ;;  %v8571_v33 = vadd.f32 %v8570_v25, %v8569_v60  ;;  %v8846_v20 = vpop.f32.mrb[35].mxu1 }
 0x151   :  { %2053 = vmatmul.mubr.bf16.gmra.mrb[148].mxu0 %v15005_v47  ;;  %v11775_v5 = vadd.f32 %v8846_v20, %v8845_v43 }
 0x152   :  { %v11768_v0 = vadd.f32 %v11685_v3, %v8571_v33  ;;  %2060 = vmatprep.mubr.bf16.mxu0 %v15006_v58 }
 0x154   :  { %v8572_v54 = vpop.f32.mrb[44].mxu0  ;;  %v8848_v61 = vpop.f32.mrb[36].mxu1 }
 0x155   :  { %v8573_v41 = vpop.f32.mrb[45].mxu0  ;;  %v8849_v8 = vpop.f32.mrb[37].mxu1 }
 0x156   :  { %v8574_v28 = vadd.f32 %v8573_v41, %v8572_v54  ;;  %v8575_v18 = vpop.f32.mrb[46].mxu0  ;;  %v11789_v36 = vadd.f32 %v8849_v8, %v8848_v61  ;;  %v8851_v12 = vpop.f32.mrb[38].mxu1 }
 0x157   :  { %v8576_v35 = vpop.f32.mrb[47].mxu0 }
 0x158   :  { %v11778_v40 = vadd.f32 %v11697_v22, %v8574_v28  ;;  %v8577_v3 = vadd.f32 %v8576_v35, %v8575_v18  ;;  %v8852_v22 = vpop.f32.mrb[39].mxu1 }
 0x159   :  { %2061 = vmatmul.mubr.bf16.gmra.mrb[152].mxu0 %v15007_v23  ;;  %v11791_v60 = vadd.f32 %v8852_v22, %v8851_v12 }
 0x15a   :  { %v11784_v53 = vadd.f32 %v11699_v32, %v8577_v3  ;;  %2068 = vmatprep.mubr.bf16.mxu0 %v8118_v34 }
 0x15c   :  { %15008 = vst [vmem:[#allocation4_spill] sm:$0xff] %v11784_v53  ;;  %v8578_v57 = vpop.f32.mrb[48].mxu0  ;;  %v8854_v34 = vpop.f32.mrb[40].mxu1 }
 0x15d   :  { %v8579_v6 = vpop.f32.mrb[49].mxu0  ;;  %v8855_v16 = vpop.f32.mrb[41].mxu1 }
 0x15e   :  { %v8580_v25 = vadd.f32 %v8579_v6, %v8578_v57  ;;  %v8581_v10 = vpop.f32.mrb[50].mxu0  ;;  %v11802_v58 = vadd.f32 %v8855_v16, %v8854_v34  ;;  %v8857_v27 = vpop.f32.mrb[42].mxu1 }
 0x15f   :  { %v8582_v30 = vpop.f32.mrb[51].mxu0  ;;  %v8858_v54 = vpop.f32.mrb[43].mxu1 }
 0x160   :  { %v11794_v33 = vadd.f32 %v11711_v44, %v8580_v25  ;;  %v8583_v32 = vadd.f32 %v8582_v30, %v8581_v10  ;;  %v11804_v41 = vadd.f32 %v8858_v54, %v8857_v27 }
 0x161   :  { %2069 = vmatmul.mubr.bf16.gmra.mrb[156].mxu0 %v8117_v59 }
 0x162   :  { %15009 = vst [vmem:[#allocation5_spill] sm:$0xff] %v11794_v33  ;;  %v11800_v47 = vadd.f32 %v11713_v37, %v8583_v32 }
 0x164   :  { %15010 = vst [vmem:[#allocation6_spill] sm:$0xff] %v11800_v47  ;;  %v8584_v43 = vpop.f32.mrb[52].mxu0  ;;  %v8860_v7 = vpop.f32.mrb[44].mxu1 }
 0x165   :  { %v8585_v20 = vpop.f32.mrb[53].mxu0  ;;  %v8861_v37 = vpop.f32.mrb[45].mxu1 }
 0x166   :  { %v8586_v44 = vadd.f32 %v8585_v20, %v8584_v43  ;;  %v8587_v28 = vpop.f32.mrb[54].mxu0  ;;  %v11812_v3 = vadd.f32 %v8861_v37, %v8860_v7  ;;  %v8863_v23 = vpop.f32.mrb[46].mxu1 }
 0x167   :  { %v8588_v18 = vpop.f32.mrb[55].mxu0  ;;  %v8864_v8 = vpop.f32.mrb[47].mxu1 }
 0x168   :  { %v11807_v35 = vadd.f32 %v11725_v21, %v8586_v44  ;;  %v8589_v49 = vadd.f32 %v8588_v18, %v8587_v28  ;;  %v11814_v57 = vadd.f32 %v8864_v8, %v8863_v23 }
 0x16a   :  { %15011 = vst [vmem:[#allocation7_spill] sm:$0xff] %v11807_v35  ;;  %v11810_v59 = vadd.f32 %v11727_v55, %v8589_v49 }
 0x16c   :  { %15012 = vst [vmem:[#allocation8_spill] sm:$0xff] %v11810_v59  ;;  %v8590_v61 = vpop.f32.mrb[56].mxu0  ;;  %v8866_v30 = vpop.f32.mrb[48].mxu1 }
 0x16d   :  { %v8591_v12 = vpop.f32.mrb[57].mxu0  ;;  %v8867_v32 = vpop.f32.mrb[49].mxu1 }
 0x16e   :  { %v8592_v22 = vadd.f32 %v8591_v12, %v8590_v61  ;;  %v8593_v6 = vpop.f32.mrb[58].mxu0  ;;  %v11822_v34 = vadd.f32 %v8867_v32, %v8866_v30  ;;  %v8869_v16 = vpop.f32.mrb[50].mxu1 }
 0x16f   :  { %v8594_v25 = vpop.f32.mrb[59].mxu0  ;;  %v8870_v43 = vpop.f32.mrb[51].mxu1 }
 0x170   :  { %v11817_v21 = vadd.f32 %v11741_v4, %v8592_v22  ;;  %v8595_v10 = vadd.f32 %v8594_v25, %v8593_v6  ;;  %v11824_v20 = vadd.f32 %v8870_v43, %v8869_v16 }
 0x172   :  { %15013 = vst [vmem:[#allocation9_spill] sm:$0xff] %v11817_v21  ;;  %v11820_v55 = vadd.f32 %v11743_v1, %v8595_v10 }
 0x174   :  { %15014 = vst [vmem:[#allocation10_spill] sm:$0xff] %v11820_v55  ;;  %v8596_v27 = vpop.f32.mrb[60].mxu0  ;;  %v8872_v7 = vpop.f32.mrb[52].mxu1 }
 0x175   :  { %v8597_v54 = vpop.f32.mrb[61].mxu0  ;;  %v8873_v37 = vpop.f32.mrb[53].mxu1 }
 0x176   :  { %v8598_v44 = vadd.f32 %v8597_v54, %v8596_v27  ;;  %v8599_v28 = vpop.f32.mrb[62].mxu0  ;;  %v11832_v23 = vadd.f32 %v8873_v37, %v8872_v7  ;;  %v8875_v61 = vpop.f32.mrb[54].mxu1 }
 0x177   :  { %v8600_v18 = vpop.f32.mrb[63].mxu0  ;;  %v8876_v12 = vpop.f32.mrb[55].mxu1 }
 0x178   :  { %v11827_v4 = vadd.f32 %v11757_v15, %v8598_v44  ;;  %v8601_v49 = vadd.f32 %v8600_v18, %v8599_v28  ;;  %v11834_v6 = vadd.f32 %v8876_v12, %v8875_v61 }
 0x17a   :  { %15015 = vst [vmem:[#allocation11_spill] sm:$0xff] %v11827_v4  ;;  %v11830_v1 = vadd.f32 %v11759_v63, %v8601_v49 }
 0x17c   :  { %15016 = vst [vmem:[#allocation12_spill] sm:$0xff] %v11830_v1  ;;  %v8618_v8 = vpop.f32.mrb[64].mxu0  ;;  %v8878_v16 = vpop.f32.mrb[56].mxu1 }
 0x17d   :  { %v8619_v22 = vpop.f32.mrb[65].mxu0  ;;  %v8879_v27 = vpop.f32.mrb[57].mxu1 }
 0x17e   :  { %v8620_v25 = vadd.f32 %v8619_v22, %v8618_v8  ;;  %v8621_v10 = vpop.f32.mrb[66].mxu0  ;;  %v11842_v43 = vadd.f32 %v8879_v27, %v8878_v16  ;;  %v8881_v54 = vpop.f32.mrb[58].mxu1 }
 0x17f   :  { %v8622_v30 = vpop.f32.mrb[67].mxu0  ;;  %v8882_v28 = vpop.f32.mrb[59].mxu1 }
 0x180   :  { %v11837_v15 = vadd.f32 %v8620_v25, %v11622_v51  ;;  %v8623_v32 = vadd.f32 %v8622_v30, %v8621_v10  ;;  %v11844_v49 = vadd.f32 %v8882_v28, %v8881_v54 }
 0x182   :  { %v11840_v63 = vadd.f32 %v8623_v32, %v11627_v52 }
 0x184   :  { %v8624_v44 = vpop.f32.mrb[68].mxu0  ;;  %v8884_v12 = vpop.f32.mrb[60].mxu1 }
 0x185   :  { %v8625_v18 = vpop.f32.mrb[69].mxu0  ;;  %v8885_v22 = vpop.f32.mrb[61].mxu1 }
 0x186   :  { %v8626_v7 = vadd.f32 %v8625_v18, %v8624_v44  ;;  %v8627_v37 = vpop.f32.mrb[70].mxu0  ;;  %v11852_v25 = vadd.f32 %v8885_v22, %v8884_v12  ;;  %v8887_v10 = vpop.f32.mrb[62].mxu1 }
 0x187   :  { %v8628_v61 = vpop.f32.mrb[71].mxu0  ;;  %v8888_v32 = vpop.f32.mrb[63].mxu1 }
 0x188   :  { %v11847_v51 = vadd.f32 %v8626_v7, %v11635_v31  ;;  %v8629_v8 = vadd.f32 %v8628_v61, %v8627_v37  ;;  %v11854_v27 = vadd.f32 %v8888_v32, %v8887_v10 }
 0x18a   :  { %v11850_v52 = vadd.f32 %v8629_v8, %v11637_v14 }
 0x18c   :  { %v8630_v30 = vpop.f32.mrb[72].mxu0  ;;  %v8890_v7 = vpop.f32.mrb[64].mxu1 }
 0x18d   :  { %v8631_v16 = vpop.f32.mrb[73].mxu0  ;;  %v8891_v37 = vpop.f32.mrb[65].mxu1 }
 0x18e   :  { %v8632_v54 = vadd.f32 %v8631_v16, %v8630_v30  ;;  %v8633_v44 = vpop.f32.mrb[74].mxu0  ;;  %v11862_v61 = vadd.f32 %v8891_v37, %v8890_v7  ;;  %v8893_v8 = vpop.f32.mrb[66].mxu1 }
 0x18f   :  { %v8634_v28 = vpop.f32.mrb[75].mxu0  ;;  %v8894_v22 = vpop.f32.mrb[67].mxu1 }
 0x190   :  { %v11857_v31 = vadd.f32 %v8632_v54, %v11645_v56  ;;  %v8635_v18 = vadd.f32 %v8634_v28, %v8633_v44  ;;  %v11864_v10 = vadd.f32 %v8894_v22, %v8893_v8 }
 0x192   :  { %v11860_v14 = vadd.f32 %v8635_v18, %v11647_v9 }
 0x194   :  { %v8636_v12 = vpop.f32.mrb[76].mxu0  ;;  %v8896_v44 = vpop.f32.mrb[68].mxu1 }
 0x195   :  { %v8637_v1 = vpop.f32.mrb[77].mxu0  ;;  %v8897_v28 = vpop.f32.mrb[69].mxu1 }
 0x196   :  { %v8638_v30 = vadd.f32 %v8637_v1, %v8636_v12  ;;  %v8639_v32 = vpop.f32.mrb[78].mxu0  ;;  %v11872_v18 = vadd.f32 %v8897_v28, %v8896_v44  ;;  %v8899_v7 = vpop.f32.mrb[70].mxu1 }
 0x197   :  { %v8640_v16 = vpop.f32.mrb[79].mxu0  ;;  %v8900_v4 = vpop.f32.mrb[71].mxu1 }
 0x198   :  { %v11867_v56 = vadd.f32 %v8638_v30, %v11659_v2  ;;  %v8641_v54 = vadd.f32 %v8640_v16, %v8639_v32  ;;  %v11874_v8 = vadd.f32 %v8900_v4, %v8899_v7 }
 0x19a   :  { %v11870_v9 = vadd.f32 %v8641_v54, %v11661_v38 }
 0x19c   :  { %v8642_v37 = vpop.f32.mrb[80].mxu0  ;;  %v8902_v32 = vpop.f32.mrb[72].mxu1 }
 0x19d   :  { %v8643_v55 = vpop.f32.mrb[81].mxu0  ;;  %v8903_v16 = vpop.f32.mrb[73].mxu1 }
 0x19e   :  { %v8644_v1 = vadd.f32 %v8643_v55, %v8642_v37  ;;  %v8645_v12 = vpop.f32.mrb[82].mxu0  ;;  %v11882_v54 = vadd.f32 %v8903_v16, %v8902_v32  ;;  %v8905_v44 = vpop.f32.mrb[74].mxu1 }
 0x19f   :  { %v8646_v22 = vpop.f32.mrb[83].mxu0  ;;  %v8906_v21 = vpop.f32.mrb[75].mxu1 }
 0x1a0   :  { %v11877_v2 = vadd.f32 %v8644_v1, %v11673_v45  ;;  %v8647_v30 = vadd.f32 %v8646_v22, %v8645_v12  ;;  %v11884_v4 = vadd.f32 %v8906_v21, %v8905_v44 }
 0x1a2   :  { %v11880_v38 = vadd.f32 %v8647_v30, %v11675_v39 }
 0x1a4   :  { %v8648_v28 = vpop.f32.mrb[84].mxu0  ;;  %v8908_v12 = vpop.f32.mrb[76].mxu1 }
 0x1a5   :  { %v8649_v59 = vpop.f32.mrb[85].mxu0  ;;  %v8909_v22 = vpop.f32.mrb[77].mxu1 }
 0x1a6   :  { %v8650_v55 = vadd.f32 %v8649_v59, %v8648_v28  ;;  %v8651_v7 = vpop.f32.mrb[86].mxu0  ;;  %v11892_v30 = vadd.f32 %v8909_v22, %v8908_v12  ;;  %v8911_v32 = vpop.f32.mrb[78].mxu1 }
 0x1a7   :  { %v8652_v37 = vpop.f32.mrb[87].mxu0  ;;  %v8912_v35 = vpop.f32.mrb[79].mxu1 }
 0x1a8   :  { %v11887_v45 = vadd.f32 %v8650_v55, %v11687_v11  ;;  %v8653_v1 = vadd.f32 %v8652_v37, %v8651_v7  ;;  %v11894_v21 = vadd.f32 %v8912_v35, %v8911_v32 }
 0x1aa   :  { %v11890_v39 = vadd.f32 %v8653_v1, %v11689_v46  ;;  %15017 = vst [vmem:[#allocation13_spill] sm:$0xff] %v11894_v21 }
 0x1ac   :  { %v8654_v16 = vpop.f32.mrb[88].mxu0  ;;  %v8914_v7 = vpop.f32.mrb[80].mxu1 }
 0x1ad   :  { %v8655_v47 = vpop.f32.mrb[89].mxu0  ;;  %v8915_v37 = vpop.f32.mrb[81].mxu1 }
 0x1ae   :  { %v8656_v59 = vadd.f32 %v8655_v47, %v8654_v16  ;;  %v8657_v44 = vpop.f32.mrb[90].mxu0  ;;  %v11902_v1 = vadd.f32 %v8915_v37, %v8914_v7  ;;  %v8917_v12 = vpop.f32.mrb[82].mxu1 }
 0x1af   :  { %v8658_v28 = vpop.f32.mrb[91].mxu0  ;;  %v8918_v33 = vpop.f32.mrb[83].mxu1 }
 0x1b0   :  { %v11897_v11 = vadd.f32 %v8656_v59, %v11701_v50  ;;  %v8659_v55 = vadd.f32 %v8658_v28, %v8657_v44  ;;  %15018 = vst [vmem:[#allocation14_spill] sm:$0xff] %v11902_v1  ;;  %v11904_v35 = vadd.f32 %v8918_v33, %v8917_v12 }
 0x1b2   :  { %v11900_v46 = vadd.f32 %v8659_v55, %v11703_v26  ;;  %15019 = vst [vmem:[#allocation15_spill] sm:$0xff] %v11904_v35  ;;  %v11916_v35 = vpop.permute.xlu0 %2753 }
 0x1b4   :  { %v8660_v22 = vpop.f32.mrb[92].mxu0  ;;  %v8920_v44 = vpop.f32.mrb[84].mxu1 }
 0x1b5   :  { %v8661_v53 = vpop.f32.mrb[93].mxu0  ;;  %v8921_v28 = vpop.f32.mrb[85].mxu1 }
 0x1b6   :  { %v8662_v47 = vadd.f32 %v8661_v53, %v8660_v22  ;;  %v8663_v32 = vpop.f32.mrb[94].mxu0  ;;  %v11912_v55 = vadd.f32 %v8921_v28, %v8920_v44  ;;  %v8923_v7 = vpop.f32.mrb[86].mxu1 }
 0x1b7   :  { %v8664_v16 = vpop.f32.mrb[95].mxu0  ;;  %v8924_v1 = vpop.f32.mrb[87].mxu1 }
 0x1b8   :  { %v11907_v50 = vadd.f32 %v8662_v47, %v11715_v24  ;;  %v8665_v59 = vadd.f32 %v8664_v16, %v8663_v32  ;;  %v11914_v33 = vadd.f32 %v8924_v1, %v8923_v7 }
 0x1ba   :  { %v11910_v26 = vadd.f32 %v8665_v59, %v11717_v62  ;;  %15020 = vst [vmem:[#allocation16_spill] sm:$0xff] %v11914_v33  ;;  %v11922_v62 = vld [vmem:[%s14914_s2] ss:$0 sm:$0xff] }
 0x1bc   :  { %v8730_v37 = vpop.f32.mrb[96].mxu0  ;;  %v8926_v32 = vpop.f32.mrb[88].mxu1 }
 0x1bd   :  { %v8731_v21 = vpop.f32.mrb[97].mxu0  ;;  %v8927_v1 = vpop.f32.mrb[89].mxu1 }
 0x1be   :  { %v8732_v53 = vadd.f32 %v8731_v21, %v8730_v37  ;;  %v8733_v12 = vpop.f32.mrb[98].mxu0  ;;  %v11926_v44 = vadd.f32 %v8927_v1, %v8926_v32  ;;  %v8929_v21 = vpop.f32.mrb[90].mxu1 }
 0x1bf   :  { %v8734_v22 = vpop.f32.mrb[99].mxu0  ;;  %v8930_v37 = vpop.f32.mrb[91].mxu1 }
 0x1c0   :  { %v2077_v24 = vadd.f32 %v8732_v53, %v11837_v15  ;;  %v8735_v47 = vadd.f32 %v8734_v22, %v8733_v12  ;;  %v11932_v12 = vpop.permute.xlu0 %2758  ;;  %v11934_v22 = vadd.f32 %v8930_v37, %v8929_v21 }
 0x1c2   :  { %v2664_v16 = vadd.f32 %v11773_v42, %v2077_v24  ;;  %v2078_v59 = vadd.f32 %v8735_v47, %v11840_v63  ;;  %15022 = vst [vmem:[#allocation18_spill] sm:$0xff] %v11934_v22 }
 0x1c4   :  { %v2665_v28 = vadd.f32 %v11775_v5, %v2078_v59  ;;  %v8736_v7 = vpop.f32.mrb[100].mxu0  ;;  %v11930_v15 = vadd.f32 %v11922_v62, %v2664_v16  ;;  %v11944_v59 = vpop.permute.xlu1 %2763 }
 0x1c5   :  { %v8737_v53 = vpop.f32.mrb[101].mxu0  ;;  %v8932_v1 = vpop.f32.mrb[92].mxu1 }
 0x1c6   :  { %15021 = vst [vmem:[#allocation17_spill] sm:$0xff] %v11930_v15  ;;  %v8738_v33 = vadd.f32 %v8737_v53, %v8736_v7  ;;  %v8739_v42 = vpop.f32.mrb[102].mxu0  ;;  %v2831_v63 = vmul.f32 %v11916_v35, %v11930_v15  ;;  %v11939_v24 = vadd.f32 %v11922_v62, %v2665_v28  ;;  %v8933_v37 = vpop.f32.mrb[93].mxu1 }
 0x1c7   :  { %v8740_v47 = vpop.f32.mrb[103].mxu0  ;;  %v11948_v53 = vadd.f32 %v8933_v37, %v8932_v1  ;;  %v8935_v28 = vpop.f32.mrb[94].mxu1 }
 0x1c8   :  { %15023 = vst [vmem:[#allocation19_spill] sm:$0xff] %v11939_v24  ;;  %v2079_v5 = vadd.f32 %v8738_v33, %v11847_v51  ;;  %v8741_v32 = vadd.f32 %v8740_v47, %v8739_v42  ;;  %2863 = vadd.xlane.f32.xlu0 %v2831_v63  ;;  %v2832_v16 = vmul.f32 %v11932_v12, %v11939_v24  ;;  %v8936_v42 = vpop.f32.mrb[95].mxu1  ;;  %v11968_v37 = vpop.permute.xlu0 %2773 }
 0x1c9   :  { %v11954_v47 = vadd.f32 %v8936_v42, %v8935_v28 }
 0x1ca   :  { %v2666_v21 = vadd.f32 %v11789_v36, %v2079_v5  ;;  %v2080_v7 = vadd.f32 %v8741_v32, %v11850_v52  ;;  %2865 = vadd.xlane.f32.xlu1 %v2832_v16  ;;  %v11961_v5 = vpop.permute.xlu1 %2768 }
 0x1cc   :  { %v2667_v15 = vadd.f32 %v11791_v60, %v2080_v7  ;;  %v8742_v51 = vpop.f32.mrb[104].mxu0  ;;  %v11952_v33 = vadd.f32 %v11922_v62, %v2666_v21 }
 0x1cd   :  { %v8743_v63 = vpop.f32.mrb[105].mxu0 }
 0x1ce   :  { %v8744_v24 = vadd.f32 %v8743_v63, %v8742_v51  ;;  %v8745_v22 = vpop.f32.mrb[106].mxu0  ;;  %v2833_v36 = vmul.f32 %v11944_v59, %v11952_v33  ;;  %v11959_v52 = vadd.f32 %v11922_v62, %v2667_v15 }
 0x1cf   :  { %v8746_v32 = vpop.f32.mrb[107].mxu0 }
 0x1d0   :  { %v2081_v60 = vadd.f32 %v8744_v24, %v11857_v31  ;;  %v8747_v16 = vadd.f32 %v8746_v32, %v8745_v22  ;;  %2867 = vadd.xlane.f32.xlu0 %v2833_v36  ;;  %v2834_v7 = vmul.f32 %v11961_v5, %v11959_v52  ;;  %v11974_v31 = vpop.permute.xlu1 %2778 }
 0x1d2   :  { %v2668_v1 = vadd.f32 %v11802_v58, %v2081_v60  ;;  %v2082_v21 = vadd.f32 %v8747_v16, %v11860_v14 }
 0x1d4   :  { %v2669_v28 = vadd.f32 %v11804_v41, %v2082_v21  ;;  %v8748_v15 = vpop.f32.mrb[108].mxu0  ;;  %2869 = vadd.xlane.f32.xlu0 %v2834_v7  ;;  %v11972_v51 = vadd.f32 %v11922_v62, %v2668_v1  ;;  %v11986_v1 = vpop.permute.xlu0 %2783 }
 0x1d5   :  { %v8749_v42 = vpop.f32.mrb[109].mxu0 }
 0x1d6   :  { %v8750_v22 = vadd.f32 %v8749_v42, %v8748_v15  ;;  %v8751_v24 = vpop.f32.mrb[110].mxu0  ;;  %v2835_v58 = vmul.f32 %v11968_v37, %v11972_v51  ;;  %v11979_v14 = vadd.f32 %v11922_v62, %v2669_v28 }
 0x1d7   :  { %v8752_v63 = vpop.f32.mrb[111].mxu0 }
 0x1d8   :  { %v2083_v36 = vadd.f32 %v8750_v22, %v11867_v56  ;;  %v8753_v41 = vadd.f32 %v8752_v63, %v8751_v24  ;;  %2871 = vadd.xlane.f32.xlu1 %v2835_v58  ;;  %v2836_v32 = vmul.f32 %v11974_v31, %v11979_v14  ;;  %v11992_v56 = vpop.permute.xlu1 %2788 }
 0x1da   :  { %v2670_v60 = vadd.f32 %v11812_v3, %v2083_v36  ;;  %v2084_v16 = vadd.f32 %v8753_v41, %v11870_v9  ;;  %2873 = vadd.xlane.f32.xlu0 %v2836_v32  ;;  %v12004_v32 = vpop.permute.xlu0 %2793 }
 0x1dc   :  { %v2671_v21 = vadd.f32 %v11814_v57, %v2084_v16  ;;  %v8754_v7 = vpop.f32.mrb[112].mxu0  ;;  %v11990_v28 = vadd.f32 %v11922_v62, %v2670_v60 }
 0x1dd   :  { %v8755_v15 = vpop.f32.mrb[113].mxu0 }
 0x1de   :  { %v8756_v42 = vadd.f32 %v8755_v15, %v8754_v7  ;;  %v8757_v22 = vpop.f32.mrb[114].mxu0  ;;  %v2837_v24 = vmul.f32 %v11986_v1, %v11990_v28  ;;  %v11997_v3 = vadd.f32 %v11922_v62, %v2671_v21 }
 0x1df   :  { %v8758_v9 = vpop.f32.mrb[115].mxu0 }
 0x1e0   :  { %v2085_v58 = vadd.f32 %v8756_v42, %v11877_v2  ;;  %v8759_v63 = vadd.f32 %v8758_v9, %v8757_v22  ;;  %2875 = vadd.xlane.f32.xlu1 %v2837_v24  ;;  %v2838_v57 = vmul.f32 %v11992_v56, %v11997_v3  ;;  %v12010_v2 = vpop.permute.xlu1 %2798 }
 0x1e2   :  { %v2672_v36 = vadd.f32 %v11822_v34, %v2085_v58  ;;  %v2086_v41 = vadd.f32 %v8759_v63, %v11880_v38  ;;  %2877 = vadd.xlane.f32.xlu0 %v2838_v57  ;;  %v12022_v57 = vpop.permute.xlu0 %2803 }
 0x1e4   :  { %v2673_v60 = vadd.f32 %v11824_v20, %v2086_v41  ;;  %v8760_v16 = vpop.f32.mrb[116].mxu0  ;;  %v12008_v21 = vadd.f32 %v11922_v62, %v2672_v36 }
 0x1e5   :  { %v8761_v7 = vpop.f32.mrb[117].mxu0 }
 0x1e6   :  { %v8762_v15 = vadd.f32 %v8761_v7, %v8760_v16  ;;  %v8763_v42 = vpop.f32.mrb[118].mxu0  ;;  %v2839_v22 = vmul.f32 %v12004_v32, %v12008_v21  ;;  %v12015_v34 = vadd.f32 %v11922_v62, %v2673_v60 }
 0x1e7   :  { %v8764_v38 = vpop.f32.mrb[119].mxu0 }
 0x1e8   :  { %v2087_v24 = vadd.f32 %v8762_v15, %v11887_v45  ;;  %v8765_v9 = vadd.f32 %v8764_v38, %v8763_v42  ;;  %2879 = vadd.xlane.f32.xlu1 %v2839_v22  ;;  %v2840_v20 = vmul.f32 %v12010_v2, %v12015_v34  ;;  %v12028_v45 = vpop.permute.xlu1 %2808 }
 0x1ea   :  { %v2674_v58 = vadd.f32 %v11832_v23, %v2087_v24  ;;  %v2088_v63 = vadd.f32 %v8765_v9, %v11890_v39  ;;  %2881 = vadd.xlane.f32.xlu0 %v2840_v20  ;;  %v12040_v20 = vpop.permute.xlu0 %2813 }
 0x1ec   :  { %v2675_v36 = vadd.f32 %v11834_v6, %v2088_v63  ;;  %v8766_v41 = vpop.f32.mrb[120].mxu0  ;;  %v12026_v60 = vadd.f32 %v11922_v62, %v2674_v58 }
 0x1ed   :  { %v8767_v16 = vpop.f32.mrb[121].mxu0 }
 0x1ee   :  { %v8768_v7 = vadd.f32 %v8767_v16, %v8766_v41  ;;  %v8769_v15 = vpop.f32.mrb[122].mxu0  ;;  %v2841_v42 = vmul.f32 %v12022_v57, %v12026_v60  ;;  %v12033_v23 = vadd.f32 %v11922_v62, %v2675_v36 }
 0x1ef   :  { %v8770_v39 = vpop.f32.mrb[123].mxu0 }
 0x1f0   :  { %v2089_v22 = vadd.f32 %v8768_v7, %v11897_v11  ;;  %v8771_v38 = vadd.f32 %v8770_v39, %v8769_v15  ;;  %2883 = vadd.xlane.f32.xlu1 %v2841_v42  ;;  %v2842_v6 = vmul.f32 %v12028_v45, %v12033_v23  ;;  %v12046_v11 = vpop.permute.xlu1 %2818 }
 0x1f2   :  { %v2676_v24 = vadd.f32 %v11842_v43, %v2089_v22  ;;  %v2090_v9 = vadd.f32 %v8771_v38, %v11900_v46  ;;  %2885 = vadd.xlane.f32.xlu0 %v2842_v6  ;;  %v12058_v6 = vpop.permute.xlu0 %2823 }
 0x1f4   :  { %v2677_v58 = vadd.f32 %v11844_v49, %v2090_v9  ;;  %v8772_v63 = vpop.f32.mrb[124].mxu0  ;;  %v12044_v36 = vadd.f32 %v11922_v62, %v2676_v24 }
 0x1f5   :  { %v8773_v41 = vpop.f32.mrb[125].mxu0 }
 0x1f6   :  { %v8774_v16 = vadd.f32 %v8773_v41, %v8772_v63  ;;  %v8775_v7 = vpop.f32.mrb[126].mxu0  ;;  %v2843_v15 = vmul.f32 %v12040_v20, %v12044_v36  ;;  %v12051_v43 = vadd.f32 %v11922_v62, %v2677_v58 }
 0x1f7   :  { %v8776_v46 = vpop.f32.mrb[127].mxu0 }
 0x1f8   :  { %v2091_v42 = vadd.f32 %v8774_v16, %v11907_v50  ;;  %v8777_v39 = vadd.f32 %v8776_v46, %v8775_v7  ;;  %2887 = vadd.xlane.f32.xlu1 %v2843_v15  ;;  %v2844_v49 = vmul.f32 %v12046_v11, %v12051_v43 }
 0x1fa   :  { %v2678_v22 = vadd.f32 %v11852_v25, %v2091_v42  ;;  %v2092_v38 = vadd.f32 %v8777_v39, %v11910_v26  ;;  %2889 = vadd.xlane.f32.xlu0 %v2844_v49 }
 0x1fc   :  { %v2679_v24 = vadd.f32 %v11854_v27, %v2092_v38  ;;  %v8778_v9 = vpop.f32.mrb[128].mxu0  ;;  %v12062_v58 = vadd.f32 %v11922_v62, %v2678_v22 }
 0x1fd   :  { %v8779_v63 = vpop.f32.mrb[129].mxu0 }
 0x1fe   :  { %v8780_v50 = vadd.f32 %v8779_v63, %v8778_v9  ;;  %v8781_v41 = vpop.f32.mrb[130].mxu0  ;;  %v2845_v16 = vmul.f32 %v12058_v6, %v12062_v58  ;;  %v12079_v63 = vadd.f32 %v11922_v62, %v2679_v24 }
 0x1ff   :  { %v8782_v7 = vpop.f32.mrb[131].mxu0 }
 0x200   :  { %v2093_v25 = vadd.f32 %v8780_v50, %v11730_v48  ;;  %v8783_v15 = vadd.f32 %v8782_v7, %v8781_v41  ;;  %2891 = vadd.xlane.f32.xlu1 %v2845_v16 }
 0x202   :  { %v2680_v26 = vadd.f32 %v11862_v61, %v2093_v25  ;;  %v2094_v46 = vadd.f32 %v8783_v15, %v11736_v29  ;;  %v12081_v61 = vpop.permute.xlu1 %2828 }
 0x203   :  { %v2846_v25 = vmul.f32 %v12081_v61, %v12079_v63 }
 0x204   :  { %v2681_v27 = vadd.f32 %v11864_v10, %v2094_v46  ;;  %v8784_v42 = vpop.f32.mrb[132].mxu0  ;;  %v12071_v39 = vadd.f32 %v11922_v62, %v2680_v26 }
 0x205   :  { %v8785_v49 = vpop.f32.mrb[133].mxu0 }
 0x206   :  { %v8786_v22 = vadd.f32 %v8785_v49, %v8784_v42  ;;  %v8787_v38 = vpop.f32.mrb[134].mxu0  ;;  %v2847_v9 = vmul.f32 %v11916_v35, %v12071_v39  ;;  %v12076_v48 = vadd.f32 %v11922_v62, %v2681_v27 }
 0x207   :  { %v8788_v29 = vpop.f32.mrb[135].mxu0 }
 0x208   :  { %v2095_v10 = vadd.f32 %v8786_v22, %v11746_v19  ;;  %v8789_v50 = vadd.f32 %v8788_v29, %v8787_v38  ;;  %2895 = vadd.xlane.f32.xlu1 %v2847_v9  ;;  %v2848_v41 = vmul.f32 %v11932_v12, %v12076_v48 }
 0x20a   :  { %v2682_v16 = vadd.f32 %v11872_v18, %v2095_v10  ;;  %v2096_v7 = vadd.f32 %v8789_v50, %v11752_v13  ;;  %2897 = vadd.xlane.f32.xlu0 %v2848_v41 }
 0x20c   :  { %v2683_v24 = vadd.f32 %v11874_v8, %v2096_v7  ;;  %v8790_v15 = vpop.f32.mrb[136].mxu0  ;;  %2893 = vadd.xlane.f32.xlu1 %v2846_v25  ;;  %v12092_v26 = vadd.f32 %v11922_v62, %v2682_v16 }
 0x20d   :  { %v8791_v19 = vpop.f32.mrb[137].mxu0 }
 0x20e   :  { %v8792_v46 = vadd.f32 %v8791_v19, %v8790_v15  ;;  %v8793_v27 = vpop.f32.mrb[138].mxu0  ;;  %v2849_v42 = vmul.f32 %v11944_v59, %v12092_v26  ;;  %v12097_v18 = vadd.f32 %v11922_v62, %v2683_v24  ;;  %v15024_v19 = vld [vmem:[#allocation4_spill] sm:$0xff] }
 0x20f   :  { %v8794_v13 = vpop.f32.mrb[139].mxu0 }
 0x210   :  { %v2097_v49 = vadd.f32 %v8792_v46, %v11762_v17  ;;  %v8795_v22 = vadd.f32 %v8794_v13, %v8793_v27  ;;  %2899 = vadd.xlane.f32.xlu0 %v2849_v42  ;;  %v2850_v9 = vmul.f32 %v11961_v5, %v12097_v18  ;;  %v15025_v27 = vld [vmem:[#allocation13_spill] sm:$0xff] }
 0x212   :  { %v2684_v8 = vadd.f32 %v11882_v54, %v2097_v49  ;;  %v2098_v38 = vadd.f32 %v8795_v22, %v11768_v0 }
 0x214   :  { %v2685_v29 = vadd.f32 %v11884_v4, %v2098_v38  ;;  %v8796_v10 = vpop.f32.mrb[140].mxu0  ;;  %2901 = vadd.xlane.f32.xlu0 %v2850_v9  ;;  %v12106_v50 = vadd.f32 %v11922_v62, %v2684_v8 }
 0x215   :  { %v8797_v41 = vpop.f32.mrb[141].mxu0 }
 0x216   :  { %v8798_v16 = vadd.f32 %v8797_v41, %v8796_v10  ;;  %v8799_v7 = vpop.f32.mrb[142].mxu0  ;;  %v2851_v17 = vmul.f32 %v11968_v37, %v12106_v50  ;;  %v12111_v54 = vadd.f32 %v11922_v62, %v2685_v29 }
 0x217   :  { %v8800_v0 = vpop.f32.mrb[143].mxu0 }
 0x218   :  { %v2099_v25 = vadd.f32 %v8798_v16, %v11778_v40  ;;  %v8801_v24 = vadd.f32 %v8800_v0, %v8799_v7  ;;  %2903 = vadd.xlane.f32.xlu1 %v2851_v17  ;;  %v2852_v4 = vmul.f32 %v11974_v31, %v12111_v54  ;;  %v15027_v7 = vld [vmem:[#allocation14_spill] sm:$0xff] }
 0x219   :  { %v15028_v0 = vld [vmem:[#allocation6_spill] sm:$0xff] }
 0x21a   :  { %v2686_v15 = vadd.f32 %v11892_v30, %v2099_v25  ;;  %v2100_v46 = vadd.f32 %v8801_v24, %v15024_v19  ;;  %2905 = vadd.xlane.f32.xlu0 %v2852_v4  ;;  %v15026_v30 = vld [vmem:[#allocation5_spill] sm:$0xff]  ;;  %v15029_v24 = vld [vmem:[#allocation15_spill] sm:$0xff] }
 0x21c   :  { %v2687_v42 = vadd.f32 %v15025_v27, %v2100_v46  ;;  %v8802_v13 = vpop.f32.mrb[144].mxu0  ;;  %v12120_v49 = vadd.f32 %v11922_v62, %v2686_v15 }
 0x21d   :  { %v8803_v22 = vpop.f32.mrb[145].mxu0 }
 0x21e   :  { %v8804_v8 = vadd.f32 %v8803_v22, %v8802_v13  ;;  %v8805_v38 = vpop.f32.mrb[146].mxu0  ;;  %v2853_v40 = vmul.f32 %v11986_v1, %v12120_v49  ;;  %v12125_v9 = vadd.f32 %v11922_v62, %v2687_v42 }
 0x21f   :  { %v8806_v29 = vpop.f32.mrb[147].mxu0 }
 0x220   :  { %v2101_v10 = vadd.f32 %v8804_v8, %v15026_v30  ;;  %v8807_v41 = vadd.f32 %v8806_v29, %v8805_v38  ;;  %2907 = vadd.xlane.f32.xlu1 %v2853_v40  ;;  %v2854_v16 = vmul.f32 %v11992_v56, %v12125_v9  ;;  %v15030_v38 = vld [vmem:[#allocation7_spill] sm:$0xff] }
 0x222   :  { %v2688_v17 = vadd.f32 %v15027_v7, %v2101_v10  ;;  %v2102_v25 = vadd.f32 %v8807_v41, %v15028_v0  ;;  %2909 = vadd.xlane.f32.xlu0 %v2854_v16  ;;  %v15031_v41 = vld [vmem:[#allocation8_spill] sm:$0xff] }
 0x223   :  { %v15032_v7 = vld [vmem:[#allocation16_spill] sm:$0xff] }
 0x224   :  { %v2689_v4 = vadd.f32 %v15029_v24, %v2102_v25  ;;  %v8808_v15 = vpop.f32.mrb[148].mxu0  ;;  %v12134_v19 = vadd.f32 %v11922_v62, %v2688_v17 }
 0x225   :  { %v8809_v46 = vpop.f32.mrb[149].mxu0 }
 0x226   :  { %v8810_v27 = vadd.f32 %v8809_v46, %v8808_v15  ;;  %v8811_v42 = vpop.f32.mrb[150].mxu0  ;;  %v2855_v13 = vmul.f32 %v12004_v32, %v12134_v19  ;;  %v12139_v22 = vadd.f32 %v11922_v62, %v2689_v4 }
 0x227   :  { %v8812_v8 = vpop.f32.mrb[151].mxu0 }
 0x228   :  { %v2103_v40 = vadd.f32 %v8810_v27, %v15030_v38  ;;  %v8813_v29 = vadd.f32 %v8812_v8, %v8811_v42  ;;  %2911 = vadd.xlane.f32.xlu1 %v2855_v13  ;;  %v2856_v30 = vmul.f32 %v12010_v2, %v12139_v22 }
 0x22a   :  { %v2690_v10 = vadd.f32 %v11912_v55, %v2103_v40  ;;  %v2104_v16 = vadd.f32 %v8813_v29, %v15031_v41  ;;  %2913 = vadd.xlane.f32.xlu0 %v2856_v30  ;;  %v15034_v55 = vld [vmem:[#allocation9_spill] sm:$0xff]  ;;  %v15035_v29 = vld [vmem:[#allocation10_spill] sm:$0xff] }
 0x22c   :  { %v2691_v17 = vadd.f32 %v15032_v7, %v2104_v16  ;;  %v8814_v0 = vpop.f32.mrb[152].mxu0  ;;  %v12148_v25 = vadd.f32 %v11922_v62, %v2690_v10  ;;  %v15036_v10 = vld [vmem:[#allocation18_spill] sm:$0xff] }
 0x22d   :  { %v8815_v24 = vpop.f32.mrb[153].mxu0 }
 0x22e   :  { %v8816_v4 = vadd.f32 %v8815_v24, %v8814_v0  ;;  %v8817_v15 = vpop.f32.mrb[154].mxu0  ;;  %v2857_v46 = vmul.f32 %v12022_v57, %v12148_v25  ;;  %v12153_v27 = vadd.f32 %v11922_v62, %v2691_v17 }
 0x22f   :  { %v8818_v42 = vpop.f32.mrb[155].mxu0 }
 0x230   :  { %15033 = vst [vmem:[#allocation4_spill] sm:$0xff] %v12153_v27  ;;  %v2105_v13 = vadd.f32 %v8816_v4, %v15034_v55  ;;  %v8819_v8 = vadd.f32 %v8818_v42, %v8817_v15  ;;  %2915 = vadd.xlane.f32.xlu1 %v2857_v46  ;;  %v2858_v38 = vmul.f32 %v12028_v45, %v12153_v27 }
 0x232   :  { %v2692_v40 = vadd.f32 %v11926_v44, %v2105_v13  ;;  %v2106_v30 = vadd.f32 %v8819_v8, %v15035_v29  ;;  %2917 = vadd.xlane.f32.xlu0 %v2858_v38  ;;  %v15039_v44 = vld [vmem:[#allocation11_spill] sm:$0xff]  ;;  %v15040_v38 = vld [vmem:[#allocation12_spill] sm:$0xff] }
 0x234   :  { %v2693_v41 = vadd.f32 %v15036_v10, %v2106_v30  ;;  %v8820_v16 = vpop.f32.mrb[156].mxu0  ;;  %v12162_v7 = vadd.f32 %v11922_v62, %v2692_v40 }
 0x235   :  { %v8821_v17 = vpop.f32.mrb[157].mxu0 }
 0x236   :  { %15037 = vst [vmem:[#allocation13_spill] sm:$0xff] %v12162_v7  ;;  %v8822_v0 = vadd.f32 %v8821_v17, %v8820_v16  ;;  %v8823_v24 = vpop.f32.mrb[158].mxu0  ;;  %v2859_v4 = vmul.f32 %v12040_v20, %v12162_v7  ;;  %v12167_v15 = vadd.f32 %v11922_v62, %v2693_v41 }
 0x237   :  { %v8824_v46 = vpop.f32.mrb[159].mxu0 }
 0x238   :  { %15038 = vst [vmem:[#allocation5_spill] sm:$0xff] %v12167_v15  ;;  %v2107_v42 = vadd.f32 %v8822_v0, %v15039_v44  ;;  %v8825_v55 = vadd.f32 %v8824_v46, %v8823_v24  ;;  %2919 = vadd.xlane.f32.xlu1 %v2859_v4  ;;  %v2860_v13 = vmul.f32 %v12046_v11, %v12167_v15 }
 0x23a   :  { %v2694_v8 = vadd.f32 %v11948_v53, %v2107_v42  ;;  %v2108_v40 = vadd.f32 %v8825_v55, %v15040_v38  ;;  %2921 = vadd.xlane.f32.xlu0 %v2860_v13 }
 0x23c   :  { %v2695_v29 = vadd.f32 %v11954_v47, %v2108_v40  ;;  %v12176_v30 = vadd.f32 %v11922_v62, %v2694_v8 }
 0x23e   :  { %15041 = vst [vmem:[#allocation14_spill] sm:$0xff] %v12176_v30  ;;  %v2861_v10 = vmul.f32 %v12058_v6, %v12176_v30  ;;  %v12181_v41 = vadd.f32 %v11922_v62, %v2695_v29 }
 0x240   :  { %15042 = vst [vmem:[#allocation6_spill] sm:$0xff] %v12181_v41  ;;  %2923 = vadd.xlane.f32.xlu1 %v2861_v10  ;;  %v2862_v16 = vmul.f32 %v12081_v61, %v12181_v41 }
 0x242   :  { %2925 = vadd.xlane.f32.xlu0 %v2862_v16 }
 0x255   :  { %v2864_v53 = vpop.xlane.xlu0 %2863 }
 0x257   :  { %v2866_v0 = vpop.xlane.xlu1 %2865 }
 0x258   :  { %v2927_v24 = vadd.f32 %v2866_v0, %v2864_v53 }
 0x25d   :  { %v2868_v17 = vpop.xlane.xlu0 %2867 }
 0x25e   :  { %v2928_v47 = vadd.f32 %v2927_v24, %v2868_v17 }
 0x261   :  { %v2870_v4 = vpop.xlane.xlu0 %2869 }
 0x262   :  { %v2929_v44 = vadd.f32 %v2928_v47, %v2870_v4 }
 0x265   :  { %v2872_v46 = vpop.xlane.xlu1 %2871 }
 0x266   :  { %v2930_v42 = vadd.f32 %v2929_v44, %v2872_v46 }
 0x267   :  { %v2874_v55 = vpop.xlane.xlu0 %2873 }
 0x268   :  { %v2931_v8 = vadd.f32 %v2930_v42, %v2874_v55 }
 0x26d   :  { %v2876_v13 = vpop.xlane.xlu1 %2875 }
 0x26e   :  { %v2932_v38 = vadd.f32 %v2931_v8, %v2876_v13 }
 0x26f   :  { %v2878_v62 = vpop.xlane.xlu0 %2877 }
 0x270   :  { %v2933_v29 = vadd.f32 %v2932_v38, %v2878_v62 }
 0x275   :  { %v2880_v40 = vpop.xlane.xlu1 %2879 }
 0x276   :  { %v2934_v10 = vadd.f32 %v2933_v29, %v2880_v40 }
 0x277   :  { %v2882_v30 = vpop.xlane.xlu0 %2881 }
 0x278   :  { %v2935_v16 = vadd.f32 %v2934_v10, %v2882_v30 }
 0x27d   :  { %v2884_v41 = vpop.xlane.xlu1 %2883 }
 0x27e   :  { %v2936_v15 = vadd.f32 %v2935_v16, %v2884_v41  ;;  %v15044_v16 = vld [vmem:[#allocation17_spill] sm:$0xff] }
 0x27f   :  { %v2886_v7 = vpop.xlane.xlu0 %2885 }
 0x280   :  { %v2937_v53 = vadd.f32 %v2936_v15, %v2886_v7 }
 0x285   :  { %v2888_v27 = vpop.xlane.xlu1 %2887 }
 0x286   :  { %v2938_v17 = vadd.f32 %v2937_v53, %v2888_v27  ;;  %v15043_v27 = vld [vmem:[#allocation19_spill] sm:$0xff] }
 0x287   :  { %v2890_v24 = vpop.xlane.xlu0 %2889 }
 0x288   :  { %v2939_v47 = vadd.f32 %v2938_v17, %v2890_v24 }
 0x28d   :  { %v2892_v0 = vpop.xlane.xlu1 %2891 }
 0x28e   :  { %v2940_v46 = vadd.f32 %v2939_v47, %v2892_v0 }
 0x295   :  { %v2896_v4 = vpop.xlane.xlu1 %2895 }
 0x297   :  { %v2898_v8 = vpop.xlane.xlu0 %2897 }
 0x298   :  { %v2948_v10 = vadd.f32 %v2898_v8, %v2896_v4 }
 0x299   :  { %v2894_v44 = vpop.xlane.xlu1 %2893 }
 0x29a   :  { %v2941_v42 = vadd.f32 %v2940_v46, %v2894_v44 }
 0x29c   :  { %v2942_v55 = vrot.slane %v2941_v42, 4 }
 0x29d   :  { %v2900_v29 = vpop.xlane.xlu0 %2899 }
 0x29e   :  { %v2943_v13 = vadd.f32 %v2942_v55, %v2941_v42  ;;  %v2949_v24 = vadd.f32 %v2948_v10, %v2900_v29 }
 0x2a0   :  { %v2944_v38 = vrot.slane %v2943_v13, 2 }
 0x2a1   :  { %v2902_v7 = vpop.xlane.xlu0 %2901 }
 0x2a2   :  { %v2945_v62 = vadd.f32 %v2944_v38, %v2943_v13  ;;  %v2950_v44 = vadd.f32 %v2949_v24, %v2902_v7 }
 0x2a4   :  { %v2946_v40 = vrot.slane %v2945_v62, 1 }
 0x2a5   :  { %v2904_v47 = vpop.xlane.xlu1 %2903 }
 0x2a6   :  { %v2947_v30 = vadd.f32 %v2946_v40, %v2945_v62  ;;  %v2951_v38 = vadd.f32 %v2950_v44, %v2904_v47  ;;  %v9939_v40 = vld [vmem:[%s14915_s6 + $0x40] sm:$0xff]  }
 0x2a7   :  { %v2906_v62 = vpop.xlane.xlu0 %2905  ;;  %9152 = vmatprep.subr.bf16.mxu0 %v9939_v40 }
 0x2a8   :  { %v12185_v41 = vmul.f32 7.8125e-05, %v2947_v30  ;;  %9153 = vmatpush3.bf16.msra.mxu0 %v9939_v40 }
 0x2aa   :  { %v12189_v15 = vsub.f32 %v15043_v27, %v12185_v41  ;;  %v12193_v53 = vsub.f32 %v15044_v16, %v12185_v41  ;;  %v12197_v0 = vsub.f32 %v11959_v52, %v12185_v41  ;;  %v12201_v17 = vsub.f32 %v11952_v33, %v12185_v41 }
 0x2ab   :  { %v12209_v42 = vsub.f32 %v11979_v14, %v12185_v41  ;;  %v12213_v52 = vsub.f32 %v11972_v51, %v12185_v41  ;;  %v12221_v14 = vsub.f32 %v11997_v3, %v12185_v41  ;;  %v12225_v51 = vsub.f32 %v11990_v28, %v12185_v41 }
 0x2ac   :  { %v3004_v4 = vmul.f32 %v12189_v15, %v11932_v12  ;;  %v3003_v46 = vmul.f32 %v12193_v53, %v11916_v35  ;;  %v3006_v13 = vmul.f32 %v12197_v0, %v11961_v5  ;;  %v3005_v8 = vmul.f32 %v12201_v17, %v11944_v59 }
 0x2ad   :  { %v2908_v29 = vpop.xlane.xlu1 %2907  ;;  %v3008_v7 = vmul.f32 %v12209_v42, %v11974_v31  ;;  %v3007_v27 = vmul.f32 %v12213_v52, %v11968_v37  ;;  %v2952_v16 = vadd.f32 %v2951_v38, %v2906_v62  ;;  %v3010_v28 = vmul.f32 %v12221_v14, %v11992_v56 }
 0x2ae   :  { %v3036_v55 = vmul.f32 %v3004_v4, %v3004_v4  ;;  %v3035_v33 = vmul.f32 %v3003_v46, %v3003_v46  ;;  %v3038_v30 = vmul.f32 %v3006_v13, %v3006_v13  ;;  %v3037_v10 = vmul.f32 %v3005_v8, %v3005_v8 }
 0x2af   :  { %v2953_v3 = vadd.f32 %v2952_v16, %v2908_v29  ;;  %v3009_v24 = vmul.f32 %v12225_v51, %v11986_v1  ;;  %v2910_v47 = vpop.xlane.xlu0 %2909  ;;  %v3040_v4 = vmul.f32 %v3008_v7, %v3008_v7  ;;  %v3039_v46 = vmul.f32 %v3007_v27, %v3007_v27 }
 0x2b0   :  { %3069 = vadd.xlane.f32.xlu0 %v3036_v55  ;;  %3067 = vadd.xlane.f32.xlu1 %v3035_v33  ;;  %v12240_v44 = vsub.f32 %v12015_v34, %v12185_v41  ;;  %v12244_v55 = vsub.f32 %v12008_v21, %v12185_v41  ;;  %v3042_v8 = vmul.f32 %v3010_v28, %v3010_v28 }
 0x2b1   :  { %v2954_v33 = vadd.f32 %v2953_v3, %v2910_v47  ;;  %v3041_v38 = vmul.f32 %v3009_v24, %v3009_v24  ;;  %v12252_v34 = vsub.f32 %v12033_v23, %v12185_v41  ;;  %v12256_v21 = vsub.f32 %v12026_v60, %v12185_v41 }
 0x2b2   :  { %v3012_v62 = vmul.f32 %v12240_v44, %v12010_v2  ;;  %v3011_v40 = vmul.f32 %v12244_v55, %v12004_v32  ;;  %v12264_v7 = vsub.f32 %v12044_v36, %v12185_v41  ;;  %v12274_v24 = vsub.f32 %v12062_v58, %v12185_v41 }
 0x2b3   :  { %v3014_v23 = vmul.f32 %v12252_v34, %v12028_v45  ;;  %v3013_v60 = vmul.f32 %v12256_v21, %v12022_v57 }
 0x2b4   :  { %3073 = vadd.xlane.f32.xlu0 %v3038_v30  ;;  %3071 = vadd.xlane.f32.xlu1 %v3037_v10  ;;  %v12260_v10 = vsub.f32 %v12051_v43, %v12185_v41  ;;  %v3044_v27 = vmul.f32 %v3012_v62, %v3012_v62  ;;  %v3043_v16 = vmul.f32 %v3011_v40, %v3011_v40 }
 0x2b5   :  { %v2912_v13 = vpop.xlane.xlu1 %2911  ;;  %v3046_v47 = vmul.f32 %v3014_v23, %v3014_v23  ;;  %v3017_v58 = vmul.f32 %v12274_v24, %v12058_v6 }
 0x2b6   :  { %v2955_v29 = vadd.f32 %v2954_v33, %v2912_v13  ;;  %v3016_v43 = vmul.f32 %v12260_v10, %v12046_v11  ;;  %v9940_v13 = vld [vmem:[%s14915_s6 + $0x48] sm:$0xff]  }
 0x2b7   :  { %v2914_v30 = vpop.xlane.xlu0 %2913  ;;  %9154 = vmatprep.subr.bf16.mxu0 %v9940_v13 }
 0x2b8   :  { %3077 = vadd.xlane.f32.xlu0 %v3040_v4  ;;  %3075 = vadd.xlane.f32.xlu1 %v3039_v46  ;;  %v2956_v28 = vadd.f32 %v2955_v29, %v2914_v30  ;;  %v3045_v4 = vmul.f32 %v3013_v60, %v3013_v60  ;;  %v3015_v46 = vmul.f32 %v12264_v7, %v12040_v20 }
 0x2b9   :  { %v3048_v62 = vmul.f32 %v3016_v43, %v3016_v43  ;;  %9155 = vmatpush3.bf16.msra.mxu0 %v9940_v13  ;;  %v9941_v43 = vld [vmem:[%s14915_s6 + $0x50] sm:$0xff]   ;;  %v9942_v13 = vld [vmem:[%s14915_s6 + $0x58] sm:$0xff]  }
 0x2ba   :  { %v3047_v40 = vmul.f32 %v3015_v46, %v3015_v46  ;;  %9156 = vmatprep.subr.bf16.mxu0 %v9941_v43 }
 0x2bc   :  { %3081 = vadd.xlane.f32.xlu0 %v3042_v8  ;;  %3079 = vadd.xlane.f32.xlu1 %v3041_v38 }
 0x2bd   :  { %v2916_v3 = vpop.xlane.xlu1 %2915  ;;  %9157 = vmatpush3.bf16.msra.mxu0 %v9941_v43 }
 0x2be   :  { %v2957_v36 = vadd.f32 %v2956_v28, %v2916_v3  ;;  %9158 = vmatprep.subr.bf16.mxu0 %v9942_v13 }
 0x2bf   :  { %v2918_v33 = vpop.xlane.xlu0 %2917 }
 0x2c0   :  { %3085 = vadd.xlane.f32.xlu0 %v3044_v27  ;;  %3083 = vadd.xlane.f32.xlu1 %v3043_v16  ;;  %v2958_v38 = vadd.f32 %v2957_v36, %v2918_v33  ;;  %v3049_v27 = vmul.f32 %v3017_v58, %v3017_v58 }
 0x2c1   :  { %9159 = vmatpush3.bf16.msra.mxu0 %v9942_v13 }
 0x2c4   :  { %3089 = vadd.xlane.f32.xlu0 %v3046_v47  ;;  %3087 = vadd.xlane.f32.xlu1 %v3045_v4 }
 0x2c5   :  { %v2920_v8 = vpop.xlane.xlu1 %2919 }
 0x2c6   :  { %v2959_v29 = vadd.f32 %v2958_v38, %v2920_v8  ;;  %v9943_v8 = vld [vmem:[%s14915_s6 + $0x60] sm:$0xff]  }
 0x2c7   :  { %v2922_v30 = vpop.xlane.xlu0 %2921  ;;  %9160 = vmatprep.subr.bf16.mxu0 %v9943_v8 }
 0x2c8   :  { %3093 = vadd.xlane.f32.xlu0 %v3048_v62  ;;  %3091 = vadd.xlane.f32.xlu1 %v3047_v40  ;;  %v2960_v16 = vadd.f32 %v2959_v29, %v2922_v30  ;;  %v12294_v40 = vsub.f32 %v12079_v63, %v12185_v41 }
 0x2c9   :  { %9161 = vmatpush3.bf16.msra.mxu0 %v9943_v8 }
 0x2ca   :  { %v3018_v63 = vmul.f32 %v12294_v40, %v12081_v61 }
 0x2cc   :  { %3095 = vadd.xlane.f32.xlu1 %v3049_v27 }
 0x2cd   :  { %v2924_v23 = vpop.xlane.xlu1 %2923 }
 0x2ce   :  { %v2961_v60 = vadd.f32 %v2960_v16, %v2924_v23 }
 0x2cf   :  { %v2926_v3 = vpop.xlane.xlu0 %2925 }
 0x2d0   :  { %v2962_v28 = vadd.f32 %v2961_v60, %v2926_v3 }
 0x2d2   :  { %v2963_v47 = vrot.slane %v2962_v28, 4 }
 0x2d4   :  { %v2964_v36 = vadd.f32 %v2963_v47, %v2962_v28 }
 0x2d6   :  { %v2965_v4 = vrot.slane %v2964_v36, 2 }
 0x2d8   :  { %v2966_v46 = vadd.f32 %v2965_v4, %v2964_v36 }
 0x2da   :  { %v2967_v33 = vrot.slane %v2966_v46, 1 }
 0x2dc   :  { %v2968_v38 = vadd.f32 %v2967_v33, %v2966_v46 }
 0x2de   :  { %v2970_v62 = vmul.f32 7.8125e-05, %v2968_v38  ;;  %v15049_v38 = vld [vmem:[#allocation14_spill] sm:$0xff] }
 0x2e0   :  { %v12297_v58 = vsub.f32 %v12076_v48, %v2970_v62  ;;  %v12300_v29 = vsub.f32 %v12071_v39, %v2970_v62  ;;  %v12303_v30 = vsub.f32 %v12092_v26, %v2970_v62  ;;  %v12312_v41 = vsub.f32 %v12097_v18, %v2970_v62 }
 0x2e1   :  { %v12317_v26 = vsub.f32 %v12106_v50, %v2970_v62  ;;  %v12320_v60 = vsub.f32 %v12111_v54, %v2970_v62  ;;  %v12327_v28 = vsub.f32 %v12120_v49, %v2970_v62  ;;  %v12332_v50 = vsub.f32 %v12125_v9, %v2970_v62 }
 0x2e2   :  { %v3020_v27 = vmul.f32 %v12297_v58, %v11932_v12  ;;  %v3019_v16 = vmul.f32 %v12300_v29, %v11916_v35  ;;  %v3021_v39 = vmul.f32 %v12303_v30, %v11944_v59  ;;  %v3050_v12 = vmul.f32 %v3018_v63, %v3018_v63 }
 0x2e3   :  { %v3022_v3 = vmul.f32 %v12312_v41, %v11961_v5  ;;  %v3023_v18 = vmul.f32 %v12317_v26, %v11968_v37  ;;  %v3024_v59 = vmul.f32 %v12320_v60, %v11974_v31  ;;  %v3025_v36 = vmul.f32 %v12327_v28, %v11986_v1 }
 0x2e4   :  { %v3052_v48 = vmul.f32 %v3020_v27, %v3020_v27  ;;  %v3051_v23 = vmul.f32 %v3019_v16, %v3019_v16  ;;  %v3053_v35 = vmul.f32 %v3021_v39, %v3021_v39  ;;  %v12337_v5 = vsub.f32 %v12134_v19, %v2970_v62  ;;  %v15045_v19 = vld [vmem:[#allocation4_spill] sm:$0xff] }
 0x2e5   :  { %v3054_v54 = vmul.f32 %v3022_v3, %v3022_v3  ;;  %v3055_v47 = vmul.f32 %v3023_v18, %v3023_v18  ;;  %v3056_v37 = vmul.f32 %v3024_v59, %v3024_v59  ;;  %v3026_v49 = vmul.f32 %v12332_v50, %v11992_v56 }
 0x2e6   :  { %3101 = vadd.xlane.f32.xlu0 %v3052_v48  ;;  %3099 = vadd.xlane.f32.xlu1 %v3051_v23  ;;  %v3057_v43 = vmul.f32 %v3025_v36, %v3025_v36  ;;  %v3027_v31 = vmul.f32 %v12337_v5, %v12004_v32  ;;  %v12344_v9 = vsub.f32 %v12139_v22, %v2970_v62  ;;  %v15046_v32 = vld [vmem:[#allocation13_spill] sm:$0xff]  ;;  %v4633_v36 = vld [vmem:[%s14916_s10 + $0x28] sm:$0xff] }
 0x2e7   :  { %v12347_v4 = vsub.f32 %v12148_v25, %v2970_v62  ;;  %v3058_v1 = vmul.f32 %v3026_v49, %v3026_v49  ;;  %v12350_v46 = vsub.f32 %v15045_v19, %v2970_v62  ;;  %v12357_v8 = vsub.f32 %v15046_v32, %v2970_v62  ;;  %v15047_v22 = vld [vmem:[#allocation5_spill] sm:$0xff]  ;;  %v4640_v32 = vld [vmem:[%s14916_s10 + $0x60] sm:$0xff] }
 0x2e8   :  { %v3059_v33 = vmul.f32 %v3027_v31, %v3027_v31  ;;  %v3028_v56 = vmul.f32 %v12344_v9, %v12010_v2  ;;  %v12360_v25 = vsub.f32 %v15047_v22, %v2970_v62  ;;  %v12363_v27 = vsub.f32 %v15049_v38, %v2970_v62  ;;  %v4635_v49 = vld [vmem:[%s14916_s10 + $0x38] sm:$0xff]  ;;  %v4637_v31 = vld [vmem:[%s14916_s10 + $0x48] sm:$0xff]  ;;  %v12432_v22 = vld [vmem:[%s14915_s6] sm:$0xff]  }
 0x2e9   :  { %v3029_v13 = vmul.f32 %v12347_v4, %v12022_v57  ;;  %v3030_v48 = vmul.f32 %v12350_v46, %v12028_v45  ;;  %v3031_v2 = vmul.f32 %v12357_v8, %v12040_v20  ;;  %v15051_v57 = vld [vmem:[#allocation6_spill] sm:$0xff]  ;;  %v9946_v19 = vld [vmem:[%s14915_s6 + $0x78] sm:$0xff]  }
 0x2ea   :  { %3103 = vadd.xlane.f32.xlu0 %v3053_v35  ;;  %3097 = vadd.xlane.f32.xlu1 %v3050_v12  ;;  %15048 = vst [vmem:[#allocation15_spill] sm:$0xff] %v12360_v25  ;;  %15050 = vst [vmem:[#allocation7_spill] sm:$0xff] %v12363_v27  ;;  %v3060_v16 = vmul.f32 %v3028_v56, %v3028_v56  ;;  %v12370_v23 = vsub.f32 %v15051_v57, %v2970_v62  ;;  %v9944_v62 = vld [vmem:[%s14915_s6 + $0x68] sm:$0xff]   ;;  %v4638_v56 = vld [vmem:[%s14916_s10 + $0x50] sm:$0xff] }
 0x2eb   :  { %v3061_v63 = vmul.f32 %v3029_v13, %v3029_v13  ;;  %v3062_v39 = vmul.f32 %v3030_v48, %v3030_v48  ;;  %v3063_v12 = vmul.f32 %v3031_v2, %v3031_v2  ;;  %v3032_v35 = vmul.f32 %v12360_v25, %v12046_v11  ;;  %9162 = vmatprep.subr.bf16.mxu0 %v9944_v62  ;;  %v4628_v11 = vld [vmem:[%s14916_s10] sm:$0xff]  ;;  %v4641_v13 = vld [vmem:[%s14916_s10 + $0x68] sm:$0xff] }
 0x2ec   :  { %15052 = vst [vmem:[#allocation8_spill] sm:$0xff] %v12370_v23  ;;  %v3033_v3 = vmul.f32 %v12363_v27, %v12058_v6  ;;  %v3034_v20 = vmul.f32 %v12370_v23, %v12081_v61  ;;  %9163 = vmatpush3.bf16.msra.mxu0 %v9944_v62  ;;  %v9945_v6 = vld [vmem:[%s14915_s6 + $0x70] sm:$0xff]  }
 0x2ed   :  { %v3064_v18 = vmul.f32 %v3032_v35, %v3032_v35  ;;  %9164 = vmatprep.subr.bf16.mxu0 %v9945_v6  ;;  %v4630_v61 = vld [vmem:[%s14916_s10 + $0x10] sm:$0xff] }
 0x2ee   :  { %3105 = vadd.xlane.f32.xlu0 %v3054_v54  ;;  %3107 = vadd.xlane.f32.xlu1 %v3055_v47  ;;  %v3065_v45 = vmul.f32 %v3033_v3, %v3033_v3  ;;  %v3066_v59 = vmul.f32 %v3034_v20, %v3034_v20  ;;  %v4631_v54 = vld [vmem:[%s14916_s10 + $0x18] sm:$0xff]  ;;  %v4629_v47 = vld [vmem:[%s14916_s10 + $0x8] sm:$0xff] }
 0x2f0   :  { %9165 = vmatpush3.bf16.msra.mxu0 %v9945_v6 }
 0x2f1   :  { %9166 = vmatprep.subr.bf16.mxu0 %v9946_v19 }
 0x2f2   :  { %3109 = vadd.xlane.f32.xlu0 %v3056_v37  ;;  %3111 = vadd.xlane.f32.xlu1 %v3057_v43  ;;  %v4632_v37 = vld [vmem:[%s14916_s10 + $0x20] sm:$0xff]  ;;  %v4634_v43 = vld [vmem:[%s14916_s10 + $0x30] sm:$0xff] }
 0x2f4   :  { %9167 = vmatpush3.bf16.msra.mxu0 %v9946_v19 }
 0x2f5   :  { %9196 = vmatprep.subr.bf16.mxu0 %v12432_v22 }
 0x2f6   :  { %3113 = vadd.xlane.f32.xlu0 %v3058_v1  ;;  %3115 = vadd.xlane.f32.xlu1 %v3059_v33  ;;  %v4636_v1 = vld [vmem:[%s14916_s10 + $0x40] sm:$0xff]  ;;  %v4639_v33 = vld [vmem:[%s14916_s10 + $0x58] sm:$0xff] }
 0x2fa   :  { %3117 = vadd.xlane.f32.xlu0 %v3060_v16  ;;  %3119 = vadd.xlane.f32.xlu1 %v3061_v63 }
 0x2fe   :  { %3121 = vadd.xlane.f32.xlu0 %v3062_v39  ;;  %3123 = vadd.xlane.f32.xlu1 %v3063_v12 }
 0x302   :  { %3125 = vadd.xlane.f32.xlu0 %v3064_v18  ;;  %3127 = vadd.xlane.f32.xlu1 %v3065_v45 }
 0x306   :  { %3129 = vadd.xlane.f32.xlu0 %v3066_v59 }
 0x313   :  { %4644 = vperm.xlu1 %9842, %v4628_v11  }
 0x317   :  { %4654 = vperm.xlu1 %9842, %v4630_v61  }
 0x31b   :  { %4659 = vperm.xlu1 %9842, %v4631_v54  }
 0x31c   :  { %4649 = vperm.xlu0 %9841, %v4629_v47  }
 0x31f   :  { %4669 = vperm.xlu1 %9842, %v4633_v36  }
 0x320   :  { %4664 = vperm.xlu0 %9841, %v4632_v37  }
 0x323   :  { %4679 = vperm.xlu1 %9842, %v4635_v49  }
 0x324   :  { %4674 = vperm.xlu0 %9841, %v4634_v43  }
 0x327   :  { %4689 = vperm.xlu1 %9842, %v4637_v31  }
 0x328   :  { %4684 = vperm.xlu0 %9841, %v4636_v1  }
 0x32b   :  { %4699 = vperm.xlu1 %9842, %v4639_v33  }
 0x32c   :  { %4694 = vperm.xlu0 %9841, %v4638_v56  }
 0x32f   :  { %4709 = vperm.xlu1 %9842, %v4641_v13  }
 0x330   :  { %4704 = vperm.xlu0 %9841, %v4640_v32  }
 0x33d   :  { %v3068_v38 = vpop.xlane.xlu1 %3067  ;;  %v3070_v16 = vpop.xlane.xlu0 %3069 }
 0x33e   :  { %v3131_v48 = vadd.f32 %v3070_v16, %v3068_v38 }
 0x341   :  { %v3072_v63 = vpop.xlane.xlu1 %3071  ;;  %v3074_v57 = vpop.xlane.xlu0 %3073 }
 0x342   :  { %v3132_v2 = vadd.f32 %v3131_v48, %v3072_v63 }
 0x344   :  { %v3133_v39 = vadd.f32 %v3132_v2, %v3074_v57 }
 0x345   :  { %v3076_v12 = vpop.xlane.xlu1 %3075  ;;  %v3078_v3 = vpop.xlane.xlu0 %3077 }
 0x346   :  { %v3134_v35 = vadd.f32 %v3133_v39, %v3076_v12 }
 0x348   :  { %v3135_v18 = vadd.f32 %v3134_v35, %v3078_v3 }
 0x349   :  { %v3080_v45 = vpop.xlane.xlu1 %3079  ;;  %v3082_v59 = vpop.xlane.xlu0 %3081 }
 0x34a   :  { %v3136_v20 = vadd.f32 %v3135_v18, %v3080_v45 }
 0x34c   :  { %v3137_v62 = vadd.f32 %v3136_v20, %v3082_v59 }
 0x34d   :  { %v3084_v11 = vpop.xlane.xlu1 %3083  ;;  %v3086_v61 = vpop.xlane.xlu0 %3085 }
 0x34e   :  { %v3138_v6 = vadd.f32 %v3137_v62, %v3084_v11 }
 0x350   :  { %v3139_v54 = vadd.f32 %v3138_v6, %v3086_v61 }
 0x351   :  { %v3088_v47 = vpop.xlane.xlu1 %3087  ;;  %v3090_v37 = vpop.xlane.xlu0 %3089 }
 0x352   :  { %v3140_v36 = vadd.f32 %v3139_v54, %v3088_v47 }
 0x354   :  { %v3141_v43 = vadd.f32 %v3140_v36, %v3090_v37 }
 0x355   :  { %v3092_v49 = vpop.xlane.xlu1 %3091  ;;  %v3094_v1 = vpop.xlane.xlu0 %3093 }
 0x356   :  { %v3142_v31 = vadd.f32 %v3141_v43, %v3092_v49 }
 0x358   :  { %v3143_v33 = vadd.f32 %v3142_v31, %v3094_v1 }
 0x359   :  { %v3096_v19 = vpop.xlane.xlu1 %3095 }
 0x35a   :  { %v3144_v32 = vadd.f32 %v3143_v33, %v3096_v19 }
 0x373   :  { %v3100_v56 = vpop.xlane.xlu1 %3099  ;;  %v3102_v13 = vpop.xlane.xlu0 %3101 }
 0x374   :  { %v3152_v63 = vadd.f32 %v3102_v13, %v3100_v56 }
 0x377   :  { %v3098_v38 = vpop.xlane.xlu1 %3097  ;;  %v3104_v16 = vpop.xlane.xlu0 %3103 }
 0x378   :  { %v3145_v48 = vadd.f32 %v3144_v32, %v3098_v38  ;;  %v3153_v57 = vadd.f32 %v3152_v63, %v3104_v16 }
 0x37a   :  { %v3146_v2 = vrot.slane %v3145_v48, 4 }
 0x37b   :  { %v3108_v39 = vpop.xlane.xlu1 %3107  ;;  %v3106_v12 = vpop.xlane.xlu0 %3105 }
 0x37c   :  { %v3147_v35 = vadd.f32 %v3146_v2, %v3145_v48  ;;  %v3154_v3 = vadd.f32 %v3153_v57, %v3106_v12  ;;  %v12438_v12 = vld [vmem:[%s14917_s3] sm:$0xff] }
 0x37e   :  { %v3148_v18 = vrot.slane %v3147_v35, 2  ;;  %v3155_v45 = vadd.f32 %v3154_v3, %v3108_v39 }
 0x37f   :  { %v3112_v20 = vpop.xlane.xlu1 %3111  ;;  %v3110_v59 = vpop.xlane.xlu0 %3109 }
 0x380   :  { %v3149_v62 = vadd.f32 %v3148_v18, %v3147_v35  ;;  %v3156_v11 = vadd.f32 %v3155_v45, %v3110_v59  ;;  %v12445_v18 = vld [vmem:[%s14917_s3 + $0x8] sm:$0xff]  ;;  %v12450_v45 = vld [vmem:[%s14917_s3 + $0x10] sm:$0xff] }
 0x382   :  { %v3150_v6 = vrot.slane %v3149_v62, 1  ;;  %v3157_v61 = vadd.f32 %v3156_v11, %v3112_v20  ;;  %v12455_v20 = vld [vmem:[%s14917_s3 + $0x18] sm:$0xff] }
 0x383   :  { %v3116_v54 = vpop.xlane.xlu1 %3115  ;;  %v3114_v47 = vpop.xlane.xlu0 %3113 }
 0x384   :  { %v3151_v36 = vadd.f32 %v3150_v6, %v3149_v62  ;;  %v3158_v37 = vadd.f32 %v3157_v61, %v3114_v47  ;;  %v12468_v61 = vld [vmem:[%s14918_s4] sm:$0xff]  ;;  %v12493_v47 = vld [vmem:[%s14918_s4 + $0x18] sm:$0xff] }
 0x386   :  { %v3173_v49 = vmul.f32 7.8125e-05, %v3151_v36  ;;  %v3159_v43 = vadd.f32 %v3158_v37, %v3116_v54  ;;  %v12473_v54 = vld [vmem:[%s14917_s3 + $0x20] sm:$0xff] }
 0x387   :  { %v3120_v31 = vpop.xlane.xlu1 %3119  ;;  %v3118_v1 = vpop.xlane.xlu0 %3117 }
 0x388   :  { %v3175_v19 = vadd.f32 1e-05, %v3173_v49  ;;  %v3160_v33 = vadd.f32 %v3159_v43, %v3118_v1 }
 0x38a   :  { %10007 = vrsqrt.f32 %v3175_v19  ;;  %v3161_v56 = vadd.f32 %v3160_v33, %v3120_v31  ;;  %v12508_v33 = vld [vmem:[%s14918_s4 + $0x20] sm:$0xff] }
 0x38b   :  { %v3124_v13 = vpop.xlane.xlu1 %3123  ;;  %v3122_v32 = vpop.xlane.xlu0 %3121 }
 0x38c   :  { %v3162_v38 = vadd.f32 %v3161_v56, %v3122_v32 }
 0x38e   :  { %v3163_v16 = vadd.f32 %v3162_v38, %v3124_v13 }
 0x38f   :  { %v3126_v63 = vpop.xlane.xlu0 %3125  ;;  %v3128_v2 = vpop.xlane.xlu1 %3127 }
 0x390   :  { %v3164_v48 = vadd.f32 %v3163_v16, %v3126_v63 }
 0x392   :  { %v3165_v57 = vadd.f32 %v3164_v48, %v3128_v2  ;;  %v12531_v2 = vld [vmem:[%s14917_s3 + $0x38] sm:$0xff] }
 0x393   :  { %v3130_v39 = vpop.xlane.xlu0 %3129 }
 0x394   :  { %v12440_v35 = vpop.eup %10007  ;;  %v3166_v3 = vadd.f32 %v3165_v57, %v3130_v39 }
 0x395   :  { %v3179_v59 = vmul.f32 %v12440_v35, %v12193_v53  ;;  %v3180_v62 = vmul.f32 %v12440_v35, %v12189_v15  ;;  %v3181_v11 = vmul.f32 %v12440_v35, %v12201_v17  ;;  %v3182_v6 = vmul.f32 %v12440_v35, %v12197_v0  ;;  %v12478_v15 = vld [vmem:[%s14917_s3 + $0x28] sm:$0xff]  ;;  %v12488_v17 = vld [vmem:[%s14918_s4 + $0x10] sm:$0xff] }
 0x396   :  { %v3167_v53 = vrot.slane %v3166_v3, 4  ;;  %v12483_v0 = vld [vmem:[%s14918_s4 + $0x8] sm:$0xff]  ;;  %v3183_v36 = vmul.f32 %v12440_v35, %v12213_v52  ;;  %v3184_v37 = vmul.f32 %v12440_v35, %v12209_v42  ;;  %v3185_v49 = vmul.f32 %v12440_v35, %v12225_v51  ;;  %v12518_v52 = vld [vmem:[%s14917_s3 + $0x30] sm:$0xff] }
 0x397   :  { %v3227_v43 = vmul.f32 %v12438_v12, %v3179_v59  ;;  %v3228_v31 = vmul.f32 %v12445_v18, %v3180_v62  ;;  %v3229_v1 = vmul.f32 %v12450_v45, %v3181_v11  ;;  %v3230_v19 = vmul.f32 %v12455_v20, %v3182_v6  ;;  %v12513_v42 = vld [vmem:[%s14918_s4 + $0x28] sm:$0xff]  ;;  %v12539_v59 = vld [vmem:[%s14918_s4 + $0x30] sm:$0xff] }
 0x398   :  { %v3168_v51 = vadd.f32 %v3167_v53, %v3166_v3  ;;  %v3231_v56 = vmul.f32 %v12473_v54, %v3183_v36  ;;  %v3232_v13 = vmul.f32 %v12478_v15, %v3184_v37  ;;  %v3186_v32 = vmul.f32 %v12440_v35, %v12221_v14  ;;  %v12544_v36 = vld [vmem:[%s14918_s4 + $0x38] sm:$0xff] }
 0x399   :  { %v3275_v38 = vadd.f32 %v12468_v61, %v3227_v43  ;;  %v3276_v16 = vadd.f32 %v12483_v0, %v3228_v31  ;;  %v3277_v63 = vadd.f32 %v12488_v17, %v3229_v1  ;;  %v3278_v48 = vadd.f32 %v12493_v47, %v3230_v19 }
 0x39a   :  { %v3169_v57 = vrot.slane %v3168_v51, 2  ;;  %v3279_v39 = vadd.f32 %v12508_v33, %v3231_v56  ;;  %v3280_v3 = vadd.f32 %v12513_v42, %v3232_v13  ;;  %v3233_v14 = vmul.f32 %v12518_v52, %v3185_v49 }
 0x39b   :  { %v3307_v62 = vmax.f32 %v3275_v38, 0.0  ;;  %v3308_v11 = vmax.f32 %v3276_v16, 0.0  ;;  %v3309_v6 = vmax.f32 %v3277_v63, 0.0  ;;  %v3310_v53 = vmax.f32 %v3278_v48, 0.0 }
 0x39c   :  { %v3170_v37 = vadd.f32 %v3169_v57, %v3168_v51  ;;  %v3311_v43 = vmax.f32 %v3279_v39, 0.0  ;;  %v3312_v31 = vmax.f32 %v3280_v3, 0.0  ;;  %v3234_v1 = vmul.f32 %v12531_v2, %v3186_v32  ;;  %v12562_v32 = vld [vmem:[%s14917_s3 + $0x40] sm:$0xff]  ;;  %v12572_v3 = vld [vmem:[%s14917_s3 + $0x48] sm:$0xff] }
 0x39d   :  { %v12547_v49 = vpack.c.bf16 %v3308_v11, %v3307_v62  ;;  %v12549_v19 = vpack.c.bf16 %v3310_v53, %v3309_v6  ;;  %v3281_v56 = vadd.f32 %v12539_v59, %v3233_v14  ;;  %v3187_v13 = vmul.f32 %v12440_v35, %v12244_v55  ;;  %v12578_v6 = vld [vmem:[%s14918_s4 + $0x40] sm:$0xff] }
 0x39e   :  { %v3171_v38 = vrot.slane %v3170_v37, 1  ;;  %v12554_v16 = vpack.c.bf16 %v3312_v31, %v3311_v43  ;;  %v3282_v63 = vadd.f32 %v12544_v36, %v3234_v1  ;;  %v3188_v51 = vmul.f32 %v12440_v35, %v12240_v44 }
 0x39f   :  { %15053 = vst [vmem:[#allocation16_spill] sm:$0xff] %v12547_v49  ;;  %3355 = vst [vmem:[#allocation2] sm:$0xff] %v12547_v49  ;;  %v3419_v48 = vshrl.u32 %v12547_v49, 16  ;;  %v3421_v57 = vshll.u32 %v12547_v49, 16  ;;  %v14936_v55 = vshll.u32 %v12549_v19, 16  ;;  %v3313_v62 = vmax.f32 %v3281_v56, 0.0 }
 0x3a0   :  { %v3172_v44 = vadd.f32 %v3171_v38, %v3170_v37  ;;  %v14941_v14 = vshll.u32 %v12554_v16, 16  ;;  %v3314_v11 = vmax.f32 %v3282_v63, 0.0  ;;  %v3235_v1 = vmul.f32 %v12562_v32, %v3187_v13  ;;  %v12587_v37 = vld [vmem:[%s14918_s4 + $0x48] sm:$0xff] }
 0x3a1   :  { %v3423_v53 = vrot.slane %v3421_v57, 1  ;;  %v3428_v43 = vrot.slane %v14936_v55, 1  ;;  %v3236_v57 = vmul.f32 %v12572_v3, %v3188_v51  ;;  %v15055_v55 = vshrl.u32 %v12549_v19, 16  ;;  %v12606_v51 = vld [vmem:[%s14917_s3 + $0x50] sm:$0xff] }
 0x3a2   :  { %v3174_v56 = vmul.f32 7.8125e-05, %v3172_v44  ;;  %v3436_v38 = vrot.slane %v14941_v14, 1  ;;  %v12591_v63 = vpack.c.bf16 %v3314_v11, %v3313_v62  ;;  %v3283_v31 = vadd.f32 %v12578_v6, %v3235_v1 }
 0x3a3   :  { %v3424_v39 = vor.u32 %v3423_v53, %v3419_v48  ;;  %v3432_v49 = vor.u32 %v15055_v55, %v3428_v43  ;;  %v15056_v23 = vshrl.u32 %v12554_v16, 16  ;;  %v3284_v44 = vadd.f32 %v12587_v37, %v3236_v57  ;;  %v9948_v48 = vld [vmem:[%s14915_s6 + $0x8] sm:$0xff]   ;;  %v12623_v53 = vld [vmem:[%s14917_s3 + $0x60] sm:$0xff] }
 0x3a4   :  { %15054 = vst [vmem:[#allocation9_spill] sm:$0xff] %v12591_v63  ;;  %v3176_v13 = vadd.f32 1e-05, %v3174_v56  ;;  %v14942_v25 = vshll.u32 %v12591_v63, 16  ;;  %v3315_v11 = vmax.f32 %v3283_v31, 0.0  ;;  %15057 = vst [vmem:[#allocation10_spill] sm:$0xff] %v12623_v53  ;;  %v3191_v1 = vmul.f32 %v12440_v35, %v12264_v7 }
 0x3a5   :  { %v3440_v27 = vor.u32 %v15056_v23, %v3436_v38  ;;  %v3429_v14 = vsel %vm3417_vm9, %v3424_v39, %v3428_v43  ;;  %v3437_v62 = vsel %vm3417_vm9, %v3432_v49, %v3436_v38  ;;  %v3316_v55 = vmax.f32 %v3284_v44, 0.0  ;;  %v12618_v49 = vld [vmem:[%s14917_s3 + $0x58] sm:$0xff]  ;;  %v12657_v7 = vld [vmem:[%s14918_s4 + $0x60] sm:$0xff] }
 0x3a6   :  { %10009 = vrsqrt.f32 %v3176_v13  ;;  %9168 = vmatprep.mubr.bf16.mxu0 %v3429_v14  ;;  %v3444_v23 = vrot.slane %v14942_v25, 1  ;;  %v3189_v39 = vmul.f32 %v12440_v35, %v12256_v21  ;;  %v12628_v14 = vld [vmem:[%s14917_s3 + $0x68] sm:$0xff]  ;;  %v3190_v43 = vmul.f32 %v12440_v35, %v12252_v34  ;;  %v12635_v21 = vld [vmem:[%s14918_s4 + $0x50] sm:$0xff]  ;;  %v12640_v31 = vld [vmem:[%s14918_s4 + $0x58] sm:$0xff] }
 0x3a7   :  { %15058 = vst [vmem:[#allocation18_spill] sm:$0xff] %v12628_v14  ;;  %9169 = vmatmul.mubr.bf16.vlgmr.msra.gmra.mrb[160].mxu0 %v3437_v62  ;;  %15059 = vst [vmem:[#allocation11_spill] sm:$0xff] %v12640_v31  ;;  %v3192_v56 = vmul.f32 %v12440_v35, %v12260_v10  ;;  %v3193_v38 = vmul.f32 %v12440_v35, %v12274_v24  ;;  %v12650_v57 = vpack.c.bf16 %v3316_v55, %v3315_v11  ;;  %v12662_v10 = vld [vmem:[%s14918_s4 + $0x68] sm:$0xff]  ;;  %v12667_v24 = vld [vmem:[%s14917_s3 + $0x70] sm:$0xff] }
 0x3a8   :  { %v3445_v34 = vsel %vm3417_vm9, %v3440_v27, %v3444_v23  ;;  %9197 = vmatpush3.bf16.msra.mxu0 %v12432_v22  ;;  %v14945_v13 = vshrl.u32 %v12591_v63, 16  ;;  %v3237_v44 = vmul.f32 %v12606_v51, %v3189_v39  ;;  %15060 = vst [vmem:[#allocation12_spill] sm:$0xff] %v12662_v10  ;;  %v3238_v27 = vmul.f32 %v12618_v49, %v3190_v43  ;;  %v12675_v11 = vld [vmem:[%s14917_s3 + $0x78] sm:$0xff]  ;;  %v9949_v55 = vld [vmem:[%s14915_s6 + $0x10] sm:$0xff]  }
 0x3a9   :  { %9172 = vmatprep.mubr.bf16.mxu0 %v3445_v34  ;;  %9198 = vmatprep.subr.bf16.mxu0 %v9948_v48  ;;  %v3239_v22 = vmul.f32 %v12623_v53, %v3191_v1  ;;  %v3240_v62 = vmul.f32 %v12628_v14, %v3192_v56  ;;  %v14950_v34 = vshll.u32 %v12650_v57, 16  ;;  %v3194_v1 = vmul.f32 %v12440_v35, %v12294_v40  ;;  %v12689_v56 = vld [vmem:[%s14918_s4 + $0x70] sm:$0xff] }
 0x3aa   :  { %v3448_v39 = vor.u32 %v14945_v13, %v3444_v23  ;;  %v3285_v43 = vadd.f32 %v12635_v21, %v3237_v44  ;;  %15061 = vst [vmem:[#allocation19_spill] sm:$0xff] %v12689_v56  ;;  %v3286_v25 = vadd.f32 %v12640_v31, %v3238_v27  ;;  %v3241_v23 = vmul.f32 %v12667_v24, %v3193_v38  ;;  %v12698_v44 = vld [vmem:[%s14918_s4 + $0x78] sm:$0xff] }
 0x3ab   :  { %v3287_v14 = vadd.f32 %v12657_v7, %v3239_v22  ;;  %v3288_v53 = vadd.f32 %v12662_v10, %v3240_v62  ;;  %v3452_v40 = vrot.slane %v14950_v34, 1  ;;  %v3242_v13 = vmul.f32 %v12675_v11, %v3194_v1  ;;  %v9950_v38 = vld [vmem:[%s14915_s6 + $0x18] sm:$0xff]  }
 0x3ac   :  { %v3317_v35 = vmax.f32 %v3285_v43, 0.0  ;;  %9199 = vmatpush3.bf16.msra.mxu0 %v9948_v48  ;;  %v3318_v63 = vmax.f32 %v3286_v25, 0.0  ;;  %v3289_v22 = vadd.f32 %v12689_v56, %v3241_v23  ;;  %v14952_v10 = vshrl.u32 %v12650_v57, 16 }
 0x3ad   :  { %v3319_v27 = vmax.f32 %v3287_v14, 0.0  ;;  %v3320_v31 = vmax.f32 %v3288_v53, 0.0  ;;  %9200 = vmatprep.subr.bf16.mxu0 %v9949_v55  ;;  %v3453_v62 = vsel %vm3417_vm9, %v3448_v39, %v3452_v40  ;;  %v3290_v34 = vadd.f32 %v12698_v44, %v3242_v13 }
 0x3ae   :  { %v12710_v48 = vpack.c.bf16 %v3318_v63, %v3317_v35  ;;  %v3321_v25 = vmax.f32 %v3289_v22, 0.0  ;;  %v15062_v14 = vshrl.u32 %v12554_v16, 16  ;;  %v3456_v23 = vor.u32 %v14952_v10, %v3452_v40 }
 0x3af   :  { %9173 = vmatmul.mubr.bf16.gmra.mrb[164].mxu0 %v3453_v62  ;;  %v12712_v43 = vpack.c.bf16 %v3320_v31, %v3319_v27  ;;  %v3322_v39 = vmax.f32 %v3290_v34, 0.0  ;;  %v15063_v56 = vshrl.u32 %v12549_v19, 16  ;;  %v9951_v27 = vld [vmem:[%s14915_s6 + $0x20] sm:$0xff]   ;;  %v15064_v22 = vshll.u32 %v12549_v19, 16 }
 0x3b0   :  { %v12714_v53 = vpop.eup %10009  ;;  %v12718_v1 = vrot.slane %v15062_v14, 5  ;;  %9201 = vmatpush3.bf16.msra.mxu0 %v9949_v55  ;;  %v14953_v63 = vshll.u32 %v12710_v48, 16  ;;  %v3462_v31 = vshrl.u32 %v12710_v48, 16 }
 0x3b1   :  { %v12724_v13 = vrot.slane %v15063_v56, 5  ;;  %9202 = vmatprep.subr.bf16.mxu0 %v9950_v38  ;;  %v12734_v40 = vrot.slane %v15064_v22, 6  ;;  %v3346_v55 = vpack.c.bf16 %v3322_v39, %v3321_v25  ;;  %v3195_v34 = vmul.f32 %v12714_v53, %v12300_v29 }
 0x3b2   :  { %v3196_v56 = vmul.f32 %v12714_v53, %v12297_v58  ;;  %v3197_v62 = vmul.f32 %v12714_v53, %v12303_v30  ;;  %v3460_v14 = vrot.slane %v14953_v63, 1  ;;  %v3198_v35 = vmul.f32 %v12714_v53, %v12312_v41 }
 0x3b3   :  { %v3199_v25 = vmul.f32 %v12714_v53, %v12317_v26  ;;  %3362 = vst [vmem:[#allocation2 + $0x38] sm:$0xff] %v3346_v55  ;;  %v3243_v29 = vmul.f32 %v12438_v12, %v3195_v34  ;;  %v3200_v30 = vmul.f32 %v12714_v53, %v12320_v60  ;;  %v15065_v41 = vshll.u32 %v12712_v43, 16 }
 0x3b4   :  { %9203 = vmatpush3.bf16.msra.mxu0 %v9950_v38  ;;  %v3244_v58 = vmul.f32 %v12445_v18, %v3196_v56  ;;  %v3245_v39 = vmul.f32 %v12450_v45, %v3197_v62  ;;  %v3461_v22 = vsel %vm3417_vm9, %v3456_v23, %v3460_v14  ;;  %v3464_v63 = vor.u32 %v3462_v31, %v3460_v14  ;;  %v9952_v38 = vld [vmem:[%s14915_s6 + $0x28] sm:$0xff]  }
 0x3b5   :  { %v3468_v10 = vrot.slane %v15065_v41, 1  ;;  %v3246_v26 = vmul.f32 %v12455_v20, %v3198_v35  ;;  %9204 = vmatprep.subr.bf16.mxu0 %v9951_v27  ;;  %9176 = vmatprep.mubr.bf16.mxu0 %v3461_v22  ;;  %v3291_v12 = vadd.f32 %v12468_v61, %v3243_v29  ;;  %v3247_v60 = vmul.f32 %v12473_v54, %v3199_v25 }
 0x3b6   :  { %v3292_v18 = vadd.f32 %v12483_v0, %v3244_v58  ;;  %v3293_v45 = vadd.f32 %v12488_v17, %v3245_v39  ;;  %v3248_v20 = vmul.f32 %v12478_v15, %v3200_v30  ;;  %v3201_v35 = vmul.f32 %v12714_v53, %v12327_v28 }
 0x3b7   :  { %v3469_v23 = vsel %vm3417_vm9, %v3464_v63, %v3468_v10  ;;  %v3294_v55 = vadd.f32 %v12493_v47, %v3246_v26  ;;  %v3323_v61 = vmax.f32 %v3291_v12, 0.0  ;;  %v3295_v17 = vadd.f32 %v12508_v33, %v3247_v60  ;;  %v9953_v33 = vld [vmem:[%s14915_s6 + $0x30] sm:$0xff]  }
 0x3b8   :  { %9177 = vmatmul.mubr.bf16.gmra.mrb[168].mxu0 %v3469_v23  ;;  %v3324_v0 = vmax.f32 %v3292_v18, 0.0  ;;  %v3325_v34 = vmax.f32 %v3293_v45, 0.0  ;;  %v3296_v56 = vadd.f32 %v12513_v42, %v3248_v20  ;;  %v3202_v63 = vmul.f32 %v12714_v53, %v12332_v50  ;;  %v9954_v18 = vld [vmem:[%s14915_s6 + $0x38] sm:$0xff]  }
 0x3b9   :  { %v3326_v54 = vmax.f32 %v3294_v55, 0.0  ;;  %9205 = vmatpush3.bf16.msra.mxu0 %v9951_v27  ;;  %v3249_v47 = vmul.f32 %v12518_v52, %v3201_v35  ;;  %v3327_v15 = vmax.f32 %v3295_v17, 0.0  ;;  %v3203_v28 = vmul.f32 %v12714_v53, %v12337_v5 }
 0x3ba   :  { %v12777_v62 = vpack.c.bf16 %v3324_v0, %v3323_v61  ;;  %v3204_v14 = vmul.f32 %v12714_v53, %v12344_v9  ;;  %9206 = vmatprep.subr.bf16.mxu0 %v9952_v38  ;;  %v3408_v42 = vld [vmem:[#allocation2 + $0x38] sm:$0x1]  ;;  %v3328_v50 = vmax.f32 %v3296_v56, 0.0  ;;  %v3250_v52 = vmul.f32 %v12531_v2, %v3202_v63 }
 0x3bb   :  { %v12786_v27 = vpack.c.bf16 %v3326_v54, %v3325_v34  ;;  %v3297_v25 = vadd.f32 %v12539_v59, %v3249_v47  ;;  %v15066_v29 = vshrl.u32 %v12712_v43, 16  ;;  %v3474_v5 = vshll.u32 %v3408_v42, 16  ;;  %v15067_v42 = vld [vmem:[#allocation15_spill] sm:$0xff] }
 0x3bc   :  { %3363 = vst [vmem:[#allocation2 + $0x40] sm:$0xff] %v12777_v62  ;;  %v3481_v9 = vshll.u32 %v12777_v62, 16  ;;  %v3251_v39 = vmul.f32 %v12562_v32, %v3203_v28  ;;  %v3479_v30 = vshrl.u32 %v12777_v62, 16  ;;  %v12797_v41 = vpack.c.bf16 %v3328_v50, %v3327_v15 }
 0x3bd   :  { %v3472_v58 = vor.u32 %v15066_v29, %v3468_v10  ;;  %v3486_v22 = vshll.u32 %v12786_v27, 16  ;;  %v3298_v2 = vadd.f32 %v12544_v36, %v3250_v52  ;;  %9207 = vmatpush3.bf16.msra.mxu0 %v9952_v38  ;;  %v3476_v59 = vrot.slane %v3474_v5, 1  ;;  %v15068_v52 = vld [vmem:[#allocation7_spill] sm:$0xff]  ;;  %v15069_v29 = vld [vmem:[#allocation8_spill] sm:$0xff] }
 0x3be   :  { %v3483_v26 = vrot.slane %v3481_v9, 1  ;;  %v3329_v12 = vmax.f32 %v3297_v25, 0.0  ;;  %v3252_v10 = vmul.f32 %v12572_v3, %v3204_v14  ;;  %9208 = vmatprep.subr.bf16.mxu0 %v9953_v33  ;;  %v3490_v45 = vshrl.u32 %v12786_v27, 16  ;;  %v15070_v5 = vld [vmem:[#allocation11_spill] sm:$0xff] }
 0x3bf   :  { %v3488_v32 = vrot.slane %v3486_v22, 1  ;;  %v3494_v60 = vshll.u32 %v12797_v41, 16  ;;  %v3330_v23 = vmax.f32 %v3298_v2, 0.0  ;;  %v3477_v36 = vsel %vm3417_vm9, %v3472_v58, %v3476_v59  ;;  %v15072_v59 = vld [vmem:[#allocation18_spill] sm:$0xff] }
 0x3c0   :  { %v3484_v38 = vor.u32 %v3483_v26, %v3479_v30  ;;  %v3299_v55 = vadd.f32 %v12578_v6, %v3251_v39  ;;  %v3300_v3 = vadd.f32 %v12587_v37, %v3252_v10  ;;  %9180 = vmatprep.mubr.bf16.mxu0 %v3477_v36  ;;  %v3205_v0 = vmul.f32 %v12714_v53, %v12347_v4  ;;  %v12825_v37 = vld [vmem:[%s14915_s6 + $0x80] sm:$0xff]  }
 0x3c1   :  { %v3492_v20 = vor.u32 %v3490_v45, %v3488_v32  ;;  %v3496_v35 = vrot.slane %v3494_v60, 1  ;;  %v12815_v61 = vpack.c.bf16 %v3330_v23, %v3329_v12  ;;  %9209 = vmatpush3.bf16.msra.mxu0 %v9953_v33  ;;  %v3206_v6 = vmul.f32 %v12714_v53, %v12350_v46  ;;  %v15071_v30 = vld [vmem:[#allocation10_spill] sm:$0xff] }
 0x3c2   :  { %v3489_v34 = vsel %vm3417_vm9, %v3484_v38, %v3488_v32  ;;  %v3331_v17 = vmax.f32 %v3299_v55, 0.0  ;;  %v3332_v54 = vmax.f32 %v3300_v3, 0.0  ;;  %9210 = vmatprep.subr.bf16.mxu0 %v9954_v18  ;;  %v3498_v63 = vshrl.u32 %v12797_v41, 16  ;;  %v15074_v38 = vld [vmem:[#allocation12_spill] sm:$0xff] }
 0x3c3   :  { %9181 = vmatmul.mubr.bf16.gmra.mrb[172].mxu0 %v3489_v34  ;;  %v3497_v56 = vsel %vm3417_vm9, %v3492_v20, %v3496_v35  ;;  %v3502_v4 = vshll.u32 %v12815_v61, 16  ;;  %v3506_v47 = vshrl.u32 %v12815_v61, 16  ;;  %v3253_v46 = vmul.f32 %v12606_v51, %v3205_v0  ;;  %v15075_v34 = vld [vmem:[#allocation19_spill] sm:$0xff] }
 0x3c4   :  { %9184 = vmatprep.mubr.bf16.mxu0 %v3497_v56  ;;  %v12831_v15 = vpack.c.bf16 %v3332_v54, %v3331_v17  ;;  %v3254_v28 = vmul.f32 %v12618_v49, %v3206_v6  ;;  %v3207_v14 = vmul.f32 %v12714_v53, %v12357_v8  ;;  %v3208_v50 = vmul.f32 %v12714_v53, %v15067_v42 }
 0x3c5   :  { %v3504_v33 = vrot.slane %v3502_v4, 1  ;;  %v3209_v25 = vmul.f32 %v12714_v53, %v15068_v52  ;;  %v3210_v58 = vmul.f32 %v12714_v53, %v15069_v29  ;;  %9211 = vmatpush3.bf16.msra.mxu0 %v9954_v18  ;;  %v3500_v51 = vor.u32 %v3498_v63, %v3496_v35 }
 0x3c6   :  { %v3510_v49 = vshll.u32 %v12831_v15, 16  ;;  %v3301_v8 = vadd.f32 %v12635_v21, %v3253_v46  ;;  %v3302_v9 = vadd.f32 %v15070_v5, %v3254_v28  ;;  %9240 = vmatprep.subr.bf16.mxu0 %v12825_v37  ;;  %v3255_v2 = vmul.f32 %v15071_v30, %v3207_v14 }
 0x3c7   :  { %v3508_v39 = vor.u32 %v3506_v47, %v3504_v33  ;;  %v3256_v26 = vmul.f32 %v15072_v59, %v3208_v50  ;;  %v15073_v53 = vshll.u32 %v12554_v16, 16  ;;  %v3257_v21 = vmul.f32 %v12667_v24, %v3209_v25  ;;  %v15076_v50 = vld [vmem:[#allocation9_spill] sm:$0xff] }
 0x3c8   :  { %v3512_v10 = vrot.slane %v3510_v49, 1  ;;  %v3333_v18 = vmax.f32 %v3301_v8, 0.0  ;;  %v3334_v32 = vmax.f32 %v3302_v9, 0.0  ;;  %v3514_v23 = vshrl.u32 %v12831_v15, 16 }
 0x3c9   :  { %v3972_v12 = vrot.slane %v15073_v53, 6  ;;  %v3303_v36 = vadd.f32 %v12657_v7, %v3255_v2  ;;  %v3304_v55 = vadd.f32 %v15074_v38, %v3256_v26  ;;  %v3258_v3 = vmul.f32 %v12675_v11, %v3210_v58 }
 0x3ca   :  { %v3505_v20 = vsel %vm3417_vm9, %v3500_v51, %v3504_v33  ;;  %v3513_v35 = vsel %vm3417_vm9, %v3508_v39, %v3512_v10  ;;  %v12866_v0 = vpack.c.bf16 %v3334_v32, %v3333_v18  ;;  %v3305_v17 = vadd.f32 %v15075_v34, %v3257_v21 }
 0x3cb   :  { %9185 = vmatmul.mubr.bf16.gmra.mrb[176].mxu0 %v3505_v20  ;;  %v3335_v54 = vmax.f32 %v3303_v36, 0.0  ;;  %v3336_v6 = vmax.f32 %v3304_v55, 0.0  ;;  %v3306_v24 = vadd.f32 %v12698_v44, %v3258_v3  ;;  %v12872_v7 = vor.u32 %v12734_v40, %v12724_v13 }
 0x3cc   :  { %9188 = vmatprep.mubr.bf16.mxu0 %v3513_v35  ;;  %v3516_v56 = vor.u32 %v3514_v23, %v3512_v10  ;;  %v3518_v11 = vshll.u32 %v12866_v0, 16  ;;  %v3337_v46 = vmax.f32 %v3305_v17, 0.0  ;;  %v3973_v28 = vor.u32 %v3972_v12, %v12718_v1 }
 0x3cd   :  { %v12876_v14 = vpack.c.bf16 %v3336_v6, %v3335_v54  ;;  %v3522_v33 = vshrl.u32 %v12866_v0, 16  ;;  %v3338_v42 = vmax.f32 %v3306_v24, 0.0  ;;  %v15077_v52 = vshrl.u32 %v15076_v50, 16 }
 0x3ce   :  { %v3520_v44 = vrot.slane %v3518_v11, 1  ;;  %v12883_v13 = vsel %vm1320_vm3, %v12872_v7, %v3973_v28  ;;  %v15078_v40 = vshll.u32 %v15076_v50, 16  ;;  %v15079_v58 = vshrl.u32 %v12650_v57, 16 }
 0x3cf   :  { %v3975_v25 = vrot.slane %v15077_v52, 5  ;;  %v3526_v1 = vshll.u32 %v12876_v14, 16  ;;  %v3354_v8 = vpack.c.bf16 %v3338_v42, %v3337_v46  ;;  %v15080_v5 = vshll.u32 %v12650_v57, 16 }
 0x3d0   :  { %v3976_v29 = vrot.slane %v15078_v40, 6  ;;  %v3979_v51 = vrot.slane %v15079_v58, 5  ;;  %v3524_v39 = vor.u32 %v3522_v33, %v3520_v44  ;;  %v3983_v2 = vrot.slane %v3462_v31, 5 }
 0x3d1   :  { %v3980_v9 = vrot.slane %v15080_v5, 6  ;;  %v3528_v59 = vrot.slane %v3526_v1, 1  ;;  %3370 = vst [vmem:[#allocation2 + $0x78] sm:$0xff] %v3354_v8  ;;  %v15081_v53 = vshll.u32 %v12710_v48, 16  ;;  %v15082_v10 = vshrl.u32 %v12712_v43, 16 }
 0x3d2   :  { %v3977_v30 = vor.u32 %v3976_v29, %v3975_v25  ;;  %v3521_v32 = vsel %vm3417_vm9, %v3516_v56, %v3520_v44  ;;  %v15083_v36 = vshll.u32 %v12712_v43, 16  ;;  %v4008_v34 = vrot.slane %v3490_v45, 5 }
 0x3d3   :  { %v3981_v26 = vor.u32 %v3980_v9, %v3979_v51  ;;  %v3984_v12 = vrot.slane %v15081_v53, 6  ;;  %v3987_v18 = vrot.slane %v15082_v10, 5  ;;  %9189 = vmatmul.mubr.bf16.gmra.mrb[180].mxu0 %v3521_v32  ;;  %v3529_v31 = vsel %vm3417_vm9, %v3524_v39, %v3528_v59  ;;  %v15084_v39 = vld [vmem:[#allocation16_spill] sm:$0xff]  ;;  %v9963_v10 = vld [vmem:[%s14915_s6 + $0xc0] sm:$0xff]  }
 0x3d4   :  { %v12900_v21 = vsel %vm1320_vm3, %v3973_v28, %v3977_v30  ;;  %v3988_v38 = vrot.slane %v15083_v36, 6  ;;  %9192 = vmatprep.mubr.bf16.mxu0 %v3529_v31  ;;  %v4009_v17 = vrot.slane %v3486_v22, 6  ;;  %v3530_v54 = vshrl.u32 %v12876_v14, 16  ;;  %v9961_v53 = vld [vmem:[%s14915_s6 + $0xb0] sm:$0xff]  }
 0x3d5   :  { %v12906_v55 = vsel %vm1320_vm3, %v3977_v30, %v3981_v26  ;;  %v3985_v3 = vor.u32 %v3984_v12, %v3983_v2  ;;  %v4012_v24 = vrot.slane %v3498_v63, 5  ;;  %v4013_v46 = vrot.slane %v3494_v60, 6  ;;  %v9956_v30 = vld [vmem:[%s14915_s6 + $0x88] sm:$0xff]   ;;  %v9957_v2 = vld [vmem:[%s14915_s6 + $0x90] sm:$0xff]   ;;  %v9962_v12 = vld [vmem:[%s14915_s6 + $0xb8] sm:$0xff]  }
 0x3d6   :  { %v12908_v20 = vor.u32 %v3988_v38, %v3987_v18  ;;  %v12924_v56 = vor.u32 %v4009_v17, %v4008_v34  ;;  %v4016_v45 = vrot.slane %v3506_v47, 5  ;;  %v4017_v22 = vrot.slane %v3502_v4, 6  ;;  %v3955_v18 = vld [vmem:[#allocation2] sm:$0xe0]  ;;  %v9964_v34 = vld [vmem:[%s14915_s6 + $0xc8] sm:$0xff]  }
 0x3d7   :  { %v12911_v35 = vsel %vm1320_vm3, %v3981_v26, %v3985_v3  ;;  %v4020_v42 = vrot.slane %v3514_v23, 5  ;;  %v4021_v52 = vrot.slane %v3510_v49, 6  ;;  %v4014_v44 = vor.u32 %v4013_v46, %v4012_v24  ;;  %v9960_v26 = vld [vmem:[%s14915_s6 + $0xa8] sm:$0xff]   ;;  %v13000_v17 = vld [vmem:[#allocation2 + $0x38] sm:$0x3f] }
 0x3d8   :  { %v12920_v6 = vsel %vm1320_vm3, %v3985_v3, %v12908_v20  ;;  %v3416_v28 = vld [vmem:[#allocation2 + $0x78] sm:$0x1]  ;;  %v4024_v40 = vrot.slane %v3522_v33, 5  ;;  %v4018_v63 = vor.u32 %v4017_v22, %v4016_v45  ;;  %v4025_v58 = vrot.slane %v3518_v11, 6  ;;  %v3957_v45 = vld [vmem:[#allocation2 + $0x40] sm:$0xe0] }
 0x3d9   :  { %v3534_v25 = vshll.u32 %v3416_v28, 16  ;;  %v4022_v29 = vor.u32 %v4021_v52, %v4020_v42  ;;  %v4028_v51 = vrot.slane %v3530_v54, 5  ;;  %v3532_v8 = vor.u32 %v3530_v54, %v3528_v59  ;;  %v9958_v59 = vld [vmem:[%s14915_s6 + $0x98] sm:$0xff]   ;;  %v9965_v54 = vld [vmem:[%s14915_s6 + $0xd0] sm:$0xff]   ;;  %v9967_v28 = vld [vmem:[%s14915_s6 + $0xe0] sm:$0xff]  }
 0x3da   :  { %v12936_v47 = vsel %vm1320_vm3, %v12924_v56, %v4014_v44  ;;  %v4029_v5 = vrot.slane %v3526_v1, 6  ;;  %v12939_v4 = vsel %vm1320_vm3, %v4014_v44, %v4018_v63  ;;  %v4026_v49 = vor.u32 %v4025_v58, %v4024_v40  ;;  %v9969_v40 = vld [vmem:[%s14915_s6 + $0xf0] sm:$0xff]  }
 0x3db   :  { %v3536_v60 = vrot.slane %v3534_v25, 1  ;;  %v12942_v23 = vsel %vm1320_vm3, %v4018_v63, %v4022_v29  ;;  %v3960_v32 = vshrl.u32 %v3955_v18, 16  ;;  %v3963_v36 = vshll.u32 %v3955_v18, 16 }
 0x3dc   :  { %v12945_v9 = vor.u32 %v4029_v5, %v4028_v51  ;;  %v12948_v11 = vsel %vm1320_vm3, %v4022_v29, %v4026_v49  ;;  %v3992_v24 = vshrl.u32 %v13000_v17, 16  ;;  %v4001_v22 = vshrl.u32 %v3957_v45, 16  ;;  %v9970_v29 = vld [vmem:[%s14915_s6 + $0xf8] sm:$0xff]  }
 0x3dd   :  { %v3537_v33 = vsel %vm3417_vm9, %v3532_v8, %v3536_v60  ;;  %v3965_v38 = vrot.slane %v3963_v36, 6  ;;  %v4004_v42 = vshll.u32 %v3957_v45, 16  ;;  %v4333_v18 = vrot.slane %v12831_v15, 6 }
 0x3de   :  { %9193 = vmatmul.mubr.bf16.gmra.mrb[184].mxu0 %v3537_v33  ;;  %v12953_v1 = vsel %vm1320_vm3, %v4026_v49, %v12945_v9  ;;  %v4003_v25 = vrot.slane %v4001_v22, 5 }
 0x3df   :  { %9212 = vmatprep.mubr.bf16.mxu0 %v15084_v39  ;;  %v4006_v44 = vrot.slane %v4004_v42, 6  ;;  %v4316_v39 = vrot.slane %v15076_v50, 6 }
 0x3e1   :  { %v4007_v63 = vor.u32 %v4006_v44, %v4003_v25 }
 0x3e6   :  { %9213 = vmatmul.mubr.bf16.vlgmr.msra.gmra.mrb[160].mxu0 %v12549_v19 }
 0x3e7   :  { %9216 = vmatprep.mubr.bf16.mxu0 %v12554_v16  ;;  %9241 = vmatpush3.bf16.msra.mxu0 %v12825_v37  ;;  %v9959_v37 = vld [vmem:[%s14915_s6 + $0xa0] sm:$0xff]  }
 0x3e8   :  { %9242 = vmatprep.subr.bf16.mxu0 %v9956_v30 }
 0x3eb   :  { %9243 = vmatpush3.bf16.msra.mxu0 %v9956_v30  ;;  %v4318_v30 = vrot.slane %v12650_v57, 6 }
 0x3ec   :  { %9244 = vmatprep.subr.bf16.mxu0 %v9957_v2 }
 0x3ee   :  { %9217 = vmatmul.mubr.bf16.gmra.mrb[164].mxu0 %v15076_v50  ;;  %v4324_v50 = vrot.slane %v13000_v17, 6 }
 0x3ef   :  { %9220 = vmatprep.mubr.bf16.mxu0 %v12650_v57  ;;  %9245 = vmatpush3.bf16.msra.mxu0 %v9957_v2 }
 0x3f0   :  { %9246 = vmatprep.subr.bf16.mxu0 %v9958_v59 }
 0x3f3   :  { %9247 = vmatpush3.bf16.msra.mxu0 %v9958_v59 }
 0x3f4   :  { %9248 = vmatprep.subr.bf16.mxu0 %v9959_v37 }
 0x3f6   :  { %9221 = vmatmul.mubr.bf16.gmra.mrb[168].mxu0 %v12710_v48 }
 0x3f7   :  { %9224 = vmatprep.mubr.bf16.mxu0 %v12712_v43  ;;  %9249 = vmatpush3.bf16.msra.mxu0 %v9959_v37 }
 0x3f8   :  { %9250 = vmatprep.subr.bf16.mxu0 %v9960_v26 }
 0x3fb   :  { %9251 = vmatpush3.bf16.msra.mxu0 %v9960_v26  ;;  %v4294_v26 = vld [vmem:[#allocation2 + $0x40] sm:$0xc0] }
 0x3fc   :  { %9252 = vmatprep.subr.bf16.mxu0 %v9961_v53  ;;  %v4326_v57 = vrot.slane %v4294_v26, 6 }
 0x3fe   :  { %9225 = vmatmul.mubr.bf16.gmra.mrb[172].mxu0 %v12777_v62  ;;  %v3962_v62 = vrot.slane %v3960_v32, 5 }
 0x3ff   :  { %9228 = vmatprep.mubr.bf16.mxu0 %v12786_v27  ;;  %9253 = vmatpush3.bf16.msra.mxu0 %v9961_v53  ;;  %v4329_v53 = vrot.slane %v12797_v41, 6 }
 0x400   :  { %9254 = vmatprep.subr.bf16.mxu0 %v9962_v12  ;;  %v3966_v31 = vor.u32 %v3965_v38, %v3962_v62 }
 0x402   :  { %v3970_v3 = vsel %vm1320_vm3, %v3966_v31, %v12872_v7  ;;  %v3995_v7 = vshll.u32 %v13000_v17, 16 }
 0x403   :  { %9255 = vmatpush3.bf16.msra.mxu0 %v9962_v12 }
 0x404   :  { %9284 = vmatprep.subr.bf16.mxu0 %v9963_v10  ;;  %v3997_v46 = vrot.slane %v3995_v7, 6 }
 0x406   :  { %9229 = vmatmul.mubr.bf16.gmra.mrb[176].mxu0 %v12797_v41  ;;  %v4337_v41 = vrot.slane %v12876_v14, 6 }
 0x407   :  { %9232 = vmatprep.mubr.bf16.mxu0 %v12815_v61 }
 0x40e   :  { %9233 = vmatmul.mubr.bf16.gmra.mrb[180].mxu0 %v12831_v15  ;;  %v13063_v15 = vpop.permute.xlu1 %4644 }
 0x40f   :  { %9236 = vmatprep.mubr.bf16.mxu0 %v12866_v0 }
 0x416   :  { %9237 = vmatmul.mubr.bf16.gmra.mrb[184].mxu0 %v12876_v14 }
 0x417   :  { %9256 = vmatprep.mubr.bf16.mxu0 %v3970_v3  ;;  %v13065_v3 = vpop.permute.xlu1 %4654 }
 0x41b   :  { %v13074_v14 = vpop.permute.xlu1 %4659 }
 0x41e   :  { %9257 = vmatmul.mubr.bf16.vlgmr.msra.gmra.mrb[160].mxu0 %v12883_v13  ;;  %v9966_v13 = vld [vmem:[%s14915_s6 + $0xd8] sm:$0xff]  }
 0x41f   :  { %9260 = vmatprep.mubr.bf16.mxu0 %v12900_v21  ;;  %9285 = vmatpush3.bf16.msra.mxu0 %v9963_v10  ;;  %v3994_v21 = vrot.slane %v3992_v24, 5  ;;  %v13092_v42 = vpop.permute.xlu1 %4669 }
 0x420   :  { %9286 = vmatprep.subr.bf16.mxu0 %v9964_v34 }
 0x421   :  { %v3998_v52 = vor.u32 %v3997_v46, %v3994_v21 }
 0x423   :  { %9287 = vmatpush3.bf16.msra.mxu0 %v9964_v34  ;;  %v13067_v34 = vpop.permute.xlu0 %4649 }
 0x424   :  { %9288 = vmatprep.subr.bf16.mxu0 %v9965_v54 }
 0x426   :  { %9261 = vmatmul.mubr.bf16.gmra.mrb[164].mxu0 %v12906_v55  ;;  %v9968_v55 = vld [vmem:[%s14915_s6 + $0xe8] sm:$0xff]  }
 0x427   :  { %9264 = vmatprep.mubr.bf16.mxu0 %v12911_v35  ;;  %9289 = vmatpush3.bf16.msra.mxu0 %v9965_v54  ;;  %v3999_v35 = vsel %vm1320_vm3, %v12908_v20, %v3998_v52  ;;  %v3958_v20 = vld [vmem:[#allocation2 + $0x78] sm:$0x3f]  ;;  %v13076_v17 = vpop.permute.xlu0 %4664 }
 0x428   :  { %9290 = vmatprep.subr.bf16.mxu0 %v9966_v13  ;;  %v4033_v58 = vshrl.u32 %v3958_v20, 16  ;;  %v4036_v51 = vshll.u32 %v3958_v20, 16  ;;  %v4339_v31 = vrot.slane %v3958_v20, 6 }
 0x42a   :  { %v4035_v8 = vrot.slane %v4033_v58, 5  ;;  %v4038_v60 = vrot.slane %v4036_v51, 6 }
 0x42b   :  { %9291 = vmatpush3.bf16.msra.mxu0 %v9966_v13  ;;  %v13097_v25 = vpop.permute.xlu0 %4674 }
 0x42c   :  { %9292 = vmatprep.subr.bf16.mxu0 %v9967_v28  ;;  %v4039_v5 = vor.u32 %v4038_v60, %v4035_v8  ;;  %v13111_v8 = vpop.permute.xlu1 %4679 }
 0x42e   :  { %9265 = vmatmul.mubr.bf16.gmra.mrb[168].mxu0 %v12920_v6  ;;  %v4011_v6 = vsel %vm1320_vm3, %v4007_v63, %v12924_v56  ;;  %v4293_v56 = vld [vmem:[#allocation2] sm:$0xc0]  ;;  %v4040_v33 = vsel %vm1320_vm3, %v12945_v9, %v4039_v5  ;;  %v4319_v9 = vsel %vm2145_vm5, %v4316_v39, %v4318_v30 }
 0x42f   :  { %9268 = vmatprep.mubr.bf16.mxu0 %v3999_v35  ;;  %9293 = vmatpush3.bf16.msra.mxu0 %v9967_v28  ;;  %v4311_v49 = vrot.slane %v4293_v56, 6 }
 0x430   :  { %9294 = vmatprep.subr.bf16.mxu0 %v9968_v55 }
 0x433   :  { %9295 = vmatpush3.bf16.msra.mxu0 %v9968_v55 }
 0x434   :  { %9296 = vmatprep.subr.bf16.mxu0 %v9969_v40 }
 0x436   :  { %9269 = vmatmul.mubr.bf16.gmra.mrb[172].mxu0 %v4011_v6 }
 0x437   :  { %9272 = vmatprep.mubr.bf16.mxu0 %v12936_v47  ;;  %9297 = vmatpush3.bf16.msra.mxu0 %v9969_v40  ;;  %v4312_v47 = vrot.slane %v12549_v19, 6  ;;  %v4320_v19 = vrot.slane %v12710_v48, 6  ;;  %v4327_v48 = vrot.slane %v12786_v27, 6  ;;  %v4335_v27 = vrot.slane %v12866_v0, 6  ;;  %v13072_v0 = vld [vmem:[%s14919_s7] ss:$0 sm:$0xff] }
 0x438   :  { %9298 = vmatprep.subr.bf16.mxu0 %v9970_v29 }
 0x439   :  { %v4321_v2 = vsel %vm2145_vm5, %v4318_v30, %v4320_v19  ;;  %v4328_v12 = vsel %vm2145_vm5, %v4326_v57, %v4327_v48  ;;  %v4330_v10 = vsel %vm2145_vm5, %v4327_v48, %v4329_v53  ;;  %v4336_v62 = vsel %vm2145_vm5, %v4333_v18, %v4335_v27 }
 0x43a   :  { %v4338_v38 = vsel %vm2145_vm5, %v4335_v27, %v4337_v41 }
 0x43b   :  { %9299 = vmatpush3.bf16.msra.mxu0 %v9970_v29 }
 0x43e   :  { %9273 = vmatmul.mubr.bf16.gmra.mrb[176].mxu0 %v12939_v4  ;;  %v4313_v4 = vsel %vm2145_vm5, %v4311_v49, %v4312_v47  ;;  %v13118_v49 = vpop.permute.xlu0 %4684 }
 0x43f   :  { %9276 = vmatprep.mubr.bf16.mxu0 %v12942_v23  ;;  %v4314_v23 = vrot.slane %v12554_v16, 6  ;;  %v4322_v16 = vrot.slane %v12712_v43, 6  ;;  %v4331_v43 = vrot.slane %v12815_v61, 6  ;;  %v4340_v61 = vsel %vm2145_vm5, %v4337_v41, %v4339_v31 }
 0x441   :  { %v4323_v59 = vsel %vm2145_vm5, %v4320_v19, %v4322_v16  ;;  %v4325_v37 = vsel %vm2145_vm5, %v4322_v16, %v4324_v50  ;;  %v4332_v32 = vsel %vm2145_vm5, %v4329_v53, %v4331_v43  ;;  %v4334_v36 = vsel %vm2145_vm5, %v4331_v43, %v4333_v18 }
 0x442   :  { %v13138_v50 = vpop.permute.xlu0 %4694 }
 0x446   :  { %9277 = vmatmul.mubr.bf16.gmra.mrb[180].mxu0 %v12948_v11  ;;  %v4315_v11 = vsel %vm2145_vm5, %v4312_v47, %v4314_v23 }
 0x447   :  { %9280 = vmatprep.mubr.bf16.mxu0 %v12953_v1  ;;  %v4317_v1 = vsel %vm2145_vm5, %v4314_v23, %v4316_v39 }
 0x44e   :  { %9281 = vmatmul.mubr.bf16.gmra.mrb[184].mxu0 %v4040_v33 }
 0x44f   :  { %9300 = vmatprep.mubr.bf16.mxu0 %v4313_v4 }
 0x456   :  { %9301 = vmatmul.mubr.bf16.vlgmr.msra.gmra.mrb[160].mxu0 %v4315_v11 }
 0x457   :  { %9304 = vmatprep.mubr.bf16.mxu0 %v4317_v1  ;;  %v13129_v1 = vpop.permute.xlu1 %4689 }
 0x45e   :  { %9305 = vmatmul.mubr.bf16.gmra.mrb[164].mxu0 %v4319_v9 }
 0x45f   :  { %9308 = vmatprep.mubr.bf16.mxu0 %v4321_v2 }
 0x466   :  { %9309 = vmatmul.mubr.bf16.gmra.mrb[168].mxu0 %v4323_v59 }
 0x467   :  { %9312 = vmatprep.mubr.bf16.mxu0 %v4325_v37 }
 0x46e   :  { %9313 = vmatmul.mubr.bf16.gmra.mrb[172].mxu0 %v4328_v12 }
 0x46f   :  { %9316 = vmatprep.mubr.bf16.mxu0 %v4330_v10 }
 0x476   :  { %9317 = vmatmul.mubr.bf16.gmra.mrb[176].mxu0 %v4332_v32  ;;  %v13157_v32 = vpop.permute.xlu1 %4699 }
 0x477   :  { %9320 = vmatprep.mubr.bf16.mxu0 %v4334_v36 }
 0x47e   :  { %9321 = vmatmul.mubr.bf16.gmra.mrb[180].mxu0 %v4336_v62 }
 0x47f   :  { %9324 = vmatprep.mubr.bf16.mxu0 %v4338_v38 }
 0x486   :  { %9325 = vmatmul.mubr.bf16.gmra.mrb[184].mxu0 %v4340_v61 }
 0x529   :  { %v9302_v54 = vpop.f32.mrb[160].mxu0 }
 0x52a   :  { %v13079_v24 = vadd.f32 %v9302_v54, %v13072_v0  ;;  %v4454_v7 = vpop.f32.mrb[161].mxu0 }
 0x52b   :  { %v13082_v13 = vadd.f32 %v13072_v0, %v4454_v7  ;;  %v9303_v21 = vpop.f32.mrb[162].mxu0 }
 0x52c   :  { %v4457_v46 = vpop.f32.mrb[163].mxu0  ;;  %v4714_v45 = vmul.f32 %v13065_v3, %v13079_v24  ;;  %v13087_v28 = vadd.f32 %v9303_v21, %v13072_v0 }
 0x52d   :  { %v13090_v22 = vadd.f32 %v13072_v0, %v4457_v46  ;;  %v4712_v55 = vmul.f32 %v13063_v15, %v13082_v13 }
 0x52e   :  { %v4747_v52 = vsel %vm4740_vm10, %v4714_v45, 0.0  ;;  %v4715_v35 = vmul.f32 %v13074_v14, %v13087_v28 }
 0x52f   :  { %4748 = vadd.xlane.f32.xlu0 %v4747_v52  ;;  %v4713_v44 = vmul.f32 %v13067_v34, %v13090_v22  ;;  %v4741_v20 = vsel %vm4740_vm10, %v4712_v55, 0.0 }
 0x530   :  { %v4750_v47 = vsel %vm4740_vm10, %v4715_v35, 0.0 }
 0x531   :  { %v9306_v40 = vpop.f32.mrb[164].mxu0  ;;  %v4744_v63 = vsel %vm4740_vm10, %v4713_v44, 0.0  ;;  %v13178_v44 = vpop.permute.xlu0 %4704 }
 0x532   :  { %v13105_v29 = vadd.f32 %v9306_v40, %v13072_v0  ;;  %v4470_v6 = vpop.f32.mrb[165].mxu0  ;;  %4745 = vadd.xlane.f32.xlu1 %v4744_v63 }
 0x533   :  { %v13109_v58 = vadd.f32 %v13072_v0, %v4470_v6  ;;  %4742 = vadd.xlane.f32.xlu0 %v4741_v20  ;;  %v9307_v51 = vpop.f32.mrb[166].mxu0 }
 0x534   :  { %v13114_v60 = vadd.f32 %v9307_v51, %v13072_v0  ;;  %v4473_v56 = vpop.f32.mrb[167].mxu0  ;;  %v4718_v5 = vmul.f32 %v13097_v25, %v13105_v29 }
 0x535   :  { %v4716_v33 = vmul.f32 %v13076_v17, %v13109_v58  ;;  %v13126_v23 = vadd.f32 %v13072_v0, %v4473_v56 }
 0x536   :  { %v4719_v4 = vmul.f32 %v13111_v8, %v13114_v60  ;;  %v4759_v39 = vsel %vm4740_vm10, %v4718_v5, 0.0 }
 0x537   :  { %4751 = vadd.xlane.f32.xlu0 %v4750_v47  ;;  %4760 = vadd.xlane.f32.xlu1 %v4759_v39  ;;  %v4717_v30 = vmul.f32 %v13092_v42, %v13126_v23  ;;  %v4753_v16 = vsel %vm4740_vm10, %v4716_v33, 0.0  ;;  %v13192_v47 = vpop.permute.xlu1 %4709 }
 0x538   :  { %v4762_v2 = vsel %vm4740_vm10, %v4719_v4, 0.0 }
 0x539   :  { %v9310_v11 = vpop.f32.mrb[168].mxu0  ;;  %v4756_v10 = vsel %vm4740_vm10, %v4717_v30, 0.0 }
 0x53a   :  { %v13134_v19 = vadd.f32 %v9310_v11, %v13072_v0  ;;  %v4486_v9 = vpop.f32.mrb[169].mxu0 }
 0x53b   :  { %v13141_v59 = vadd.f32 %v13072_v0, %v4486_v9  ;;  %4763 = vadd.xlane.f32.xlu0 %v4762_v2  ;;  %v9311_v37 = vpop.f32.mrb[170].mxu0  ;;  %4754 = vadd.xlane.f32.xlu1 %v4753_v16 }
 0x53c   :  { %v4722_v26 = vmul.f32 %v13138_v50, %v13134_v19  ;;  %v4489_v57 = vpop.f32.mrb[171].mxu0  ;;  %v13151_v12 = vadd.f32 %v9311_v37, %v13072_v0 }
 0x53d   :  { %v13146_v48 = vadd.f32 %v13072_v0, %v4489_v57  ;;  %v4720_v53 = vmul.f32 %v13118_v49, %v13141_v59 }
 0x53e   :  { %v4771_v43 = vsel %vm4740_vm10, %v4722_v26, 0.0  ;;  %v4723_v41 = vmul.f32 %v13157_v32, %v13151_v12 }
 0x53f   :  { %v4721_v18 = vmul.f32 %v13129_v1, %v13146_v48  ;;  %4757 = vadd.xlane.f32.xlu0 %v4756_v10  ;;  %4772 = vadd.xlane.f32.xlu1 %v4771_v43  ;;  %v4765_v31 = vsel %vm4740_vm10, %v4720_v53, 0.0 }
 0x540   :  { %v4774_v52 = vsel %vm4740_vm10, %v4723_v41, 0.0 }
 0x541   :  { %v9314_v36 = vpop.f32.mrb[172].mxu0  ;;  %v4768_v27 = vsel %vm4740_vm10, %v4721_v18, 0.0 }
 0x542   :  { %v13163_v62 = vadd.f32 %v9314_v36, %v13072_v0  ;;  %v4502_v38 = vpop.f32.mrb[173].mxu0 }
 0x543   :  { %4769 = vadd.xlane.f32.xlu0 %v4768_v27  ;;  %v9315_v61 = vpop.f32.mrb[174].mxu0  ;;  %4766 = vadd.xlane.f32.xlu1 %v4765_v31  ;;  %v13172_v46 = vadd.f32 %v13072_v0, %v4502_v38 }
 0x544   :  { %v13167_v54 = vadd.f32 %v9315_v61, %v13072_v0  ;;  %v4505_v7 = vpop.f32.mrb[175].mxu0  ;;  %v4726_v21 = vmul.f32 %v13063_v15, %v13163_v62 }
 0x545   :  { %v13181_v35 = vadd.f32 %v13072_v0, %v4505_v7  ;;  %v4724_v63 = vmul.f32 %v13178_v44, %v13172_v46 }
 0x546   :  { %v4727_v45 = vmul.f32 %v13067_v34, %v13167_v54  ;;  %v4783_v51 = vsel %vm4740_vm10, %v4726_v21, 0.0 }
 0x547   :  { %4775 = vadd.xlane.f32.xlu1 %v4774_v52  ;;  %v4725_v39 = vmul.f32 %v13192_v47, %v13181_v35  ;;  %v4777_v2 = vsel %vm4740_vm10, %v4724_v63, 0.0 }
 0x548   :  { %v4786_v55 = vsel %vm4740_vm10, %v4727_v45, 0.0 }
 0x549   :  { %v9318_v40 = vpop.f32.mrb[176].mxu0  ;;  %4787 = vadd.xlane.f32.xlu0 %v4786_v55  ;;  %v4780_v10 = vsel %vm4740_vm10, %v4725_v39, 0.0 }
 0x54a   :  { %v13186_v6 = vadd.f32 %v9318_v40, %v13072_v0  ;;  %v4518_v20 = vpop.f32.mrb[177].mxu0 }
 0x54b   :  { %v13190_v56 = vadd.f32 %v13072_v0, %v4518_v20  ;;  %v9319_v5 = vpop.f32.mrb[178].mxu0  ;;  %4784 = vadd.xlane.f32.xlu1 %v4783_v51 }
 0x54c   :  { %v4730_v33 = vmul.f32 %v13076_v17, %v13186_v6  ;;  %v4521_v4 = vpop.f32.mrb[179].mxu0  ;;  %v13206_v37 = vadd.f32 %v9319_v5, %v13072_v0 }
 0x54d   :  { %v4728_v11 = vmul.f32 %v13065_v3, %v13190_v56  ;;  %v13201_v30 = vadd.f32 %v13072_v0, %v4521_v4 }
 0x54e   :  { %v4795_v9 = vsel %vm4740_vm10, %v4730_v33, 0.0  ;;  %v4731_v38 = vmul.f32 %v13092_v42, %v13206_v37 }
 0x54f   :  { %4796 = vadd.xlane.f32.xlu0 %v4795_v9  ;;  %4778 = vadd.xlane.f32.xlu1 %v4777_v2  ;;  %v4729_v26 = vmul.f32 %v13074_v14, %v13201_v30  ;;  %v4789_v53 = vsel %vm4740_vm10, %v4728_v11, 0.0 }
 0x550   :  { %v4798_v63 = vsel %vm4740_vm10, %v4731_v38, 0.0 }
 0x551   :  { %v9322_v16 = vpop.f32.mrb[180].mxu0  ;;  %v4792_v61 = vsel %vm4740_vm10, %v4729_v26, 0.0 }
 0x552   :  { %v4534_v57 = vpop.f32.mrb[181].mxu0  ;;  %v13213_v43 = vadd.f32 %v9322_v16, %v13072_v0 }
 0x553   :  { %v13216_v18 = vadd.f32 %v13072_v0, %v4534_v57  ;;  %v9323_v36 = vpop.f32.mrb[182].mxu0  ;;  %4790 = vadd.xlane.f32.xlu0 %v4789_v53  ;;  %4781 = vadd.xlane.f32.xlu1 %v4780_v10 }
 0x554   :  { %v4537_v27 = vpop.f32.mrb[183].mxu0  ;;  %v4734_v7 = vmul.f32 %v13118_v49, %v13213_v43  ;;  %v13230_v52 = vadd.f32 %v9323_v36, %v13072_v0 }
 0x555   :  { %v4732_v41 = vmul.f32 %v13097_v25, %v13216_v18  ;;  %v13223_v31 = vadd.f32 %v13072_v0, %v4537_v27 }
 0x556   :  { %v4807_v33 = vsel %vm4740_vm10, %v4734_v7, 0.0  ;;  %v4735_v11 = vmul.f32 %v13129_v1, %v13230_v52 }
 0x557   :  { %4793 = vadd.xlane.f32.xlu0 %v4792_v61  ;;  %v4801_v21 = vsel %vm4740_vm10, %v4732_v41, 0.0  ;;  %v4733_v55 = vmul.f32 %v13111_v8, %v13223_v31 }
 0x558   :  { %4802 = vadd.xlane.f32.xlu1 %v4801_v21  ;;  %v4810_v10 = vsel %vm4740_vm10, %v4735_v11, 0.0 }
 0x559   :  { %v9326_v45 = vpop.f32.mrb[184].mxu0  ;;  %v4804_v2 = vsel %vm4740_vm10, %v4733_v55, 0.0 }
 0x55a   :  { %v4550_v40 = vpop.f32.mrb[185].mxu0  ;;  %v13236_v20 = vadd.f32 %v9326_v45, %v13072_v0 }
 0x55b   :  { %v13239_v51 = vadd.f32 %v13072_v0, %v4550_v40  ;;  %v9327_v5 = vpop.f32.mrb[186].mxu0  ;;  %4799 = vadd.xlane.f32.xlu0 %v4798_v63 }
 0x55c   :  { %15085 = vst [vmem:[#allocation17_spill] sm:$0xff] %v13236_v20  ;;  %v4553_v4 = vpop.f32.mrb[187].mxu0  ;;  %4808 = vadd.xlane.f32.xlu1 %v4807_v33  ;;  %v4738_v16 = vmul.f32 %v13178_v44, %v13236_v20  ;;  %v13254_v57 = vadd.f32 %v9327_v5, %v13072_v0 }
 0x55d   :  { %15086 = vst [vmem:[#allocation4_spill] sm:$0xff] %v13239_v51  ;;  %v4736_v39 = vmul.f32 %v13138_v50, %v13239_v51  ;;  %v13247_v9 = vadd.f32 %v13072_v0, %v4553_v4 }
 0x55e   :  { %15088 = vst [vmem:[#allocation5_spill] sm:$0xff] %v13254_v57  ;;  %v4819_v36 = vsel %vm4740_vm10, %v4738_v16, 0.0  ;;  %v4739_v27 = vmul.f32 %v13192_v47, %v13254_v57 }
 0x55f   :  { %15087 = vst [vmem:[#allocation13_spill] sm:$0xff] %v13247_v9  ;;  %4805 = vadd.xlane.f32.xlu0 %v4804_v2  ;;  %v4813_v26 = vsel %vm4740_vm10, %v4736_v39, 0.0  ;;  %v4737_v53 = vmul.f32 %v13157_v32, %v13247_v9 }
 0x560   :  { %4814 = vadd.xlane.f32.xlu1 %v4813_v26  ;;  %v4822_v38 = vsel %vm4740_vm10, %v4739_v27, 0.0 }
 0x561   :  { %v4816_v41 = vsel %vm4740_vm10, %v4737_v53, 0.0 }
 0x563   :  { %4811 = vadd.xlane.f32.xlu0 %v4810_v10 }
 0x564   :  { %4820 = vadd.xlane.f32.xlu1 %v4819_v36  ;;  %v9971_v36 = vld [vmem:[%s14920_s11 + $0x20] sm:$0xff]  }
 0x565   :  { %9328 = vmatprep.subr.bf16.mxu1 %v9971_v36 }
 0x566   :  { %9329 = vmatpush3.bf16.msra.mxu1 %v9971_v36 }
 0x567   :  { %4817 = vadd.xlane.f32.xlu0 %v4816_v41 }
 0x56b   :  { %4823 = vadd.xlane.f32.xlu0 %v4822_v38  ;;  %v9972_v38 = vld [vmem:[%s14920_s11 + $0x28] sm:$0xff]  }
 0x56c   :  { %9330 = vmatprep.subr.bf16.mxu1 %v9972_v38 }
 0x56d   :  { %9331 = vmatpush3.bf16.msra.mxu1 %v9972_v38 }
 0x5bc   :  { %v4749_v0 = vpop.xlane.xlu0 %4748 }
 0x5bf   :  { %v4746_v61 = vpop.xlane.xlu1 %4745 }
 0x5c0   :  { %v4743_v7 = vpop.xlane.xlu0 %4742 }
 0x5c1   :  { %v4825_v21 = vadd.f32 %v4746_v61, %v4743_v7 }
 0x5c3   :  { %v4826_v40 = vadd.f32 %v4825_v21, %v4749_v0 }
 0x5c4   :  { %v4761_v45 = vpop.xlane.xlu1 %4760  ;;  %v4752_v55 = vpop.xlane.xlu0 %4751 }
 0x5c5   :  { %v4827_v33 = vadd.f32 %v4826_v40, %v4752_v55 }
 0x5c8   :  { %v4755_v63 = vpop.xlane.xlu1 %4754  ;;  %v4764_v5 = vpop.xlane.xlu0 %4763 }
 0x5c9   :  { %v4828_v4 = vadd.f32 %v4827_v33, %v4755_v63 }
 0x5cc   :  { %v4773_v39 = vpop.xlane.xlu1 %4772  ;;  %v4758_v11 = vpop.xlane.xlu0 %4757 }
 0x5cd   :  { %v4829_v2 = vadd.f32 %v4828_v4, %v4758_v11 }
 0x5cf   :  { %v4830_v16 = vadd.f32 %v4829_v2, %v4761_v45 }
 0x5d0   :  { %v4767_v26 = vpop.xlane.xlu1 %4766  ;;  %v4770_v27 = vpop.xlane.xlu0 %4769 }
 0x5d1   :  { %v4831_v53 = vadd.f32 %v4830_v16, %v4764_v5 }
 0x5d3   :  { %v4832_v10 = vadd.f32 %v4831_v53, %v4767_v26 }
 0x5d4   :  { %v4776_v41 = vpop.xlane.xlu1 %4775 }
 0x5d5   :  { %v4833_v0 = vadd.f32 %v4832_v10, %v4770_v27 }
 0x5d6   :  { %v4788_v61 = vpop.xlane.xlu0 %4787 }
 0x5d7   :  { %v4834_v21 = vadd.f32 %v4833_v0, %v4773_v39 }
 0x5d8   :  { %v4785_v7 = vpop.xlane.xlu1 %4784 }
 0x5d9   :  { %v4835_v40 = vadd.f32 %v4834_v21, %v4776_v41  ;;  %v4844_v4 = vadd.f32 %v4788_v61, %v4785_v7 }
 0x5dc   :  { %v4779_v45 = vpop.xlane.xlu1 %4778  ;;  %v4797_v55 = vpop.xlane.xlu0 %4796 }
 0x5dd   :  { %v4836_v63 = vadd.f32 %v4835_v40, %v4779_v45 }
 0x5e0   :  { %v4782_v5 = vpop.xlane.xlu1 %4781  ;;  %v4791_v33 = vpop.xlane.xlu0 %4790 }
 0x5e1   :  { %v4837_v11 = vadd.f32 %v4836_v63, %v4782_v5  ;;  %v4845_v16 = vadd.f32 %v4844_v4, %v4791_v33 }
 0x5e3   :  { %v4838_v2 = vrot.slane %v4837_v11, 4 }
 0x5e4   :  { %v4794_v26 = vpop.xlane.xlu0 %4793 }
 0x5e5   :  { %v4839_v53 = vadd.f32 %v4838_v2, %v4837_v11  ;;  %v4846_v10 = vadd.f32 %v4845_v16, %v4794_v26  ;;  %v4803_v27 = vpop.xlane.xlu1 %4802 }
 0x5e7   :  { %v4840_v36 = vrot.slane %v4839_v53, 2  ;;  %v4847_v57 = vadd.f32 %v4846_v10, %v4797_v55 }
 0x5e8   :  { %v4800_v20 = vpop.xlane.xlu0 %4799 }
 0x5e9   :  { %v4841_v9 = vadd.f32 %v4840_v36, %v4839_v53  ;;  %v4848_v39 = vadd.f32 %v4847_v57, %v4800_v20  ;;  %v4809_v38 = vpop.xlane.xlu1 %4808 }
 0x5eb   :  { %v4842_v0 = vrot.slane %v4841_v9, 1  ;;  %v4849_v51 = vadd.f32 %v4848_v39, %v4803_v27 }
 0x5ec   :  { %v4806_v41 = vpop.xlane.xlu0 %4805 }
 0x5ed   :  { %v4843_v21 = vadd.f32 %v4842_v0, %v4841_v9  ;;  %v4850_v45 = vadd.f32 %v4849_v51, %v4806_v41  ;;  %v4815_v7 = vpop.xlane.xlu1 %4814 }
 0x5ef   :  { %v13270_v40 = vmul.f32 0.00019290124, %v4843_v21  ;;  %v4851_v61 = vadd.f32 %v4850_v45, %v4809_v38 }
 0x5f0   :  { %v4812_v63 = vpop.xlane.xlu0 %4811 }
 0x5f1   :  { %v4852_v5 = vadd.f32 %v4851_v61, %v4812_v63  ;;  %v13274_v33 = vsub.f32 %v13090_v22, %v13270_v40  ;;  %v13278_v55 = vsub.f32 %v13082_v13, %v13270_v40  ;;  %v13282_v20 = vsub.f32 %v13087_v28, %v13270_v40  ;;  %v4821_v26 = vpop.xlane.xlu1 %4820 }
 0x5f2   :  { %v13286_v51 = vsub.f32 %v13079_v24, %v13270_v40  ;;  %v13290_v9 = vsub.f32 %v13126_v23, %v13270_v40  ;;  %v13294_v22 = vsub.f32 %v13109_v58, %v13270_v40  ;;  %v13306_v58 = vsub.f32 %v13114_v60, %v13270_v40 }
 0x5f3   :  { %v4853_v57 = vadd.f32 %v4852_v5, %v4815_v7  ;;  %v4894_v13 = vmul.f32 %v13274_v33, %v13067_v34  ;;  %v4893_v28 = vmul.f32 %v13278_v55, %v13063_v15  ;;  %v4896_v4 = vmul.f32 %v13282_v20, %v13074_v14 }
 0x5f4   :  { %v4818_v24 = vpop.xlane.xlu0 %4817  ;;  %v4895_v11 = vmul.f32 %v13286_v51, %v13065_v3  ;;  %v4898_v27 = vmul.f32 %v13290_v9, %v13092_v42  ;;  %v4897_v36 = vmul.f32 %v13294_v22, %v13076_v17  ;;  %v4900_v60 = vmul.f32 %v13306_v58, %v13111_v8 }
 0x5f5   :  { %v4854_v23 = vadd.f32 %v4853_v57, %v4818_v24  ;;  %v4922_v2 = vmul.f32 %v4894_v13, %v4894_v13  ;;  %v4921_v16 = vmul.f32 %v4893_v28, %v4893_v28  ;;  %v4924_v53 = vmul.f32 %v4896_v4, %v4896_v4 }
 0x5f6   :  { %v4923_v10 = vmul.f32 %v4895_v11, %v4895_v11  ;;  %v13318_v45 = vsub.f32 %v13105_v29, %v13270_v40  ;;  %v4926_v63 = vmul.f32 %v4898_v27, %v4898_v27  ;;  %v4925_v5 = vmul.f32 %v4897_v36, %v4897_v36 }
 0x5f7   :  { %v4952_v39 = vsel %vm4740_vm10, %v4922_v2, 0.0  ;;  %v4949_v38 = vsel %vm4740_vm10, %v4921_v16, 0.0  ;;  %v4855_v0 = vadd.f32 %v4854_v23, %v4821_v26  ;;  %v4958_v61 = vsel %vm4740_vm10, %v4924_v53, 0.0 }
 0x5f8   :  { %4953 = vadd.xlane.f32.xlu0 %v4952_v39  ;;  %4950 = vadd.xlane.f32.xlu1 %v4949_v38  ;;  %v4824_v41 = vpop.xlane.xlu0 %4823  ;;  %v4955_v7 = vsel %vm4740_vm10, %v4923_v10, 0.0  ;;  %v4899_v13 = vmul.f32 %v13318_v45, %v13097_v25  ;;  %v13326_v28 = vsub.f32 %v13146_v48, %v13270_v40  ;;  %v13330_v4 = vsub.f32 %v13141_v59, %v13270_v40 }
 0x5f9   :  { %v4856_v21 = vadd.f32 %v4855_v0, %v4824_v41  ;;  %v4964_v24 = vsel %vm4740_vm10, %v4926_v63, 0.0  ;;  %v4961_v11 = vsel %vm4740_vm10, %v4925_v5, 0.0  ;;  %v4928_v23 = vmul.f32 %v4900_v60, %v4900_v60 }
 0x5fa   :  { %v13336_v2 = vsub.f32 %v13134_v19, %v13270_v40  ;;  %v4927_v26 = vmul.f32 %v4899_v13, %v4899_v13  ;;  %v4902_v48 = vmul.f32 %v13326_v28, %v13129_v1  ;;  %v4901_v59 = vmul.f32 %v13330_v4, %v13118_v49 }
 0x5fb   :  { %v4857_v57 = vrot.slane %v4856_v21, 4  ;;  %v4970_v10 = vsel %vm4740_vm10, %v4928_v23, 0.0  ;;  %v13347_v19 = vsub.f32 %v13151_v12, %v13270_v40 }
 0x5fc   :  { %4959 = vadd.xlane.f32.xlu0 %v4958_v61  ;;  %4956 = vadd.xlane.f32.xlu1 %v4955_v7  ;;  %v4903_v27 = vmul.f32 %v13336_v2, %v13138_v50  ;;  %v4967_v39 = vsel %vm4740_vm10, %v4927_v26, 0.0  ;;  %v4930_v38 = vmul.f32 %v4902_v48, %v4902_v48  ;;  %v4929_v0 = vmul.f32 %v4901_v59, %v4901_v59 }
 0x5fd   :  { %v4858_v29 = vadd.f32 %v4857_v57, %v4856_v21  ;;  %v4904_v60 = vmul.f32 %v13347_v19, %v13157_v32 }
 0x5fe   :  { %v4931_v21 = vmul.f32 %v4903_v27, %v4903_v27  ;;  %v4976_v7 = vsel %vm4740_vm10, %v4930_v38, 0.0  ;;  %v4973_v63 = vsel %vm4740_vm10, %v4929_v0, 0.0 }
 0x5ff   :  { %v4859_v16 = vrot.slane %v4858_v29, 2 }
 0x600   :  { %4965 = vadd.xlane.f32.xlu0 %v4964_v24  ;;  %4962 = vadd.xlane.f32.xlu1 %v4961_v11  ;;  %v4979_v13 = vsel %vm4740_vm10, %v4931_v21, 0.0  ;;  %v13371_v24 = vsub.f32 %v13172_v46, %v13270_v40 }
 0x601   :  { %v4860_v53 = vadd.f32 %v4859_v16, %v4858_v29  ;;  %v4932_v29 = vmul.f32 %v4904_v60, %v4904_v60 }
 0x602   :  { %v4905_v46 = vmul.f32 %v13371_v24, %v13178_v44 }
 0x603   :  { %v4861_v36 = vrot.slane %v4860_v53, 1  ;;  %v4982_v16 = vsel %vm4740_vm10, %v4932_v29, 0.0 }
 0x604   :  { %4971 = vadd.xlane.f32.xlu0 %v4970_v10  ;;  %4968 = vadd.xlane.f32.xlu1 %v4967_v39  ;;  %v4933_v59 = vmul.f32 %v4905_v46, %v4905_v46 }
 0x605   :  { %v4862_v41 = vadd.f32 %v4861_v36, %v4860_v53 }
 0x606   :  { %v4985_v0 = vsel %vm4740_vm10, %v4933_v59, 0.0 }
 0x607   :  { %v13352_v61 = vmul.f32 0.00019290124, %v4862_v41 }
 0x608   :  { %4977 = vadd.xlane.f32.xlu0 %v4976_v7  ;;  %4974 = vadd.xlane.f32.xlu1 %v4973_v63 }
 0x609   :  { %v13358_v12 = vsub.f32 %v13167_v54, %v13352_v61  ;;  %v13362_v5 = vsub.f32 %v13190_v56, %v13352_v61  ;;  %v13366_v57 = vsub.f32 %v13163_v62, %v13352_v61  ;;  %v13381_v62 = vsub.f32 %v13201_v30, %v13352_v61 }
 0x60a   :  { %v13433_v63 = vsub.f32 %v13230_v52, %v13352_v61 }
 0x60b   :  { %v4908_v11 = vmul.f32 %v13358_v12, %v13067_v34  ;;  %v4909_v54 = vmul.f32 %v13362_v5, %v13065_v3  ;;  %v4907_v56 = vmul.f32 %v13366_v57, %v13063_v15  ;;  %v13388_v34 = vsub.f32 %v13186_v6, %v13352_v61 }
 0x60c   :  { %4980 = vadd.xlane.f32.xlu1 %v4979_v13  ;;  %v13392_v3 = vsub.f32 %v13181_v35, %v13270_v40  ;;  %v4910_v48 = vmul.f32 %v13381_v62, %v13074_v14  ;;  %v13401_v6 = vsub.f32 %v13206_v37, %v13352_v61  ;;  %v13405_v35 = vsub.f32 %v13216_v18, %v13352_v61 }
 0x60d   :  { %v4936_v23 = vmul.f32 %v4908_v11, %v4908_v11  ;;  %v4937_v26 = vmul.f32 %v4909_v54, %v4909_v54  ;;  %v4935_v30 = vmul.f32 %v4907_v56, %v4907_v56  ;;  %v4911_v14 = vmul.f32 %v13388_v34, %v13076_v17  ;;  %v15090_v54 = vld [vmem:[#allocation13_spill] sm:$0xff] }
 0x60e   :  { %v4906_v53 = vmul.f32 %v13392_v3, %v13192_v47  ;;  %v4938_v27 = vmul.f32 %v4910_v48, %v4910_v48  ;;  %v4912_v39 = vmul.f32 %v13401_v6, %v13092_v42  ;;  %v4913_v37 = vmul.f32 %v13405_v35, %v13097_v25 }
 0x60f   :  { %v4994_v15 = vsel %vm4740_vm10, %v4936_v23, 0.0  ;;  %v4997_v40 = vsel %vm4740_vm10, %v4937_v26, 0.0  ;;  %v4991_v10 = vsel %vm4740_vm10, %v4935_v30, 0.0  ;;  %v13417_v18 = vsub.f32 %v13223_v31, %v13352_v61  ;;  %v15092_v30 = vld [vmem:[#allocation5_spill] sm:$0xff] }
 0x610   :  { %4983 = vadd.xlane.f32.xlu1 %v4982_v16  ;;  %4995 = vadd.xlane.f32.xlu0 %v4994_v15  ;;  %v4934_v36 = vmul.f32 %v4906_v53, %v4906_v53  ;;  %v5000_v38 = vsel %vm4740_vm10, %v4938_v27, 0.0  ;;  %v4939_v41 = vmul.f32 %v4911_v14, %v4911_v14  ;;  %v13423_v17 = vsub.f32 %v13213_v43, %v13352_v61  ;;  %v15089_v43 = vld [vmem:[#allocation4_spill] sm:$0xff]  ;;  %v15091_v16 = vld [vmem:[#allocation17_spill] sm:$0xff] }
 0x611   :  { %v4940_v21 = vmul.f32 %v4912_v39, %v4912_v39  ;;  %v4941_v60 = vmul.f32 %v4913_v37, %v4913_v37  ;;  %v4914_v25 = vmul.f32 %v13417_v18, %v13111_v8  ;;  %v13437_v13 = vsub.f32 %v15089_v43, %v13352_v61  ;;  %v9974_v43 = vld [vmem:[%s14920_s11 + $0x38] sm:$0xff]  }
 0x612   :  { %v4988_v42 = vsel %vm4740_vm10, %v4934_v36, 0.0  ;;  %v5003_v31 = vsel %vm4740_vm10, %v4939_v41, 0.0  ;;  %v4915_v7 = vmul.f32 %v13423_v17, %v13118_v49  ;;  %v13443_v56 = vsub.f32 %v15090_v54, %v13352_v61  ;;  %v7475_v41 = vld [vmem:[%s14921_s15 + $0x8] sm:$0xff] }
 0x613   :  { %v5006_v29 = vsel %vm4740_vm10, %v4940_v21, 0.0  ;;  %v5009_v11 = vsel %vm4740_vm10, %v4941_v60, 0.0  ;;  %v4942_v8 = vmul.f32 %v4914_v25, %v4914_v25  ;;  %v4916_v52 = vmul.f32 %v13433_v63, %v13129_v1  ;;  %v7478_v21 = vld [vmem:[%s14921_s15 + $0x20] sm:$0xff]  ;;  %v7481_v60 = vld [vmem:[%s14921_s15 + $0x38] sm:$0xff]  ;;  %v7480_v25 = vld [vmem:[%s14921_s15 + $0x30] sm:$0xff] }
 0x614   :  { %4998 = vadd.xlane.f32.xlu0 %v4997_v40  ;;  %4992 = vadd.xlane.f32.xlu1 %v4991_v10  ;;  %v4943_v49 = vmul.f32 %v4915_v7, %v4915_v7  ;;  %v4917_v23 = vmul.f32 %v13437_v13, %v13138_v50  ;;  %v13451_v46 = vsub.f32 %v15091_v16, %v13352_v61  ;;  %v9973_v40 = vld [vmem:[%s14920_s11 + $0x30] sm:$0xff]   ;;  %v7482_v7 = vld [vmem:[%s14921_s15 + $0x40] sm:$0xff] }
 0x615   :  { %v5012_v15 = vsel %vm4740_vm10, %v4942_v8, 0.0  ;;  %v4918_v26 = vmul.f32 %v13443_v56, %v13157_v32  ;;  %v13458_v48 = vsub.f32 %v15092_v30, %v13352_v61  ;;  %v4944_v59 = vmul.f32 %v4916_v52, %v4916_v52  ;;  %9332 = vmatprep.subr.bf16.mxu1 %v9973_v40 }
 0x616   :  { %v5015_v1 = vsel %vm4740_vm10, %v4943_v49, 0.0  ;;  %v4945_v53 = vmul.f32 %v4917_v23, %v4917_v23  ;;  %v4919_v50 = vmul.f32 %v13451_v46, %v13178_v44  ;;  %9333 = vmatpush3.bf16.msra.mxu1 %v9973_v40 }
 0x617   :  { %v4920_v32 = vmul.f32 %v13458_v48, %v13192_v47  ;;  %v5018_v61 = vsel %vm4740_vm10, %v4944_v59, 0.0  ;;  %v4946_v27 = vmul.f32 %v4918_v26, %v4918_v26  ;;  %v7474_v47 = vld [vmem:[%s14921_s15] sm:$0xff]  ;;  %9334 = vmatprep.subr.bf16.mxu1 %v9974_v43 }
 0x618   :  { %5001 = vadd.xlane.f32.xlu0 %v5000_v38  ;;  %4986 = vadd.xlane.f32.xlu1 %v4985_v0  ;;  %v5021_v10 = vsel %vm4740_vm10, %v4945_v53, 0.0  ;;  %v4947_v14 = vmul.f32 %v4919_v50, %v4919_v50  ;;  %v7476_v38 = vld [vmem:[%s14921_s15 + $0x10] sm:$0xff]  ;;  %v7477_v0 = vld [vmem:[%s14921_s15 + $0x18] sm:$0xff] }
 0x619   :  { %v5024_v44 = vsel %vm4740_vm10, %v4946_v27, 0.0  ;;  %v4948_v39 = vmul.f32 %v4920_v32, %v4920_v32 }
 0x61a   :  { %v5027_v36 = vsel %vm4740_vm10, %v4947_v14, 0.0  ;;  %9335 = vmatpush3.bf16.msra.mxu1 %v9974_v43 }
 0x61b   :  { %v5030_v37 = vsel %vm4740_vm10, %v4948_v39, 0.0 }
 0x61c   :  { %5004 = vadd.xlane.f32.xlu0 %v5003_v31  ;;  %4989 = vadd.xlane.f32.xlu1 %v4988_v42  ;;  %v7479_v42 = vld [vmem:[%s14921_s15 + $0x28] sm:$0xff] }
 0x61d   :  { %v7483_v31 = vld [vmem:[%s14921_s15 + $0x48] sm:$0xff] }
 0x620   :  { %5007 = vadd.xlane.f32.xlu0 %v5006_v29  ;;  %5010 = vadd.xlane.f32.xlu1 %v5009_v11  ;;  %v13509_v29 = vld [vmem:[%s14920_s11] sm:$0xff]  }
 0x621   :  { %9356 = vmatprep.subr.bf16.mxu1 %v13509_v29 }
 0x624   :  { %5013 = vadd.xlane.f32.xlu0 %v5012_v15  ;;  %5016 = vadd.xlane.f32.xlu1 %v5015_v1 }
 0x628   :  { %5019 = vadd.xlane.f32.xlu0 %v5018_v61  ;;  %5022 = vadd.xlane.f32.xlu1 %v5021_v10 }
 0x62c   :  { %5025 = vadd.xlane.f32.xlu0 %v5024_v44  ;;  %5028 = vadd.xlane.f32.xlu1 %v5027_v36 }
 0x630   :  { %5031 = vadd.xlane.f32.xlu0 %v5030_v37 }
 0x63d   :  { %7486 = vperm.xlu1 %9842, %v7474_v47  }
 0x641   :  { %7496 = vperm.xlu1 %9842, %v7476_v38  }
 0x645   :  { %7501 = vperm.xlu1 %9842, %v7477_v0  }
 0x646   :  { %7491 = vperm.xlu0 %9841, %v7475_v41  }
 0x649   :  { %7511 = vperm.xlu1 %9842, %v7479_v42  }
 0x64a   :  { %7506 = vperm.xlu0 %9841, %v7478_v21  }
 0x64d   :  { %7521 = vperm.xlu1 %9842, %v7481_v60  }
 0x64e   :  { %7516 = vperm.xlu0 %9841, %v7480_v25  }
 0x651   :  { %7531 = vperm.xlu1 %9842, %v7483_v31  }
 0x652   :  { %7526 = vperm.xlu0 %9841, %v7482_v7  }
 0x685   :  { %v4951_v11 = vpop.xlane.xlu1 %4950  ;;  %v4954_v8 = vpop.xlane.xlu0 %4953 }
 0x686   :  { %v5033_v54 = vadd.f32 %v4954_v8, %v4951_v11 }
 0x689   :  { %v4957_v49 = vpop.xlane.xlu1 %4956  ;;  %v4960_v52 = vpop.xlane.xlu0 %4959 }
 0x68a   :  { %v5034_v23 = vadd.f32 %v5033_v54, %v4957_v49 }
 0x68c   :  { %v5035_v16 = vadd.f32 %v5034_v23, %v4960_v52 }
 0x68d   :  { %v4963_v15 = vpop.xlane.xlu1 %4962  ;;  %v4966_v26 = vpop.xlane.xlu0 %4965 }
 0x68e   :  { %v5036_v30 = vadd.f32 %v5035_v16, %v4963_v15 }
 0x690   :  { %v5037_v1 = vadd.f32 %v5036_v30, %v4966_v26 }
 0x691   :  { %v4969_v59 = vpop.xlane.xlu1 %4968  ;;  %v4972_v53 = vpop.xlane.xlu0 %4971 }
 0x692   :  { %v5038_v50 = vadd.f32 %v5037_v1, %v4969_v59 }
 0x694   :  { %v5039_v32 = vadd.f32 %v5038_v50, %v4972_v53 }
 0x695   :  { %v4975_v40 = vpop.xlane.xlu1 %4974  ;;  %v4978_v61 = vpop.xlane.xlu0 %4977 }
 0x696   :  { %v5040_v27 = vadd.f32 %v5039_v32, %v4975_v40 }
 0x698   :  { %v5041_v36 = vadd.f32 %v5040_v27, %v4978_v61 }
 0x699   :  { %v4981_v10 = vpop.xlane.xlu1 %4980 }
 0x69a   :  { %v5042_v38 = vadd.f32 %v5041_v36, %v4981_v10 }
 0x69d   :  { %v4984_v14 = vpop.xlane.xlu1 %4983  ;;  %v4996_v44 = vpop.xlane.xlu0 %4995 }
 0x69e   :  { %v5043_v42 = vadd.f32 %v5042_v38, %v4984_v14 }
 0x6a1   :  { %v4993_v39 = vpop.xlane.xlu1 %4992  ;;  %v4999_v37 = vpop.xlane.xlu0 %4998 }
 0x6a2   :  { %v5052_v47 = vadd.f32 %v4996_v44, %v4993_v39 }
 0x6a4   :  { %v5053_v21 = vadd.f32 %v5052_v47, %v4999_v37 }
 0x6a5   :  { %v4987_v0 = vpop.xlane.xlu1 %4986  ;;  %v5002_v41 = vpop.xlane.xlu0 %5001 }
 0x6a6   :  { %v5044_v60 = vadd.f32 %v5043_v42, %v4987_v0  ;;  %v5054_v7 = vadd.f32 %v5053_v21, %v5002_v41 }
 0x6a9   :  { %v4990_v25 = vpop.xlane.xlu1 %4989  ;;  %v5005_v31 = vpop.xlane.xlu0 %5004 }
 0x6aa   :  { %v5045_v43 = vadd.f32 %v5044_v60, %v4990_v25  ;;  %v5055_v8 = vadd.f32 %v5054_v7, %v5005_v31  ;;  %v13515_v60 = vld [vmem:[%s14922_s8] sm:$0xff]  ;;  %v13522_v7 = vld [vmem:[%s14922_s8 + $0x8] sm:$0xff] }
 0x6ac   :  { %v5046_v11 = vrot.slane %v5045_v43, 4 }
 0x6ad   :  { %v5011_v54 = vpop.xlane.xlu1 %5010  ;;  %v5008_v49 = vpop.xlane.xlu0 %5007 }
 0x6ae   :  { %v5047_v52 = vadd.f32 %v5046_v11, %v5045_v43  ;;  %v5056_v23 = vadd.f32 %v5055_v8, %v5008_v49  ;;  %v13527_v43 = vld [vmem:[%s14922_s8 + $0x10] sm:$0xff]  ;;  %v13532_v11 = vld [vmem:[%s14922_s8 + $0x18] sm:$0xff] }
 0x6b0   :  { %v5048_v16 = vrot.slane %v5047_v52, 2  ;;  %v5057_v15 = vadd.f32 %v5056_v23, %v5011_v54  ;;  %v13545_v23 = vld [vmem:[%s14923_s9] sm:$0xff] }
 0x6b1   :  { %v5017_v26 = vpop.xlane.xlu1 %5016  ;;  %v5014_v30 = vpop.xlane.xlu0 %5013 }
 0x6b2   :  { %v5049_v1 = vadd.f32 %v5048_v16, %v5047_v52  ;;  %v5058_v59 = vadd.f32 %v5057_v15, %v5014_v30  ;;  %v13550_v16 = vld [vmem:[%s14922_s8 + $0x20] sm:$0xff]  ;;  %v13570_v15 = vld [vmem:[%s14923_s9 + $0x18] sm:$0xff] }
 0x6b4   :  { %v5050_v53 = vrot.slane %v5049_v1, 1  ;;  %v5059_v50 = vadd.f32 %v5058_v59, %v5017_v26 }
 0x6b5   :  { %v5023_v40 = vpop.xlane.xlu1 %5022  ;;  %v5020_v32 = vpop.xlane.xlu0 %5019 }
 0x6b6   :  { %v5051_v61 = vadd.f32 %v5050_v53, %v5049_v1  ;;  %v5060_v10 = vadd.f32 %v5059_v50, %v5020_v32  ;;  %v13585_v32 = vld [vmem:[%s14923_s9 + $0x20] sm:$0xff] }
 0x6b8   :  { %v5071_v27 = vmul.f32 0.00019290124, %v5051_v61  ;;  %v5061_v14 = vadd.f32 %v5060_v10, %v5023_v40 }
 0x6b9   :  { %v5026_v44 = vpop.xlane.xlu0 %5025  ;;  %v5029_v37 = vpop.xlane.xlu1 %5028 }
 0x6ba   :  { %v5073_v36 = vadd.f32 1e-05, %v5071_v27  ;;  %v5062_v39 = vadd.f32 %v5061_v14, %v5026_v44 }
 0x6bc   :  { %10011 = vrsqrt.f32 %v5073_v36  ;;  %v5063_v47 = vadd.f32 %v5062_v39, %v5029_v37  ;;  %v13608_v37 = vld [vmem:[%s14922_s8 + $0x38] sm:$0xff] }
 0x6bd   :  { %v5032_v38 = vpop.xlane.xlu0 %5031 }
 0x6be   :  { %v5064_v0 = vadd.f32 %v5063_v47, %v5032_v38 }
 0x6c0   :  { %v5065_v41 = vrot.slane %v5064_v0, 4 }
 0x6c2   :  { %v5066_v42 = vadd.f32 %v5065_v41, %v5064_v0  ;;  %v13616_v41 = vld [vmem:[%s14923_s9 + $0x30] sm:$0xff] }
 0x6c4   :  { %v5067_v21 = vrot.slane %v5066_v42, 2 }
 0x6c6   :  { %v13517_v25 = vpop.eup %10011  ;;  %v5068_v31 = vadd.f32 %v5067_v21, %v5066_v42 }
 0x6c7   :  { %v5077_v8 = vmul.f32 %v13517_v25, %v13278_v55  ;;  %v5078_v54 = vmul.f32 %v13517_v25, %v13274_v33  ;;  %v5079_v49 = vmul.f32 %v13517_v25, %v13286_v51  ;;  %v5080_v52 = vmul.f32 %v13517_v25, %v13282_v20  ;;  %v13555_v33 = vld [vmem:[%s14922_s8 + $0x28] sm:$0xff]  ;;  %v13565_v51 = vld [vmem:[%s14923_s9 + $0x10] sm:$0xff] }
 0x6c8   :  { %v5069_v55 = vrot.slane %v5068_v31, 1  ;;  %v13560_v20 = vld [vmem:[%s14923_s9 + $0x8] sm:$0xff]  ;;  %v5081_v26 = vmul.f32 %v13517_v25, %v13294_v22  ;;  %v5082_v30 = vmul.f32 %v13517_v25, %v13290_v9  ;;  %v5083_v1 = vmul.f32 %v13517_v25, %v13318_v45  ;;  %v13595_v22 = vld [vmem:[%s14922_s8 + $0x30] sm:$0xff] }
 0x6c9   :  { %v5119_v59 = vmul.f32 %v13515_v60, %v5077_v8  ;;  %v5120_v53 = vmul.f32 %v13522_v7, %v5078_v54  ;;  %v5121_v50 = vmul.f32 %v13527_v43, %v5079_v49  ;;  %v5122_v40 = vmul.f32 %v13532_v11, %v5080_v52  ;;  %v13590_v9 = vld [vmem:[%s14923_s9 + $0x28] sm:$0xff]  ;;  %v13621_v54 = vld [vmem:[%s14923_s9 + $0x38] sm:$0xff] }
 0x6ca   :  { %v5070_v45 = vadd.f32 %v5069_v55, %v5068_v31  ;;  %v5123_v61 = vmul.f32 %v13550_v16, %v5081_v26  ;;  %v5124_v10 = vmul.f32 %v13555_v33, %v5082_v30  ;;  %v5084_v27 = vmul.f32 %v13517_v25, %v13306_v58  ;;  %v13627_v30 = vld [vmem:[%s14922_s8 + $0x40] sm:$0xff] }
 0x6cb   :  { %v5161_v14 = vadd.f32 %v13545_v23, %v5119_v59  ;;  %v5162_v44 = vadd.f32 %v13560_v20, %v5120_v53  ;;  %v5163_v36 = vadd.f32 %v13565_v51, %v5121_v50  ;;  %v5164_v39 = vadd.f32 %v13570_v15, %v5122_v40  ;;  %v13635_v40 = vld [vmem:[%s14922_s8 + $0x48] sm:$0xff] }
 0x6cc   :  { %v5072_v47 = vmul.f32 0.00019290124, %v5070_v45  ;;  %v5165_v38 = vadd.f32 %v13585_v32, %v5123_v61  ;;  %v5166_v0 = vadd.f32 %v13590_v9, %v5124_v10  ;;  %v5125_v58 = vmul.f32 %v13595_v22, %v5083_v1 }
 0x6cd   :  { %v5189_v42 = vmax.f32 %v5161_v14, 0.0  ;;  %v5190_v21 = vmax.f32 %v5162_v44, 0.0  ;;  %v5191_v31 = vmax.f32 %v5163_v36, 0.0  ;;  %v5192_v8 = vmax.f32 %v5164_v39, 0.0  ;;  %v13653_v14 = vld [vmem:[%s14922_s8 + $0x58] sm:$0xff]  ;;  %v13661_v36 = vld [vmem:[%s14923_s9 + $0x48] sm:$0xff] }
 0x6ce   :  { %v5074_v49 = vadd.f32 1e-05, %v5072_v47  ;;  %v5193_v52 = vmax.f32 %v5165_v38, 0.0  ;;  %v5194_v55 = vmax.f32 %v5166_v0, 0.0  ;;  %v5126_v26 = vmul.f32 %v13608_v37, %v5084_v27  ;;  %v13643_v27 = vld [vmem:[%s14923_s9 + $0x40] sm:$0xff] }
 0x6cf   :  { %v5217_v1 = vpack.c.bf16 %v5190_v21, %v5189_v42  ;;  %v5218_v59 = vpack.c.bf16 %v5192_v8, %v5191_v31  ;;  %v5167_v53 = vadd.f32 %v13616_v41, %v5125_v58  ;;  %v5085_v50 = vmul.f32 %v13517_v25, %v13330_v4  ;;  %v13648_v4 = vld [vmem:[%s14922_s8 + $0x50] sm:$0xff]  ;;  %v13677_v42 = vld [vmem:[%s14923_s9 + $0x58] sm:$0xff] }
 0x6d0   :  { %10013 = vrsqrt.f32 %v5074_v49  ;;  %v5219_v45 = vpack.c.bf16 %v5194_v55, %v5193_v52  ;;  %v5168_v61 = vadd.f32 %v13621_v54, %v5126_v26  ;;  %v5086_v10 = vmul.f32 %v13517_v25, %v13326_v28  ;;  %v13672_v58 = vld [vmem:[%s14923_s9 + $0x50] sm:$0xff] }
 0x6d1   :  { %5231 = vst.msk [vmem:[#allocation3] sm:$0xff] %vm4740_vm10, %v5217_v1  ;;  %5232 = vst.msk [vmem:[#allocation3 + $0x8] sm:$0xff] %vm4740_vm10, %v5218_v59  ;;  %v5195_v28 = vmax.f32 %v5167_v53, 0.0  ;;  %v5127_v44 = vmul.f32 %v13627_v30, %v5085_v50  ;;  %v5087_v39 = vmul.f32 %v13517_v25, %v13336_v2  ;;  %v5088_v47 = vmul.f32 %v13517_v25, %v13347_v19 }
 0x6d2   :  { %5233 = vst.msk [vmem:[#allocation3 + $0x10] sm:$0xff] %vm4740_vm10, %v5219_v45  ;;  %v5196_v38 = vmax.f32 %v5168_v61, 0.0  ;;  %v5128_v0 = vmul.f32 %v13635_v40, %v5086_v10  ;;  %v13692_v61 = vmul.f32 %v13517_v25, %v13371_v24 }
 0x6d3   :  { %v5169_v2 = vadd.f32 %v13643_v27, %v5127_v44  ;;  %v5129_v21 = vmul.f32 %v13648_v4, %v5087_v39  ;;  %v5130_v19 = vmul.f32 %v13653_v14, %v5088_v47  ;;  %v13703_v47 = vmul.f32 %v13517_v25, %v13392_v3 }
 0x6d4   :  { %v5220_v31 = vpack.c.bf16 %v5196_v38, %v5195_v28  ;;  %v5170_v8 = vadd.f32 %v13661_v36, %v5128_v0 }
 0x6d5   :  { %v5197_v49 = vmax.f32 %v5169_v2, 0.0  ;;  %v5171_v52 = vadd.f32 %v13672_v58, %v5129_v21  ;;  %v5172_v55 = vadd.f32 %v13677_v42, %v5130_v19 }
 0x6d6   :  { %5234 = vst.msk [vmem:[#allocation3 + $0x18] sm:$0xff] %vm4740_vm10, %v5220_v31  ;;  %v5198_v26 = vmax.f32 %v5170_v8, 0.0 }
 0x6d7   :  { %v5199_v1 = vmax.f32 %v5171_v52, 0.0  ;;  %v5200_v59 = vmax.f32 %v5172_v55, 0.0 }
 0x6d8   :  { %v13686_v53 = vld [vmem:[#allocation3] sm:$0xff]  ;;  %v13688_v50 = vld [vmem:[#allocation3 + $0x8] sm:$0xff]  ;;  %v5221_v45 = vpack.c.bf16 %v5198_v26, %v5197_v49 }
 0x6d9   :  { %v5266_v10 = vshrl.u32 %v13686_v53, 16  ;;  %v5268_v28 = vshll.u32 %v13686_v53, 16  ;;  %v13697_v44 = vshll.u32 %v13688_v50, 16  ;;  %v13699_v39 = vld [vmem:[#allocation3 + $0x10] sm:$0xff]  ;;  %v13708_v0 = vshrl.u32 %v13688_v50, 16 }
 0x6da   :  { %v13705_v38 = vpop.eup %10013  ;;  %v13711_v24 = vshll.u32 %v13699_v39, 16  ;;  %v13714_v2 = vshrl.u32 %v13699_v39, 16  ;;  %5235 = vst.msk [vmem:[#allocation3 + $0x20] sm:$0xff] %vm4740_vm10, %v5221_v45  ;;  %v5222_v21 = vpack.c.bf16 %v5200_v59, %v5199_v1 }
 0x6db   :  { %v5270_v19 = vrot.slane %v5268_v28, 1  ;;  %v5275_v31 = vrot.slane %v13697_v44, 1  ;;  %v5091_v3 = vmul.f32 %v13705_v38, %v13366_v57  ;;  %v5092_v25 = vmul.f32 %v13705_v38, %v13358_v12 }
 0x6dc   :  { %v5283_v8 = vrot.slane %v13711_v24, 1  ;;  %5236 = vst.msk [vmem:[#allocation3 + $0x28] sm:$0xff] %vm4740_vm10, %v5222_v21  ;;  %v5093_v49 = vmul.f32 %v13705_v38, %v13362_v5  ;;  %v5094_v52 = vmul.f32 %v13705_v38, %v13381_v62  ;;  %v5095_v55 = vmul.f32 %v13705_v38, %v13388_v34 }
 0x6dd   :  { %v5271_v26 = vor.u32 %v5270_v19, %v5266_v10  ;;  %v5279_v1 = vor.u32 %v13708_v0, %v5275_v31  ;;  %v13731_v57 = vld [vmem:[#allocation3 + $0x18] sm:$0xff]  ;;  %v5133_v12 = vmul.f32 %v13515_v60, %v5091_v3  ;;  %v5134_v59 = vmul.f32 %v13522_v7, %v5092_v25  ;;  %v9976_v60 = vld [vmem:[%s14920_s11 + $0x8] sm:$0xff]  }
 0x6de   :  { %v5287_v45 = vor.u32 %v13714_v2, %v5283_v8  ;;  %v13737_v28 = vshll.u32 %v13731_v57, 16  ;;  %v13740_v5 = vshrl.u32 %v13731_v57, 16  ;;  %v5135_v62 = vmul.f32 %v13527_v43, %v5093_v49 }
 0x6df   :  { %v5276_v34 = vsel %vm3417_vm9, %v5271_v26, %v5275_v31  ;;  %v5284_v10 = vsel %vm3417_vm9, %v5279_v1, %v5283_v8  ;;  %v5136_v7 = vmul.f32 %v13532_v11, %v5094_v52  ;;  %v5175_v21 = vadd.f32 %v13545_v23, %v5133_v12 }
 0x6e0   :  { %9336 = vmatprep.mubr.msk.bf16.mxu1 %vm4740_vm10, %v5276_v34  ;;  %v5291_v19 = vrot.slane %v13737_v28, 1  ;;  %v5176_v3 = vadd.f32 %v13560_v20, %v5134_v59  ;;  %v5177_v43 = vadd.f32 %v13565_v51, %v5135_v62  ;;  %v5096_v31 = vmul.f32 %v13705_v38, %v13401_v6 }
 0x6e1   :  { %9337 = vmatmul.mubr.msk.bf16.vlgmr.msra.gmra.mrb[96].mxu1 %vm4740_vm10, %v5284_v10  ;;  %v13757_v25 = vld [vmem:[#allocation3 + $0x20] sm:$0xff]  ;;  %v5178_v8 = vadd.f32 %v13570_v15, %v5136_v7  ;;  %v5203_v11 = vmax.f32 %v5175_v21, 0.0  ;;  %v5137_v23 = vmul.f32 %v13550_v16, %v5095_v55  ;;  %v5097_v49 = vmul.f32 %v13705_v38, %v13405_v35 }
 0x6e2   :  { %v5292_v52 = vsel %vm3417_vm9, %v5287_v45, %v5291_v19  ;;  %9357 = vmatpush3.bf16.msra.mxu1 %v13509_v29  ;;  %v5295_v20 = vor.u32 %v13740_v5, %v5291_v19  ;;  %v13767_v6 = vshll.u32 %v13757_v25, 16  ;;  %v13770_v51 = vshrl.u32 %v13757_v25, 16  ;;  %v9977_v29 = vld [vmem:[%s14920_s11 + $0x10] sm:$0xff]  }
 0x6e3   :  { %9340 = vmatprep.mubr.msk.bf16.mxu1 %vm4740_vm10, %v5292_v52  ;;  %v13773_v15 = vld [vmem:[#allocation3 + $0x28] sm:$0x1]  ;;  %9358 = vmatprep.subr.bf16.mxu1 %v9976_v60  ;;  %v5204_v16 = vmax.f32 %v5176_v3, 0.0  ;;  %v5205_v55 = vmax.f32 %v5177_v43, 0.0  ;;  %v5206_v35 = vmax.f32 %v5178_v8, 0.0  ;;  %v5138_v26 = vmul.f32 %v13555_v33, %v5096_v31 }
 0x6e4   :  { %v5299_v1 = vrot.slane %v13767_v6, 1  ;;  %v5305_v12 = vshll.u32 %v13773_v15, 16  ;;  %v5179_v59 = vadd.f32 %v13585_v32, %v5137_v23  ;;  %v5098_v45 = vmul.f32 %v13705_v38, %v13417_v18 }
 0x6e5   :  { %v5224_v62 = vpack.c.bf16 %v5204_v16, %v5203_v11  ;;  %v5225_v34 = vpack.c.bf16 %v5206_v35, %v5205_v55  ;;  %v5180_v10 = vadd.f32 %v13590_v9, %v5138_v26  ;;  %v5139_v7 = vmul.f32 %v13595_v22, %v5097_v49  ;;  %v9978_v22 = vld [vmem:[%s14920_s11 + $0x18] sm:$0xff]   ;;  %v13838_v26 = vld [vmem:[%s14923_s9 + $0x60] sm:$0xff] }
 0x6e6   :  { %v5300_v33 = vsel %vm3417_vm9, %v5295_v20, %v5299_v1  ;;  %v5303_v21 = vor.u32 %v13770_v51, %v5299_v1  ;;  %v5307_v19 = vrot.slane %v5305_v12, 1  ;;  %9359 = vmatpush3.bf16.msra.mxu1 %v9976_v60  ;;  %v5207_v3 = vmax.f32 %v5179_v59, 0.0 }
 0x6e7   :  { %5238 = vst.msk [vmem:[#allocation3 + $0x38] sm:$0xff] %vm4740_vm10, %v5224_v62  ;;  %5239 = vst.msk [vmem:[#allocation3 + $0x40] sm:$0xff] %vm4740_vm10, %v5225_v34  ;;  %v5208_v32 = vmax.f32 %v5180_v10, 0.0  ;;  %9360 = vmatprep.subr.bf16.mxu1 %v9977_v29  ;;  %v5140_v18 = vmul.f32 %v13608_v37, %v5098_v45  ;;  %v5181_v43 = vadd.f32 %v13616_v41, %v5139_v7  ;;  %v13807_v41 = vld [vmem:[%s14922_s8 + $0x60] sm:$0xff] }
 0x6e8   :  { %v5099_v9 = vmul.f32 %v13705_v38, %v13423_v17  ;;  %v5308_v60 = vsel %vm3417_vm9, %v5303_v21, %v5307_v19  ;;  %v5100_v31 = vmul.f32 %v13705_v38, %v13433_v63  ;;  %v5101_v8 = vmul.f32 %v13705_v38, %v13437_v13  ;;  %v13815_v63 = vld [vmem:[%s14922_s8 + $0x68] sm:$0xff] }
 0x6e9   :  { %v5102_v37 = vmul.f32 %v13705_v38, %v13443_v56  ;;  %9341 = vmatmul.mubr.msk.bf16.gmra.mrb[100].mxu1 %vm4740_vm10, %v5300_v33  ;;  %v5226_v17 = vpack.c.bf16 %v5208_v32, %v5207_v3  ;;  %v5182_v11 = vadd.f32 %v13621_v54, %v5140_v18  ;;  %v5209_v23 = vmax.f32 %v5181_v43, 0.0 }
 0x6ea   :  { %v5141_v49 = vmul.f32 %v13627_v30, %v5099_v9  ;;  %9344 = vmatprep.mubr.msk.bf16.mxu1 %vm4740_vm10, %v5308_v60  ;;  %9361 = vmatpush3.bf16.msra.mxu1 %v9977_v29  ;;  %v5142_v13 = vmul.f32 %v13635_v40, %v5100_v31  ;;  %v5143_v56 = vmul.f32 %v13648_v4, %v5101_v8  ;;  %v13826_v30 = vld [vmem:[%s14920_s11 + $0x40] sm:$0xff]   ;;  %v5931_v9 = vrot.slane %v13708_v0, 5 }
 0x6eb   :  { %v5144_v52 = vmul.f32 %v13653_v14, %v5102_v37  ;;  %5240 = vst.msk [vmem:[#allocation3 + $0x48] sm:$0xff] %vm4740_vm10, %v5226_v17  ;;  %v5210_v54 = vmax.f32 %v5182_v11, 0.0  ;;  %9362 = vmatprep.subr.bf16.mxu1 %v9978_v22  ;;  %v5131_v16 = vmul.f32 %v13807_v41, %v13692_v61  ;;  %v5132_v55 = vmul.f32 %v13815_v63, %v13703_v47  ;;  %v13843_v61 = vld [vmem:[%s14923_s9 + $0x68] sm:$0xff] }
 0x6ec   :  { %v5183_v20 = vadd.f32 %v13643_v27, %v5141_v49  ;;  %v5184_v40 = vadd.f32 %v13661_v36, %v5142_v13  ;;  %v5185_v4 = vadd.f32 %v13672_v58, %v5143_v56  ;;  %v5932_v37 = vrot.slane %v13697_v44, 6 }
 0x6ed   :  { %v5186_v14 = vadd.f32 %v13677_v42, %v5144_v52  ;;  %v5227_v35 = vpack.c.bf16 %v5210_v54, %v5209_v23  ;;  %v5173_v62 = vadd.f32 %v13838_v26, %v5131_v16  ;;  %v5174_v34 = vadd.f32 %v13843_v61, %v5132_v55 }
 0x6ee   :  { %v5211_v27 = vmax.f32 %v5183_v20, 0.0  ;;  %v13845_v36 = vld [vmem:[#allocation3 + $0x38] sm:$0xff]  ;;  %v13847_v58 = vld [vmem:[#allocation3 + $0x40] sm:$0xff]  ;;  %v5212_v42 = vmax.f32 %v5184_v40, 0.0  ;;  %9363 = vmatpush3.bf16.msra.mxu1 %v9978_v22  ;;  %v5213_v29 = vmax.f32 %v5185_v4, 0.0  ;;  %v5935_v17 = vrot.slane %v13714_v2, 5 }
 0x6ef   :  { %v5214_v47 = vmax.f32 %v5186_v14, 0.0  ;;  %v5312_v1 = vshll.u32 %v13845_v36, 16  ;;  %v13851_v12 = vshll.u32 %v13847_v58, 16  ;;  %5241 = vst.msk [vmem:[#allocation3 + $0x50] sm:$0xff] %vm4740_vm10, %v5227_v35  ;;  %9384 = vmatprep.subr.bf16.mxu1 %v13826_v30  ;;  %v5310_v10 = vshrl.u32 %v13845_v36, 16 }
 0x6f0   :  { %v5228_v59 = vpack.c.bf16 %v5212_v42, %v5211_v27  ;;  %v13860_v21 = vshrl.u32 %v13847_v58, 16  ;;  %v5201_v22 = vmax.f32 %v5173_v62, 0.0  ;;  %v5202_v60 = vmax.f32 %v5174_v34, 0.0 }
 0x6f1   :  { %v5229_v45 = vpack.c.bf16 %v5214_v47, %v5213_v29  ;;  %v5314_v7 = vrot.slane %v5312_v1, 1  ;;  %v5319_v33 = vrot.slane %v13851_v12, 1  ;;  %v5936_v23 = vrot.slane %v13711_v24, 6 }
 0x6f2   :  { %v13862_v19 = vld [vmem:[#allocation3 + $0x48] sm:$0xff]  ;;  %5242 = vst.msk [vmem:[#allocation3 + $0x58] sm:$0xff] %vm4740_vm10, %v5228_v59  ;;  %v5939_v49 = vrot.slane %v13740_v5, 5  ;;  %v13893_v16 = vor.u32 %v5932_v37, %v5931_v9  ;;  %v5940_v4 = vrot.slane %v13737_v28, 6  ;;  %v5943_v27 = vrot.slane %v13770_v51, 5 }
 0x6f3   :  { %5243 = vst.msk [vmem:[#allocation3 + $0x60] sm:$0xff] %vm4740_vm10, %v5229_v45  ;;  %v5315_v3 = vor.u32 %v5314_v7, %v5310_v10  ;;  %v5323_v32 = vor.u32 %v13860_v21, %v5319_v33  ;;  %v13868_v18 = vshll.u32 %v13862_v19, 16  ;;  %v13871_v43 = vshrl.u32 %v13862_v19, 16 }
 0x6f4   :  { %v5937_v40 = vor.u32 %v5936_v23, %v5935_v17  ;;  %v5944_v42 = vrot.slane %v13767_v6, 6  ;;  %v5223_v29 = vpack.c.bf16 %v5202_v60, %v5201_v22  ;;  %v5964_v37 = vrot.slane %v13860_v21, 5 }
 0x6f5   :  { %v5320_v31 = vsel %vm3417_vm9, %v5315_v3, %v5319_v33  ;;  %v5327_v8 = vrot.slane %v13868_v18, 1  ;;  %v5941_v3 = vor.u32 %v5940_v4, %v5939_v49  ;;  %v5965_v23 = vrot.slane %v13851_v12, 6 }
 0x6f6   :  { %9345 = vmatmul.mubr.msk.bf16.gmra.mrb[104].mxu1 %vm4740_vm10, %v5320_v31  ;;  %v13879_v11 = vld [vmem:[#allocation3 + $0x50] sm:$0xff]  ;;  %5237 = vst.msk [vmem:[#allocation3 + $0x30] sm:$0xff] %vm4740_vm10, %v5223_v29  ;;  %v13911_v10 = vsel %vm1320_vm3, %v13893_v16, %v5937_v40  ;;  %v5968_v49 = vrot.slane %v13871_v43, 5 }
 0x6f7   :  { %v5328_v13 = vsel %vm3417_vm9, %v5323_v32, %v5327_v8  ;;  %v5331_v56 = vor.u32 %v13871_v43, %v5327_v8  ;;  %v13886_v52 = vshll.u32 %v13879_v11, 16  ;;  %v13889_v54 = vshrl.u32 %v13879_v11, 16 }
 0x6f8   :  { %9348 = vmatprep.mubr.msk.bf16.mxu1 %vm4740_vm10, %v5328_v13  ;;  %v5717_v20 = vrot.slane %v13879_v11, 1  ;;  %v13921_v32 = vor.u32 %v5944_v42, %v5943_v27  ;;  %v13930_v31 = vsel %vm1320_vm3, %v5937_v40, %v5941_v3  ;;  %v5969_v13 = vrot.slane %v13868_v18, 6 }
 0x6f9   :  { %v5335_v14 = vrot.slane %v13886_v52, 1  ;;  %v13897_v55 = vld [vmem:[#allocation3 + $0x58] sm:$0xff]  ;;  %v5973_v4 = vrot.slane %v13886_v52, 6 }
 0x6fa   :  { %v5264_v35 = vld [vmem:[#allocation3 + $0x60] sm:$0x1]  ;;  %v13902_v47 = vshll.u32 %v13897_v55, 16  ;;  %v5719_v59 = vrot.slane %v13897_v55, 1  ;;  %v13927_v22 = vshrl.u32 %v13897_v55, 16  ;;  %v13934_v8 = vsel %vm1320_vm3, %v5941_v3, %v13921_v32 }
 0x6fb   :  { %v5339_v1 = vor.u32 %v13889_v54, %v5335_v14  ;;  %v5721_v45 = vrot.slane %v5264_v35, 1  ;;  %v5336_v62 = vsel %vm3417_vm9, %v5331_v56, %v5335_v14  ;;  %v5349_v60 = vshll.u32 %v5264_v35, 16 }
 0x6fc   :  { %v5343_v34 = vrot.slane %v13902_v47, 1  ;;  %v13916_v7 = vsel %vm5700_vm11, %v5717_v20, %v5719_v59  ;;  %v5972_v56 = vrot.slane %v13889_v54, 5  ;;  %v13943_v14 = vor.u32 %v5965_v23, %v5964_v37 }
 0x6fd   :  { %v13919_v33 = vsel %vm5700_vm11, %v5719_v59, %v5721_v45  ;;  %v5351_v40 = vrot.slane %v5349_v60, 1  ;;  %v5976_v35 = vrot.slane %v13927_v22, 5  ;;  %v5977_v27 = vrot.slane %v13902_v47, 6  ;;  %v9980_v60 = vld [vmem:[%s14920_s11 + $0x48] sm:$0xff]  }
 0x6fe   :  { %9349 = vmatmul.mubr.msk.bf16.gmra.mrb[108].mxu1 %vm4740_vm10, %v5336_v62  ;;  %v5344_v9 = vsel %vm3417_vm9, %v5339_v1, %v5343_v34  ;;  %v5347_v17 = vor.u32 %v13927_v22, %v5343_v34  ;;  %v5970_v42 = vor.u32 %v5969_v13, %v5968_v49  ;;  %v5974_v29 = vor.u32 %v5973_v4, %v5972_v56  ;;  %v9981_v4 = vld [vmem:[%s14920_s11 + $0x50] sm:$0xff]  }
 0x6ff   :  { %9352 = vmatprep.mubr.msk.bf16.mxu1 %vm4740_vm10, %v5344_v9  ;;  %v13948_v59 = vor.u32 %v5977_v27, %v5976_v35  ;;  %v14959_v3 = vrot.slane %v13879_v11, 6  ;;  %v14958_v9 = vrot.slane %v13897_v55, 6  ;;  %v6424_v23 = vrot.slane %v13714_v2, 6 }
 0x700   :  { %v5352_v1 = vsel %vm3417_vm9, %v5347_v17, %v5351_v40  ;;  %v13953_v45 = vsel %vm1320_vm3, %v13943_v14, %v5970_v42  ;;  %v13956_v62 = vsel %vm1320_vm3, %v5970_v42, %v5974_v29  ;;  %v6421_v17 = vrot.slane %v13697_v44, 7 }
 0x701   :  { %v13962_v34 = vsel %vm1320_vm3, %v5974_v29, %v13948_v59  ;;  %v13974_v37 = vsel %vm2145_vm5, %v14959_v3, %v14958_v9  ;;  %v6425_v49 = vrot.slane %v13711_v24, 7  ;;  %v6428_v56 = vrot.slane %v13740_v5, 6 }
 0x702   :  { %v6432_v44 = vrot.slane %v13770_v51, 6  ;;  %v6433_v35 = vrot.slane %v13767_v6, 7 }
 0x703   :  { %v6426_v40 = vor.u32 %v6425_v49, %v6424_v23  ;;  %v6454_v23 = vrot.slane %v13851_v12, 7  ;;  %v6457_v49 = vrot.slane %v13871_v43, 6 }
 0x704   :  { %v13998_v42 = vor.u32 %v6433_v35, %v6432_v44  ;;  %v6462_v44 = vrot.slane %v13886_v52, 7  ;;  %v6466_v35 = vrot.slane %v13902_v47, 7 }
 0x706   :  { %9353 = vmatmul.mubr.msk.bf16.gmra.mrb[112].mxu1 %vm4740_vm10, %v5352_v1  ;;  %v9982_v1 = vld [vmem:[%s14920_s11 + $0x58] sm:$0xff]  }
 0x707   :  { %9364 = vmatprep.mubr.msk.bf16.mxu1 %vm4740_vm10, %v13686_v53  ;;  %v6420_v53 = vrot.slane %v13708_v0, 6  ;;  %v6429_v0 = vrot.slane %v13737_v28, 7 }
 0x709   :  { %v13985_v13 = vor.u32 %v6421_v17, %v6420_v53  ;;  %v6430_v27 = vor.u32 %v6429_v0, %v6428_v56  ;;  %v6453_v17 = vrot.slane %v13860_v21, 6  ;;  %v6461_v56 = vrot.slane %v13889_v54, 6  ;;  %v9983_v21 = vld [vmem:[%s14920_s11 + $0x60] sm:$0xff]  }
 0x70b   :  { %v14001_v29 = vsel %vm6411_vm12, %v6426_v40, %v6430_v27  ;;  %v14008_v53 = vsel %vm6411_vm12, %v6430_v27, %v13998_v42  ;;  %v14017_v0 = vor.u32 %v6454_v23, %v6453_v17  ;;  %v6463_v27 = vor.u32 %v6462_v44, %v6461_v56 }
 0x70c   :  { %v5104_v56 = vmul.f32 %v13705_v38, %v13458_v48  ;;  %v5686_v48 = vld [vmem:[#allocation3] sm:$0xfe] }
 0x70e   :  { %9365 = vmatmul.mubr.msk.bf16.vlgmr.msra.gmra.mrb[96].mxu1 %vm4740_vm10, %v13688_v50  ;;  %v5146_v44 = vmul.f32 %v13815_v63, %v5104_v56  ;;  %v6984_v63 = vrot.slane %v13871_v43, 3  ;;  %v7002_v56 = vrot.slane %v13927_v22, 3 }
 0x70f   :  { %9368 = vmatprep.mubr.msk.bf16.mxu1 %vm4740_vm10, %v13699_v39  ;;  %9385 = vmatpush3.bf16.msra.mxu1 %v13826_v30  ;;  %v13996_v30 = vsel %vm6411_vm12, %v13985_v13, %v6426_v40  ;;  %v6465_v40 = vrot.slane %v13927_v22, 6  ;;  %v9984_v22 = vld [vmem:[%s14920_s11 + $0x68] sm:$0xff]  }
 0x710   :  { %9386 = vmatprep.subr.bf16.mxu1 %v9980_v60 }
 0x711   :  { %v14027_v9 = vor.u32 %v6466_v35, %v6465_v40  ;;  %v5188_v40 = vadd.f32 %v13843_v61, %v5146_v44  ;;  %v6996_v61 = vrot.slane %v13886_v52, 4  ;;  %v5704_v52 = vrot.slane %v13699_v39, 1 }
 0x713   :  { %9387 = vmatpush3.bf16.msra.mxu1 %v9980_v60  ;;  %v6458_v60 = vrot.slane %v13868_v18, 7  ;;  %v14038_v3 = vsel %vm6411_vm12, %v6463_v27, %v14027_v9 }
 0x714   :  { %9388 = vmatprep.subr.bf16.mxu1 %v9981_v4 }
 0x715   :  { %v6459_v12 = vor.u32 %v6458_v60, %v6457_v49  ;;  %v6715_v49 = vrot.slane %v13897_v55, 3  ;;  %v5103_v60 = vmul.f32 %v13705_v38, %v13451_v46 }
 0x716   :  { %9369 = vmatmul.mubr.msk.bf16.gmra.mrb[100].mxu1 %vm4740_vm10, %v13731_v57 }
 0x717   :  { %9372 = vmatprep.mubr.msk.bf16.mxu1 %vm4740_vm10, %v13757_v25  ;;  %9389 = vmatpush3.bf16.msra.mxu1 %v9981_v4  ;;  %v14031_v17 = vsel %vm6411_vm12, %v14017_v0, %v6459_v12  ;;  %v14034_v23 = vsel %vm6411_vm12, %v6459_v12, %v6463_v27  ;;  %v6713_v4 = vrot.slane %v13879_v11, 3  ;;  %v5216_v12 = vmax.f32 %v5188_v40, 0.0 }
 0x718   :  { %9390 = vmatprep.subr.bf16.mxu1 %v9982_v1  ;;  %v5701_v27 = vrot.slane %v5686_v48, 1  ;;  %v7243_v48 = vrot.slane %v13879_v11, 4 }
 0x71b   :  { %9391 = vmatpush3.bf16.msra.mxu1 %v9982_v1  ;;  %v14055_v1 = vsel %vm6698_vm13, %v6713_v4, %v6715_v49 }
 0x71c   :  { %9412 = vmatprep.subr.bf16.mxu1 %v9983_v21 }
 0x71e   :  { %9373 = vmatmul.mubr.msk.bf16.gmra.mrb[104].mxu1 %vm4740_vm10, %v13845_v36  ;;  %v5145_v36 = vmul.f32 %v13807_v41, %v5103_v60  ;;  %v5702_v41 = vrot.slane %v13688_v50, 1  ;;  %v6987_v60 = vrot.slane %v13868_v18, 4 }
 0x71f   :  { %9376 = vmatprep.mubr.msk.bf16.mxu1 %vm4740_vm10, %v13847_v58 }
 0x720   :  { %v5187_v46 = vadd.f32 %v13838_v26, %v5145_v36  ;;  %v6993_v26 = vrot.slane %v13889_v54, 3  ;;  %v7005_v36 = vrot.slane %v13902_v47, 4  ;;  %v14076_v40 = vor.u32 %v6987_v60, %v6984_v63  ;;  %v14091_v47 = vld [vmem:[#allocation3 + $0x60] sm:$0xff] }
 0x721   :  { %v5706_v54 = vrot.slane %v13731_v57, 1  ;;  %v7247_v63 = vrot.slane %v14091_v47, 4  ;;  %v5708_v60 = vrot.slane %v13757_v25, 1 }
 0x722   :  { %v5215_v35 = vmax.f32 %v5187_v46, 0.0  ;;  %v6997_v44 = vor.u32 %v6996_v61, %v6993_v26  ;;  %v5703_v46 = vsel %vm5700_vm11, %v5701_v27, %v5702_v41 }
 0x723   :  { %v5707_v27 = vsel %vm5700_vm11, %v5704_v52, %v5706_v54 }
 0x724   :  { %v5230_v38 = vpack.c.bf16 %v5216_v12, %v5215_v35  ;;  %v14078_v35 = vor.u32 %v7005_v36, %v7002_v56  ;;  %v14083_v18 = vsel %vm6919_vm14, %v14076_v40, %v6997_v44  ;;  %v5705_v12 = vsel %vm5700_vm11, %v5702_v41, %v5704_v52  ;;  %v9985_v41 = vld [vmem:[%s14920_s11 + $0x70] sm:$0xff]  }
 0x725   :  { %v5710_v56 = vrot.slane %v13773_v15, 1  ;;  %v5709_v36 = vsel %vm5700_vm11, %v5706_v54, %v5708_v60  ;;  %v9987_v15 = vld [vmem:[%s14920_s11 + $0x80] sm:$0xff]  }
 0x726   :  { %9377 = vmatmul.mubr.msk.bf16.gmra.mrb[108].mxu1 %vm4740_vm10, %v13862_v19  ;;  %5244 = vst.msk [vmem:[#allocation3 + $0x68] sm:$0xff] %vm4740_vm10, %v5230_v38  ;;  %v14087_v43 = vsel %vm6919_vm14, %v6997_v44, %v14078_v35  ;;  %v7245_v38 = vrot.slane %v13897_v55, 4 }
 0x727   :  { %9380 = vmatprep.mubr.msk.bf16.mxu1 %vm4740_vm10, %v13879_v11  ;;  %v5711_v44 = vsel %vm5700_vm11, %v5708_v60, %v5710_v56 }
 0x728   :  { %v14106_v26 = vsel %vm7228_vm15, %v7243_v48, %v7245_v38  ;;  %v14114_v61 = vsel %vm7228_vm15, %v7245_v38, %v7247_v63 }
 0x72e   :  { %9381 = vmatmul.mubr.msk.bf16.gmra.mrb[112].mxu1 %vm4740_vm10, %v13897_v55 }
 0x72f   :  { %9392 = vmatprep.mubr.msk.bf16.mxu1 %vm4740_vm10, %v5703_v46  ;;  %v5687_v46 = vld [vmem:[#allocation3 + $0x38] sm:$0xfe] }
 0x730   :  { %v5712_v52 = vrot.slane %v5687_v46, 1 }
 0x736   :  { %9393 = vmatmul.mubr.msk.bf16.vlgmr.msra.gmra.mrb[96].mxu1 %vm4740_vm10, %v5705_v12  ;;  %v5715_v12 = vrot.slane %v13862_v19, 1 }
 0x737   :  { %9396 = vmatprep.mubr.msk.bf16.mxu1 %vm4740_vm10, %v5707_v27  ;;  %9413 = vmatpush3.bf16.msra.mxu1 %v9983_v21  ;;  %v9986_v21 = vld [vmem:[%s14920_s11 + $0x78] sm:$0xff]   ;;  %v5919_v27 = vld [vmem:[#allocation3] sm:$0xe0] }
 0x738   :  { %9414 = vmatprep.subr.bf16.mxu1 %v9984_v22  ;;  %v5927_v60 = vshll.u32 %v5919_v27, 16  ;;  %v5718_v56 = vsel %vm5700_vm11, %v5715_v12, %v5717_v20 }
 0x73b   :  { %9415 = vmatpush3.bf16.msra.mxu1 %v9984_v22  ;;  %v5713_v22 = vrot.slane %v13847_v58, 1 }
 0x73c   :  { %9416 = vmatprep.subr.bf16.mxu1 %v9985_v41 }
 0x73d   :  { %v5714_v54 = vsel %vm5700_vm11, %v5712_v52, %v5713_v22  ;;  %v5716_v38 = vsel %vm5700_vm11, %v5713_v22, %v5715_v12  ;;  %v14145_v52 = vld [vmem:[#allocation3 + $0x28] sm:$0x3f] }
 0x73e   :  { %9397 = vmatmul.mubr.msk.bf16.gmra.mrb[100].mxu1 %vm4740_vm10, %v5709_v36  ;;  %v5948_v20 = vshrl.u32 %v14145_v52, 16  ;;  %v5951_v22 = vshll.u32 %v14145_v52, 16  ;;  %v9988_v12 = vld [vmem:[%s14920_s11 + $0x88] sm:$0xff]  }
 0x73f   :  { %9400 = vmatprep.mubr.msk.bf16.mxu1 %vm4740_vm10, %v5711_v44  ;;  %9417 = vmatpush3.bf16.msra.mxu1 %v9985_v41  ;;  %v5924_v41 = vshrl.u32 %v5919_v27, 16 }
 0x740   :  { %9418 = vmatprep.subr.bf16.mxu1 %v9986_v21 }
 0x741   :  { %v5926_v36 = vrot.slane %v5924_v41, 5 }
 0x743   :  { %9419 = vmatpush3.bf16.msra.mxu1 %v9986_v21  ;;  %v5929_v21 = vrot.slane %v5927_v60, 6 }
 0x744   :  { %9440 = vmatprep.subr.bf16.mxu1 %v9987_v15 }
 0x745   :  { %v5930_v44 = vor.u32 %v5929_v21, %v5926_v36 }
 0x746   :  { %9401 = vmatmul.mubr.msk.bf16.gmra.mrb[104].mxu1 %vm4740_vm10, %v5714_v54  ;;  %v5921_v54 = vld [vmem:[#allocation3 + $0x38] sm:$0xe0] }
 0x747   :  { %9404 = vmatprep.mubr.msk.bf16.mxu1 %vm4740_vm10, %v5716_v38  ;;  %v5934_v46 = vsel %vm1320_vm3, %v5930_v44, %v13893_v16  ;;  %v9989_v16 = vld [vmem:[%s14920_s11 + $0x90] sm:$0xff]   ;;  %v5957_v38 = vshrl.u32 %v5921_v54, 16  ;;  %v5960_v27 = vshll.u32 %v5921_v54, 16  ;;  %v6194_v54 = vrot.slane %v13699_v39, 6 }
 0x749   :  { %v5959_v60 = vrot.slane %v5957_v38, 5  ;;  %v6198_v38 = vrot.slane %v13757_v25, 6 }
 0x74e   :  { %9405 = vmatmul.mubr.msk.bf16.gmra.mrb[108].mxu1 %vm4740_vm10, %v5718_v56  ;;  %v5962_v56 = vrot.slane %v5960_v27, 6  ;;  %v6200_v27 = vrot.slane %v14145_v52, 6  ;;  %v9995_v52 = vld [vmem:[%s14920_s11 + $0xc0] sm:$0xff]  }
 0x74f   :  { %9408 = vmatprep.mubr.msk.bf16.mxu1 %vm4740_vm10, %v13916_v7  ;;  %v5950_v7 = vrot.slane %v5948_v20, 5 }
 0x750   :  { %v5963_v36 = vor.u32 %v5962_v56, %v5959_v60  ;;  %v6201_v60 = vsel %vm2145_vm5, %v6198_v38, %v6200_v27  ;;  %v6186_v56 = vld [vmem:[#allocation3 + $0x38] sm:$0xc0] }
 0x752   :  { %v5967_v21 = vsel %vm1320_vm3, %v5963_v36, %v13943_v14  ;;  %v6192_v14 = vrot.slane %v13688_v50, 6  ;;  %v6205_v36 = vrot.slane %v13862_v19, 6 }
 0x756   :  { %9409 = vmatmul.mubr.msk.bf16.gmra.mrb[112].mxu1 %vm4740_vm10, %v13919_v33  ;;  %v5953_v33 = vrot.slane %v5951_v22, 6  ;;  %v6185_v22 = vld [vmem:[#allocation3] sm:$0xc0] }
 0x757   :  { %9420 = vmatprep.mubr.msk.bf16.mxu1 %vm4740_vm10, %v5934_v46 }
 0x758   :  { %v5954_v41 = vor.u32 %v5953_v33, %v5950_v7  ;;  %v6191_v7 = vrot.slane %v6185_v22, 6 }
 0x75e   :  { %9421 = vmatmul.mubr.msk.bf16.vlgmr.msra.gmra.mrb[96].mxu1 %vm4740_vm10, %v13911_v10  ;;  %v9990_v10 = vld [vmem:[%s14920_s11 + $0x98] sm:$0xff]  }
 0x75f   :  { %9424 = vmatprep.mubr.msk.bf16.mxu1 %vm4740_vm10, %v13930_v31  ;;  %9441 = vmatpush3.bf16.msra.mxu1 %v9987_v15  ;;  %v5955_v31 = vsel %vm1320_vm3, %v13921_v32, %v5954_v41  ;;  %v9991_v15 = vld [vmem:[%s14920_s11 + $0xa0] sm:$0xff]   ;;  %v9994_v41 = vld [vmem:[%s14920_s11 + $0xb8] sm:$0xff]  }
 0x760   :  { %9442 = vmatprep.subr.bf16.mxu1 %v9988_v12 }
 0x763   :  { %9443 = vmatpush3.bf16.msra.mxu1 %v9988_v12 }
 0x764   :  { %9444 = vmatprep.subr.bf16.mxu1 %v9989_v16 }
 0x766   :  { %9425 = vmatmul.mubr.msk.bf16.gmra.mrb[100].mxu1 %vm4740_vm10, %v13934_v8  ;;  %v5922_v8 = vld [vmem:[#allocation3 + $0x60] sm:$0x3f] }
 0x767   :  { %9428 = vmatprep.mubr.msk.bf16.mxu1 %vm4740_vm10, %v5955_v31  ;;  %9445 = vmatpush3.bf16.msra.mxu1 %v9989_v16  ;;  %v5981_v32 = vshrl.u32 %v5922_v8, 16  ;;  %v5984_v44 = vshll.u32 %v5922_v8, 16  ;;  %v6195_v16 = vsel %vm2145_vm5, %v6192_v14, %v6194_v54  ;;  %v6202_v31 = vrot.slane %v6186_v56, 6 }
 0x768   :  { %9446 = vmatprep.subr.bf16.mxu1 %v9990_v10 }
 0x769   :  { %v5983_v46 = vrot.slane %v5981_v32, 5  ;;  %v5986_v20 = vrot.slane %v5984_v44, 6  ;;  %v6413_v44 = vshrl.u32 %v6185_v22, 16 }
 0x76b   :  { %9447 = vmatpush3.bf16.msra.mxu1 %v9990_v10  ;;  %v5987_v12 = vor.u32 %v5986_v20, %v5983_v46  ;;  %v6416_v46 = vshll.u32 %v6185_v22, 16  ;;  %v15093_v20 = vrot.slane %v13879_v11, 6 }
 0x76c   :  { %9468 = vmatprep.subr.bf16.mxu1 %v9991_v15 }
 0x76d   :  { %v5988_v33 = vsel %vm1320_vm3, %v13948_v59, %v5987_v12  ;;  %v9993_v59 = vld [vmem:[%s14920_s11 + $0xb0] sm:$0xff]   ;;  %v6208_v12 = vsel %vm2145_vm5, %v6205_v36, %v15093_v20  ;;  %v6702_v20 = vrot.slane %v13731_v57, 3 }
 0x76e   :  { %9429 = vmatmul.mubr.msk.bf16.gmra.mrb[104].mxu1 %vm4740_vm10, %v5967_v21 }
 0x76f   :  { %9432 = vmatprep.mubr.msk.bf16.mxu1 %vm4740_vm10, %v13953_v45  ;;  %v6193_v45 = vsel %vm2145_vm5, %v6191_v7, %v6192_v14  ;;  %v6418_v7 = vrot.slane %v6416_v46, 7  ;;  %v6211_v14 = vrot.slane %v5922_v8, 6 }
 0x776   :  { %9433 = vmatmul.mubr.msk.bf16.gmra.mrb[108].mxu1 %vm4740_vm10, %v13956_v62  ;;  %v6196_v62 = vrot.slane %v13731_v57, 6  ;;  %v10001_v57 = vld [vmem:[%s14920_s11 + $0xf0] sm:$0xff]  }
 0x777   :  { %9436 = vmatprep.mubr.msk.bf16.mxu1 %vm4740_vm10, %v13962_v34  ;;  %v9992_v34 = vld [vmem:[%s14920_s11 + $0xa8] sm:$0xff]  }
 0x778   :  { %v6197_v50 = vsel %vm2145_vm5, %v6194_v54, %v6196_v62  ;;  %v6199_v10 = vsel %vm2145_vm5, %v6196_v62, %v6198_v38  ;;  %v6409_v62 = vld [vmem:[#allocation3 + $0x28] sm:$0x7f]  ;;  %v6449_v38 = vshll.u32 %v6186_v56, 16 }
 0x77e   :  { %9437 = vmatmul.mubr.msk.bf16.gmra.mrb[112].mxu1 %vm4740_vm10, %v5988_v33 }
 0x77f   :  { %9448 = vmatprep.mubr.msk.bf16.mxu1 %vm4740_vm10, %v6193_v45  ;;  %v15094_v45 = vrot.slane %v13897_v55, 6  ;;  %v6940_v55 = vrot.slane %v13740_v5, 3 }
 0x781   :  { %v6212_v54 = vsel %vm2145_vm5, %v15094_v45, %v6211_v14  ;;  %v10002_v14 = vld [vmem:[%s14920_s11 + $0xf8] sm:$0xff]  }
 0x786   :  { %9449 = vmatmul.mubr.msk.bf16.vlgmr.msra.gmra.mrb[96].mxu1 %vm4740_vm10, %v6195_v16  ;;  %v6440_v16 = vshll.u32 %v6409_v62, 16 }
 0x787   :  { %9452 = vmatprep.mubr.msk.bf16.mxu1 %vm4740_vm10, %v6197_v50  ;;  %9469 = vmatpush3.bf16.msra.mxu1 %v9991_v15  ;;  %v6203_v15 = vrot.slane %v13847_v58, 6  ;;  %v6415_v58 = vrot.slane %v6413_v44, 6 }
 0x788   :  { %9470 = vmatprep.subr.bf16.mxu1 %v9992_v34  ;;  %v6442_v50 = vrot.slane %v6440_v16, 7 }
 0x789   :  { %v6204_v21 = vsel %vm2145_vm5, %v6202_v31, %v6203_v15  ;;  %v6206_v32 = vsel %vm2145_vm5, %v6203_v15, %v6205_v36  ;;  %v6419_v33 = vor.u32 %v6418_v7, %v6415_v58  ;;  %v6679_v58 = vld [vmem:[#allocation3 + $0x30] sm:$0x7] }
 0x78a   :  { %v6708_v7 = vrot.slane %v6679_v58, 3 }
 0x78b   :  { %9471 = vmatpush3.bf16.msra.mxu1 %v9992_v34  ;;  %v6423_v22 = vsel %vm6411_vm12, %v6419_v33, %v13985_v13  ;;  %v6437_v34 = vshrl.u32 %v6409_v62, 16  ;;  %v9997_v13 = vld [vmem:[%s14920_s11 + $0xd0] sm:$0xff]  }
 0x78c   :  { %9472 = vmatprep.subr.bf16.mxu1 %v9993_v59 }
 0x78d   :  { %v6439_v8 = vrot.slane %v6437_v34, 6  ;;  %v6711_v34 = vrot.slane %v13862_v19, 3 }
 0x78e   :  { %9453 = vmatmul.mubr.msk.bf16.gmra.mrb[100].mxu1 %vm4740_vm10, %v6199_v10  ;;  %v6451_v10 = vrot.slane %v6449_v38, 7  ;;  %v6685_v38 = vld [vmem:[#allocation3 + $0x68] sm:$0x7] }
 0x78f   :  { %9456 = vmatprep.mubr.msk.bf16.mxu1 %vm4740_vm10, %v6201_v60  ;;  %9473 = vmatpush3.bf16.msra.mxu1 %v9993_v59  ;;  %v6446_v59 = vshrl.u32 %v6186_v56, 16  ;;  %v6443_v27 = vor.u32 %v6442_v50, %v6439_v8  ;;  %v9999_v60 = vld [vmem:[%s14920_s11 + $0xe0] sm:$0xff]   ;;  %v6717_v8 = vrot.slane %v14091_v47, 3 }
 0x790   :  { %9474 = vmatprep.subr.bf16.mxu1 %v9994_v41 }
 0x793   :  { %9475 = vmatpush3.bf16.msra.mxu1 %v9994_v41  ;;  %v6448_v41 = vrot.slane %v6446_v59, 6  ;;  %v6718_v59 = vsel %vm6698_vm13, %v6715_v49, %v6717_v8  ;;  %v6943_v49 = vrot.slane %v13737_v28, 4 }
 0x794   :  { %9496 = vmatprep.subr.bf16.mxu1 %v9995_v52 }
 0x795   :  { %v6452_v56 = vor.u32 %v6451_v10, %v6448_v41  ;;  %v6931_v41 = vrot.slane %v13714_v2, 3  ;;  %v6719_v10 = vrot.slane %v6685_v38, 3  ;;  %v6952_v2 = vrot.slane %v13767_v6, 4 }
 0x796   :  { %9457 = vmatmul.mubr.msk.bf16.gmra.mrb[104].mxu1 %vm4740_vm10, %v6204_v21  ;;  %v6674_v21 = vld [vmem:[#allocation3 + $0x8] sm:$0xf8] }
 0x797   :  { %9460 = vmatprep.mubr.msk.bf16.mxu1 %vm4740_vm10, %v6206_v32  ;;  %v6699_v44 = vrot.slane %v6674_v21, 3  ;;  %v6921_v50 = vshrl.u32 %v6674_v21, 16 }
 0x79e   :  { %9461 = vmatmul.mubr.msk.bf16.gmra.mrb[108].mxu1 %vm4740_vm10, %v6208_v12 }
 0x79f   :  { %9464 = vmatprep.mubr.msk.bf16.mxu1 %vm4740_vm10, %v13974_v37  ;;  %v9996_v37 = vld [vmem:[%s14920_s11 + $0xc8] sm:$0xff]  }
 0x7a6   :  { %9465 = vmatmul.mubr.msk.bf16.gmra.mrb[112].mxu1 %vm4740_vm10, %v6212_v54  ;;  %v14285_v54 = vld [vmem:[#allocation3 + $0x40] sm:$0xf8] }
 0x7a7   :  { %9476 = vmatprep.mubr.msk.bf16.mxu1 %vm4740_vm10, %v6423_v22  ;;  %v10003_v22 = vld [vmem:[%s14920_s11 + $0x100] sm:$0xff]   ;;  %v6710_v62 = vrot.slane %v14285_v54, 3 }
 0x7a9   :  { %v6712_v16 = vsel %vm6698_vm13, %v6710_v62, %v6711_v34  ;;  %v6918_v62 = vld [vmem:[#allocation3 + $0x68] sm:$0xf] }
 0x7ae   :  { %9477 = vmatmul.mubr.msk.bf16.vlgmr.msra.gmra.mrb[96].mxu1 %vm4740_vm10, %v13996_v30  ;;  %v9998_v30 = vld [vmem:[%s14920_s11 + $0xd8] sm:$0xff]  }
 0x7af   :  { %9480 = vmatprep.mubr.msk.bf16.mxu1 %vm4740_vm10, %v14001_v29  ;;  %9497 = vmatpush3.bf16.msra.mxu1 %v9995_v52  ;;  %v6444_v29 = vsel %vm6411_vm12, %v13998_v42, %v6443_v27  ;;  %v6456_v52 = vsel %vm6411_vm12, %v6452_v56, %v14017_v0  ;;  %v6700_v0 = vrot.slane %v13699_v39, 3  ;;  %v6923_v27 = vrot.slane %v6921_v50, 3 }
 0x7b0   :  { %9498 = vmatprep.subr.bf16.mxu1 %v9996_v37  ;;  %v6720_v56 = vsel %vm6698_vm13, %v6717_v8, %v6719_v10  ;;  %v10027_v10 = vld [vmem:[#allocation3 + $0x20] sm:$0xff] }
 0x7b1   :  { %v6703_v12 = vsel %vm6698_vm13, %v6700_v0, %v6702_v20 }
 0x7b3   :  { %9499 = vmatpush3.bf16.msra.mxu1 %v9996_v37  ;;  %v6714_v37 = vsel %vm6698_vm13, %v6711_v34, %v6713_v4  ;;  %v6934_v4 = vrot.slane %v13711_v24, 4  ;;  %v14316_v24 = vld [vmem:[#allocation3 + $0x30] sm:$0xf]  ;;  %v7018_v34 = vshrl.u32 %v6918_v62, 16 }
 0x7b4   :  { %9500 = vmatprep.subr.bf16.mxu1 %v9997_v13  ;;  %v6965_v28 = vshrl.u32 %v14316_v24, 16 }
 0x7b5   :  { %v7020_v8 = vrot.slane %v7018_v34, 3 }
 0x7b6   :  { %9481 = vmatmul.mubr.msk.bf16.gmra.mrb[100].mxu1 %vm4740_vm10, %v14008_v53  ;;  %v6410_v53 = vld [vmem:[#allocation3 + $0x60] sm:$0x7f] }
 0x7b7   :  { %9484 = vmatprep.mubr.msk.bf16.mxu1 %vm4740_vm10, %v6444_v29  ;;  %9501 = vmatpush3.bf16.msra.mxu1 %v9997_v13  ;;  %v6470_v42 = vshrl.u32 %v6410_v53, 16  ;;  %v6473_v31 = vshll.u32 %v6410_v53, 16  ;;  %v6924_v13 = vshll.u32 %v6674_v21, 16  ;;  %v6944_v53 = vor.u32 %v6943_v49, %v6940_v55 }
 0x7b8   :  { %9502 = vmatprep.subr.bf16.mxu1 %v9998_v30  ;;  %v7238_v55 = vrot.slane %v14316_v24, 4 }
 0x7b9   :  { %v6472_v15 = vrot.slane %v6470_v42, 6  ;;  %v6475_v36 = vrot.slane %v6473_v31, 7 }
 0x7bb   :  { %9503 = vmatpush3.bf16.msra.mxu1 %v9998_v30  ;;  %v6476_v32 = vor.u32 %v6475_v36, %v6472_v15  ;;  %v6926_v30 = vrot.slane %v6924_v13, 4  ;;  %v6968_v15 = vshll.u32 %v14316_v24, 16  ;;  %v7249_v24 = vrot.slane %v6918_v62, 4 }
 0x7bc   :  { %9524 = vmatprep.subr.bf16.mxu1 %v9999_v60 }
 0x7bd   :  { %v6477_v46 = vsel %vm6411_vm12, %v14027_v9, %v6476_v32  ;;  %v14272_v9 = vld [vmem:[#allocation3 + $0x28] sm:$0xff]  ;;  %v6927_v29 = vor.u32 %v6926_v30, %v6923_v27  ;;  %v10025_v27 = vld [vmem:[#allocation3 + $0x10] sm:$0xff] }
 0x7be   :  { %9485 = vmatmul.mubr.msk.bf16.gmra.mrb[104].mxu1 %vm4740_vm10, %v6456_v52  ;;  %v6949_v52 = vrot.slane %v13770_v51, 3  ;;  %v6956_v42 = vshrl.u32 %v14272_v9, 16  ;;  %v6959_v31 = vshll.u32 %v14272_v9, 16  ;;  %v10004_v51 = vld [vmem:[%s14920_s11 + $0x108] sm:$0xff]   ;;  %v7230_v30 = vrot.slane %v10025_v27, 4 }
 0x7bf   :  { %9488 = vmatprep.mubr.msk.bf16.mxu1 %vm4740_vm10, %v14031_v17  ;;  %v6701_v17 = vsel %vm6698_vm13, %v6699_v44, %v6700_v0  ;;  %v6967_v44 = vrot.slane %v6965_v28, 3  ;;  %v6970_v0 = vrot.slane %v6968_v15, 4 }
 0x7c0   :  { %v6953_v5 = vor.u32 %v6952_v2, %v6949_v52  ;;  %v6958_v36 = vrot.slane %v6956_v42, 3  ;;  %v6961_v21 = vrot.slane %v6959_v31, 4  ;;  %v7223_v52 = vld [vmem:[#allocation3 + $0x40] sm:$0xf0]  ;;  %v14382_v31 = vpop.permute.xlu1 %7486 }
 0x7c1   :  { %v7240_v2 = vrot.slane %v7223_v52, 4 }
 0x7c2   :  { %v6954_v32 = vsel %vm6919_vm14, %v6944_v53, %v6953_v5 }
 0x7c4   :  { %v14384_v11 = vpop.permute.xlu1 %7496 }
 0x7c6   :  { %9489 = vmatmul.mubr.msk.bf16.gmra.mrb[108].mxu1 %vm4740_vm10, %v14034_v23  ;;  %v6704_v23 = vrot.slane %v13757_v25, 3  ;;  %v6706_v25 = vrot.slane %v14272_v9, 3 }
 0x7c7   :  { %9492 = vmatprep.mubr.msk.bf16.mxu1 %vm4740_vm10, %v14038_v3  ;;  %v10000_v3 = vld [vmem:[%s14920_s11 + $0xe8] sm:$0xff]  }
 0x7c8   :  { %v6705_v39 = vsel %vm6698_vm13, %v6702_v20, %v6704_v23  ;;  %v6707_v33 = vsel %vm6698_vm13, %v6704_v23, %v6706_v25  ;;  %v6709_v45 = vsel %vm6698_vm13, %v6706_v25, %v6708_v7  ;;  %v6974_v20 = vshrl.u32 %v14285_v54, 16 }
 0x7c9   :  { %v6977_v23 = vshll.u32 %v14285_v54, 16 }
 0x7ca   :  { %v6976_v58 = vrot.slane %v6974_v20, 3 }
 0x7ce   :  { %9493 = vmatmul.mubr.msk.bf16.gmra.mrb[112].mxu1 %vm4740_vm10, %v6477_v46  ;;  %v10005_v46 = vld [vmem:[%s14920_s11 + $0x110] sm:$0xff]  }
 0x7cf   :  { %9504 = vmatprep.mubr.msk.bf16.mxu1 %vm4740_vm10, %v6701_v17  ;;  %v6962_v17 = vor.u32 %v6961_v21, %v6958_v36  ;;  %v14404_v36 = vpop.permute.xlu1 %7501 }
 0x7d6   :  { %9505 = vmatmul.mubr.msk.bf16.vlgmr.msra.gmra.mrb[96].mxu1 %vm4740_vm10, %v6703_v12  ;;  %v10006_v12 = vld [vmem:[%s14920_s11 + $0x118] sm:$0xff]  }
 0x7d7   :  { %9508 = vmatprep.mubr.msk.bf16.mxu1 %vm4740_vm10, %v6705_v39  ;;  %9525 = vmatpush3.bf16.msra.mxu1 %v9999_v60  ;;  %v6935_v60 = vor.u32 %v6934_v4, %v6931_v41  ;;  %v6963_v39 = vsel %vm6919_vm14, %v6953_v5, %v6962_v17  ;;  %v10026_v4 = vld [vmem:[#allocation3 + $0x18] sm:$0xff] }
 0x7d8   :  { %9526 = vmatprep.subr.bf16.mxu1 %v10000_v3 }
 0x7d9   :  { %v6945_v6 = vsel %vm6919_vm14, %v6935_v60, %v6944_v53  ;;  %v7241_v53 = vrot.slane %v13862_v19, 4  ;;  %v7250_v19 = vsel %vm7228_vm15, %v7247_v63, %v7249_v24 }
 0x7db   :  { %9527 = vmatpush3.bf16.msra.mxu1 %v10000_v3  ;;  %v6971_v3 = vor.u32 %v6970_v0, %v6967_v44  ;;  %v7242_v42 = vsel %vm7228_vm15, %v7240_v2, %v7241_v53 }
 0x7dc   :  { %9528 = vmatprep.subr.bf16.mxu1 %v10001_v57 }
 0x7dd   :  { %v6972_v25 = vsel %vm6919_vm14, %v6962_v17, %v6971_v3 }
 0x7de   :  { %9509 = vmatmul.mubr.msk.bf16.gmra.mrb[100].mxu1 %vm4740_vm10, %v6707_v33  ;;  %v7012_v33 = vshll.u32 %v14091_v47, 16 }
 0x7df   :  { %9512 = vmatprep.mubr.msk.bf16.mxu1 %vm4740_vm10, %v6709_v45  ;;  %9529 = vmatpush3.bf16.msra.mxu1 %v10001_v57  ;;  %v6979_v57 = vrot.slane %v6977_v23, 4 }
 0x7e0   :  { %9530 = vmatprep.subr.bf16.mxu1 %v10002_v14 }
 0x7e1   :  { %v6980_v7 = vor.u32 %v6979_v57, %v6976_v58 }
 0x7e3   :  { %9531 = vmatpush3.bf16.msra.mxu1 %v10002_v14  ;;  %v7009_v14 = vshrl.u32 %v14091_v47, 16  ;;  %v6989_v45 = vsel %vm6919_vm14, %v6980_v7, %v14076_v40  ;;  %v7222_v40 = vld [vmem:[#allocation3 + $0x8] sm:$0xf0] }
 0x7e4   :  { %9552 = vmatprep.subr.bf16.mxu1 %v10003_v22  ;;  %v7229_v38 = vrot.slane %v7222_v40, 4 }
 0x7e5   :  { %v7011_v54 = vrot.slane %v7009_v14, 3 }
 0x7e6   :  { %9513 = vmatmul.mubr.msk.bf16.gmra.mrb[104].mxu1 %vm4740_vm10, %v6712_v16  ;;  %v7021_v16 = vshll.u32 %v6918_v62, 16  ;;  %v7231_v41 = vsel %vm7228_vm15, %v7229_v38, %v7230_v30 }
 0x7e7   :  { %9516 = vmatprep.mubr.msk.bf16.mxu1 %vm4740_vm10, %v6714_v37 }
 0x7e8   :  { %v7023_v50 = vrot.slane %v7021_v16, 4 }
 0x7ee   :  { %9517 = vmatmul.mubr.msk.bf16.gmra.mrb[108].mxu1 %vm4740_vm10, %v14055_v1  ;;  %v6936_v1 = vsel %vm6919_vm14, %v6927_v29, %v6935_v60  ;;  %v7234_v29 = vrot.slane %v10027_v10, 4 }
 0x7ef   :  { %9520 = vmatprep.mubr.msk.bf16.mxu1 %vm4740_vm10, %v6718_v59  ;;  %v7024_v59 = vor.u32 %v7023_v50, %v7020_v8 }
 0x7f6   :  { %9521 = vmatmul.mubr.msk.bf16.gmra.mrb[112].mxu1 %vm4740_vm10, %v6720_v56  ;;  %v7236_v56 = vrot.slane %v14272_v9, 4  ;;  %v7244_v9 = vsel %vm7228_vm15, %v7241_v53, %v7243_v48  ;;  %v14389_v48 = vld [vmem:[%s14924_s12] ss:$0 sm:$0xff] }
 0x7f7   :  { %9532 = vmatprep.mubr.msk.bf16.mxu1 %vm4740_vm10, %v6936_v1 }
 0x7f8   :  { %v7237_v49 = vsel %vm7228_vm15, %v7234_v29, %v7236_v56  ;;  %v7239_v1 = vsel %vm7228_vm15, %v7236_v56, %v7238_v55 }
 0x7fe   :  { %9533 = vmatmul.mubr.msk.bf16.vlgmr.msra.gmra.mrb[96].mxu1 %vm4740_vm10, %v6945_v6 }
 0x7ff   :  { %9536 = vmatprep.mubr.msk.bf16.mxu1 %vm4740_vm10, %v6954_v32  ;;  %9553 = vmatpush3.bf16.msra.mxu1 %v10003_v22  ;;  %v7014_v22 = vrot.slane %v7012_v33, 4 }
 0x800   :  { %9554 = vmatprep.subr.bf16.mxu1 %v10004_v51 }
 0x801   :  { %v7015_v37 = vor.u32 %v7014_v22, %v7011_v54 }
 0x803   :  { %9555 = vmatpush3.bf16.msra.mxu1 %v10004_v51  ;;  %v7016_v13 = vsel %vm6919_vm14, %v14078_v35, %v7015_v37 }
 0x804   :  { %9556 = vmatprep.subr.bf16.mxu1 %v10005_v46 }
 0x806   :  { %9537 = vmatmul.mubr.msk.bf16.gmra.mrb[100].mxu1 %vm4740_vm10, %v6963_v39 }
 0x807   :  { %9540 = vmatprep.mubr.msk.bf16.mxu1 %vm4740_vm10, %v6972_v25  ;;  %9557 = vmatpush3.bf16.msra.mxu1 %v10005_v46 }
 0x808   :  { %9558 = vmatprep.subr.bf16.mxu1 %v10006_v12 }
 0x80b   :  { %9559 = vmatpush3.bf16.msra.mxu1 %v10006_v12 }
 0x80e   :  { %9541 = vmatmul.mubr.msk.bf16.gmra.mrb[104].mxu1 %vm4740_vm10, %v6989_v45  ;;  %v14431_v45 = vpop.permute.xlu1 %7511 }
 0x80f   :  { %9544 = vmatprep.mubr.msk.bf16.mxu1 %vm4740_vm10, %v14083_v18  ;;  %v7025_v18 = vsel %vm6919_vm14, %v7015_v37, %v7024_v59 }
 0x812   :  { %v14447_v59 = vpop.permute.xlu1 %7521 }
 0x816   :  { %9545 = vmatmul.mubr.msk.bf16.gmra.mrb[108].mxu1 %vm4740_vm10, %v14087_v43  ;;  %v7232_v43 = vrot.slane %v10026_v4, 4 }
 0x817   :  { %9548 = vmatprep.mubr.msk.bf16.mxu1 %vm4740_vm10, %v7016_v13 }
 0x818   :  { %v7233_v35 = vsel %vm7228_vm15, %v7230_v30, %v7232_v43  ;;  %v7235_v60 = vsel %vm7228_vm15, %v7232_v43, %v7234_v29 }
 0x81e   :  { %9549 = vmatmul.mubr.msk.bf16.gmra.mrb[112].mxu1 %vm4740_vm10, %v7025_v18 }
 0x81f   :  { %9560 = vmatprep.mubr.msk.bf16.mxu1 %vm4740_vm10, %v7231_v41 }
 0x826   :  { %9561 = vmatmul.mubr.msk.bf16.vlgmr.msra.gmra.mrb[96].mxu1 %vm4740_vm10, %v7233_v35 }
 0x827   :  { %9564 = vmatprep.mubr.msk.bf16.mxu1 %vm4740_vm10, %v7235_v60 }
 0x82e   :  { %9565 = vmatmul.mubr.msk.bf16.gmra.mrb[100].mxu1 %vm4740_vm10, %v7237_v49 }
 0x82f   :  { %9568 = vmatprep.mubr.msk.bf16.mxu1 %vm4740_vm10, %v7239_v1 }
 0x836   :  { %9569 = vmatmul.mubr.msk.bf16.gmra.mrb[104].mxu1 %vm4740_vm10, %v7242_v42 }
 0x837   :  { %9572 = vmatprep.mubr.msk.bf16.mxu1 %vm4740_vm10, %v7244_v9 }
 0x83e   :  { %9573 = vmatmul.mubr.msk.bf16.gmra.mrb[108].mxu1 %vm4740_vm10, %v14106_v26  ;;  %v14391_v26 = vpop.permute.xlu0 %7491 }
 0x83f   :  { %9576 = vmatprep.mubr.msk.bf16.mxu1 %vm4740_vm10, %v14114_v61 }
 0x842   :  { %v14414_v46 = vpop.permute.xlu0 %7506 }
 0x846   :  { %9577 = vmatmul.mubr.msk.bf16.gmra.mrb[112].mxu1 %vm4740_vm10, %v7250_v19  ;;  %v14423_v25 = vpop.permute.xlu0 %7516 }
 0x84a   :  { %v14473_v2 = vpop.permute.xlu0 %7526 }
 0x8f9   :  { %v9562_v5 = vpop.f32.mrb[96].mxu1 }
 0x8fa   :  { %v14394_v61 = vadd.f32 %v9562_v5, %v14389_v48  ;;  %v7348_v47 = vpop.f32.mrb[97].mxu1 }
 0x8fb   :  { %v14397_v63 = vadd.f32 %v14389_v48, %v7348_v47  ;;  %v9563_v28 = vpop.f32.mrb[98].mxu1  ;;  %v14487_v47 = vpop.permute.xlu1 %7531 }
 0x8fc   :  { %v7536_v15 = vmul.f32 %v14384_v11, %v14394_v61  ;;  %v14402_v51 = vadd.f32 %v9563_v28, %v14389_v48  ;;  %v7351_v6 = vpop.f32.mrb[99].mxu1 }
 0x8fd   :  { %v7534_v21 = vmul.f32 %v14382_v31, %v14397_v63  ;;  %v14411_v44 = vadd.f32 %v14389_v48, %v7351_v6 }
 0x8fe   :  { %v7537_v32 = vmul.f32 %v14404_v36, %v14402_v51  ;;  %v7561_v0 = vsel %vm7554_vm0, %v7536_v15, 0.0 }
 0x8ff   :  { %7562 = vadd.xlane.f32.xlu1 %v7561_v0  ;;  %v7555_v17 = vsel %vm7554_vm0, %v7534_v21, 0.0  ;;  %v7535_v23 = vmul.f32 %v14391_v26, %v14411_v44 }
 0x900   :  { %7556 = vadd.xlane.f32.xlu0 %v7555_v17  ;;  %v7564_v39 = vsel %vm7554_vm0, %v7537_v32, 0.0 }
 0x901   :  { %v9566_v20 = vpop.f32.mrb[100].mxu1  ;;  %v7558_v33 = vsel %vm7554_vm0, %v7535_v23, 0.0 }
 0x902   :  { %v14420_v3 = vadd.f32 %v9566_v20, %v14389_v48  ;;  %v7364_v12 = vpop.f32.mrb[101].mxu1 }
 0x903   :  { %7565 = vadd.xlane.f32.xlu1 %v7564_v39  ;;  %v9567_v58 = vpop.f32.mrb[102].mxu1  ;;  %v14428_v14 = vadd.f32 %v14389_v48, %v7364_v12 }
 0x904   :  { %v7367_v57 = vpop.f32.mrb[103].mxu1  ;;  %v7540_v7 = vmul.f32 %v14423_v25, %v14420_v3  ;;  %v14436_v62 = vadd.f32 %v9567_v58, %v14389_v48 }
 0x905   :  { %v7538_v22 = vmul.f32 %v14414_v46, %v14428_v14  ;;  %v14450_v38 = vadd.f32 %v14389_v48, %v7367_v57 }
 0x906   :  { %v7573_v37 = vsel %vm7554_vm0, %v7540_v7, 0.0  ;;  %v7541_v27 = vmul.f32 %v14447_v59, %v14436_v62 }
 0x907   :  { %7559 = vadd.xlane.f32.xlu1 %v7558_v33  ;;  %v7567_v41 = vsel %vm7554_vm0, %v7538_v22, 0.0  ;;  %v7539_v4 = vmul.f32 %v14431_v45, %v14450_v38 }
 0x908   :  { %v7576_v56 = vsel %vm7554_vm0, %v7541_v27, 0.0 }
 0x909   :  { %v9570_v54 = vpop.f32.mrb[104].mxu1  ;;  %v7570_v42 = vsel %vm7554_vm0, %v7539_v4, 0.0 }
 0x90a   :  { %v14439_v34 = vadd.f32 %v9570_v54, %v14389_v48  ;;  %v7380_v16 = vpop.f32.mrb[105].mxu1 }
 0x90b   :  { %v9571_v8 = vpop.f32.mrb[106].mxu1  ;;  %7574 = vadd.xlane.f32.xlu1 %v7573_v37  ;;  %v14461_v10 = vadd.f32 %v14389_v48, %v7380_v16 }
 0x90c   :  { %v7544_v50 = vmul.f32 %v14382_v31, %v14439_v34  ;;  %v14445_v13 = vadd.f32 %v9571_v8, %v14389_v48  ;;  %v7383_v40 = vpop.f32.mrb[107].mxu1 }
 0x90d   :  { %v14476_v53 = vadd.f32 %v14389_v48, %v7383_v40  ;;  %v7542_v9 = vmul.f32 %v14473_v2, %v14461_v10 }
 0x90e   :  { %v7545_v30 = vmul.f32 %v14391_v26, %v14445_v13  ;;  %v7585_v18 = vsel %vm7554_vm0, %v7544_v50, 0.0 }
 0x90f   :  { %7586 = vadd.xlane.f32.xlu0 %v7585_v18  ;;  %7568 = vadd.xlane.f32.xlu1 %v7567_v41  ;;  %v7543_v28 = vmul.f32 %v14487_v47, %v14476_v53  ;;  %v7579_v17 = vsel %vm7554_vm0, %v7542_v9, 0.0 }
 0x910   :  { %v7588_v60 = vsel %vm7554_vm0, %v7545_v30, 0.0 }
 0x911   :  { %v9574_v43 = vpop.f32.mrb[108].mxu1  ;;  %v7582_v57 = vsel %vm7554_vm0, %v7543_v28, 0.0 }
 0x912   :  { %v14464_v29 = vadd.f32 %v9574_v43, %v14389_v48  ;;  %v7396_v35 = vpop.f32.mrb[109].mxu1 }
 0x913   :  { %v14469_v55 = vadd.f32 %v14389_v48, %v7396_v35  ;;  %v9575_v49 = vpop.f32.mrb[110].mxu1  ;;  %7589 = vadd.xlane.f32.xlu0 %v7588_v60  ;;  %7577 = vadd.xlane.f32.xlu1 %v7576_v56 }
 0x914   :  { %v7548_v1 = vmul.f32 %v14414_v46, %v14464_v29  ;;  %v7399_v52 = vpop.f32.mrb[111].mxu1  ;;  %v14484_v19 = vadd.f32 %v9575_v49, %v14389_v48 }
 0x915   :  { %v7546_v24 = vmul.f32 %v14384_v11, %v14469_v55  ;;  %v14494_v21 = vadd.f32 %v14389_v48, %v7399_v52 }
 0x916   :  { %v7597_v5 = vsel %vm7554_vm0, %v7548_v1, 0.0  ;;  %v7549_v6 = vmul.f32 %v14431_v45, %v14484_v19 }
 0x917   :  { %7598 = vadd.xlane.f32.xlu0 %v7597_v5  ;;  %7571 = vadd.xlane.f32.xlu1 %v7570_v42  ;;  %v7591_v0 = vsel %vm7554_vm0, %v7546_v24, 0.0  ;;  %v7547_v12 = vmul.f32 %v14404_v36, %v14494_v21 }
 0x918   :  { %v7600_v58 = vsel %vm7554_vm0, %v7549_v6, 0.0 }
 0x919   :  { %v9578_v15 = vpop.f32.mrb[112].mxu1  ;;  %v7594_v54 = vsel %vm7554_vm0, %v7547_v12, 0.0 }
 0x91a   :  { %v7412_v32 = vpop.f32.mrb[113].mxu1  ;;  %v14501_v39 = vadd.f32 %v9578_v15, %v14389_v48 }
 0x91b   :  { %v9579_v20 = vpop.f32.mrb[114].mxu1  ;;  %7592 = vadd.xlane.f32.xlu0 %v7591_v0  ;;  %7580 = vadd.xlane.f32.xlu1 %v7579_v17  ;;  %v14508_v33 = vadd.f32 %v14389_v48, %v7412_v32 }
 0x91c   :  { %v7415_v23 = vpop.f32.mrb[115].mxu1  ;;  %v7552_v7 = vmul.f32 %v14473_v2, %v14501_v39  ;;  %v14518_v8 = vadd.f32 %v9579_v20, %v14389_v48 }
 0x91d   :  { %v7550_v22 = vmul.f32 %v14423_v25, %v14508_v33  ;;  %v14514_v16 = vadd.f32 %v14389_v48, %v7415_v23 }
 0x91e   :  { %v7609_v37 = vsel %vm7554_vm0, %v7552_v7, 0.0  ;;  %v7553_v27 = vmul.f32 %v14487_v47, %v14518_v8 }
 0x91f   :  { %7601 = vadd.xlane.f32.xlu0 %v7600_v58  ;;  %7583 = vadd.xlane.f32.xlu1 %v7582_v57  ;;  %v7551_v50 = vmul.f32 %v14447_v59, %v14514_v16  ;;  %v7603_v40 = vsel %vm7554_vm0, %v7550_v22, 0.0 }
 0x920   :  { %v7612_v18 = vsel %vm7554_vm0, %v7553_v27, 0.0 }
 0x921   :  { %v7606_v30 = vsel %vm7554_vm0, %v7551_v50, 0.0 }
 0x923   :  { %7595 = vadd.xlane.f32.xlu0 %v7594_v54 }
 0x927   :  { %7610 = vadd.xlane.f32.xlu0 %v7609_v37 }
 0x92b   :  { %7604 = vadd.xlane.f32.xlu0 %v7603_v40 }
 0x92f   :  { %7607 = vadd.xlane.f32.xlu0 %v7606_v30 }
 0x933   :  { %7613 = vadd.xlane.f32.xlu0 %v7612_v18 }
 0x98c   :  { %v7563_v41 = vpop.xlane.xlu1 %7562 }
 0x98d   :  { %v7557_v48 = vpop.xlane.xlu0 %7556 }
 0x990   :  { %v7566_v4 = vpop.xlane.xlu1 %7565 }
 0x994   :  { %v7560_v43 = vpop.xlane.xlu1 %7559 }
 0x995   :  { %v7615_v60 = vadd.f32 %v7560_v43, %v7557_v48 }
 0x997   :  { %v7616_v1 = vadd.f32 %v7615_v60, %v7563_v41 }
 0x998   :  { %v7575_v35 = vpop.xlane.xlu1 %7574 }
 0x999   :  { %v7617_v9 = vadd.f32 %v7616_v1, %v7566_v4 }
 0x99c   :  { %v7569_v56 = vpop.xlane.xlu1 %7568  ;;  %v7587_v49 = vpop.xlane.xlu0 %7586 }
 0x99d   :  { %v7618_v24 = vadd.f32 %v7617_v9, %v7569_v56 }
 0x9a0   :  { %v7578_v52 = vpop.xlane.xlu1 %7577  ;;  %v7590_v42 = vpop.xlane.xlu0 %7589 }
 0x9a1   :  { %v7630_v58 = vadd.f32 %v7590_v42, %v7587_v49 }
 0x9a4   :  { %v7572_v5 = vpop.xlane.xlu1 %7571  ;;  %v7599_v28 = vpop.xlane.xlu0 %7598 }
 0x9a5   :  { %v7619_v15 = vadd.f32 %v7618_v24, %v7572_v5 }
 0x9a7   :  { %v7620_v6 = vadd.f32 %v7619_v15, %v7575_v35 }
 0x9a8   :  { %v7581_v32 = vpop.xlane.xlu1 %7580  ;;  %v7593_v0 = vpop.xlane.xlu0 %7592 }
 0x9a9   :  { %v7621_v17 = vadd.f32 %v7620_v6, %v7578_v52  ;;  %v7631_v7 = vadd.f32 %v7630_v58, %v7593_v0 }
 0x9ab   :  { %v7622_v20 = vadd.f32 %v7621_v17, %v7581_v32 }
 0x9ac   :  { %v7584_v23 = vpop.xlane.xlu1 %7583  ;;  %v7602_v12 = vpop.xlane.xlu0 %7601 }
 0x9ad   :  { %v7623_v57 = vadd.f32 %v7622_v20, %v7584_v23 }
 0x9af   :  { %v7624_v54 = vrot.slane %v7623_v57, 4 }
 0x9b0   :  { %v7596_v22 = vpop.xlane.xlu0 %7595 }
 0x9b1   :  { %v7625_v37 = vadd.f32 %v7624_v54, %v7623_v57  ;;  %v7632_v50 = vadd.f32 %v7631_v7, %v7596_v22 }
 0x9b3   :  { %v7626_v40 = vrot.slane %v7625_v37, 2  ;;  %v7633_v18 = vadd.f32 %v7632_v50, %v7599_v28 }
 0x9b4   :  { %v7611_v27 = vpop.xlane.xlu0 %7610 }
 0x9b5   :  { %v7627_v30 = vadd.f32 %v7626_v40, %v7625_v37  ;;  %v7634_v48 = vadd.f32 %v7633_v18, %v7602_v12 }
 0x9b7   :  { %v7628_v41 = vrot.slane %v7627_v30, 1 }
 0x9b8   :  { %v7605_v4 = vpop.xlane.xlu0 %7604 }
 0x9b9   :  { %v7629_v43 = vadd.f32 %v7628_v41, %v7627_v30  ;;  %v7635_v60 = vadd.f32 %v7634_v48, %v7605_v4 }
 0x9bb   :  { %v14527_v35 = vmul.f32 0.0006377551, %v7629_v43 }
 0x9bc   :  { %v7608_v56 = vpop.xlane.xlu0 %7607 }
 0x9bd   :  { %v7636_v1 = vadd.f32 %v7635_v60, %v7608_v56  ;;  %v14531_v49 = vsub.f32 %v14411_v44, %v14527_v35  ;;  %v14535_v52 = vsub.f32 %v14397_v63, %v14527_v35  ;;  %v14539_v42 = vsub.f32 %v14394_v61, %v14527_v35 }
 0x9be   :  { %v14543_v9 = vsub.f32 %v14402_v51, %v14527_v35  ;;  %v14555_v51 = vsub.f32 %v14428_v14, %v14527_v35  ;;  %v14561_v58 = vsub.f32 %v14450_v38, %v14527_v35  ;;  %v14571_v18 = vsub.f32 %v14420_v3, %v14527_v35 }
 0x9bf   :  { %v7637_v24 = vadd.f32 %v7636_v1, %v7611_v27  ;;  %v7668_v5 = vmul.f32 %v14531_v49, %v14391_v26  ;;  %v7667_v44 = vmul.f32 %v14535_v52, %v14382_v31  ;;  %v7669_v28 = vmul.f32 %v14539_v42, %v14384_v11 }
 0x9c0   :  { %v7614_v63 = vpop.xlane.xlu0 %7613  ;;  %v7670_v61 = vmul.f32 %v14543_v9, %v14404_v36  ;;  %v7671_v14 = vmul.f32 %v14555_v51, %v14414_v46  ;;  %v7672_v37 = vmul.f32 %v14561_v58, %v14431_v45  ;;  %v7673_v56 = vmul.f32 %v14571_v18, %v14423_v25 }
 0x9c1   :  { %v7638_v15 = vadd.f32 %v7637_v24, %v7614_v63  ;;  %v7688_v6 = vmul.f32 %v7668_v5, %v7668_v5  ;;  %v7687_v32 = vmul.f32 %v7667_v44, %v7667_v44  ;;  %v7689_v23 = vmul.f32 %v7669_v28, %v7669_v28 }
 0x9c2   :  { %v7690_v54 = vmul.f32 %v7670_v61, %v7670_v61  ;;  %v7691_v27 = vmul.f32 %v7671_v14, %v7671_v14  ;;  %v7692_v38 = vmul.f32 %v7672_v37, %v7672_v37  ;;  %v14593_v1 = vsub.f32 %v14436_v62, %v14527_v35 }
 0x9c3   :  { %v7639_v0 = vrot.slane %v7638_v15, 4  ;;  %v7710_v17 = vsel %vm7554_vm0, %v7688_v6, 0.0  ;;  %v7707_v20 = vsel %vm7554_vm0, %v7687_v32, 0.0  ;;  %v7713_v7 = vsel %vm7554_vm0, %v7689_v23, 0.0 }
 0x9c4   :  { %7711 = vadd.xlane.f32.xlu0 %v7710_v17  ;;  %7708 = vadd.xlane.f32.xlu1 %v7707_v20  ;;  %v7716_v40 = vsel %vm7554_vm0, %v7690_v54, 0.0  ;;  %v7719_v4 = vsel %vm7554_vm0, %v7691_v27, 0.0  ;;  %v7722_v3 = vsel %vm7554_vm0, %v7692_v38, 0.0  ;;  %v7693_v28 = vmul.f32 %v7673_v56, %v7673_v56 }
 0x9c5   :  { %v7640_v12 = vadd.f32 %v7639_v0, %v7638_v15  ;;  %v7674_v62 = vmul.f32 %v14593_v1, %v14447_v59 }
 0x9c6   :  { %v7725_v6 = vsel %vm7554_vm0, %v7693_v28, 0.0 }
 0x9c7   :  { %v7641_v57 = vrot.slane %v7640_v12, 2  ;;  %v7694_v32 = vmul.f32 %v7674_v62, %v7674_v62 }
 0x9c8   :  { %7714 = vadd.xlane.f32.xlu1 %v7713_v7 }
 0x9c9   :  { %v7642_v22 = vadd.f32 %v7641_v57, %v7640_v12  ;;  %v7728_v20 = vsel %vm7554_vm0, %v7694_v32, 0.0 }
 0x9cb   :  { %v7643_v50 = vrot.slane %v7642_v22, 1 }
 0x9cc   :  { %7717 = vadd.xlane.f32.xlu1 %v7716_v40 }
 0x9cd   :  { %v7644_v30 = vadd.f32 %v7643_v50, %v7642_v22 }
 0x9cf   :  { %v14573_v41 = vmul.f32 0.0006377551, %v7644_v30 }
 0x9d0   :  { %7720 = vadd.xlane.f32.xlu1 %v7719_v4 }
 0x9d1   :  { %v14578_v43 = vsub.f32 %v14445_v13, %v14573_v41  ;;  %v14582_v48 = vsub.f32 %v14439_v34, %v14573_v41  ;;  %v14586_v60 = vsub.f32 %v14469_v55, %v14573_v41  ;;  %v14603_v55 = vsub.f32 %v14494_v21, %v14573_v41 }
 0x9d2   :  { %v14649_v37 = vsub.f32 %v14514_v16, %v14573_v41  ;;  %v14657_v27 = vsub.f32 %v14501_v39, %v14573_v41  ;;  %v14664_v38 = vsub.f32 %v14518_v8, %v14573_v41 }
 0x9d3   :  { %v7678_v13 = vmul.f32 %v14578_v43, %v14391_v26  ;;  %v7677_v34 = vmul.f32 %v14582_v48, %v14382_v31  ;;  %v7679_v24 = vmul.f32 %v14586_v60, %v14384_v11  ;;  %v14609_v26 = vsub.f32 %v14464_v29, %v14573_v41 }
 0x9d4   :  { %7723 = vadd.xlane.f32.xlu1 %v7722_v3  ;;  %v14613_v31 = vsub.f32 %v14461_v10, %v14527_v35  ;;  %v7680_v15 = vmul.f32 %v14603_v55, %v14404_v36  ;;  %v14624_v10 = vsub.f32 %v14476_v53, %v14527_v35  ;;  %v14631_v36 = vsub.f32 %v14484_v19, %v14573_v41 }
 0x9d5   :  { %v7698_v5 = vmul.f32 %v7678_v13, %v7678_v13  ;;  %v7697_v44 = vmul.f32 %v7677_v34, %v7677_v34  ;;  %v7699_v63 = vmul.f32 %v7679_v24, %v7679_v24  ;;  %v7681_v17 = vmul.f32 %v14609_v26, %v14414_v46 }
 0x9d6   :  { %v7675_v29 = vmul.f32 %v14613_v31, %v14473_v2  ;;  %v7700_v0 = vmul.f32 %v7680_v15, %v7680_v15  ;;  %v7676_v12 = vmul.f32 %v14624_v10, %v14487_v47  ;;  %v7682_v57 = vmul.f32 %v14631_v36, %v14431_v45 }
 0x9d7   :  { %v7740_v11 = vsel %vm7554_vm0, %v7698_v5, 0.0  ;;  %v7737_v21 = vsel %vm7554_vm0, %v7697_v44, 0.0  ;;  %v7743_v61 = vsel %vm7554_vm0, %v7699_v63, 0.0  ;;  %v7701_v35 = vmul.f32 %v7681_v17, %v7681_v17 }
 0x9d8   :  { %7741 = vadd.xlane.f32.xlu0 %v7740_v11  ;;  %7738 = vadd.xlane.f32.xlu1 %v7737_v21  ;;  %v7695_v23 = vmul.f32 %v7675_v29, %v7675_v29  ;;  %v7746_v53 = vsel %vm7554_vm0, %v7700_v0, 0.0  ;;  %v14641_v46 = vsub.f32 %v14508_v33, %v14573_v41  ;;  %v7696_v7 = vmul.f32 %v7676_v12, %v7676_v12 }
 0x9d9   :  { %v7749_v54 = vsel %vm7554_vm0, %v7701_v35, 0.0  ;;  %v7702_v14 = vmul.f32 %v7682_v57, %v7682_v57  ;;  %v7684_v40 = vmul.f32 %v14649_v37, %v14447_v59  ;;  %v7685_v30 = vmul.f32 %v14657_v27, %v14473_v2 }
 0x9da   :  { %v7731_v19 = vsel %vm7554_vm0, %v7695_v23, 0.0  ;;  %v7683_v22 = vmul.f32 %v14641_v46, %v14423_v25  ;;  %v7734_v45 = vsel %vm7554_vm0, %v7696_v7, 0.0  ;;  %v7686_v39 = vmul.f32 %v14664_v38, %v14487_v47 }
 0x9db   :  { %v7752_v33 = vsel %vm7554_vm0, %v7702_v14, 0.0  ;;  %v7704_v16 = vmul.f32 %v7684_v40, %v7684_v40  ;;  %v7705_v59 = vmul.f32 %v7685_v30, %v7685_v30 }
 0x9dc   :  { %7744 = vadd.xlane.f32.xlu0 %v7743_v61  ;;  %7726 = vadd.xlane.f32.xlu1 %v7725_v6  ;;  %v7703_v50 = vmul.f32 %v7683_v22, %v7683_v22  ;;  %v7706_v56 = vmul.f32 %v7686_v39, %v7686_v39 }
 0x9dd   :  { %v7758_v4 = vsel %vm7554_vm0, %v7704_v16, 0.0  ;;  %v7761_v3 = vsel %vm7554_vm0, %v7705_v59, 0.0 }
 0x9de   :  { %v7755_v25 = vsel %vm7554_vm0, %v7703_v50, 0.0  ;;  %v7764_v13 = vsel %vm7554_vm0, %v7706_v56, 0.0 }
 0x9e0   :  { %7747 = vadd.xlane.f32.xlu0 %v7746_v53  ;;  %7729 = vadd.xlane.f32.xlu1 %v7728_v20 }
 0x9e4   :  { %7750 = vadd.xlane.f32.xlu0 %v7749_v54  ;;  %7732 = vadd.xlane.f32.xlu1 %v7731_v19 }
 0x9e8   :  { %7753 = vadd.xlane.f32.xlu0 %v7752_v33  ;;  %7735 = vadd.xlane.f32.xlu1 %v7734_v45 }
 0x9ec   :  { %7756 = vadd.xlane.f32.xlu0 %v7755_v25 }
 0x9f0   :  { %7759 = vadd.xlane.f32.xlu0 %v7758_v4 }
 0x9f4   :  { %7762 = vadd.xlane.f32.xlu0 %v7761_v3 }
 0x9f8   :  { %7765 = vadd.xlane.f32.xlu0 %v7764_v13 }
 0xa51   :  { %v7709_v2 = vpop.xlane.xlu1 %7708  ;;  %v7712_v41 = vpop.xlane.xlu0 %7711 }
 0xa52   :  { %v7767_v62 = vadd.f32 %v7712_v41, %v7709_v2 }
 0xa55   :  { %v7715_v34 = vpop.xlane.xlu1 %7714 }
 0xa56   :  { %v7768_v11 = vadd.f32 %v7767_v62, %v7715_v34  ;;  %v14679_v62 = vld [vmem:[%s14925_s13 + $0x8] sm:$0xff] }
 0xa59   :  { %v7718_v24 = vpop.xlane.xlu1 %7717 }
 0xa5a   :  { %v7769_v63 = vadd.f32 %v7768_v11, %v7718_v24  ;;  %v14684_v11 = vld [vmem:[%s14925_s13 + $0x10] sm:$0xff] }
 0xa5d   :  { %v7721_v8 = vpop.xlane.xlu1 %7720 }
 0xa5e   :  { %v7770_v15 = vadd.f32 %v7769_v63, %v7721_v8  ;;  %v14694_v63 = vld [vmem:[%s14925_s13 + $0x20] sm:$0xff] }
 0xa61   :  { %v7724_v5 = vpop.xlane.xlu1 %7723 }
 0xa62   :  { %v7771_v29 = vadd.f32 %v7770_v15, %v7724_v5  ;;  %v14699_v15 = vld [vmem:[%s14925_s13 + $0x28] sm:$0xff] }
 0xa65   :  { %v7739_v44 = vpop.xlane.xlu1 %7738  ;;  %v7742_v28 = vpop.xlane.xlu0 %7741 }
 0xa66   :  { %v7782_v35 = vadd.f32 %v7742_v28, %v7739_v44  ;;  %v14674_v28 = vld [vmem:[%s14925_s13] sm:$0xff] }
 0xa69   :  { %v7727_v21 = vpop.xlane.xlu1 %7726  ;;  %v7745_v47 = vpop.xlane.xlu0 %7744 }
 0xa6a   :  { %v7772_v61 = vadd.f32 %v7771_v29, %v7727_v21  ;;  %v7783_v19 = vadd.f32 %v7782_v35, %v7745_v47  ;;  %v14689_v47 = vld [vmem:[%s14925_s13 + $0x18] sm:$0xff] }
 0xa6b   :  { %v14709_v29 = vld [vmem:[%s14925_s13 + $0x38] sm:$0xff] }
 0xa6d   :  { %v7730_v6 = vpop.xlane.xlu1 %7729  ;;  %v7748_v32 = vpop.xlane.xlu0 %7747 }
 0xa6e   :  { %v7773_v20 = vadd.f32 %v7772_v61, %v7730_v6  ;;  %v7784_v14 = vadd.f32 %v7783_v19, %v7748_v32  ;;  %v14704_v32 = vld [vmem:[%s14925_s13 + $0x30] sm:$0xff]  ;;  %v14714_v61 = vld [vmem:[%s14925_s13 + $0x40] sm:$0xff]  ;;  %v14747_v19 = vld [vmem:[%s14926_s14 + $0x18] sm:$0xff] }
 0xa71   :  { %v7733_v0 = vpop.xlane.xlu1 %7732  ;;  %v7751_v17 = vpop.xlane.xlu0 %7750 }
 0xa72   :  { %v7774_v23 = vadd.f32 %v7773_v20, %v7733_v0  ;;  %v7785_v45 = vadd.f32 %v7784_v14, %v7751_v17  ;;  %v14766_v14 = vld [vmem:[%s14926_s14 + $0x30] sm:$0xff] }
 0xa75   :  { %v7736_v12 = vpop.xlane.xlu1 %7735  ;;  %v7754_v53 = vpop.xlane.xlu0 %7753 }
 0xa76   :  { %v7775_v57 = vadd.f32 %v7774_v23, %v7736_v12  ;;  %v7786_v25 = vadd.f32 %v7785_v45, %v7754_v53  ;;  %v14723_v12 = vld [vmem:[%s14925_s13 + $0x48] sm:$0xff]  ;;  %v14728_v53 = vld [vmem:[%s14926_s14] sm:$0xff] }
 0xa78   :  { %v7776_v7 = vrot.slane %v7775_v57, 4 }
 0xa79   :  { %v7757_v54 = vpop.xlane.xlu0 %7756 }
 0xa7a   :  { %v7777_v22 = vadd.f32 %v7776_v7, %v7775_v57  ;;  %v7787_v30 = vadd.f32 %v7786_v25, %v7757_v54  ;;  %v14742_v57 = vld [vmem:[%s14926_s14 + $0x10] sm:$0xff]  ;;  %v14761_v54 = vld [vmem:[%s14926_s14 + $0x28] sm:$0xff] }
 0xa7c   :  { %v7778_v33 = vrot.slane %v7777_v22, 2 }
 0xa7d   :  { %v7760_v50 = vpop.xlane.xlu0 %7759 }
 0xa7e   :  { %v7779_v40 = vadd.f32 %v7778_v33, %v7777_v22  ;;  %v7788_v39 = vadd.f32 %v7787_v30, %v7760_v50  ;;  %v14780_v50 = vld [vmem:[%s14926_s14 + $0x40] sm:$0xff] }
 0xa80   :  { %v7780_v16 = vrot.slane %v7779_v40, 1 }
 0xa81   :  { %v7763_v4 = vpop.xlane.xlu0 %7762 }
 0xa82   :  { %v7781_v59 = vadd.f32 %v7780_v16, %v7779_v40  ;;  %v7789_v56 = vadd.f32 %v7788_v39, %v7763_v4  ;;  %v14785_v40 = vld [vmem:[%s14926_s14 + $0x48] sm:$0xff] }
 0xa84   :  { %v7797_v3 = vmul.f32 0.0006377551, %v7781_v59 }
 0xa85   :  { %v7766_v13 = vpop.xlane.xlu0 %7765 }
 0xa86   :  { %v7799_v2 = vadd.f32 1e-05, %v7797_v3  ;;  %v7790_v34 = vadd.f32 %v7789_v56, %v7766_v13 }
 0xa88   :  { %10015 = vrsqrt.f32 %v7799_v2  ;;  %v7791_v24 = vrot.slane %v7790_v34, 4 }
 0xa8a   :  { %v7792_v8 = vadd.f32 %v7791_v24, %v7790_v34 }
 0xa8c   :  { %v7793_v41 = vrot.slane %v7792_v8, 2 }
 0xa8e   :  { %v7794_v5 = vadd.f32 %v7793_v41, %v7792_v8 }
 0xa90   :  { %v7795_v44 = vrot.slane %v7794_v5, 1 }
 0xa92   :  { %v10016_v21 = vpop.eup %10015  ;;  %v7796_v6 = vadd.f32 %v7795_v44, %v7794_v5 }
 0xa93   :  { %v7803_v0 = vmul.f32 %v10016_v21, %v14535_v52  ;;  %v7804_v17 = vmul.f32 %v10016_v21, %v14531_v49  ;;  %v7805_v20 = vmul.f32 %v10016_v21, %v14539_v42  ;;  %v7806_v23 = vmul.f32 %v10016_v21, %v14543_v9  ;;  %v14733_v52 = vld [vmem:[%s14926_s14 + $0x8] sm:$0xff] }
 0xa94   :  { %v7807_v49 = vmul.f32 %v10016_v21, %v14555_v51  ;;  %v7808_v42 = vmul.f32 %v10016_v21, %v14561_v58  ;;  %v7809_v9 = vmul.f32 %v10016_v21, %v14571_v18  ;;  %v7810_v35 = vmul.f32 %v10016_v21, %v14593_v1  ;;  %v14752_v51 = vld [vmem:[%s14926_s14 + $0x20] sm:$0xff] }
 0xa95   :  { %v7811_v58 = vmul.f32 %v10016_v21, %v14613_v31  ;;  %v7812_v18 = vmul.f32 %v10016_v21, %v14624_v10  ;;  %v7833_v1 = vmul.f32 %v14674_v28, %v7803_v0  ;;  %v7834_v7 = vmul.f32 %v14679_v62, %v7804_v17  ;;  %v14771_v31 = vld [vmem:[%s14926_s14 + $0x38] sm:$0xff] }
 0xa96   :  { %v7835_v10 = vmul.f32 %v14684_v11, %v7805_v20  ;;  %v7836_v22 = vmul.f32 %v14689_v47, %v7806_v23  ;;  %v7837_v45 = vmul.f32 %v14694_v63, %v7807_v49  ;;  %v7838_v33 = vmul.f32 %v14699_v15, %v7808_v42 }
 0xa97   :  { %v7839_v25 = vmul.f32 %v14704_v32, %v7809_v9  ;;  %v7840_v16 = vmul.f32 %v14709_v29, %v7810_v35  ;;  %v7841_v30 = vmul.f32 %v14714_v61, %v7811_v58  ;;  %v7842_v4 = vmul.f32 %v14723_v12, %v7812_v18 }
 0xa98   :  { %v7863_v59 = vadd.f32 %v14728_v53, %v7833_v1  ;;  %v7864_v39 = vadd.f32 %v14733_v52, %v7834_v7  ;;  %v7865_v3 = vadd.f32 %v14742_v57, %v7835_v10  ;;  %v7866_v56 = vadd.f32 %v14747_v19, %v7836_v22 }
 0xa99   :  { %v7867_v13 = vadd.f32 %v14752_v51, %v7837_v45  ;;  %v7868_v2 = vadd.f32 %v14761_v54, %v7838_v33  ;;  %v7869_v34 = vadd.f32 %v14766_v14, %v7839_v25  ;;  %v7870_v24 = vadd.f32 %v14771_v31, %v7840_v16 }
 0xa9a   :  { %v7871_v8 = vadd.f32 %v14780_v50, %v7841_v30  ;;  %v7872_v41 = vadd.f32 %v14785_v40, %v7842_v4  ;;  %v7883_v5 = vmax.f32 %v7863_v59, 0.0  ;;  %v7884_v44 = vmax.f32 %v7864_v39, 0.0 }
 0xa9b   :  { %v7885_v21 = vmax.f32 %v7865_v3, 0.0  ;;  %v7886_v0 = vmax.f32 %v7866_v56, 0.0  ;;  %v7887_v17 = vmax.f32 %v7867_v13, 0.0  ;;  %v7888_v20 = vmax.f32 %v7868_v2, 0.0 }
 0xa9c   :  { %v7889_v23 = vmax.f32 %v7869_v34, 0.0  ;;  %v7890_v49 = vmax.f32 %v7870_v24, 0.0  ;;  %v7891_v42 = vmax.f32 %v7871_v8, 0.0  ;;  %v7892_v9 = vmax.f32 %v7872_v41, 0.0  ;;  %7903 = vst.msk [vmem:[%s14927_s16] sm:$0xff] %vm7554_vm0, %v7883_v5  ;;  %7904 = vst.msk [vmem:[%s14927_s16 + $0x8] sm:$0xff] %vm7554_vm0, %v7884_v44 }
 0xa9d   :  { %7905 = vst.msk [vmem:[%s14927_s16 + $0x10] sm:$0xff] %vm7554_vm0, %v7885_v21  ;;  %7906 = vst.msk [vmem:[%s14927_s16 + $0x18] sm:$0xff] %vm7554_vm0, %v7886_v0  ;;  %v7798_v35 = vmul.f32 0.0006377551, %v7796_v6 }
 0xa9e   :  { %7907 = vst.msk [vmem:[%s14927_s16 + $0x20] sm:$0xff] %vm7554_vm0, %v7887_v17  ;;  %7908 = vst.msk [vmem:[%s14927_s16 + $0x28] sm:$0xff] %vm7554_vm0, %v7888_v20 }
 0xa9f   :  { %7909 = vst.msk [vmem:[%s14927_s16 + $0x30] sm:$0xff] %vm7554_vm0, %v7889_v23  ;;  %7910 = vst.msk [vmem:[%s14927_s16 + $0x38] sm:$0xff] %vm7554_vm0, %v7890_v49  ;;  %v7800_v6 = vadd.f32 1e-05, %v7798_v35 }
 0xaa0   :  { %7911 = vst.msk [vmem:[%s14927_s16 + $0x40] sm:$0xff] %vm7554_vm0, %v7891_v42  ;;  %7912 = vst.msk [vmem:[%s14927_s16 + $0x48] sm:$0xff] %vm7554_vm0, %v7892_v9 }
 0xaa1   :  { %10017 = vrsqrt.f32 %v7800_v6 }
 0xaab   :  { %v10018_v58 = vpop.eup %10017 }
 0xaac   :  { %v7813_v18 = vmul.f32 %v10018_v58, %v14582_v48  ;;  %v7814_v1 = vmul.f32 %v10018_v58, %v14578_v43  ;;  %v7815_v7 = vmul.f32 %v10018_v58, %v14586_v60  ;;  %v7816_v10 = vmul.f32 %v10018_v58, %v14603_v55 }
 0xaad   :  { %v7817_v22 = vmul.f32 %v10018_v58, %v14609_v26  ;;  %v7818_v45 = vmul.f32 %v10018_v58, %v14631_v36  ;;  %v7819_v33 = vmul.f32 %v10018_v58, %v14641_v46  ;;  %v7820_v25 = vmul.f32 %v10018_v58, %v14649_v37 }
 0xaae   :  { %v7821_v16 = vmul.f32 %v10018_v58, %v14657_v27  ;;  %v7822_v30 = vmul.f32 %v10018_v58, %v14664_v38  ;;  %v7843_v48 = vmul.f32 %v14674_v28, %v7813_v18  ;;  %v7844_v43 = vmul.f32 %v14679_v62, %v7814_v1 }
 0xaaf   :  { %v7845_v60 = vmul.f32 %v14684_v11, %v7815_v7  ;;  %v7846_v55 = vmul.f32 %v14689_v47, %v7816_v10  ;;  %v7847_v26 = vmul.f32 %v14694_v63, %v7817_v22  ;;  %v7848_v36 = vmul.f32 %v14699_v15, %v7818_v45 }
 0xab0   :  { %v7849_v46 = vmul.f32 %v14704_v32, %v7819_v33  ;;  %v7850_v37 = vmul.f32 %v14709_v29, %v7820_v25  ;;  %v7851_v27 = vmul.f32 %v14714_v61, %v7821_v16  ;;  %v7852_v38 = vmul.f32 %v14723_v12, %v7822_v30 }
 0xab1   :  { %v7873_v28 = vadd.f32 %v14728_v53, %v7843_v48  ;;  %v7874_v62 = vadd.f32 %v14733_v52, %v7844_v43  ;;  %v7875_v11 = vadd.f32 %v14742_v57, %v7845_v60  ;;  %v7876_v47 = vadd.f32 %v14747_v19, %v7846_v55 }
 0xab2   :  { %v7877_v63 = vadd.f32 %v14752_v51, %v7847_v26  ;;  %v7878_v15 = vadd.f32 %v14761_v54, %v7848_v36  ;;  %v7879_v32 = vadd.f32 %v14766_v14, %v7849_v46  ;;  %v7880_v29 = vadd.f32 %v14771_v31, %v7850_v37 }
 0xab3   :  { %v7881_v61 = vadd.f32 %v14780_v50, %v7851_v27  ;;  %v7882_v12 = vadd.f32 %v14785_v40, %v7852_v38  ;;  %v7893_v4 = vmax.f32 %v7873_v28, 0.0  ;;  %v7894_v53 = vmax.f32 %v7874_v62, 0.0 }
 0xab4   :  { %v7895_v59 = vmax.f32 %v7875_v11, 0.0  ;;  %v7896_v52 = vmax.f32 %v7876_v47, 0.0  ;;  %v7897_v39 = vmax.f32 %v7877_v63, 0.0  ;;  %v7898_v57 = vmax.f32 %v7878_v15, 0.0 }
 0xab5   :  { %v7899_v3 = vmax.f32 %v7879_v32, 0.0  ;;  %v7900_v19 = vmax.f32 %v7880_v29, 0.0  ;;  %v7901_v56 = vmax.f32 %v7881_v61, 0.0  ;;  %v7902_v51 = vmax.f32 %v7882_v12, 0.0  ;;  %7913 = vst.msk [vmem:[%s14927_s16 + $0x50] sm:$0xff] %vm7554_vm0, %v7893_v4  ;;  %7914 = vst.msk [vmem:[%s14927_s16 + $0x58] sm:$0xff] %vm7554_vm0, %v7894_v53 }
 0xab6   :  { %7915 = vst.msk [vmem:[%s14927_s16 + $0x60] sm:$0xff] %vm7554_vm0, %v7895_v59  ;;  %7916 = vst.msk [vmem:[%s14927_s16 + $0x68] sm:$0xff] %vm7554_vm0, %v7896_v52 }
 0xab7   :  { %7917 = vst.msk [vmem:[%s14927_s16 + $0x70] sm:$0xff] %vm7554_vm0, %v7897_v39  ;;  %7918 = vst.msk [vmem:[%s14927_s16 + $0x78] sm:$0xff] %vm7554_vm0, %v7898_v57 }
 0xab8   :  { %7919 = vst.msk [vmem:[%s14927_s16 + $0x80] sm:$0xff] %vm7554_vm0, %v7899_v3  ;;  %7920 = vst.msk [vmem:[%s14927_s16 + $0x88] sm:$0xff] %vm7554_vm0, %v7900_v19 }
 0xab9   :  { %7921 = vst.msk [vmem:[%s14927_s16 + $0x90] sm:$0xff] %vm7554_vm0, %v7901_v56  ;;  %7922 = vst.msk [vmem:[%s14927_s16 + $0x98] sm:$0xff] %vm7554_vm0, %v7902_v51 }

</bundles_post_ra>
